<compile_context>
chip_gen: v6e
topology: v6e:2x2x1
jax: 0.10.0
libtpu: 0.0.40
codegen_flags: <defaults>
</compile_context>

<pallas_src>
import functools
import math

import jax
import jax.numpy as jnp
from jax.experimental import pallas as pl
from jax.experimental.pallas import tpu as pltpu


# ------------------------------ kernel helpers -------------------------------

def _full_spec(a):
    """BlockSpec for a whole (un-tiled, VMEM-resident) operand, grid=(B,)."""
    nd = a.ndim
    return pl.BlockSpec(a.shape, lambda b, _nd=nd: (0,) * _nd)


def _layernorm(v, g, b, eps=1e-5):
    mean = jnp.mean(v, axis=-1, keepdims=True)
    cen = v - mean
    var = jnp.mean(cen * cen, axis=-1, keepdims=True)
    return cen * jax.lax.rsqrt(var + eps) * g + b


def _gelu(y):
    # TODO(synk): torch.nn.GELU uses exact erf; tanh approximation used here.
    c = jnp.float32(0.7978845608028654)  # sqrt(2/pi)
    return 0.5 * y * (1.0 + jnp.tanh(c * (y + 0.044715 * y * y * y)))


# ------------------------------ patchify kernel ------------------------------

def _patchify_kernel(cols_ref, w_ref, b_ref, pos_ref, o_ref):
    # cols: [T_full, P] for one batch element; w: [P, C] bf16; pos: [T_full, C]
    cols = cols_ref[0].astype(jnp.bfloat16)
    y = jnp.dot(cols, w_ref[...], preferred_element_type=jnp.float32)
    o_ref[0] = y + b_ref[...] + pos_ref[...]


def pallas_patchify(cols, w_bf16, b, pos):
    """Conv2d(1,C,patch,stride=patch) as im2col matmul, with pos-embedding add
    fused.  cols: [B, T_full, p1*p2]; returns [B, T_full, C]."""
    B, Tf, P = cols.shape
    C = w_bf16.shape[1]
    return pl.pallas_call(
        _patchify_kernel,
        out_shape=jax.ShapeDtypeStruct((B, Tf, C), jnp.float32),
        grid=(B,),
        in_specs=[pl.BlockSpec((1, Tf, P), lambda bb: (bb, 0, 0)),
                  _full_spec(w_bf16), _full_spec(b), _full_spec(pos)],
        out_specs=pl.BlockSpec((1, Tf, C), lambda bb: (bb, 0, 0)),
        compiler_params=pltpu.CompilerParams(dimension_semantics=("parallel",)),
    )(cols, w_bf16, b, pos)


# --------------------------- fused transformer stack -------------------------

def _stack_kernel(*refs, num_layers, num_heads, add_pos, final_op):
    it = iter(refs)
    x_ref = next(it)
    pos_ref = next(it) if add_pos else None
    ln1g, ln1b = next(it), next(it)
    qw, qb = next(it), next(it)
    kw, kb = next(it), next(it)
    vw, vb = next(it), next(it)
    pw, projb = next(it), next(it)
    ln2g, ln2b = next(it), next(it)
    f1w, f1b = next(it), next(it)
    f2w, f2b = next(it), next(it)
    fin_a, fin_b = next(it), next(it)   # (ln_g, ln_b) or (head_w, head_b)
    o_ref = next(it)

    T = x_ref.shape[1]
    C = x_ref.shape[2]

    x = x_ref[0].astype(jnp.float32)                              # [T, C]
    if add_pos:
        x = x + pos_ref[...]

    for l in range(num_layers):
        # --- attention: x += sum_h softmax(q_h k_h^T) v_h @ W_proj_h + b_proj
        xn = _layernorm(x, ln1g[l], ln1b[l])
        xnb = xn.astype(jnp.bfloat16)
        attn = jnp.zeros((T, C), jnp.float32)
        for h in range(num_heads):
            i = l * num_heads + h
            # scale already folded into qw/qb in the wrapper
            q = jnp.dot(xnb, qw[i], preferred_element_type=jnp.float32) + qb[i]
            k = jnp.dot(xnb, kw[i], preferred_element_type=jnp.float32) + kb[i]
            v = jnp.dot(xnb, vw[i], preferred_element_type=jnp.float32) + vb[i]
            s = jax.lax.dot_general(                              # q @ k^T
                q.astype(jnp.bfloat16), k.astype(jnp.bfloat16),
                dimension_numbers=(((1,), (1,)), ((), ())),
                preferred_element_type=jnp.float32)               # [T, T]
            s = s - jnp.max(s, axis=-1, keepdims=True)
            e = jnp.exp(s)
            # TODO(synk): approx reciprocal (EUP); use exact division for
            # bit-level parity with the PyTorch softmax if required.
            p = e * pl.reciprocal(jnp.sum(e, axis=-1, keepdims=True), approx=True)
            ctx = jnp.dot(p.astype(jnp.bfloat16), v.astype(jnp.bfloat16),
                          preferred_element_type=jnp.float32)     # [T, d]
            attn = attn + jnp.dot(ctx.astype(jnp.bfloat16), pw[i],
                                  preferred_element_type=jnp.float32)
        x = x + attn + projb[l]

        # --- MLP: x += FC2(GELU(FC1(LN2(x))))
        xn = _layernorm(x, ln2g[l], ln2b[l])
        h1 = jnp.dot(xn.astype(jnp.bfloat16), f1w[l],
                     preferred_element_type=jnp.float32) + f1b[l]
        h1 = _gelu(h1)
        x = x + jnp.dot(h1.astype(jnp.bfloat16), f2w[l],
                        preferred_element_type=jnp.float32) + f2b[l]

    if final_op == "layernorm":
        o_ref[0] = _layernorm(x, fin_a[...], fin_b[...])
    else:  # "head": drop cls token, project tokens to patch pixels
        y = jnp.dot(x[1:].astype(jnp.bfloat16), fin_a[...],
                    preferred_element_type=jnp.float32) + fin_b[...]
        o_ref[0] = y


_STACK_KEYS = ("ln1_g", "ln1_b", "qw", "qb", "kw", "kb", "vw", "vb",
               "pw", "proj_b", "ln2_g", "ln2_b",
               "fc1_w", "fc1_b", "fc2_w", "fc2_b", "final_a", "final_b")


def pallas_transformer_stack(x, stack, num_heads, *, final_op, pos=None):
    """Run ALL transformer blocks (+ final LN or output head) in one
    pallas_call.  x: [B, T, C]; grid over batch ("parallel")."""
    B, T, C = x.shape
    L = stack["ln1_g"].shape[0]

    args = [x]
    in_specs = [pl.BlockSpec((1, T, C), lambda bb: (bb, 0, 0))]
    if pos is not None:
        args.append(pos)
        in_specs.append(_full_spec(pos))
    for kname in _STACK_KEYS:
        a = stack[kname]
        args.append(a)
        in_specs.append(_full_spec(a))

    if final_op == "layernorm":
        out_T, out_D = T, C
    else:  # "head"
        out_T, out_D = T - 1, stack["final_a"].shape[1]

    return pl.pallas_call(
        functools.partial(_stack_kernel, num_layers=L, num_heads=num_heads,
                          add_pos=pos is not None, final_op=final_op),
        out_shape=jax.ShapeDtypeStruct((B, out_T, out_D), jnp.float32),
        grid=(B,),
        in_specs=in_specs,
        out_specs=pl.BlockSpec((1, out_T, out_D), lambda bb: (bb, 0, 0)),
        compiler_params=pltpu.CompilerParams(dimension_semantics=("parallel",)),
    )(*args)


# ------------------------------- glue (JAX) ----------------------------------

def take_tokens(seq_btc, idx_bt):
    # torch take_indexes (gather over the token axis), in [B, T, C] layout.
    return jnp.take_along_axis(seq_btc, idx_bt[:, :, None].astype(jnp.int32), axis=1)


def encoder_forward(enc, x, cfg, shuffle_key=None, forward_indexes=None,
                    backward_indexes=None, remain_T=None):
    B = x.shape[0]
    p1, p2 = cfg["patch_size"]
    C = cfg["emb_dim"]
    H, W = x.shape[2], x.shape[3]
    h, w = H // p1, W // p2
    T_full = h * w

    # im2col for Conv2d(1, C, patch, stride=patch): [B, T_full, p1*p2]
    cols = x.reshape(B, 1, h, p1, w, p2).transpose(0, 2, 4, 1, 3, 5)
    cols = cols.reshape(B, T_full, p1 * p2)
    patches = pallas_patchify(cols, enc["patch_w"], enc["patch_b"], enc["pos"])

    if forward_indexes is None:
        # PatchShuffle.
        # TODO(synk): torch uses host-side np.random.shuffle; deterministic
        # jax.random.permutation used here (masks differ for identical seeds).
        keys = jax.random.split(shuffle_key, B)
        forward_indexes = jax.vmap(
            lambda k: jax.random.permutation(k, T_full))(keys).astype(jnp.int32)
        backward_indexes = jnp.argsort(forward_indexes, axis=1).astype(jnp.int32)
        remain_T = int(T_full * (1 - cfg["mask_ratio"]))

    vis = take_tokens(patches, forward_indexes)[:, :remain_T]        # [B, remain_T, C]
    cls = jnp.broadcast_to(enc["cls_token"].reshape(1, 1, C), (B, 1, C))
    tokens = jnp.concatenate([cls, vis], axis=1)                      # [B, remain_T+1, C]

    feats = pallas_transformer_stack(tokens, enc["stack"], cfg["num_head"],
                                     final_op="layernorm")
    return feats, forward_indexes, backward_indexes, remain_T


def decoder_forward(dec, features, backward_indexes, remain_T, cfg):
    B, T, C = features.shape                     # T = remain_T + 1 (incl. cls)
    p1, p2 = cfg["patch_size"]
    H, W = cfg["sample_shape"]
    h, w = H // p1, W // p2
    T_full = h * w

    bwd_full = jnp.concatenate(
        [jnp.zeros((B, 1), jnp.int32), backward_indexes.astype(jnp.int32) + 1],
        axis=1)                                                      # [B, T_full+1]
    mask_tok = jnp.broadcast_to(dec["mask_token"].reshape(1, 1, C),
                                (B, T_full + 1 - T, C))
    seq = jnp.concatenate([features, mask_tok], axis=1)              # [B, T_full+1, C]
    seq = take_tokens(seq, bwd_full)

    # Fused decoder stack: +pos, all blocks, cls-drop, output head.
    patches = pallas_transformer_stack(seq, dec["stack"], cfg["num_head"],
                                       final_op="head", pos=dec["pos"])
    # mask (replicates the torch logic: 1 iff shuffled position >= remain_T+1)
    masked = (backward_indexes >= remain_T + 1).astype(jnp.float32)  # [B, T_full]
    mask_patches = jnp.broadcast_to(masked[:, :, None], patches.shape)

    def patch2img(pch):  # '(h w) b (c p1 p2) -> b c (h p1) (w p2)', c = 1
        y = pch.reshape(B, h, w, 1, p1, p2).transpose(0, 3, 1, 4, 2, 5)
        return y.reshape(B, 1, h * p1, w * p2)

    return patch2img(patches), patch2img(mask_patches)


def mae_vit_dlinear_forward(params, x_avg, x_err, shuffle_key, cfg):
    f_avg, fwd, bwd, remain_T = encoder_forward(
        params["enc_avg"], x_avg, cfg, shuffle_key=shuffle_key)
    f_err, _, _, _ = encoder_forward(
        params["enc_err"], x_err, cfg, forward_indexes=fwd,
        backward_indexes=bwd, remain_T=remain_T)
    features = f_avg + f_err
    return decoder_forward(params["dec"], features, bwd, remain_T, cfg)


# ------------------------- parameter init & prep -----------------------------

def init_block_params(key, C, mlp_ratio=4):
    ks = jax.random.split(key, 4)
    Hd = C * mlp_ratio
    f32 = jnp.float32
    return dict(
        ln1_g=jnp.ones((C,), f32), ln1_b=jnp.zeros((C,), f32),
        qkv_w=0.02 * jax.random.normal(ks[0], (C, 3 * C), f32),
        qkv_b=jnp.zeros((3 * C,), f32),
        proj_w=0.02 * jax.random.normal(ks[1], (C, C), f32),
        proj_b=jnp.zeros((C,), f32),
        ln2_g=jnp.ones((C,), f32), ln2_b=jnp.zeros((C,), f32),
        fc1_w=0.02 * jax.random.normal(ks[2], (C, Hd), f32),
        fc1_b=jnp.zeros((Hd,), f32),
        fc2_w=0.02 * jax.random.normal(ks[3], (Hd, C), f32),
        fc2_b=jnp.zeros((C,), f32),
    )


def init_encoder_params(key, cfg, num_layer):
    p1, p2 = cfg["patch_size"]
    C = cfg["emb_dim"]
    H, W = cfg["sample_shape"]
    Np = (H // p1) * (W // p2)
    ks = jax.random.split(key, 4 + num_layer)
    f32 = jnp.float32
    return dict(
        cls_token=0.02 * jax.random.normal(ks[0], (1, 1, C), f32),
        pos_embedding=0.02 * jax.random.normal(ks[1], (Np, 1, C), f32),
        patch_w=0.02 * jax.random.normal(ks[2], (p1 * p2, C), f32),
        patch_b=0.02 * jax.random.normal(ks[3], (C,), f32),
        blocks=[init_block_params(ks[4 + i], C) for i in range(num_layer)],
        ln_g=jnp.ones((C,), f32), ln_b=jnp.zeros((C,), f32),
    )


def init_decoder_params(key, cfg, num_layer):
    p1, p2 = cfg["patch_size"]
    C = cfg["emb_dim"]
    H, W = cfg["sample_shape"]
    Np = (H // p1) * (W // p2)
    ks = jax.random.split(key, 4 + num_layer)
    f32 = jnp.float32
    return dict(
        mask_token=0.02 * jax.random.normal(ks[0], (1, 1, C), f32),
        pos_embedding=0.02 * jax.random.normal(ks[1], (Np + 1, 1, C), f32),
        blocks=[init_block_params(ks[4 + i], C) for i in range(num_layer)],
        head_w=0.02 * jax.random.normal(ks[2], (C, p1 * p2), f32),
        head_b=jnp.zeros((p1 * p2,), f32),
    )


def prep_stack(blocks, C, num_heads, final_a, final_b, final_is_head):
    """Stack per-layer params along a leading L axis, pre-split q/k/v/proj per
    head, fold the attention scale into q, and pre-cast matmul weights bf16."""
    L = len(blocks)
    H = num_heads
    d = C // H
    scale = 1.0 / math.sqrt(d)
    bf16, f32 = jnp.bfloat16, jnp.float32

    def st(name):
        return jnp.stack([jnp.asarray(b[name], f32) for b in blocks])

    qkv_w = st("qkv_w")            # (L, C, 3C)
    qkv_b = st("qkv_b")            # (L, 3C)
    proj_w = st("proj_w")          # (L, C, C)

    def per_head_w(w_lcc, fold_scale=False):   # (L, C, C) -> (L*H, C, d)
        w = w_lcc.reshape(L, C, H, d).transpose(0, 2, 1, 3).reshape(L * H, C, d)
        if fold_scale:
            w = w * scale
        return w.astype(bf16)

    def per_head_b(b_lc, fold_scale=False):    # (L, C) -> (L*H, 1, d)
        b = b_lc.reshape(L, H, d).reshape(L * H, 1, d)
        if fold_scale:
            b = b * scale
        return b.astype(f32)

    stack = dict(
        ln1_g=st("ln1_g").reshape(L, 1, C), ln1_b=st("ln1_b").reshape(L, 1, C),
        qw=per_head_w(qkv_w[:, :, 0:C], fold_scale=True),
        qb=per_head_b(qkv_b[:, 0:C], fold_scale=True),
        kw=per_head_w(qkv_w[:, :, C:2 * C]), kb=per_head_b(qkv_b[:, C:2 * C]),
        vw=per_head_w(qkv_w[:, :, 2 * C:]), vb=per_head_b(qkv_b[:, 2 * C:]),
        pw=proj_w.reshape(L, H, d, C).reshape(L * H, d, C).astype(bf16),
        proj_b=st("proj_b").reshape(L, 1, C),
        ln2_g=st("ln2_g").reshape(L, 1, C), ln2_b=st("ln2_b").reshape(L, 1, C),
        fc1_w=st("fc1_w").astype(bf16), fc1_b=st("fc1_b").reshape(L, 1, -1),
        fc2_w=st("fc2_w").astype(bf16), fc2_b=st("fc2_b").reshape(L, 1, C),
    )
    if final_is_head:
        stack["final_a"] = jnp.asarray(final_a, f32).astype(bf16)       # (C, P)
        stack["final_b"] = jnp.asarray(final_b, f32).reshape(1, -1)
    else:
        stack["final_a"] = jnp.asarray(final_a, f32).reshape(1, C)      # ln_g
        stack["final_b"] = jnp.asarray(final_b, f32).reshape(1, C)      # ln_b
    return stack


def prep_encoder_params(raw, cfg):
    C = cfg["emb_dim"]
    return dict(
        cls_token=raw["cls_token"],
        pos=raw["pos_embedding"].reshape(-1, C),           # (T_full, C)
        patch_w=raw["patch_w"].astype(jnp.bfloat16),
        patch_b=raw["patch_b"].reshape(1, C),
        stack=prep_stack(raw["blocks"], C, cfg["num_head"],
                         raw["ln_g"], raw["ln_b"], final_is_head=False),
    )


def prep_decoder_params(raw, cfg):
    C = cfg["emb_dim"]
    return dict(
        mask_token=raw["mask_token"],
        pos=raw["pos_embedding"].reshape(-1, C),           # (T_full+1, C)
        stack=prep_stack(raw["blocks"], C, cfg["num_head"],
                         raw["head_w"], raw["head_b"], final_is_head=True),
    )


# ----------------------------------- main ------------------------------------

if __name__ == "__main__":
    cfg = dict(
        sample_shape=(2, 80),      # small H x W (vs default [2, 240])
        patch_size=(2, 10),
        emb_dim=64,
        num_head=4,
        mask_ratio=0.75,
    )
    encoder_layer = 2
    decoder_layer = 2

    root = jax.random.PRNGKey(0)
    k_pa, k_pe, k_pd, k_xa, k_xe, k_shuf = jax.random.split(root, 6)

    raw = dict(
        enc_avg=init_encoder_params(k_pa, cfg, encoder_layer),
        enc_err=init_encoder_params(k_pe, cfg, encoder_layer),
        dec=init_decoder_params(k_pd, cfg, decoder_layer),
    )
    # bf16 pre-cast / per-head split / scale folding happen ONCE, outside jit.
    params = dict(
        enc_avg=prep_encoder_params(raw["enc_avg"], cfg),
        enc_err=prep_encoder_params(raw["enc_err"], cfg),
        dec=prep_decoder_params(raw["dec"], cfg),
    )

    B = 2
    H, W = cfg["sample_shape"]
    x_avg = jax.random.normal(k_xa, (B, 1, H, W), jnp.float32)
    x_err = jax.random.normal(k_xe, (B, 1, H, W), jnp.float32)

    fwd_fn = jax.jit(
        lambda prm, xa, xe, key: mae_vit_dlinear_forward(prm, xa, xe, key, cfg))

    predicted_x, mask = fwd_fn(params, x_avg, x_err, k_shuf)
    jax.block_until_ready((predicted_x, mask))

    assert predicted_x.shape == (B, 1, H, W)
    assert mask.shape == (B, 1, H, W)
    print("KERNEL_OK")
</pallas_src>

<mosaic_0001>
module attributes {stable_mosaic.version = 11 : i64} {
  func.func @_patchify_kernel(%arg0: i32, %arg1: memref<1x8x20xf32, #tpu.memory_space<vmem>>, %arg2: memref<20x64xbf16, #tpu.memory_space<vmem>>, %arg3: memref<1x64xf32, #tpu.memory_space<vmem>>, %arg4: memref<8x64xf32, #tpu.memory_space<vmem>>, %arg5: memref<1x8x64xf32, #tpu.memory_space<vmem>>) attributes {dimension_semantics = [#tpu.dimension_semantics<parallel>], iteration_bounds = array<i64: 2>, scalar_prefetch = 0 : i64, scratch_operands = 0 : i64, tpu.core_type = #tpu.core_type<tc>, window_params = [{transform_indices = @transform_0, window_bounds = array<i64: 1, 8, 20>}, {pipeline_mode = #tpu.pipeline_mode<synchronous>, transform_indices = @transform_1, window_bounds = array<i64: 20, 64>}, {pipeline_mode = #tpu.pipeline_mode<synchronous>, transform_indices = @transform_2, window_bounds = array<i64: 1, 64>}, {pipeline_mode = #tpu.pipeline_mode<synchronous>, transform_indices = @transform_3, window_bounds = array<i64: 8, 64>}, {transform_indices = @transform_4, window_bounds = array<i64: 1, 8, 64>}]} {
    %c0 = arith.constant 0 : index
    %c0_0 = arith.constant 0 : index
    %c0_1 = arith.constant 0 : index
    %0 = vector.load %arg1[%c0, %c0_0, %c0_1] : memref<1x8x20xf32, #tpu.memory_space<vmem>>, vector<1x8x20xf32>
    %1 = vector.shape_cast %0 : vector<1x8x20xf32> to vector<8x20xf32>
    %2 = arith.truncf %1 : vector<8x20xf32> to vector<8x20xbf16>
    %c0_2 = arith.constant 0 : index
    %c0_3 = arith.constant 0 : index
    %3 = vector.load %arg2[%c0_2, %c0_3] : memref<20x64xbf16, #tpu.memory_space<vmem>>, vector<20x64xbf16>
    %cst = arith.constant dense<0.000000e+00> : vector<8x64xf32>
    %4 = tpu.matmul %2, %3, %cst {dimension_numbers = #tpu.dot_dimension_numbers<[1], [0], [0], [1], [0, 0, 1, 1], [], []>} : vector<8x20xbf16>, vector<20x64xbf16>, vector<8x64xf32> -> vector<8x64xf32>
    %c0_4 = arith.constant 0 : index
    %c0_5 = arith.constant 0 : index
    %5 = vector.load %arg3[%c0_4, %c0_5] : memref<1x64xf32, #tpu.memory_space<vmem>>, vector<1x64xf32>
    %6 = vector.broadcast %5 : vector<1x64xf32> to vector<8x64xf32>
    %7 = arith.addf %4, %6 : vector<8x64xf32>
    %c0_6 = arith.constant 0 : index
    %c0_7 = arith.constant 0 : index
    %8 = vector.load %arg4[%c0_6, %c0_7] : memref<8x64xf32, #tpu.memory_space<vmem>>, vector<8x64xf32>
    %9 = arith.addf %7, %8 : vector<8x64xf32>
    %c0_8 = arith.constant 0 : index
    %c0_9 = arith.constant 0 : index
    %c0_10 = arith.constant 0 : index
    %10 = vector.load %arg5[%c0_8, %c0_9, %c0_10] : memref<1x8x64xf32, #tpu.memory_space<vmem>>, vector<1x8x64xf32>
    %11 = vector.shape_cast %10 : vector<1x8x64xf32> to vector<8x64xf32>
    %12 = vector.shape_cast %9 : vector<8x64xf32> to vector<1x8x64xf32>
    tpu.vector_store %arg5[%c0_8, %c0_9, %c0_10], %12 {strides = array<i32>} : memref<1x8x64xf32, #tpu.memory_space<vmem>>, vector<1x8x64xf32>,
    return
  }
  func.func @transform_0(%arg0: i32) -> (i32, i32, i32) {
    %c0_i32 = arith.constant 0 : i32
    %c0_i32_0 = arith.constant 0 : i32
    %c0_i32_1 = arith.constant 0 : i32
    return %arg0, %c0_i32, %c0_i32_0 : i32, i32, i32
  }
  func.func @transform_1(%arg0: i32) -> (i32, i32) {
    %c0_i32 = arith.constant 0 : i32
    %c0_i32_0 = arith.constant 0 : i32
    %c0_i32_1 = arith.constant 0 : i32
    return %c0_i32, %c0_i32_0 : i32, i32
  }
  func.func @transform_2(%arg0: i32) -> (i32, i32) {
    %c0_i32 = arith.constant 0 : i32
    %c0_i32_0 = arith.constant 0 : i32
    %c0_i32_1 = arith.constant 0 : i32
    return %c0_i32, %c0_i32_0 : i32, i32
  }
  func.func @transform_3(%arg0: i32) -> (i32, i32) {
    %c0_i32 = arith.constant 0 : i32
    %c0_i32_0 = arith.constant 0 : i32
    %c0_i32_1 = arith.constant 0 : i32
    return %c0_i32, %c0_i32_0 : i32, i32
  }
  func.func @transform_4(%arg0: i32) -> (i32, i32, i32) {
    %c0_i32 = arith.constant 0 : i32
    %c0_i32_0 = arith.constant 0 : i32
    %c0_i32_1 = arith.constant 0 : i32
    return %arg0, %c0_i32, %c0_i32_0 : i32, i32, i32
  }
}

module attributes {stable_mosaic.version = 11 : i64} {
  func.func @_stack_kernel(%arg0: i32, %arg1: memref<1x3x64xf32, #tpu.memory_space<vmem>>, %arg2: memref<2x1x64xf32, #tpu.memory_space<vmem>>, %arg3: memref<2x1x64xf32, #tpu.memory_space<vmem>>, %arg4: memref<8x64x16xbf16, #tpu.memory_space<vmem>>, %arg5: memref<8x1x16xf32, #tpu.memory_space<vmem>>, %arg6: memref<8x64x16xbf16, #tpu.memory_space<vmem>>, %arg7: memref<8x1x16xf32, #tpu.memory_space<vmem>>, %arg8: memref<8x64x16xbf16, #tpu.memory_space<vmem>>, %arg9: memref<8x1x16xf32, #tpu.memory_space<vmem>>, %arg10: memref<8x16x64xbf16, #tpu.memory_space<vmem>>, %arg11: memref<2x1x64xf32, #tpu.memory_space<vmem>>, %arg12: memref<2x1x64xf32, #tpu.memory_space<vmem>>, %arg13: memref<2x1x64xf32, #tpu.memory_space<vmem>>, %arg14: memref<2x64x256xbf16, #tpu.memory_space<vmem>>, %arg15: memref<2x1x256xf32, #tpu.memory_space<vmem>>, %arg16: memref<2x256x64xbf16, #tpu.memory_space<vmem>>, %arg17: memref<2x1x64xf32, #tpu.memory_space<vmem>>, %arg18: memref<1x64xf32, #tpu.memory_space<vmem>>, %arg19: memref<1x64xf32, #tpu.memory_space<vmem>>, %arg20: memref<1x3x64xf32, #tpu.memory_space<vmem>>) attributes {dimension_semantics = [#tpu.dimension_semantics<parallel>], iteration_bounds = array<i64: 2>, scalar_prefetch = 0 : i64, scratch_operands = 0 : i64, tpu.core_type = #tpu.core_type<tc>, window_params = [{transform_indices = @transform_0, window_bounds = array<i64: 1, 3, 64>}, {pipeline_mode = #tpu.pipeline_mode<synchronous>, transform_indices = @transform_1, window_bounds = array<i64: 2, 1, 64>}, {pipeline_mode = #tpu.pipeline_mode<synchronous>, transform_indices = @transform_2, window_bounds = array<i64: 2, 1, 64>}, {pipeline_mode = #tpu.pipeline_mode<synchronous>, transform_indices = @transform_3, window_bounds = array<i64: 8, 64, 16>}, {pipeline_mode = #tpu.pipeline_mode<synchronous>, transform_indices = @transform_4, window_bounds = array<i64: 8, 1, 16>}, {pipeline_mode = #tpu.pipeline_mode<synchronous>, transform_indices = @transform_5, window_bounds = array<i64: 8, 64, 16>}, {pipeline_mode = #tpu.pipeline_mode<synchronous>, transform_indices = @transform_6, window_bounds = array<i64: 8, 1, 16>}, {pipeline_mode = #tpu.pipeline_mode<synchronous>, transform_indices = @transform_7, window_bounds = array<i64: 8, 64, 16>}, {pipeline_mode = #tpu.pipeline_mode<synchronous>, transform_indices = @transform_8, window_bounds = array<i64: 8, 1, 16>}, {pipeline_mode = #tpu.pipeline_mode<synchronous>, transform_indices = @transform_9, window_bounds = array<i64: 8, 16, 64>}, {pipeline_mode = #tpu.pipeline_mode<synchronous>, transform_indices = @transform_10, window_bounds = array<i64: 2, 1, 64>}, {pipeline_mode = #tpu.pipeline_mode<synchronous>, transform_indices = @transform_11, window_bounds = array<i64: 2, 1, 64>}, {pipeline_mode = #tpu.pipeline_mode<synchronous>, transform_indices = @transform_12, window_bounds = array<i64: 2, 1, 64>}, {pipeline_mode = #tpu.pipeline_mode<synchronous>, transform_indices = @transform_13, window_bounds = array<i64: 2, 64, 256>}, {pipeline_mode = #tpu.pipeline_mode<synchronous>, transform_indices = @transform_14, window_bounds = array<i64: 2, 1, 256>}, {pipeline_mode = #tpu.pipeline_mode<synchronous>, transform_indices = @transform_15, window_bounds = array<i64: 2, 256, 64>}, {pipeline_mode = #tpu.pipeline_mode<synchronous>, transform_indices = @transform_16, window_bounds = array<i64: 2, 1, 64>}, {pipeline_mode = #tpu.pipeline_mode<synchronous>, transform_indices = @transform_17, window_bounds = array<i64: 1, 64>}, {pipeline_mode = #tpu.pipeline_mode<synchronous>, transform_indices = @transform_18, window_bounds = array<i64: 1, 64>}, {transform_indices = @transform_19, window_bounds = array<i64: 1, 3, 64>}]} {
    %c0 = arith.constant 0 : index
    %c0_0 = arith.constant 0 : index
    %c0_1 = arith.constant 0 : index
    %0 = vector.load %arg1[%c0, %c0_0, %c0_1] : memref<1x3x64xf32, #tpu.memory_space<vmem>>, vector<1x3x64xf32>
    %1 = vector.shape_cast %0 : vector<1x3x64xf32> to vector<3x64xf32>
    %c0_2 = arith.constant 0 : index
    %c0_3 = arith.constant 0 : index
    %c0_4 = arith.constant 0 : index
    %2 = vector.load %arg2[%c0_2, %c0_3, %c0_4] : memref<2x1x64xf32, #tpu.memory_space<vmem>>, vector<1x1x64xf32>
    %3 = vector.shape_cast %2 : vector<1x1x64xf32> to vector<1x64xf32>
    %c0_5 = arith.constant 0 : index
    %c0_6 = arith.constant 0 : index
    %c0_7 = arith.constant 0 : index
    %4 = vector.load %arg3[%c0_5, %c0_6, %c0_7] : memref<2x1x64xf32, #tpu.memory_space<vmem>>, vector<1x1x64xf32>
    %5 = vector.shape_cast %4 : vector<1x1x64xf32> to vector<1x64xf32>
    %cst = arith.constant dense<0.000000e+00> : vector<3xf32>
    %6 = vector.multi_reduction <add>, %1, %cst [1] : vector<3x64xf32> to vector<3xf32>
    %7 = vector.shape_cast %6 : vector<3xf32> to vector<3x1xf32>
    %cst_8 = arith.constant 6.400000e+01 : f32
    %8 = vector.broadcast %cst_8 : f32 to vector<3x1xf32>
    %9 = arith.divf %7, %8 : vector<3x1xf32>
    %10 = vector.broadcast %9 : vector<3x1xf32> to vector<3x64xf32>
    %11 = arith.subf %1, %10 : vector<3x64xf32>
    %12 = arith.mulf %11, %11 : vector<3x64xf32>
    %cst_9 = arith.constant dense<0.000000e+00> : vector<3xf32>
    %13 = vector.multi_reduction <add>, %12, %cst_9 [1] : vector<3x64xf32> to vector<3xf32>
    %14 = vector.shape_cast %13 : vector<3xf32> to vector<3x1xf32>
    %cst_10 = arith.constant 6.400000e+01 : f32
    %15 = vector.broadcast %cst_10 : f32 to vector<3x1xf32>
    %16 = arith.divf %14, %15 : vector<3x1xf32>
    %cst_11 = arith.constant 9.99999974E-6 : f32
    %17 = vector.broadcast %cst_11 : f32 to vector<3x1xf32>
    %18 = arith.addf %16, %17 : vector<3x1xf32>
    %19 = math.rsqrt %18 : vector<3x1xf32>
    %20 = vector.broadcast %19 : vector<3x1xf32> to vector<3x64xf32>
    %21 = arith.mulf %11, %20 : vector<3x64xf32>
    %22 = vector.broadcast %3 : vector<1x64xf32> to vector<3x64xf32>
    %23 = arith.mulf %21, %22 : vector<3x64xf32>
    %24 = vector.broadcast %5 : vector<1x64xf32> to vector<3x64xf32>
    %25 = arith.addf %23, %24 : vector<3x64xf32>
    %26 = arith.truncf %25 : vector<3x64xf32> to vector<3x64xbf16>
    %cst_12 = arith.constant 0.000000e+00 : f32
    %27 = vector.broadcast %cst_12 : f32 to vector<3x64xf32>
    %c0_13 = arith.constant 0 : index
    %c0_14 = arith.constant 0 : index
    %c0_15 = arith.constant 0 : index
    %28 = vector.load %arg4[%c0_13, %c0_14, %c0_15] : memref<8x64x16xbf16, #tpu.memory_space<vmem>>, vector<1x64x16xbf16>
    %29 = vector.shape_cast %28 : vector<1x64x16xbf16> to vector<64x16xbf16>
    %cst_16 = arith.constant dense<0.000000e+00> : vector<3x16xf32>
    %30 = tpu.matmul %26, %29, %cst_16 {dimension_numbers = #tpu.dot_dimension_numbers<[1], [0], [0], [1], [0, 0, 1, 1], [], []>} : vector<3x64xbf16>, vector<64x16xbf16>, vector<3x16xf32> -> vector<3x16xf32>
    %c0_17 = arith.constant 0 : index
    %c0_18 = arith.constant 0 : index
    %c0_19 = arith.constant 0 : index
    %31 = vector.load %arg5[%c0_17, %c0_18, %c0_19] : memref<8x1x16xf32, #tpu.memory_space<vmem>>, vector<1x1x16xf32>
    %32 = vector.shape_cast %31 : vector<1x1x16xf32> to vector<1x16xf32>
    %33 = vector.broadcast %32 : vector<1x16xf32> to vector<3x16xf32>
    %34 = arith.addf %30, %33 : vector<3x16xf32>
    %c0_20 = arith.constant 0 : index
    %c0_21 = arith.constant 0 : index
    %c0_22 = arith.constant 0 : index
    %35 = vector.load %arg6[%c0_20, %c0_21, %c0_22] : memref<8x64x16xbf16, #tpu.memory_space<vmem>>, vector<1x64x16xbf16>
    %36 = vector.shape_cast %35 : vector<1x64x16xbf16> to vector<64x16xbf16>
    %cst_23 = arith.constant dense<0.000000e+00> : vector<3x16xf32>
    %37 = tpu.matmul %26, %36, %cst_23 {dimension_numbers = #tpu.dot_dimension_numbers<[1], [0], [0], [1], [0, 0, 1, 1], [], []>} : vector<3x64xbf16>, vector<64x16xbf16>, vector<3x16xf32> -> vector<3x16xf32>
    %c0_24 = arith.constant 0 : index
    %c0_25 = arith.constant 0 : index
    %c0_26 = arith.constant 0 : index
    %38 = vector.load %arg7[%c0_24, %c0_25, %c0_26] : memref<8x1x16xf32, #tpu.memory_space<vmem>>, vector<1x1x16xf32>
    %39 = vector.shape_cast %38 : vector<1x1x16xf32> to vector<1x16xf32>
    %40 = vector.broadcast %39 : vector<1x16xf32> to vector<3x16xf32>
    %41 = arith.addf %37, %40 : vector<3x16xf32>
    %c0_27 = arith.constant 0 : index
    %c0_28 = arith.constant 0 : index
    %c0_29 = arith.constant 0 : index
    %42 = vector.load %arg8[%c0_27, %c0_28, %c0_29] : memref<8x64x16xbf16, #tpu.memory_space<vmem>>, vector<1x64x16xbf16>
    %43 = vector.shape_cast %42 : vector<1x64x16xbf16> to vector<64x16xbf16>
    %cst_30 = arith.constant dense<0.000000e+00> : vector<3x16xf32>
    %44 = tpu.matmul %26, %43, %cst_30 {dimension_numbers = #tpu.dot_dimension_numbers<[1], [0], [0], [1], [0, 0, 1, 1], [], []>} : vector<3x64xbf16>, vector<64x16xbf16>, vector<3x16xf32> -> vector<3x16xf32>
    %c0_31 = arith.constant 0 : index
    %c0_32 = arith.constant 0 : index
    %c0_33 = arith.constant 0 : index
    %45 = vector.load %arg9[%c0_31, %c0_32, %c0_33] : memref<8x1x16xf32, #tpu.memory_space<vmem>>, vector<1x1x16xf32>
    %46 = vector.shape_cast %45 : vector<1x1x16xf32> to vector<1x16xf32>
    %47 = vector.broadcast %46 : vector<1x16xf32> to vector<3x16xf32>
    %48 = arith.addf %44, %47 : vector<3x16xf32>
    %49 = arith.truncf %34 : vector<3x16xf32> to vector<3x16xbf16>
    %50 = arith.truncf %41 : vector<3x16xf32> to vector<3x16xbf16>
    %cst_34 = arith.constant dense<0.000000e+00> : vector<3x3xf32>
    %51 = tpu.matmul %49, %50, %cst_34 {dimension_numbers = #tpu.dot_dimension_numbers<[1], [1], [0], [0], [0, 0, 1, 0], [], []>} : vector<3x16xbf16>, vector<3x16xbf16>, vector<3x3xf32> -> vector<3x3xf32>
    %cst_35 = arith.constant dense<0xFF800000> : vector<3xf32>
    %52 = vector.multi_reduction <maximumf>, %51, %cst_35 [1] : vector<3x3xf32> to vector<3xf32>
    %53 = vector.shape_cast %52 : vector<3xf32> to vector<3x1xf32>
    %54 = vector.broadcast %53 : vector<3x1xf32> to vector<3x3xf32>
    %55 = arith.subf %51, %54 : vector<3x3xf32>
    %56 = math.exp %55 : vector<3x3xf32>
    %cst_36 = arith.constant dense<0.000000e+00> : vector<3xf32>
    %57 = vector.multi_reduction <add>, %56, %cst_36 [1] : vector<3x3xf32> to vector<3xf32>
    %58 = vector.shape_cast %57 : vector<3xf32> to vector<3x1xf32>
    %59 = tpu.reciprocal %58 {approx = true} : vector<3x1xf32> -> vector<3x1xf32>
    %60 = vector.broadcast %59 : vector<3x1xf32> to vector<3x3xf32>
    %61 = arith.mulf %56, %60 : vector<3x3xf32>
    %62 = arith.truncf %61 : vector<3x3xf32> to vector<3x3xbf16>
    %63 = arith.truncf %48 : vector<3x16xf32> to vector<3x16xbf16>
    %cst_37 = arith.constant dense<0.000000e+00> : vector<3x16xf32>
    %64 = tpu.matmul %62, %63, %cst_37 {dimension_numbers = #tpu.dot_dimension_numbers<[1], [0], [0], [1], [0, 0, 1, 1], [], []>} : vector<3x3xbf16>, vector<3x16xbf16>, vector<3x16xf32> -> vector<3x16xf32>
    %65 = arith.truncf %64 : vector<3x16xf32> to vector<3x16xbf16>
    %c0_38 = arith.constant 0 : index
    %c0_39 = arith.constant 0 : index
    %c0_40 = arith.constant 0 : index
    %66 = vector.load %arg10[%c0_38, %c0_39, %c0_40] : memref<8x16x64xbf16, #tpu.memory_space<vmem>>, vector<1x16x64xbf16>
    %67 = vector.shape_cast %66 : vector<1x16x64xbf16> to vector<16x64xbf16>
    %cst_41 = arith.constant dense<0.000000e+00> : vector<3x64xf32>
    %68 = tpu.matmul %65, %67, %cst_41 {dimension_numbers = #tpu.dot_dimension_numbers<[1], [0], [0], [1], [0, 0, 1, 1], [], []>} : vector<3x16xbf16>, vector<16x64xbf16>, vector<3x64xf32> -> vector<3x64xf32>
    %69 = arith.addf %27, %68 : vector<3x64xf32>
    %c1 = arith.constant 1 : index
    %c0_42 = arith.constant 0 : index
    %c0_43 = arith.constant 0 : index
    %70 = vector.load %arg4[%c1, %c0_42, %c0_43] : memref<8x64x16xbf16, #tpu.memory_space<vmem>>, vector<1x64x16xbf16>
    %71 = vector.shape_cast %70 : vector<1x64x16xbf16> to vector<64x16xbf16>
    %cst_44 = arith.constant dense<0.000000e+00> : vector<3x16xf32>
    %72 = tpu.matmul %26, %71, %cst_44 {dimension_numbers = #tpu.dot_dimension_numbers<[1], [0], [0], [1], [0, 0, 1, 1], [], []>} : vector<3x64xbf16>, vector<64x16xbf16>, vector<3x16xf32> -> vector<3x16xf32>
    %c1_45 = arith.constant 1 : index
    %c0_46 = arith.constant 0 : index
    %c0_47 = arith.constant 0 : index
    %73 = vector.load %arg5[%c1_45, %c0_46, %c0_47] : memref<8x1x16xf32, #tpu.memory_space<vmem>>, vector<1x1x16xf32>
    %74 = vector.shape_cast %73 : vector<1x1x16xf32> to vector<1x16xf32>
    %75 = vector.broadcast %74 : vector<1x16xf32> to vector<3x16xf32>
    %76 = arith.addf %72, %75 : vector<3x16xf32>
    %c1_48 = arith.constant 1 : index
    %c0_49 = arith.constant 0 : index
    %c0_50 = arith.constant 0 : index
    %77 = vector.load %arg6[%c1_48, %c0_49, %c0_50] : memref<8x64x16xbf16, #tpu.memory_space<vmem>>, vector<1x64x16xbf16>
    %78 = vector.shape_cast %77 : vector<1x64x16xbf16> to vector<64x16xbf16>
    %cst_51 = arith.constant dense<0.000000e+00> : vector<3x16xf32>
    %79 = tpu.matmul %26, %78, %cst_51 {dimension_numbers = #tpu.dot_dimension_numbers<[1], [0], [0], [1], [0, 0, 1, 1], [], []>} : vector<3x64xbf16>, vector<64x16xbf16>, vector<3x16xf32> -> vector<3x16xf32>
    %c1_52 = arith.constant 1 : index
    %c0_53 = arith.constant 0 : index
    %c0_54 = arith.constant 0 : index
    %80 = vector.load %arg7[%c1_52, %c0_53, %c0_54] : memref<8x1x16xf32, #tpu.memory_space<vmem>>, vector<1x1x16xf32>
    %81 = vector.shape_cast %80 : vector<1x1x16xf32> to vector<1x16xf32>
    %82 = vector.broadcast %81 : vector<1x16xf32> to vector<3x16xf32>
    %83 = arith.addf %79, %82 : vector<3x16xf32>
    %c1_55 = arith.constant 1 : index
    %c0_56 = arith.constant 0 : index
    %c0_57 = arith.constant 0 : index
    %84 = vector.load %arg8[%c1_55, %c0_56, %c0_57] : memref<8x64x16xbf16, #tpu.memory_space<vmem>>, vector<1x64x16xbf16>
    %85 = vector.shape_cast %84 : vector<1x64x16xbf16> to vector<64x16xbf16>
    %cst_58 = arith.constant dense<0.000000e+00> : vector<3x16xf32>
    %86 = tpu.matmul %26, %85, %cst_58 {dimension_numbers = #tpu.dot_dimension_numbers<[1], [0], [0], [1], [0, 0, 1, 1], [], []>} : vector<3x64xbf16>, vector<64x16xbf16>, vector<3x16xf32> -> vector<3x16xf32>
    %c1_59 = arith.constant 1 : index
    %c0_60 = arith.constant 0 : index
    %c0_61 = arith.constant 0 : index
    %87 = vector.load %arg9[%c1_59, %c0_60, %c0_61] : memref<8x1x16xf32, #tpu.memory_space<vmem>>, vector<1x1x16xf32>
    %88 = vector.shape_cast %87 : vector<1x1x16xf32> to vector<1x16xf32>
    %89 = vector.broadcast %88 : vector<1x16xf32> to vector<3x16xf32>
    %90 = arith.addf %86, %89 : vector<3x16xf32>
    %91 = arith.truncf %76 : vector<3x16xf32> to vector<3x16xbf16>
    %92 = arith.truncf %83 : vector<3x16xf32> to vector<3x16xbf16>
    %cst_62 = arith.constant dense<0.000000e+00> : vector<3x3xf32>
    %93 = tpu.matmul %91, %92, %cst_62 {dimension_numbers = #tpu.dot_dimension_numbers<[1], [1], [0], [0], [0, 0, 1, 0], [], []>} : vector<3x16xbf16>, vector<3x16xbf16>, vector<3x3xf32> -> vector<3x3xf32>
    %cst_63 = arith.constant dense<0xFF800000> : vector<3xf32>
    %94 = vector.multi_reduction <maximumf>, %93, %cst_63 [1] : vector<3x3xf32> to vector<3xf32>
    %95 = vector.shape_cast %94 : vector<3xf32> to vector<3x1xf32>
    %96 = vector.broadcast %95 : vector<3x1xf32> to vector<3x3xf32>
    %97 = arith.subf %93, %96 : vector<3x3xf32>
    %98 = math.exp %97 : vector<3x3xf32>
    %cst_64 = arith.constant dense<0.000000e+00> : vector<3xf32>
    %99 = vector.multi_reduction <add>, %98, %cst_64 [1] : vector<3x3xf32> to vector<3xf32>
    %100 = vector.shape_cast %99 : vector<3xf32> to vector<3x1xf32>
    %101 = tpu.reciprocal %100 {approx = true} : vector<3x1xf32> -> vector<3x1xf32>
    %102 = vector.broadcast %101 : vector<3x1xf32> to vector<3x3xf32>
    %103 = arith.mulf %98, %102 : vector<3x3xf32>
    %104 = arith.truncf %103 : vector<3x3xf32> to vector<3x3xbf16>
    %105 = arith.truncf %90 : vector<3x16xf32> to vector<3x16xbf16>
    %cst_65 = arith.constant dense<0.000000e+00> : vector<3x16xf32>
    %106 = tpu.matmul %104, %105, %cst_65 {dimension_numbers = #tpu.dot_dimension_numbers<[1], [0], [0], [1], [0, 0, 1, 1], [], []>} : vector<3x3xbf16>, vector<3x16xbf16>, vector<3x16xf32> -> vector<3x16xf32>
    %107 = arith.truncf %106 : vector<3x16xf32> to vector<3x16xbf16>
    %c1_66 = arith.constant 1 : index
    %c0_67 = arith.constant 0 : index
    %c0_68 = arith.constant 0 : index
    %108 = vector.load %arg10[%c1_66, %c0_67, %c0_68] : memref<8x16x64xbf16, #tpu.memory_space<vmem>>, vector<1x16x64xbf16>
    %109 = vector.shape_cast %108 : vector<1x16x64xbf16> to vector<16x64xbf16>
    %cst_69 = arith.constant dense<0.000000e+00> : vector<3x64xf32>
    %110 = tpu.matmul %107, %109, %cst_69 {dimension_numbers = #tpu.dot_dimension_numbers<[1], [0], [0], [1], [0, 0, 1, 1], [], []>} : vector<3x16xbf16>, vector<16x64xbf16>, vector<3x64xf32> -> vector<3x64xf32>
    %111 = arith.addf %69, %110 : vector<3x64xf32>
    %c2 = arith.constant 2 : index
    %c0_70 = arith.constant 0 : index
    %c0_71 = arith.constant 0 : index
    %112 = vector.load %arg4[%c2, %c0_70, %c0_71] : memref<8x64x16xbf16, #tpu.memory_space<vmem>>, vector<1x64x16xbf16>
    %113 = vector.shape_cast %112 : vector<1x64x16xbf16> to vector<64x16xbf16>
    %cst_72 = arith.constant dense<0.000000e+00> : vector<3x16xf32>
    %114 = tpu.matmul %26, %113, %cst_72 {dimension_numbers = #tpu.dot_dimension_numbers<[1], [0], [0], [1], [0, 0, 1, 1], [], []>} : vector<3x64xbf16>, vector<64x16xbf16>, vector<3x16xf32> -> vector<3x16xf32>
    %c2_73 = arith.constant 2 : index
    %c0_74 = arith.constant 0 : index
    %c0_75 = arith.constant 0 : index
    %115 = vector.load %arg5[%c2_73, %c0_74, %c0_75] : memref<8x1x16xf32, #tpu.memory_space<vmem>>, vector<1x1x16xf32>
    %116 = vector.shape_cast %115 : vector<1x1x16xf32> to vector<1x16xf32>
    %117 = vector.broadcast %116 : vector<1x16xf32> to vector<3x16xf32>
    %118 = arith.addf %114, %117 : vector<3x16xf32>
    %c2_76 = arith.constant 2 : index
    %c0_77 = arith.constant 0 : index
    %c0_78 = arith.constant 0 : index
    %119 = vector.load %arg6[%c2_76, %c0_77, %c0_78] : memref<8x64x16xbf16, #tpu.memory_space<vmem>>, vector<1x64x16xbf16>
    %120 = vector.shape_cast %119 : vector<1x64x16xbf16> to vector<64x16xbf16>
    %cst_79 = arith.constant dense<0.000000e+00> : vector<3x16xf32>
    %121 = tpu.matmul %26, %120, %cst_79 {dimension_numbers = #tpu.dot_dimension_numbers<[1], [0], [0], [1], [0, 0, 1, 1], [], []>} : vector<3x64xbf16>, vector<64x16xbf16>, vector<3x16xf32> -> vector<3x16xf32>
    %c2_80 = arith.constant 2 : index
    %c0_81 = arith.constant 0 : index
    %c0_82 = arith.constant 0 : index
    %122 = vector.load %arg7[%c2_80, %c0_81, %c0_82] : memref<8x1x16xf32, #tpu.memory_space<vmem>>, vector<1x1x16xf32>
    %123 = vector.shape_cast %122 : vector<1x1x16xf32> to vector<1x16xf32>
    %124 = vector.broadcast %123 : vector<1x16xf32> to vector<3x16xf32>
    %125 = arith.addf %121, %124 : vector<3x16xf32>
    %c2_83 = arith.constant 2 : index
    %c0_84 = arith.constant 0 : index
    %c0_85 = arith.constant 0 : index
    %126 = vector.load %arg8[%c2_83, %c0_84, %c0_85] : memref<8x64x16xbf16, #tpu.memory_space<vmem>>, vector<1x64x16xbf16>
    %127 = vector.shape_cast %126 : vector<1x64x16xbf16> to vector<64x16xbf16>
    %cst_86 = arith.constant dense<0.000000e+00> : vector<3x16xf32>
    %128 = tpu.matmul %26, %127, %cst_86 {dimension_numbers = #tpu.dot_dimension_numbers<[1], [0], [0], [1], [0, 0, 1, 1], [], []>} : vector<3x64xbf16>, vector<64x16xbf16>, vector<3x16xf32> -> vector<3x16xf32>
    %c2_87 = arith.constant 2 : index
    %c0_88 = arith.constant 0 : index
    %c0_89 = arith.constant 0 : index
    %129 = vector.load %arg9[%c2_87, %c0_88, %c0_89] : memref<8x1x16xf32, #tpu.memory_space<vmem>>, vector<1x1x16xf32>
    %130 = vector.shape_cast %129 : vector<1x1x16xf32> to vector<1x16xf32>
    %131 = vector.broadcast %130 : vector<1x16xf32> to vector<3x16xf32>
    %132 = arith.addf %128, %131 : vector<3x16xf32>
    %133 = arith.truncf %118 : vector<3x16xf32> to vector<3x16xbf16>
    %134 = arith.truncf %125 : vector<3x16xf32> to vector<3x16xbf16>
    %cst_90 = arith.constant dense<0.000000e+00> : vector<3x3xf32>
    %135 = tpu.matmul %133, %134, %cst_90 {dimension_numbers = #tpu.dot_dimension_numbers<[1], [1], [0], [0], [0, 0, 1, 0], [], []>} : vector<3x16xbf16>, vector<3x16xbf16>, vector<3x3xf32> -> vector<3x3xf32>
    %cst_91 = arith.constant dense<0xFF800000> : vector<3xf32>
    %136 = vector.multi_reduction <maximumf>, %135, %cst_91 [1] : vector<3x3xf32> to vector<3xf32>
    %137 = vector.shape_cast %136 : vector<3xf32> to vector<3x1xf32>
    %138 = vector.broadcast %137 : vector<3x1xf32> to vector<3x3xf32>
    %139 = arith.subf %135, %138 : vector<3x3xf32>
    %140 = math.exp %139 : vector<3x3xf32>
    %cst_92 = arith.constant dense<0.000000e+00> : vector<3xf32>
    %141 = vector.multi_reduction <add>, %140, %cst_92 [1] : vector<3x3xf32> to vector<3xf32>
    %142 = vector.shape_cast %141 : vector<3xf32> to vector<3x1xf32>
    %143 = tpu.reciprocal %142 {approx = true} : vector<3x1xf32> -> vector<3x1xf32>
    %144 = vector.broadcast %143 : vector<3x1xf32> to vector<3x3xf32>
    %145 = arith.mulf %140, %144 : vector<3x3xf32>
    %146 = arith.truncf %145 : vector<3x3xf32> to vector<3x3xbf16>
    %147 = arith.truncf %132 : vector<3x16xf32> to vector<3x16xbf16>
    %cst_93 = arith.constant dense<0.000000e+00> : vector<3x16xf32>
    %148 = tpu.matmul %146, %147, %cst_93 {dimension_numbers = #tpu.dot_dimension_numbers<[1], [0], [0], [1], [0, 0, 1, 1], [], []>} : vector<3x3xbf16>, vector<3x16xbf16>, vector<3x16xf32> -> vector<3x16xf32>
    %149 = arith.truncf %148 : vector<3x16xf32> to vector<3x16xbf16>
    %c2_94 = arith.constant 2 : index
    %c0_95 = arith.constant 0 : index
    %c0_96 = arith.constant 0 : index
    %150 = vector.load %arg10[%c2_94, %c0_95, %c0_96] : memref<8x16x64xbf16, #tpu.memory_space<vmem>>, vector<1x16x64xbf16>
    %151 = vector.shape_cast %150 : vector<1x16x64xbf16> to vector<16x64xbf16>
    %cst_97 = arith.constant dense<0.000000e+00> : vector<3x64xf32>
    %152 = tpu.matmul %149, %151, %cst_97 {dimension_numbers = #tpu.dot_dimension_numbers<[1], [0], [0], [1], [0, 0, 1, 1], [], []>} : vector<3x16xbf16>, vector<16x64xbf16>, vector<3x64xf32> -> vector<3x64xf32>
    %153 = arith.addf %111, %152 : vector<3x64xf32>
    %c3 = arith.constant 3 : index
    %c0_98 = arith.constant 0 : index
    %c0_99 = arith.constant 0 : index
    %154 = vector.load %arg4[%c3, %c0_98, %c0_99] : memref<8x64x16xbf16, #tpu.memory_space<vmem>>, vector<1x64x16xbf16>
    %155 = vector.shape_cast %154 : vector<1x64x16xbf16> to vector<64x16xbf16>
    %cst_100 = arith.constant dense<0.000000e+00> : vector<3x16xf32>
    %156 = tpu.matmul %26, %155, %cst_100 {dimension_numbers = #tpu.dot_dimension_numbers<[1], [0], [0], [1], [0, 0, 1, 1], [], []>} : vector<3x64xbf16>, vector<64x16xbf16>, vector<3x16xf32> -> vector<3x16xf32>
    %c3_101 = arith.constant 3 : index
    %c0_102 = arith.constant 0 : index
    %c0_103 = arith.constant 0 : index
    %157 = vector.load %arg5[%c3_101, %c0_102, %c0_103] : memref<8x1x16xf32, #tpu.memory_space<vmem>>, vector<1x1x16xf32>
    %158 = vector.shape_cast %157 : vector<1x1x16xf32> to vector<1x16xf32>
    %159 = vector.broadcast %158 : vector<1x16xf32> to vector<3x16xf32>
    %160 = arith.addf %156, %159 : vector<3x16xf32>
    %c3_104 = arith.constant 3 : index
    %c0_105 = arith.constant 0 : index
    %c0_106 = arith.constant 0 : index
    %161 = vector.load %arg6[%c3_104, %c0_105, %c0_106] : memref<8x64x16xbf16, #tpu.memory_space<vmem>>, vector<1x64x16xbf16>
    %162 = vector.shape_cast %161 : vector<1x64x16xbf16> to vector<64x16xbf16>
    %cst_107 = arith.constant dense<0.000000e+00> : vector<3x16xf32>
    %163 = tpu.matmul %26, %162, %cst_107 {dimension_numbers = #tpu.dot_dimension_numbers<[1], [0], [0], [1], [0, 0, 1, 1], [], []>} : vector<3x64xbf16>, vector<64x16xbf16>, vector<3x16xf32> -> vector<3x16xf32>
    %c3_108 = arith.constant 3 : index
    %c0_109 = arith.constant 0 : index
    %c0_110 = arith.constant 0 : index
    %164 = vector.load %arg7[%c3_108, %c0_109, %c0_110] : memref<8x1x16xf32, #tpu.memory_space<vmem>>, vector<1x1x16xf32>
    %165 = vector.shape_cast %164 : vector<1x1x16xf32> to vector<1x16xf32>
    %166 = vector.broadcast %165 : vector<1x16xf32> to vector<3x16xf32>
    %167 = arith.addf %163, %166 : vector<3x16xf32>
    %c3_111 = arith.constant 3 : index
    %c0_112 = arith.constant 0 : index
    %c0_113 = arith.constant 0 : index
    %168 = vector.load %arg8[%c3_111, %c0_112, %c0_113] : memref<8x64x16xbf16, #tpu.memory_space<vmem>>, vector<1x64x16xbf16>
    %169 = vector.shape_cast %168 : vector<1x64x16xbf16> to vector<64x16xbf16>
    %cst_114 = arith.constant dense<0.000000e+00> : vector<3x16xf32>
    %170 = tpu.matmul %26, %169, %cst_114 {dimension_numbers = #tpu.dot_dimension_numbers<[1], [0], [0], [1], [0, 0, 1, 1], [], []>} : vector<3x64xbf16>, vector<64x16xbf16>, vector<3x16xf32> -> vector<3x16xf32>
    %c3_115 = arith.constant 3 : index
    %c0_116 = arith.constant 0 : index
    %c0_117 = arith.constant 0 : index
    %171 = vector.load %arg9[%c3_115, %c0_116, %c0_117] : memref<8x1x16xf32, #tpu.memory_space<vmem>>, vector<1x1x16xf32>
    %172 = vector.shape_cast %171 : vector<1x1x16xf32> to vector<1x16xf32>
    %173 = vector.broadcast %172 : vector<1x16xf32> to vector<3x16xf32>
    %174 = arith.addf %170, %173 : vector<3x16xf32>
    %175 = arith.truncf %160 : vector<3x16xf32> to vector<3x16xbf16>
    %176 = arith.truncf %167 : vector<3x16xf32> to vector<3x16xbf16>
    %cst_118 = arith.constant dense<0.000000e+00> : vector<3x3xf32>
    %177 = tpu.matmul %175, %176, %cst_118 {dimension_numbers = #tpu.dot_dimension_numbers<[1], [1], [0], [0], [0, 0, 1, 0], [], []>} : vector<3x16xbf16>, vector<3x16xbf16>, vector<3x3xf32> -> vector<3x3xf32>
    %cst_119 = arith.constant dense<0xFF800000> : vector<3xf32>
    %178 = vector.multi_reduction <maximumf>, %177, %cst_119 [1] : vector<3x3xf32> to vector<3xf32>
    %179 = vector.shape_cast %178 : vector<3xf32> to vector<3x1xf32>
    %180 = vector.broadcast %179 : vector<3x1xf32> to vector<3x3xf32>
    %181 = arith.subf %177, %180 : vector<3x3xf32>
    %182 = math.exp %181 : vector<3x3xf32>
    %cst_120 = arith.constant dense<0.000000e+00> : vector<3xf32>
    %183 = vector.multi_reduction <add>, %182, %cst_120 [1] : vector<3x3xf32> to vector<3xf32>
    %184 = vector.shape_cast %183 : vector<3xf32> to vector<3x1xf32>
    %185 = tpu.reciprocal %184 {approx = true} : vector<3x1xf32> -> vector<3x1xf32>
    %186 = vector.broadcast %185 : vector<3x1xf32> to vector<3x3xf32>
    %187 = arith.mulf %182, %186 : vector<3x3xf32>
    %188 = arith.truncf %187 : vector<3x3xf32> to vector<3x3xbf16>
    %189 = arith.truncf %174 : vector<3x16xf32> to vector<3x16xbf16>
    %cst_121 = arith.constant dense<0.000000e+00> : vector<3x16xf32>
    %190 = tpu.matmul %188, %189, %cst_121 {dimension_numbers = #tpu.dot_dimension_numbers<[1], [0], [0], [1], [0, 0, 1, 1], [], []>} : vector<3x3xbf16>, vector<3x16xbf16>, vector<3x16xf32> -> vector<3x16xf32>
    %191 = arith.truncf %190 : vector<3x16xf32> to vector<3x16xbf16>
    %c3_122 = arith.constant 3 : index
    %c0_123 = arith.constant 0 : index
    %c0_124 = arith.constant 0 : index
    %192 = vector.load %arg10[%c3_122, %c0_123, %c0_124] : memref<8x16x64xbf16, #tpu.memory_space<vmem>>, vector<1x16x64xbf16>
    %193 = vector.shape_cast %192 : vector<1x16x64xbf16> to vector<16x64xbf16>
    %cst_125 = arith.constant dense<0.000000e+00> : vector<3x64xf32>
    %194 = tpu.matmul %191, %193, %cst_125 {dimension_numbers = #tpu.dot_dimension_numbers<[1], [0], [0], [1], [0, 0, 1, 1], [], []>} : vector<3x16xbf16>, vector<16x64xbf16>, vector<3x64xf32> -> vector<3x64xf32>
    %195 = arith.addf %153, %194 : vector<3x64xf32>
    %196 = arith.addf %1, %195 : vector<3x64xf32>
    %c0_126 = arith.constant 0 : index
    %c0_127 = arith.constant 0 : index
    %c0_128 = arith.constant 0 : index
    %197 = vector.load %arg11[%c0_126, %c0_127, %c0_128] : memref<2x1x64xf32, #tpu.memory_space<vmem>>, vector<1x1x64xf32>
    %198 = vector.shape_cast %197 : vector<1x1x64xf32> to vector<1x64xf32>
    %199 = vector.broadcast %198 : vector<1x64xf32> to vector<3x64xf32>
    %200 = arith.addf %196, %199 : vector<3x64xf32>
    %c0_129 = arith.constant 0 : index
    %c0_130 = arith.constant 0 : index
    %c0_131 = arith.constant 0 : index
    %201 = vector.load %arg12[%c0_129, %c0_130, %c0_131] : memref<2x1x64xf32, #tpu.memory_space<vmem>>, vector<1x1x64xf32>
    %202 = vector.shape_cast %201 : vector<1x1x64xf32> to vector<1x64xf32>
    %c0_132 = arith.constant 0 : index
    %c0_133 = arith.constant 0 : index
    %c0_134 = arith.constant 0 : index
    %203 = vector.load %arg13[%c0_132, %c0_133, %c0_134] : memref<2x1x64xf32, #tpu.memory_space<vmem>>, vector<1x1x64xf32>
    %204 = vector.shape_cast %203 : vector<1x1x64xf32> to vector<1x64xf32>
    %cst_135 = arith.constant dense<0.000000e+00> : vector<3xf32>
    %205 = vector.multi_reduction <add>, %200, %cst_135 [1] : vector<3x64xf32> to vector<3xf32>
    %206 = vector.shape_cast %205 : vector<3xf32> to vector<3x1xf32>
    %cst_136 = arith.constant 6.400000e+01 : f32
    %207 = vector.broadcast %cst_136 : f32 to vector<3x1xf32>
    %208 = arith.divf %206, %207 : vector<3x1xf32>
    %209 = vector.broadcast %208 : vector<3x1xf32> to vector<3x64xf32>
    %210 = arith.subf %200, %209 : vector<3x64xf32>
    %211 = arith.mulf %210, %210 : vector<3x64xf32>
    %cst_137 = arith.constant dense<0.000000e+00> : vector<3xf32>
    %212 = vector.multi_reduction <add>, %211, %cst_137 [1] : vector<3x64xf32> to vector<3xf32>
    %213 = vector.shape_cast %212 : vector<3xf32> to vector<3x1xf32>
    %cst_138 = arith.constant 6.400000e+01 : f32
    %214 = vector.broadcast %cst_138 : f32 to vector<3x1xf32>
    %215 = arith.divf %213, %214 : vector<3x1xf32>
    %cst_139 = arith.constant 9.99999974E-6 : f32
    %216 = vector.broadcast %cst_139 : f32 to vector<3x1xf32>
    %217 = arith.addf %215, %216 : vector<3x1xf32>
    %218 = math.rsqrt %217 : vector<3x1xf32>
    %219 = vector.broadcast %218 : vector<3x1xf32> to vector<3x64xf32>
    %220 = arith.mulf %210, %219 : vector<3x64xf32>
    %221 = vector.broadcast %202 : vector<1x64xf32> to vector<3x64xf32>
    %222 = arith.mulf %220, %221 : vector<3x64xf32>
    %223 = vector.broadcast %204 : vector<1x64xf32> to vector<3x64xf32>
    %224 = arith.addf %222, %223 : vector<3x64xf32>
    %225 = arith.truncf %224 : vector<3x64xf32> to vector<3x64xbf16>
    %c0_140 = arith.constant 0 : index
    %c0_141 = arith.constant 0 : index
    %c0_142 = arith.constant 0 : index
    %226 = vector.load %arg14[%c0_140, %c0_141, %c0_142] : memref<2x64x256xbf16, #tpu.memory_space<vmem>>, vector<1x64x256xbf16>
    %227 = vector.shape_cast %226 : vector<1x64x256xbf16> to vector<64x256xbf16>
    %cst_143 = arith.constant dense<0.000000e+00> : vector<3x256xf32>
    %228 = tpu.matmul %225, %227, %cst_143 {dimension_numbers = #tpu.dot_dimension_numbers<[1], [0], [0], [1], [0, 0, 1, 1], [], []>} : vector<3x64xbf16>, vector<64x256xbf16>, vector<3x256xf32> -> vector<3x256xf32>
    %c0_144 = arith.constant 0 : index
    %c0_145 = arith.constant 0 : index
    %c0_146 = arith.constant 0 : index
    %229 = vector.load %arg15[%c0_144, %c0_145, %c0_146] : memref<2x1x256xf32, #tpu.memory_space<vmem>>, vector<1x1x256xf32>
    %230 = vector.shape_cast %229 : vector<1x1x256xf32> to vector<1x256xf32>
    %231 = vector.broadcast %230 : vector<1x256xf32> to vector<3x256xf32>
    %232 = arith.addf %228, %231 : vector<3x256xf32>
    %cst_147 = arith.constant 5.000000e-01 : f32
    %233 = vector.broadcast %cst_147 : f32 to vector<3x256xf32>
    %234 = arith.mulf %233, %232 : vector<3x256xf32>
    %cst_148 = arith.constant 4.471500e-02 : f32
    %235 = vector.broadcast %cst_148 : f32 to vector<3x256xf32>
    %236 = arith.mulf %235, %232 : vector<3x256xf32>
    %237 = arith.mulf %236, %232 : vector<3x256xf32>
    %238 = arith.mulf %237, %232 : vector<3x256xf32>
    %239 = arith.addf %232, %238 : vector<3x256xf32>
    %cst_149 = arith.constant 0.797884583 : f32
    %240 = vector.broadcast %cst_149 : f32 to vector<3x256xf32>
    %241 = arith.mulf %240, %239 : vector<3x256xf32>
    %242 = math.tanh %241 : vector<3x256xf32>
    %cst_150 = arith.constant 1.000000e+00 : f32
    %243 = vector.broadcast %cst_150 : f32 to vector<3x256xf32>
    %244 = arith.addf %243, %242 : vector<3x256xf32>
    %245 = arith.mulf %234, %244 : vector<3x256xf32>
    %246 = arith.truncf %245 : vector<3x256xf32> to vector<3x256xbf16>
    %c0_151 = arith.constant 0 : index
    %c0_152 = arith.constant 0 : index
    %c0_153 = arith.constant 0 : index
    %247 = vector.load %arg16[%c0_151, %c0_152, %c0_153] : memref<2x256x64xbf16, #tpu.memory_space<vmem>>, vector<1x256x64xbf16>
    %248 = vector.shape_cast %247 : vector<1x256x64xbf16> to vector<256x64xbf16>
    %cst_154 = arith.constant dense<0.000000e+00> : vector<3x64xf32>
    %249 = tpu.matmul %246, %248, %cst_154 {dimension_numbers = #tpu.dot_dimension_numbers<[1], [0], [0], [1], [0, 0, 1, 1], [], []>} : vector<3x256xbf16>, vector<256x64xbf16>, vector<3x64xf32> -> vector<3x64xf32>
    %250 = arith.addf %200, %249 : vector<3x64xf32>
    %c0_155 = arith.constant 0 : index
    %c0_156 = arith.constant 0 : index
    %c0_157 = arith.constant 0 : index
    %251 = vector.load %arg17[%c0_155, %c0_156, %c0_157] : memref<2x1x64xf32, #tpu.memory_space<vmem>>, vector<1x1x64xf32>
    %252 = vector.shape_cast %251 : vector<1x1x64xf32> to vector<1x64xf32>
    %253 = vector.broadcast %252 : vector<1x64xf32> to vector<3x64xf32>
    %254 = arith.addf %250, %253 : vector<3x64xf32>
    %c1_158 = arith.constant 1 : index
    %c0_159 = arith.constant 0 : index
    %c0_160 = arith.constant 0 : index
    %255 = vector.load %arg2[%c1_158, %c0_159, %c0_160] : memref<2x1x64xf32, #tpu.memory_space<vmem>>, vector<1x1x64xf32>
    %256 = vector.shape_cast %255 : vector<1x1x64xf32> to vector<1x64xf32>
    %c1_161 = arith.constant 1 : index
    %c0_162 = arith.constant 0 : index
    %c0_163 = arith.constant 0 : index
    %257 = vector.load %arg3[%c1_161, %c0_162, %c0_163] : memref<2x1x64xf32, #tpu.memory_space<vmem>>, vector<1x1x64xf32>
    %258 = vector.shape_cast %257 : vector<1x1x64xf32> to vector<1x64xf32>
    %cst_164 = arith.constant dense<0.000000e+00> : vector<3xf32>
    %259 = vector.multi_reduction <add>, %254, %cst_164 [1] : vector<3x64xf32> to vector<3xf32>
    %260 = vector.shape_cast %259 : vector<3xf32> to vector<3x1xf32>
    %cst_165 = arith.constant 6.400000e+01 : f32
    %261 = vector.broadcast %cst_165 : f32 to vector<3x1xf32>
    %262 = arith.divf %260, %261 : vector<3x1xf32>
    %263 = vector.broadcast %262 : vector<3x1xf32> to vector<3x64xf32>
    %264 = arith.subf %254, %263 : vector<3x64xf32>
    %265 = arith.mulf %264, %264 : vector<3x64xf32>
    %cst_166 = arith.constant dense<0.000000e+00> : vector<3xf32>
    %266 = vector.multi_reduction <add>, %265, %cst_166 [1] : vector<3x64xf32> to vector<3xf32>
    %267 = vector.shape_cast %266 : vector<3xf32> to vector<3x1xf32>
    %cst_167 = arith.constant 6.400000e+01 : f32
    %268 = vector.broadcast %cst_167 : f32 to vector<3x1xf32>
    %269 = arith.divf %267, %268 : vector<3x1xf32>
    %cst_168 = arith.constant 9.99999974E-6 : f32
    %270 = vector.broadcast %cst_168 : f32 to vector<3x1xf32>
    %271 = arith.addf %269, %270 : vector<3x1xf32>
    %272 = math.rsqrt %271 : vector<3x1xf32>
    %273 = vector.broadcast %272 : vector<3x1xf32> to vector<3x64xf32>
    %274 = arith.mulf %264, %273 : vector<3x64xf32>
    %275 = vector.broadcast %256 : vector<1x64xf32> to vector<3x64xf32>
    %276 = arith.mulf %274, %275 : vector<3x64xf32>
    %277 = vector.broadcast %258 : vector<1x64xf32> to vector<3x64xf32>
    %278 = arith.addf %276, %277 : vector<3x64xf32>
    %279 = arith.truncf %278 : vector<3x64xf32> to vector<3x64xbf16>
    %cst_169 = arith.constant 0.000000e+00 : f32
    %280 = vector.broadcast %cst_169 : f32 to vector<3x64xf32>
    %c4 = arith.constant 4 : index
    %c0_170 = arith.constant 0 : index
    %c0_171 = arith.constant 0 : index
    %281 = vector.load %arg4[%c4, %c0_170, %c0_171] : memref<8x64x16xbf16, #tpu.memory_space<vmem>>, vector<1x64x16xbf16>
    %282 = vector.shape_cast %281 : vector<1x64x16xbf16> to vector<64x16xbf16>
    %cst_172 = arith.constant dense<0.000000e+00> : vector<3x16xf32>
    %283 = tpu.matmul %279, %282, %cst_172 {dimension_numbers = #tpu.dot_dimension_numbers<[1], [0], [0], [1], [0, 0, 1, 1], [], []>} : vector<3x64xbf16>, vector<64x16xbf16>, vector<3x16xf32> -> vector<3x16xf32>
    %c4_173 = arith.constant 4 : index
    %c0_174 = arith.constant 0 : index
    %c0_175 = arith.constant 0 : index
    %284 = vector.load %arg5[%c4_173, %c0_174, %c0_175] : memref<8x1x16xf32, #tpu.memory_space<vmem>>, vector<1x1x16xf32>
    %285 = vector.shape_cast %284 : vector<1x1x16xf32> to vector<1x16xf32>
    %286 = vector.broadcast %285 : vector<1x16xf32> to vector<3x16xf32>
    %287 = arith.addf %283, %286 : vector<3x16xf32>
    %c4_176 = arith.constant 4 : index
    %c0_177 = arith.constant 0 : index
    %c0_178 = arith.constant 0 : index
    %288 = vector.load %arg6[%c4_176, %c0_177, %c0_178] : memref<8x64x16xbf16, #tpu.memory_space<vmem>>, vector<1x64x16xbf16>
    %289 = vector.shape_cast %288 : vector<1x64x16xbf16> to vector<64x16xbf16>
    %cst_179 = arith.constant dense<0.000000e+00> : vector<3x16xf32>
    %290 = tpu.matmul %279, %289, %cst_179 {dimension_numbers = #tpu.dot_dimension_numbers<[1], [0], [0], [1], [0, 0, 1, 1], [], []>} : vector<3x64xbf16>, vector<64x16xbf16>, vector<3x16xf32> -> vector<3x16xf32>
    %c4_180 = arith.constant 4 : index
    %c0_181 = arith.constant 0 : index
    %c0_182 = arith.constant 0 : index
    %291 = vector.load %arg7[%c4_180, %c0_181, %c0_182] : memref<8x1x16xf32, #tpu.memory_space<vmem>>, vector<1x1x16xf32>
    %292 = vector.shape_cast %291 : vector<1x1x16xf32> to vector<1x16xf32>
    %293 = vector.broadcast %292 : vector<1x16xf32> to vector<3x16xf32>
    %294 = arith.addf %290, %293 : vector<3x16xf32>
    %c4_183 = arith.constant 4 : index
    %c0_184 = arith.constant 0 : index
    %c0_185 = arith.constant 0 : index
    %295 = vector.load %arg8[%c4_183, %c0_184, %c0_185] : memref<8x64x16xbf16, #tpu.memory_space<vmem>>, vector<1x64x16xbf16>
    %296 = vector.shape_cast %295 : vector<1x64x16xbf16> to vector<64x16xbf16>
    %cst_186 = arith.constant dense<0.000000e+00> : vector<3x16xf32>
    %297 = tpu.matmul %279, %296, %cst_186 {dimension_numbers = #tpu.dot_dimension_numbers<[1], [0], [0], [1], [0, 0, 1, 1], [], []>} : vector<3x64xbf16>, vector<64x16xbf16>, vector<3x16xf32> -> vector<3x16xf32>
    %c4_187 = arith.constant 4 : index
    %c0_188 = arith.constant 0 : index
    %c0_189 = arith.constant 0 : index
    %298 = vector.load %arg9[%c4_187, %c0_188, %c0_189] : memref<8x1x16xf32, #tpu.memory_space<vmem>>, vector<1x1x16xf32>
    %299 = vector.shape_cast %298 : vector<1x1x16xf32> to vector<1x16xf32>
    %300 = vector.broadcast %299 : vector<1x16xf32> to vector<3x16xf32>
    %301 = arith.addf %297, %300 : vector<3x16xf32>
    %302 = arith.truncf %287 : vector<3x16xf32> to vector<3x16xbf16>
    %303 = arith.truncf %294 : vector<3x16xf32> to vector<3x16xbf16>
    %cst_190 = arith.constant dense<0.000000e+00> : vector<3x3xf32>
    %304 = tpu.matmul %302, %303, %cst_190 {dimension_numbers = #tpu.dot_dimension_numbers<[1], [1], [0], [0], [0, 0, 1, 0], [], []>} : vector<3x16xbf16>, vector<3x16xbf16>, vector<3x3xf32> -> vector<3x3xf32>
    %cst_191 = arith.constant dense<0xFF800000> : vector<3xf32>
    %305 = vector.multi_reduction <maximumf>, %304, %cst_191 [1] : vector<3x3xf32> to vector<3xf32>
    %306 = vector.shape_cast %305 : vector<3xf32> to vector<3x1xf32>
    %307 = vector.broadcast %306 : vector<3x1xf32> to vector<3x3xf32>
    %308 = arith.subf %304, %307 : vector<3x3xf32>
    %309 = math.exp %308 : vector<3x3xf32>
    %cst_192 = arith.constant dense<0.000000e+00> : vector<3xf32>
    %310 = vector.multi_reduction <add>, %309, %cst_192 [1] : vector<3x3xf32> to vector<3xf32>
    %311 = vector.shape_cast %310 : vector<3xf32> to vector<3x1xf32>
    %312 = tpu.reciprocal %311 {approx = true} : vector<3x1xf32> -> vector<3x1xf32>
    %313 = vector.broadcast %312 : vector<3x1xf32> to vector<3x3xf32>
    %314 = arith.mulf %309, %313 : vector<3x3xf32>
    %315 = arith.truncf %314 : vector<3x3xf32> to vector<3x3xbf16>
    %316 = arith.truncf %301 : vector<3x16xf32> to vector<3x16xbf16>
    %cst_193 = arith.constant dense<0.000000e+00> : vector<3x16xf32>
    %317 = tpu.matmul %315, %316, %cst_193 {dimension_numbers = #tpu.dot_dimension_numbers<[1], [0], [0], [1], [0, 0, 1, 1], [], []>} : vector<3x3xbf16>, vector<3x16xbf16>, vector<3x16xf32> -> vector<3x16xf32>
    %318 = arith.truncf %317 : vector<3x16xf32> to vector<3x16xbf16>
    %c4_194 = arith.constant 4 : index
    %c0_195 = arith.constant 0 : index
    %c0_196 = arith.constant 0 : index
    %319 = vector.load %arg10[%c4_194, %c0_195, %c0_196] : memref<8x16x64xbf16, #tpu.memory_space<vmem>>, vector<1x16x64xbf16>
    %320 = vector.shape_cast %319 : vector<1x16x64xbf16> to vector<16x64xbf16>
    %cst_197 = arith.constant dense<0.000000e+00> : vector<3x64xf32>
    %321 = tpu.matmul %318, %320, %cst_197 {dimension_numbers = #tpu.dot_dimension_numbers<[1], [0], [0], [1], [0, 0, 1, 1], [], []>} : vector<3x16xbf16>, vector<16x64xbf16>, vector<3x64xf32> -> vector<3x64xf32>
    %322 = arith.addf %280, %321 : vector<3x64xf32>
    %c5 = arith.constant 5 : index
    %c0_198 = arith.constant 0 : index
    %c0_199 = arith.constant 0 : index
    %323 = vector.load %arg4[%c5, %c0_198, %c0_199] : memref<8x64x16xbf16, #tpu.memory_space<vmem>>, vector<1x64x16xbf16>
    %324 = vector.shape_cast %323 : vector<1x64x16xbf16> to vector<64x16xbf16>
    %cst_200 = arith.constant dense<0.000000e+00> : vector<3x16xf32>
    %325 = tpu.matmul %279, %324, %cst_200 {dimension_numbers = #tpu.dot_dimension_numbers<[1], [0], [0], [1], [0, 0, 1, 1], [], []>} : vector<3x64xbf16>, vector<64x16xbf16>, vector<3x16xf32> -> vector<3x16xf32>
    %c5_201 = arith.constant 5 : index
    %c0_202 = arith.constant 0 : index
    %c0_203 = arith.constant 0 : index
    %326 = vector.load %arg5[%c5_201, %c0_202, %c0_203] : memref<8x1x16xf32, #tpu.memory_space<vmem>>, vector<1x1x16xf32>
    %327 = vector.shape_cast %326 : vector<1x1x16xf32> to vector<1x16xf32>
    %328 = vector.broadcast %327 : vector<1x16xf32> to vector<3x16xf32>
    %329 = arith.addf %325, %328 : vector<3x16xf32>
    %c5_204 = arith.constant 5 : index
    %c0_205 = arith.constant 0 : index
    %c0_206 = arith.constant 0 : index
    %330 = vector.load %arg6[%c5_204, %c0_205, %c0_206] : memref<8x64x16xbf16, #tpu.memory_space<vmem>>, vector<1x64x16xbf16>
    %331 = vector.shape_cast %330 : vector<1x64x16xbf16> to vector<64x16xbf16>
    %cst_207 = arith.constant dense<0.000000e+00> : vector<3x16xf32>
    %332 = tpu.matmul %279, %331, %cst_207 {dimension_numbers = #tpu.dot_dimension_numbers<[1], [0], [0], [1], [0, 0, 1, 1], [], []>} : vector<3x64xbf16>, vector<64x16xbf16>, vector<3x16xf32> -> vector<3x16xf32>
    %c5_208 = arith.constant 5 : index
    %c0_209 = arith.constant 0 : index
    %c0_210 = arith.constant 0 : index
    %333 = vector.load %arg7[%c5_208, %c0_209, %c0_210] : memref<8x1x16xf32, #tpu.memory_space<vmem>>, vector<1x1x16xf32>
    %334 = vector.shape_cast %333 : vector<1x1x16xf32> to vector<1x16xf32>
    %335 = vector.broadcast %334 : vector<1x16xf32> to vector<3x16xf32>
    %336 = arith.addf %332, %335 : vector<3x16xf32>
    %c5_211 = arith.constant 5 : index
    %c0_212 = arith.constant 0 : index
    %c0_213 = arith.constant 0 : index
    %337 = vector.load %arg8[%c5_211, %c0_212, %c0_213] : memref<8x64x16xbf16, #tpu.memory_space<vmem>>, vector<1x64x16xbf16>
    %338 = vector.shape_cast %337 : vector<1x64x16xbf16> to vector<64x16xbf16>
    %cst_214 = arith.constant dense<0.000000e+00> : vector<3x16xf32>
    %339 = tpu.matmul %279, %338, %cst_214 {dimension_numbers = #tpu.dot_dimension_numbers<[1], [0], [0], [1], [0, 0, 1, 1], [], []>} : vector<3x64xbf16>, vector<64x16xbf16>, vector<3x16xf32> -> vector<3x16xf32>
    %c5_215 = arith.constant 5 : index
    %c0_216 = arith.constant 0 : index
    %c0_217 = arith.constant 0 : index
    %340 = vector.load %arg9[%c5_215, %c0_216, %c0_217] : memref<8x1x16xf32, #tpu.memory_space<vmem>>, vector<1x1x16xf32>
    %341 = vector.shape_cast %340 : vector<1x1x16xf32> to vector<1x16xf32>
    %342 = vector.broadcast %341 : vector<1x16xf32> to vector<3x16xf32>
    %343 = arith.addf %339, %342 : vector<3x16xf32>
    %344 = arith.truncf %329 : vector<3x16xf32> to vector<3x16xbf16>
    %345 = arith.truncf %336 : vector<3x16xf32> to vector<3x16xbf16>
    %cst_218 = arith.constant dense<0.000000e+00> : vector<3x3xf32>
    %346 = tpu.matmul %344, %345, %cst_218 {dimension_numbers = #tpu.dot_dimension_numbers<[1], [1], [0], [0], [0, 0, 1, 0], [], []>} : vector<3x16xbf16>, vector<3x16xbf16>, vector<3x3xf32> -> vector<3x3xf32>
    %cst_219 = arith.constant dense<0xFF800000> : vector<3xf32>
    %347 = vector.multi_reduction <maximumf>, %346, %cst_219 [1] : vector<3x3xf32> to vector<3xf32>
    %348 = vector.shape_cast %347 : vector<3xf32> to vector<3x1xf32>
    %349 = vector.broadcast %348 : vector<3x1xf32> to vector<3x3xf32>
    %350 = arith.subf %346, %349 : vector<3x3xf32>
    %351 = math.exp %350 : vector<3x3xf32>
    %cst_220 = arith.constant dense<0.000000e+00> : vector<3xf32>
    %352 = vector.multi_reduction <add>, %351, %cst_220 [1] : vector<3x3xf32> to vector<3xf32>
    %353 = vector.shape_cast %352 : vector<3xf32> to vector<3x1xf32>
    %354 = tpu.reciprocal %353 {approx = true} : vector<3x1xf32> -> vector<3x1xf32>
    %355 = vector.broadcast %354 : vector<3x1xf32> to vector<3x3xf32>
    %356 = arith.mulf %351, %355 : vector<3x3xf32>
    %357 = arith.truncf %356 : vector<3x3xf32> to vector<3x3xbf16>
    %358 = arith.truncf %343 : vector<3x16xf32> to vector<3x16xbf16>
    %cst_221 = arith.constant dense<0.000000e+00> : vector<3x16xf32>
    %359 = tpu.matmul %357, %358, %cst_221 {dimension_numbers = #tpu.dot_dimension_numbers<[1], [0], [0], [1], [0, 0, 1, 1], [], []>} : vector<3x3xbf16>, vector<3x16xbf16>, vector<3x16xf32> -> vector<3x16xf32>
    %360 = arith.truncf %359 : vector<3x16xf32> to vector<3x16xbf16>
    %c5_222 = arith.constant 5 : index
    %c0_223 = arith.constant 0 : index
    %c0_224 = arith.constant 0 : index
    %361 = vector.load %arg10[%c5_222, %c0_223, %c0_224] : memref<8x16x64xbf16, #tpu.memory_space<vmem>>, vector<1x16x64xbf16>
    %362 = vector.shape_cast %361 : vector<1x16x64xbf16> to vector<16x64xbf16>
    %cst_225 = arith.constant dense<0.000000e+00> : vector<3x64xf32>
    %363 = tpu.matmul %360, %362, %cst_225 {dimension_numbers = #tpu.dot_dimension_numbers<[1], [0], [0], [1], [0, 0, 1, 1], [], []>} : vector<3x16xbf16>, vector<16x64xbf16>, vector<3x64xf32> -> vector<3x64xf32>
    %364 = arith.addf %322, %363 : vector<3x64xf32>
    %c6 = arith.constant 6 : index
    %c0_226 = arith.constant 0 : index
    %c0_227 = arith.constant 0 : index
    %365 = vector.load %arg4[%c6, %c0_226, %c0_227] : memref<8x64x16xbf16, #tpu.memory_space<vmem>>, vector<1x64x16xbf16>
    %366 = vector.shape_cast %365 : vector<1x64x16xbf16> to vector<64x16xbf16>
    %cst_228 = arith.constant dense<0.000000e+00> : vector<3x16xf32>
    %367 = tpu.matmul %279, %366, %cst_228 {dimension_numbers = #tpu.dot_dimension_numbers<[1], [0], [0], [1], [0, 0, 1, 1], [], []>} : vector<3x64xbf16>, vector<64x16xbf16>, vector<3x16xf32> -> vector<3x16xf32>
    %c6_229 = arith.constant 6 : index
    %c0_230 = arith.constant 0 : index
    %c0_231 = arith.constant 0 : index
    %368 = vector.load %arg5[%c6_229, %c0_230, %c0_231] : memref<8x1x16xf32, #tpu.memory_space<vmem>>, vector<1x1x16xf32>
    %369 = vector.shape_cast %368 : vector<1x1x16xf32> to vector<1x16xf32>
    %370 = vector.broadcast %369 : vector<1x16xf32> to vector<3x16xf32>
    %371 = arith.addf %367, %370 : vector<3x16xf32>
    %c6_232 = arith.constant 6 : index
    %c0_233 = arith.constant 0 : index
    %c0_234 = arith.constant 0 : index
    %372 = vector.load %arg6[%c6_232, %c0_233, %c0_234] : memref<8x64x16xbf16, #tpu.memory_space<vmem>>, vector<1x64x16xbf16>
    %373 = vector.shape_cast %372 : vector<1x64x16xbf16> to vector<64x16xbf16>
    %cst_235 = arith.constant dense<0.000000e+00> : vector<3x16xf32>
    %374 = tpu.matmul %279, %373, %cst_235 {dimension_numbers = #tpu.dot_dimension_numbers<[1], [0], [0], [1], [0, 0, 1, 1], [], []>} : vector<3x64xbf16>, vector<64x16xbf16>, vector<3x16xf32> -> vector<3x16xf32>
    %c6_236 = arith.constant 6 : index
    %c0_237 = arith.constant 0 : index
    %c0_238 = arith.constant 0 : index
    %375 = vector.load %arg7[%c6_236, %c0_237, %c0_238] : memref<8x1x16xf32, #tpu.memory_space<vmem>>, vector<1x1x16xf32>
    %376 = vector.shape_cast %375 : vector<1x1x16xf32> to vector<1x16xf32>
    %377 = vector.broadcast %376 : vector<1x16xf32> to vector<3x16xf32>
    %378 = arith.addf %374, %377 : vector<3x16xf32>
    %c6_239 = arith.constant 6 : index
    %c0_240 = arith.constant 0 : index
    %c0_241 = arith.constant 0 : index
    %379 = vector.load %arg8[%c6_239, %c0_240, %c0_241] : memref<8x64x16xbf16, #tpu.memory_space<vmem>>, vector<1x64x16xbf16>
    %380 = vector.shape_cast %379 : vector<1x64x16xbf16> to vector<64x16xbf16>
    %cst_242 = arith.constant dense<0.000000e+00> : vector<3x16xf32>
    %381 = tpu.matmul %279, %380, %cst_242 {dimension_numbers = #tpu.dot_dimension_numbers<[1], [0], [0], [1], [0, 0, 1, 1], [], []>} : vector<3x64xbf16>, vector<64x16xbf16>, vector<3x16xf32> -> vector<3x16xf32>
    %c6_243 = arith.constant 6 : index
    %c0_244 = arith.constant 0 : index
    %c0_245 = arith.constant 0 : index
    %382 = vector.load %arg9[%c6_243, %c0_244, %c0_245] : memref<8x1x16xf32, #tpu.memory_space<vmem>>, vector<1x1x16xf32>
    %383 = vector.shape_cast %382 : vector<1x1x16xf32> to vector<1x16xf32>
    %384 = vector.broadcast %383 : vector<1x16xf32> to vector<3x16xf32>
    %385 = arith.addf %381, %384 : vector<3x16xf32>
    %386 = arith.truncf %371 : vector<3x16xf32> to vector<3x16xbf16>
    %387 = arith.truncf %378 : vector<3x16xf32> to vector<3x16xbf16>
    %cst_246 = arith.constant dense<0.000000e+00> : vector<3x3xf32>
    %388 = tpu.matmul %386, %387, %cst_246 {dimension_numbers = #tpu.dot_dimension_numbers<[1], [1], [0], [0], [0, 0, 1, 0], [], []>} : vector<3x16xbf16>, vector<3x16xbf16>, vector<3x3xf32> -> vector<3x3xf32>
    %cst_247 = arith.constant dense<0xFF800000> : vector<3xf32>
    %389 = vector.multi_reduction <maximumf>, %388, %cst_247 [1] : vector<3x3xf32> to vector<3xf32>
    %390 = vector.shape_cast %389 : vector<3xf32> to vector<3x1xf32>
    %391 = vector.broadcast %390 : vector<3x1xf32> to vector<3x3xf32>
    %392 = arith.subf %388, %391 : vector<3x3xf32>
    %393 = math.exp %392 : vector<3x3xf32>
    %cst_248 = arith.constant dense<0.000000e+00> : vector<3xf32>
    %394 = vector.multi_reduction <add>, %393, %cst_248 [1] : vector<3x3xf32> to vector<3xf32>
    %395 = vector.shape_cast %394 : vector<3xf32> to vector<3x1xf32>
    %396 = tpu.reciprocal %395 {approx = true} : vector<3x1xf32> -> vector<3x1xf32>
    %397 = vector.broadcast %396 : vector<3x1xf32> to vector<3x3xf32>
    %398 = arith.mulf %393, %397 : vector<3x3xf32>
    %399 = arith.truncf %398 : vector<3x3xf32> to vector<3x3xbf16>
    %400 = arith.truncf %385 : vector<3x16xf32> to vector<3x16xbf16>
    %cst_249 = arith.constant dense<0.000000e+00> : vector<3x16xf32>
    %401 = tpu.matmul %399, %400, %cst_249 {dimension_numbers = #tpu.dot_dimension_numbers<[1], [0], [0], [1], [0, 0, 1, 1], [], []>} : vector<3x3xbf16>, vector<3x16xbf16>, vector<3x16xf32> -> vector<3x16xf32>
    %402 = arith.truncf %401 : vector<3x16xf32> to vector<3x16xbf16>
    %c6_250 = arith.constant 6 : index
    %c0_251 = arith.constant 0 : index
    %c0_252 = arith.constant 0 : index
    %403 = vector.load %arg10[%c6_250, %c0_251, %c0_252] : memref<8x16x64xbf16, #tpu.memory_space<vmem>>, vector<1x16x64xbf16>
    %404 = vector.shape_cast %403 : vector<1x16x64xbf16> to vector<16x64xbf16>
    %cst_253 = arith.constant dense<0.000000e+00> : vector<3x64xf32>
    %405 = tpu.matmul %402, %404, %cst_253 {dimension_numbers = #tpu.dot_dimension_numbers<[1], [0], [0], [1], [0, 0, 1, 1], [], []>} : vector<3x16xbf16>, vector<16x64xbf16>, vector<3x64xf32> -> vector<3x64xf32>
    %406 = arith.addf %364, %405 : vector<3x64xf32>
    %c7 = arith.constant 7 : index
    %c0_254 = arith.constant 0 : index
    %c0_255 = arith.constant 0 : index
    %407 = vector.load %arg4[%c7, %c0_254, %c0_255] : memref<8x64x16xbf16, #tpu.memory_space<vmem>>, vector<1x64x16xbf16>
    %408 = vector.shape_cast %407 : vector<1x64x16xbf16> to vector<64x16xbf16>
    %cst_256 = arith.constant dense<0.000000e+00> : vector<3x16xf32>
    %409 = tpu.matmul %279, %408, %cst_256 {dimension_numbers = #tpu.dot_dimension_numbers<[1], [0], [0], [1], [0, 0, 1, 1], [], []>} : vector<3x64xbf16>, vector<64x16xbf16>, vector<3x16xf32> -> vector<3x16xf32>
    %c7_257 = arith.constant 7 : index
    %c0_258 = arith.constant 0 : index
    %c0_259 = arith.constant 0 : index
    %410 = vector.load %arg5[%c7_257, %c0_258, %c0_259] : memref<8x1x16xf32, #tpu.memory_space<vmem>>, vector<1x1x16xf32>
    %411 = vector.shape_cast %410 : vector<1x1x16xf32> to vector<1x16xf32>
    %412 = vector.broadcast %411 : vector<1x16xf32> to vector<3x16xf32>
    %413 = arith.addf %409, %412 : vector<3x16xf32>
    %c7_260 = arith.constant 7 : index
    %c0_261 = arith.constant 0 : index
    %c0_262 = arith.constant 0 : index
    %414 = vector.load %arg6[%c7_260, %c0_261, %c0_262] : memref<8x64x16xbf16, #tpu.memory_space<vmem>>, vector<1x64x16xbf16>
    %415 = vector.shape_cast %414 : vector<1x64x16xbf16> to vector<64x16xbf16>
    %cst_263 = arith.constant dense<0.000000e+00> : vector<3x16xf32>
    %416 = tpu.matmul %279, %415, %cst_263 {dimension_numbers = #tpu.dot_dimension_numbers<[1], [0], [0], [1], [0, 0, 1, 1], [], []>} : vector<3x64xbf16>, vector<64x16xbf16>, vector<3x16xf32> -> vector<3x16xf32>
    %c7_264 = arith.constant 7 : index
    %c0_265 = arith.constant 0 : index
    %c0_266 = arith.constant 0 : index
    %417 = vector.load %arg7[%c7_264, %c0_265, %c0_266] : memref<8x1x16xf32, #tpu.memory_space<vmem>>, vector<1x1x16xf32>
    %418 = vector.shape_cast %417 : vector<1x1x16xf32> to vector<1x16xf32>
    %419 = vector.broadcast %418 : vector<1x16xf32> to vector<3x16xf32>
    %420 = arith.addf %416, %419 : vector<3x16xf32>
    %c7_267 = arith.constant 7 : index
    %c0_268 = arith.constant 0 : index
    %c0_269 = arith.constant 0 : index
    %421 = vector.load %arg8[%c7_267, %c0_268, %c0_269] : memref<8x64x16xbf16, #tpu.memory_space<vmem>>, vector<1x64x16xbf16>
    %422 = vector.shape_cast %421 : vector<1x64x16xbf16> to vector<64x16xbf16>
    %cst_270 = arith.constant dense<0.000000e+00> : vector<3x16xf32>
    %423 = tpu.matmul %279, %422, %cst_270 {dimension_numbers = #tpu.dot_dimension_numbers<[1], [0], [0], [1], [0, 0, 1, 1], [], []>} : vector<3x64xbf16>, vector<64x16xbf16>, vector<3x16xf32> -> vector<3x16xf32>
    %c7_271 = arith.constant 7 : index
    %c0_272 = arith.constant 0 : index
    %c0_273 = arith.constant 0 : index
    %424 = vector.load %arg9[%c7_271, %c0_272, %c0_273] : memref<8x1x16xf32, #tpu.memory_space<vmem>>, vector<1x1x16xf32>
    %425 = vector.shape_cast %424 : vector<1x1x16xf32> to vector<1x16xf32>
    %426 = vector.broadcast %425 : vector<1x16xf32> to vector<3x16xf32>
    %427 = arith.addf %423, %426 : vector<3x16xf32>
    %428 = arith.truncf %413 : vector<3x16xf32> to vector<3x16xbf16>
    %429 = arith.truncf %420 : vector<3x16xf32> to vector<3x16xbf16>
    %cst_274 = arith.constant dense<0.000000e+00> : vector<3x3xf32>
    %430 = tpu.matmul %428, %429, %cst_274 {dimension_numbers = #tpu.dot_dimension_numbers<[1], [1], [0], [0], [0, 0, 1, 0], [], []>} : vector<3x16xbf16>, vector<3x16xbf16>, vector<3x3xf32> -> vector<3x3xf32>
    %cst_275 = arith.constant dense<0xFF800000> : vector<3xf32>
    %431 = vector.multi_reduction <maximumf>, %430, %cst_275 [1] : vector<3x3xf32> to vector<3xf32>
    %432 = vector.shape_cast %431 : vector<3xf32> to vector<3x1xf32>
    %433 = vector.broadcast %432 : vector<3x1xf32> to vector<3x3xf32>
    %434 = arith.subf %430, %433 : vector<3x3xf32>
    %435 = math.exp %434 : vector<3x3xf32>
    %cst_276 = arith.constant dense<0.000000e+00> : vector<3xf32>
    %436 = vector.multi_reduction <add>, %435, %cst_276 [1] : vector<3x3xf32> to vector<3xf32>
    %437 = vector.shape_cast %436 : vector<3xf32> to vector<3x1xf32>
    %438 = tpu.reciprocal %437 {approx = true} : vector<3x1xf32> -> vector<3x1xf32>
    %439 = vector.broadcast %438 : vector<3x1xf32> to vector<3x3xf32>
    %440 = arith.mulf %435, %439 : vector<3x3xf32>
    %441 = arith.truncf %440 : vector<3x3xf32> to vector<3x3xbf16>
    %442 = arith.truncf %427 : vector<3x16xf32> to vector<3x16xbf16>
    %cst_277 = arith.constant dense<0.000000e+00> : vector<3x16xf32>
    %443 = tpu.matmul %441, %442, %cst_277 {dimension_numbers = #tpu.dot_dimension_numbers<[1], [0], [0], [1], [0, 0, 1, 1], [], []>} : vector<3x3xbf16>, vector<3x16xbf16>, vector<3x16xf32> -> vector<3x16xf32>
    %444 = arith.truncf %443 : vector<3x16xf32> to vector<3x16xbf16>
    %c7_278 = arith.constant 7 : index
    %c0_279 = arith.constant 0 : index
    %c0_280 = arith.constant 0 : index
    %445 = vector.load %arg10[%c7_278, %c0_279, %c0_280] : memref<8x16x64xbf16, #tpu.memory_space<vmem>>, vector<1x16x64xbf16>
    %446 = vector.shape_cast %445 : vector<1x16x64xbf16> to vector<16x64xbf16>
    %cst_281 = arith.constant dense<0.000000e+00> : vector<3x64xf32>
    %447 = tpu.matmul %444, %446, %cst_281 {dimension_numbers = #tpu.dot_dimension_numbers<[1], [0], [0], [1], [0, 0, 1, 1], [], []>} : vector<3x16xbf16>, vector<16x64xbf16>, vector<3x64xf32> -> vector<3x64xf32>
    %448 = arith.addf %406, %447 : vector<3x64xf32>
    %449 = arith.addf %254, %448 : vector<3x64xf32>
    %c1_282 = arith.constant 1 : index
    %c0_283 = arith.constant 0 : index
    %c0_284 = arith.constant 0 : index
    %450 = vector.load %arg11[%c1_282, %c0_283, %c0_284] : memref<2x1x64xf32, #tpu.memory_space<vmem>>, vector<1x1x64xf32>
    %451 = vector.shape_cast %450 : vector<1x1x64xf32> to vector<1x64xf32>
    %452 = vector.broadcast %451 : vector<1x64xf32> to vector<3x64xf32>
    %453 = arith.addf %449, %452 : vector<3x64xf32>
    %c1_285 = arith.constant 1 : index
    %c0_286 = arith.constant 0 : index
    %c0_287 = arith.constant 0 : index
    %454 = vector.load %arg12[%c1_285, %c0_286, %c0_287] : memref<2x1x64xf32, #tpu.memory_space<vmem>>, vector<1x1x64xf32>
    %455 = vector.shape_cast %454 : vector<1x1x64xf32> to vector<1x64xf32>
    %c1_288 = arith.constant 1 : index
    %c0_289 = arith.constant 0 : index
    %c0_290 = arith.constant 0 : index
    %456 = vector.load %arg13[%c1_288, %c0_289, %c0_290] : memref<2x1x64xf32, #tpu.memory_space<vmem>>, vector<1x1x64xf32>
    %457 = vector.shape_cast %456 : vector<1x1x64xf32> to vector<1x64xf32>
    %cst_291 = arith.constant dense<0.000000e+00> : vector<3xf32>
    %458 = vector.multi_reduction <add>, %453, %cst_291 [1] : vector<3x64xf32> to vector<3xf32>
    %459 = vector.shape_cast %458 : vector<3xf32> to vector<3x1xf32>
    %cst_292 = arith.constant 6.400000e+01 : f32
    %460 = vector.broadcast %cst_292 : f32 to vector<3x1xf32>
    %461 = arith.divf %459, %460 : vector<3x1xf32>
    %462 = vector.broadcast %461 : vector<3x1xf32> to vector<3x64xf32>
    %463 = arith.subf %453, %462 : vector<3x64xf32>
    %464 = arith.mulf %463, %463 : vector<3x64xf32>
    %cst_293 = arith.constant dense<0.000000e+00> : vector<3xf32>
    %465 = vector.multi_reduction <add>, %464, %cst_293 [1] : vector<3x64xf32> to vector<3xf32>
    %466 = vector.shape_cast %465 : vector<3xf32> to vector<3x1xf32>
    %cst_294 = arith.constant 6.400000e+01 : f32
    %467 = vector.broadcast %cst_294 : f32 to vector<3x1xf32>
    %468 = arith.divf %466, %467 : vector<3x1xf32>
    %cst_295 = arith.constant 9.99999974E-6 : f32
    %469 = vector.broadcast %cst_295 : f32 to vector<3x1xf32>
    %470 = arith.addf %468, %469 : vector<3x1xf32>
    %471 = math.rsqrt %470 : vector<3x1xf32>
    %472 = vector.broadcast %471 : vector<3x1xf32> to vector<3x64xf32>
    %473 = arith.mulf %463, %472 : vector<3x64xf32>
    %474 = vector.broadcast %455 : vector<1x64xf32> to vector<3x64xf32>
    %475 = arith.mulf %473, %474 : vector<3x64xf32>
    %476 = vector.broadcast %457 : vector<1x64xf32> to vector<3x64xf32>
    %477 = arith.addf %475, %476 : vector<3x64xf32>
    %478 = arith.truncf %477 : vector<3x64xf32> to vector<3x64xbf16>
    %c1_296 = arith.constant 1 : index
    %c0_297 = arith.constant 0 : index
    %c0_298 = arith.constant 0 : index
    %479 = vector.load %arg14[%c1_296, %c0_297, %c0_298] : memref<2x64x256xbf16, #tpu.memory_space<vmem>>, vector<1x64x256xbf16>
    %480 = vector.shape_cast %479 : vector<1x64x256xbf16> to vector<64x256xbf16>
    %cst_299 = arith.constant dense<0.000000e+00> : vector<3x256xf32>
    %481 = tpu.matmul %478, %480, %cst_299 {dimension_numbers = #tpu.dot_dimension_numbers<[1], [0], [0], [1], [0, 0, 1, 1], [], []>} : vector<3x64xbf16>, vector<64x256xbf16>, vector<3x256xf32> -> vector<3x256xf32>
    %c1_300 = arith.constant 1 : index
    %c0_301 = arith.constant 0 : index
    %c0_302 = arith.constant 0 : index
    %482 = vector.load %arg15[%c1_300, %c0_301, %c0_302] : memref<2x1x256xf32, #tpu.memory_space<vmem>>, vector<1x1x256xf32>
    %483 = vector.shape_cast %482 : vector<1x1x256xf32> to vector<1x256xf32>
    %484 = vector.broadcast %483 : vector<1x256xf32> to vector<3x256xf32>
    %485 = arith.addf %481, %484 : vector<3x256xf32>
    %cst_303 = arith.constant 5.000000e-01 : f32
    %486 = vector.broadcast %cst_303 : f32 to vector<3x256xf32>
    %487 = arith.mulf %486, %485 : vector<3x256xf32>
    %cst_304 = arith.constant 4.471500e-02 : f32
    %488 = vector.broadcast %cst_304 : f32 to vector<3x256xf32>
    %489 = arith.mulf %488, %485 : vector<3x256xf32>
    %490 = arith.mulf %489, %485 : vector<3x256xf32>
    %491 = arith.mulf %490, %485 : vector<3x256xf32>
    %492 = arith.addf %485, %491 : vector<3x256xf32>
    %cst_305 = arith.constant 0.797884583 : f32
    %493 = vector.broadcast %cst_305 : f32 to vector<3x256xf32>
    %494 = arith.mulf %493, %492 : vector<3x256xf32>
    %495 = math.tanh %494 : vector<3x256xf32>
    %cst_306 = arith.constant 1.000000e+00 : f32
    %496 = vector.broadcast %cst_306 : f32 to vector<3x256xf32>
    %497 = arith.addf %496, %495 : vector<3x256xf32>
    %498 = arith.mulf %487, %497 : vector<3x256xf32>
    %499 = arith.truncf %498 : vector<3x256xf32> to vector<3x256xbf16>
    %c1_307 = arith.constant 1 : index
    %c0_308 = arith.constant 0 : index
    %c0_309 = arith.constant 0 : index
    %500 = vector.load %arg16[%c1_307, %c0_308, %c0_309] : memref<2x256x64xbf16, #tpu.memory_space<vmem>>, vector<1x256x64xbf16>
    %501 = vector.shape_cast %500 : vector<1x256x64xbf16> to vector<256x64xbf16>
    %cst_310 = arith.constant dense<0.000000e+00> : vector<3x64xf32>
    %502 = tpu.matmul %499, %501, %cst_310 {dimension_numbers = #tpu.dot_dimension_numbers<[1], [0], [0], [1], [0, 0, 1, 1], [], []>} : vector<3x256xbf16>, vector<256x64xbf16>, vector<3x64xf32> -> vector<3x64xf32>
    %503 = arith.addf %453, %502 : vector<3x64xf32>
    %c1_311 = arith.constant 1 : index
    %c0_312 = arith.constant 0 : index
    %c0_313 = arith.constant 0 : index
    %504 = vector.load %arg17[%c1_311, %c0_312, %c0_313] : memref<2x1x64xf32, #tpu.memory_space<vmem>>, vector<1x1x64xf32>
    %505 = vector.shape_cast %504 : vector<1x1x64xf32> to vector<1x64xf32>
    %506 = vector.broadcast %505 : vector<1x64xf32> to vector<3x64xf32>
    %507 = arith.addf %503, %506 : vector<3x64xf32>
    %c0_314 = arith.constant 0 : index
    %c0_315 = arith.constant 0 : index
    %508 = vector.load %arg18[%c0_314, %c0_315] : memref<1x64xf32, #tpu.memory_space<vmem>>, vector<1x64xf32>
    %c0_316 = arith.constant 0 : index
    %c0_317 = arith.constant 0 : index
    %509 = vector.load %arg19[%c0_316, %c0_317] : memref<1x64xf32, #tpu.memory_space<vmem>>, vector<1x64xf32>
    %cst_318 = arith.constant dense<0.000000e+00> : vector<3xf32>
    %510 = vector.multi_reduction <add>, %507, %cst_318 [1] : vector<3x64xf32> to vector<3xf32>
    %511 = vector.shape_cast %510 : vector<3xf32> to vector<3x1xf32>
    %cst_319 = arith.constant 6.400000e+01 : f32
    %512 = vector.broadcast %cst_319 : f32 to vector<3x1xf32>
    %513 = arith.divf %511, %512 : vector<3x1xf32>
    %514 = vector.broadcast %513 : vector<3x1xf32> to vector<3x64xf32>
    %515 = arith.subf %507, %514 : vector<3x64xf32>
    %516 = arith.mulf %515, %515 : vector<3x64xf32>
    %cst_320 = arith.constant dense<0.000000e+00> : vector<3xf32>
    %517 = vector.multi_reduction <add>, %516, %cst_320 [1] : vector<3x64xf32> to vector<3xf32>
    %518 = vector.shape_cast %517 : vector<3xf32> to vector<3x1xf32>
    %cst_321 = arith.constant 6.400000e+01 : f32
    %519 = vector.broadcast %cst_321 : f32 to vector<3x1xf32>
    %520 = arith.divf %518, %519 : vector<3x1xf32>
    %cst_322 = arith.constant 9.99999974E-6 : f32
    %521 = vector.broadcast %cst_322 : f32 to vector<3x1xf32>
    %522 = arith.addf %520, %521 : vector<3x1xf32>
    %523 = math.rsqrt %522 : vector<3x1xf32>
    %524 = vector.broadcast %523 : vector<3x1xf32> to vector<3x64xf32>
    %525 = arith.mulf %515, %524 : vector<3x64xf32>
    %526 = vector.broadcast %508 : vector<1x64xf32> to vector<3x64xf32>
    %527 = arith.mulf %525, %526 : vector<3x64xf32>
    %528 = vector.broadcast %509 : vector<1x64xf32> to vector<3x64xf32>
    %529 = arith.addf %527, %528 : vector<3x64xf32>
    %c0_323 = arith.constant 0 : index
    %c0_324 = arith.constant 0 : index
    %c0_325 = arith.constant 0 : index
    %530 = vector.load %arg20[%c0_323, %c0_324, %c0_325] : memref<1x3x64xf32, #tpu.memory_space<vmem>>, vector<1x3x64xf32>
    %531 = vector.shape_cast %530 : vector<1x3x64xf32> to vector<3x64xf32>
    %532 = vector.shape_cast %529 : vector<3x64xf32> to vector<1x3x64xf32>
    tpu.vector_store %arg20[%c0_323, %c0_324, %c0_325], %532 {strides = array<i32>} : memref<1x3x64xf32, #tpu.memory_space<vmem>>, vector<1x3x64xf32>,
    return
  }
  func.func @transform_0(%arg0: i32) -> (i32, i32, i32) {
    %c0_i32 = arith.constant 0 : i32
    %c0_i32_0 = arith.constant 0 : i32
    %c0_i32_1 = arith.constant 0 : i32
    return %arg0, %c0_i32, %c0_i32_0 : i32, i32, i32
  }
  func.func @transform_1(%arg0: i32) -> (i32, i32, i32) {
    %c0_i32 = arith.constant 0 : i32
    %c0_i32_0 = arith.constant 0 : i32
    %c0_i32_1 = arith.constant 0 : i32
    %c0_i32_2 = arith.constant 0 : i32
    return %c0_i32, %c0_i32_0, %c0_i32_1 : i32, i32, i32
  }
  func.func @transform_2(%arg0: i32) -> (i32, i32, i32) {
    %c0_i32 = arith.constant 0 : i32
    %c0_i32_0 = arith.constant 0 : i32
    %c0_i32_1 = arith.constant 0 : i32
    %c0_i32_2 = arith.constant 0 : i32
    return %c0_i32, %c0_i32_0, %c0_i32_1 : i32, i32, i32
  }
  func.func @transform_3(%arg0: i32) -> (i32, i32, i32) {
    %c0_i32 = arith.constant 0 : i32
    %c0_i32_0 = arith.constant 0 : i32
    %c0_i32_1 = arith.constant 0 : i32
    %c0_i32_2 = arith.constant 0 : i32
    return %c0_i32, %c0_i32_0, %c0_i32_1 : i32, i32, i32
  }
  func.func @transform_4(%arg0: i32) -> (i32, i32, i32) {
    %c0_i32 = arith.constant 0 : i32
    %c0_i32_0 = arith.constant 0 : i32
    %c0_i32_1 = arith.constant 0 : i32
    %c0_i32_2 = arith.constant 0 : i32
    return %c0_i32, %c0_i32_0, %c0_i32_1 : i32, i32, i32
  }
  func.func @transform_5(%arg0: i32) -> (i32, i32, i32) {
    %c0_i32 = arith.constant 0 : i32
    %c0_i32_0 = arith.constant 0 : i32
    %c0_i32_1 = arith.constant 0 : i32
    %c0_i32_2 = arith.constant 0 : i32
    return %c0_i32, %c0_i32_0, %c0_i32_1 : i32, i32, i32
  }
  func.func @transform_6(%arg0: i32) -> (i32, i32, i32) {
    %c0_i32 = arith.constant 0 : i32
    %c0_i32_0 = arith.constant 0 : i32
    %c0_i32_1 = arith.constant 0 : i32
    %c0_i32_2 = arith.constant 0 : i32
    return %c0_i32, %c0_i32_0, %c0_i32_1 : i32, i32, i32
  }
  func.func @transform_7(%arg0: i32) -> (i32, i32, i32) {
    %c0_i32 = arith.constant 0 : i32
    %c0_i32_0 = arith.constant 0 : i32
    %c0_i32_1 = arith.constant 0 : i32
    %c0_i32_2 = arith.constant 0 : i32
    return %c0_i32, %c0_i32_0, %c0_i32_1 : i32, i32, i32
  }
  func.func @transform_8(%arg0: i32) -> (i32, i32, i32) {
    %c0_i32 = arith.constant 0 : i32
    %c0_i32_0 = arith.constant 0 : i32
    %c0_i32_1 = arith.constant 0 : i32
    %c0_i32_2 = arith.constant 0 : i32
    return %c0_i32, %c0_i32_0, %c0_i32_1 : i32, i32, i32
  }
  func.func @transform_9(%arg0: i32) -> (i32, i32, i32) {
    %c0_i32 = arith.constant 0 : i32
    %c0_i32_0 = arith.constant 0 : i32
    %c0_i32_1 = arith.constant 0 : i32
    %c0_i32_2 = arith.constant 0 : i32
    return %c0_i32, %c0_i32_0, %c0_i32_1 : i32, i32, i32
  }
  func.func @transform_10(%arg0: i32) -> (i32, i32, i32) {
    %c0_i32 = arith.constant 0 : i32
    %c0_i32_0 = arith.constant 0 : i32
    %c0_i32_1 = arith.constant 0 : i32
    %c0_i32_2 = arith.constant 0 : i32
    return %c0_i32, %c0_i32_0, %c0_i32_1 : i32, i32, i32
  }
  func.func @transform_11(%arg0: i32) -> (i32, i32, i32) {
    %c0_i32 = arith.constant 0 : i32
    %c0_i32_0 = arith.constant 0 : i32
    %c0_i32_1 = arith.constant 0 : i32
    %c0_i32_2 = arith.constant 0 : i32
    return %c0_i32, %c0_i32_0, %c0_i32_1 : i32, i32, i32
  }
  func.func @transform_12(%arg0: i32) -> (i32, i32, i32) {
    %c0_i32 = arith.constant 0 : i32
    %c0_i32_0 = arith.constant 0 : i32
    %c0_i32_1 = arith.constant 0 : i32
    %c0_i32_2 = arith.constant 0 : i32
    return %c0_i32, %c0_i32_0, %c0_i32_1 : i32, i32, i32
  }
  func.func @transform_13(%arg0: i32) -> (i32, i32, i32) {
    %c0_i32 = arith.constant 0 : i32
    %c0_i32_0 = arith.constant 0 : i32
    %c0_i32_1 = arith.constant 0 : i32
    %c0_i32_2 = arith.constant 0 : i32
    return %c0_i32, %c0_i32_0, %c0_i32_1 : i32, i32, i32
  }
  func.func @transform_14(%arg0: i32) -> (i32, i32, i32) {
    %c0_i32 = arith.constant 0 : i32
    %c0_i32_0 = arith.constant 0 : i32
    %c0_i32_1 = arith.constant 0 : i32
    %c0_i32_2 = arith.constant 0 : i32
    return %c0_i32, %c0_i32_0, %c0_i32_1 : i32, i32, i32
  }
  func.func @transform_15(%arg0: i32) -> (i32, i32, i32) {
    %c0_i32 = arith.constant 0 : i32
    %c0_i32_0 = arith.constant 0 : i32
    %c0_i32_1 = arith.constant 0 : i32
    %c0_i32_2 = arith.constant 0 : i32
    return %c0_i32, %c0_i32_0, %c0_i32_1 : i32, i32, i32
  }
  func.func @transform_16(%arg0: i32) -> (i32, i32, i32) {
    %c0_i32 = arith.constant 0 : i32
    %c0_i32_0 = arith.constant 0 : i32
    %c0_i32_1 = arith.constant 0 : i32
    %c0_i32_2 = arith.constant 0 : i32
    return %c0_i32, %c0_i32_0, %c0_i32_1 : i32, i32, i32
  }
  func.func @transform_17(%arg0: i32) -> (i32, i32) {
    %c0_i32 = arith.constant 0 : i32
    %c0_i32_0 = arith.constant 0 : i32
    %c0_i32_1 = arith.constant 0 : i32
    return %c0_i32, %c0_i32_0 : i32, i32
  }
  func.func @transform_18(%arg0: i32) -> (i32, i32) {
    %c0_i32 = arith.constant 0 : i32
    %c0_i32_0 = arith.constant 0 : i32
    %c0_i32_1 = arith.constant 0 : i32
    return %c0_i32, %c0_i32_0 : i32, i32
  }
  func.func @transform_19(%arg0: i32) -> (i32, i32, i32) {
    %c0_i32 = arith.constant 0 : i32
    %c0_i32_0 = arith.constant 0 : i32
    %c0_i32_1 = arith.constant 0 : i32
    return %arg0, %c0_i32, %c0_i32_0 : i32, i32, i32
  }
}

module attributes {stable_mosaic.version = 11 : i64} {
  func.func @_stack_kernel(%arg0: i32, %arg1: memref<1x9x64xf32, #tpu.memory_space<vmem>>, %arg2: memref<9x64xf32, #tpu.memory_space<vmem>>, %arg3: memref<2x1x64xf32, #tpu.memory_space<vmem>>, %arg4: memref<2x1x64xf32, #tpu.memory_space<vmem>>, %arg5: memref<8x64x16xbf16, #tpu.memory_space<vmem>>, %arg6: memref<8x1x16xf32, #tpu.memory_space<vmem>>, %arg7: memref<8x64x16xbf16, #tpu.memory_space<vmem>>, %arg8: memref<8x1x16xf32, #tpu.memory_space<vmem>>, %arg9: memref<8x64x16xbf16, #tpu.memory_space<vmem>>, %arg10: memref<8x1x16xf32, #tpu.memory_space<vmem>>, %arg11: memref<8x16x64xbf16, #tpu.memory_space<vmem>>, %arg12: memref<2x1x64xf32, #tpu.memory_space<vmem>>, %arg13: memref<2x1x64xf32, #tpu.memory_space<vmem>>, %arg14: memref<2x1x64xf32, #tpu.memory_space<vmem>>, %arg15: memref<2x64x256xbf16, #tpu.memory_space<vmem>>, %arg16: memref<2x1x256xf32, #tpu.memory_space<vmem>>, %arg17: memref<2x256x64xbf16, #tpu.memory_space<vmem>>, %arg18: memref<2x1x64xf32, #tpu.memory_space<vmem>>, %arg19: memref<64x20xbf16, #tpu.memory_space<vmem>>, %arg20: memref<1x20xf32, #tpu.memory_space<vmem>>, %arg21: memref<1x8x20xf32, #tpu.memory_space<vmem>>) attributes {dimension_semantics = [#tpu.dimension_semantics<parallel>], iteration_bounds = array<i64: 2>, scalar_prefetch = 0 : i64, scratch_operands = 0 : i64, tpu.core_type = #tpu.core_type<tc>, window_params = [{transform_indices = @transform_0, window_bounds = array<i64: 1, 9, 64>}, {pipeline_mode = #tpu.pipeline_mode<synchronous>, transform_indices = @transform_1, window_bounds = array<i64: 9, 64>}, {pipeline_mode = #tpu.pipeline_mode<synchronous>, transform_indices = @transform_2, window_bounds = array<i64: 2, 1, 64>}, {pipeline_mode = #tpu.pipeline_mode<synchronous>, transform_indices = @transform_3, window_bounds = array<i64: 2, 1, 64>}, {pipeline_mode = #tpu.pipeline_mode<synchronous>, transform_indices = @transform_4, window_bounds = array<i64: 8, 64, 16>}, {pipeline_mode = #tpu.pipeline_mode<synchronous>, transform_indices = @transform_5, window_bounds = array<i64: 8, 1, 16>}, {pipeline_mode = #tpu.pipeline_mode<synchronous>, transform_indices = @transform_6, window_bounds = array<i64: 8, 64, 16>}, {pipeline_mode = #tpu.pipeline_mode<synchronous>, transform_indices = @transform_7, window_bounds = array<i64: 8, 1, 16>}, {pipeline_mode = #tpu.pipeline_mode<synchronous>, transform_indices = @transform_8, window_bounds = array<i64: 8, 64, 16>}, {pipeline_mode = #tpu.pipeline_mode<synchronous>, transform_indices = @transform_9, window_bounds = array<i64: 8, 1, 16>}, {pipeline_mode = #tpu.pipeline_mode<synchronous>, transform_indices = @transform_10, window_bounds = array<i64: 8, 16, 64>}, {pipeline_mode = #tpu.pipeline_mode<synchronous>, transform_indices = @transform_11, window_bounds = array<i64: 2, 1, 64>}, {pipeline_mode = #tpu.pipeline_mode<synchronous>, transform_indices = @transform_12, window_bounds = array<i64: 2, 1, 64>}, {pipeline_mode = #tpu.pipeline_mode<synchronous>, transform_indices = @transform_13, window_bounds = array<i64: 2, 1, 64>}, {pipeline_mode = #tpu.pipeline_mode<synchronous>, transform_indices = @transform_14, window_bounds = array<i64: 2, 64, 256>}, {pipeline_mode = #tpu.pipeline_mode<synchronous>, transform_indices = @transform_15, window_bounds = array<i64: 2, 1, 256>}, {pipeline_mode = #tpu.pipeline_mode<synchronous>, transform_indices = @transform_16, window_bounds = array<i64: 2, 256, 64>}, {pipeline_mode = #tpu.pipeline_mode<synchronous>, transform_indices = @transform_17, window_bounds = array<i64: 2, 1, 64>}, {pipeline_mode = #tpu.pipeline_mode<synchronous>, transform_indices = @transform_18, window_bounds = array<i64: 64, 20>}, {pipeline_mode = #tpu.pipeline_mode<synchronous>, transform_indices = @transform_19, window_bounds = array<i64: 1, 20>}, {transform_indices = @transform_20, window_bounds = array<i64: 1, 8, 20>}]} {
    %c0 = arith.constant 0 : index
    %c0_0 = arith.constant 0 : index
    %c0_1 = arith.constant 0 : index
    %0 = vector.load %arg1[%c0, %c0_0, %c0_1] : memref<1x9x64xf32, #tpu.memory_space<vmem>>, vector<1x9x64xf32>
    %1 = vector.shape_cast %0 : vector<1x9x64xf32> to vector<9x64xf32>
    %c0_2 = arith.constant 0 : index
    %c0_3 = arith.constant 0 : index
    %2 = vector.load %arg2[%c0_2, %c0_3] : memref<9x64xf32, #tpu.memory_space<vmem>>, vector<9x64xf32>
    %3 = arith.addf %1, %2 : vector<9x64xf32>
    %c0_4 = arith.constant 0 : index
    %c0_5 = arith.constant 0 : index
    %c0_6 = arith.constant 0 : index
    %4 = vector.load %arg3[%c0_4, %c0_5, %c0_6] : memref<2x1x64xf32, #tpu.memory_space<vmem>>, vector<1x1x64xf32>
    %5 = vector.shape_cast %4 : vector<1x1x64xf32> to vector<1x64xf32>
    %c0_7 = arith.constant 0 : index
    %c0_8 = arith.constant 0 : index
    %c0_9 = arith.constant 0 : index
    %6 = vector.load %arg4[%c0_7, %c0_8, %c0_9] : memref<2x1x64xf32, #tpu.memory_space<vmem>>, vector<1x1x64xf32>
    %7 = vector.shape_cast %6 : vector<1x1x64xf32> to vector<1x64xf32>
    %cst = arith.constant dense<0.000000e+00> : vector<9xf32>
    %8 = vector.multi_reduction <add>, %3, %cst [1] : vector<9x64xf32> to vector<9xf32>
    %9 = vector.shape_cast %8 : vector<9xf32> to vector<9x1xf32>
    %cst_10 = arith.constant 6.400000e+01 : f32
    %10 = vector.broadcast %cst_10 : f32 to vector<9x1xf32>
    %11 = arith.divf %9, %10 : vector<9x1xf32>
    %12 = vector.broadcast %11 : vector<9x1xf32> to vector<9x64xf32>
    %13 = arith.subf %3, %12 : vector<9x64xf32>
    %14 = arith.mulf %13, %13 : vector<9x64xf32>
    %cst_11 = arith.constant dense<0.000000e+00> : vector<9xf32>
    %15 = vector.multi_reduction <add>, %14, %cst_11 [1] : vector<9x64xf32> to vector<9xf32>
    %16 = vector.shape_cast %15 : vector<9xf32> to vector<9x1xf32>
    %cst_12 = arith.constant 6.400000e+01 : f32
    %17 = vector.broadcast %cst_12 : f32 to vector<9x1xf32>
    %18 = arith.divf %16, %17 : vector<9x1xf32>
    %cst_13 = arith.constant 9.99999974E-6 : f32
    %19 = vector.broadcast %cst_13 : f32 to vector<9x1xf32>
    %20 = arith.addf %18, %19 : vector<9x1xf32>
    %21 = math.rsqrt %20 : vector<9x1xf32>
    %22 = vector.broadcast %21 : vector<9x1xf32> to vector<9x64xf32>
    %23 = arith.mulf %13, %22 : vector<9x64xf32>
    %24 = vector.broadcast %5 : vector<1x64xf32> to vector<9x64xf32>
    %25 = arith.mulf %23, %24 : vector<9x64xf32>
    %26 = vector.broadcast %7 : vector<1x64xf32> to vector<9x64xf32>
    %27 = arith.addf %25, %26 : vector<9x64xf32>
    %28 = arith.truncf %27 : vector<9x64xf32> to vector<9x64xbf16>
    %cst_14 = arith.constant 0.000000e+00 : f32
    %29 = vector.broadcast %cst_14 : f32 to vector<9x64xf32>
    %c0_15 = arith.constant 0 : index
    %c0_16 = arith.constant 0 : index
    %c0_17 = arith.constant 0 : index
    %30 = vector.load %arg5[%c0_15, %c0_16, %c0_17] : memref<8x64x16xbf16, #tpu.memory_space<vmem>>, vector<1x64x16xbf16>
    %31 = vector.shape_cast %30 : vector<1x64x16xbf16> to vector<64x16xbf16>
    %cst_18 = arith.constant dense<0.000000e+00> : vector<9x16xf32>
    %32 = tpu.matmul %28, %31, %cst_18 {dimension_numbers = #tpu.dot_dimension_numbers<[1], [0], [0], [1], [0, 0, 1, 1], [], []>} : vector<9x64xbf16>, vector<64x16xbf16>, vector<9x16xf32> -> vector<9x16xf32>
    %c0_19 = arith.constant 0 : index
    %c0_20 = arith.constant 0 : index
    %c0_21 = arith.constant 0 : index
    %33 = vector.load %arg6[%c0_19, %c0_20, %c0_21] : memref<8x1x16xf32, #tpu.memory_space<vmem>>, vector<1x1x16xf32>
    %34 = vector.shape_cast %33 : vector<1x1x16xf32> to vector<1x16xf32>
    %35 = vector.broadcast %34 : vector<1x16xf32> to vector<9x16xf32>
    %36 = arith.addf %32, %35 : vector<9x16xf32>
    %c0_22 = arith.constant 0 : index
    %c0_23 = arith.constant 0 : index
    %c0_24 = arith.constant 0 : index
    %37 = vector.load %arg7[%c0_22, %c0_23, %c0_24] : memref<8x64x16xbf16, #tpu.memory_space<vmem>>, vector<1x64x16xbf16>
    %38 = vector.shape_cast %37 : vector<1x64x16xbf16> to vector<64x16xbf16>
    %cst_25 = arith.constant dense<0.000000e+00> : vector<9x16xf32>
    %39 = tpu.matmul %28, %38, %cst_25 {dimension_numbers = #tpu.dot_dimension_numbers<[1], [0], [0], [1], [0, 0, 1, 1], [], []>} : vector<9x64xbf16>, vector<64x16xbf16>, vector<9x16xf32> -> vector<9x16xf32>
    %c0_26 = arith.constant 0 : index
    %c0_27 = arith.constant 0 : index
    %c0_28 = arith.constant 0 : index
    %40 = vector.load %arg8[%c0_26, %c0_27, %c0_28] : memref<8x1x16xf32, #tpu.memory_space<vmem>>, vector<1x1x16xf32>
    %41 = vector.shape_cast %40 : vector<1x1x16xf32> to vector<1x16xf32>
    %42 = vector.broadcast %41 : vector<1x16xf32> to vector<9x16xf32>
    %43 = arith.addf %39, %42 : vector<9x16xf32>
    %c0_29 = arith.constant 0 : index
    %c0_30 = arith.constant 0 : index
    %c0_31 = arith.constant 0 : index
    %44 = vector.load %arg9[%c0_29, %c0_30, %c0_31] : memref<8x64x16xbf16, #tpu.memory_space<vmem>>, vector<1x64x16xbf16>
    %45 = vector.shape_cast %44 : vector<1x64x16xbf16> to vector<64x16xbf16>
    %cst_32 = arith.constant dense<0.000000e+00> : vector<9x16xf32>
    %46 = tpu.matmul %28, %45, %cst_32 {dimension_numbers = #tpu.dot_dimension_numbers<[1], [0], [0], [1], [0, 0, 1, 1], [], []>} : vector<9x64xbf16>, vector<64x16xbf16>, vector<9x16xf32> -> vector<9x16xf32>
    %c0_33 = arith.constant 0 : index
    %c0_34 = arith.constant 0 : index
    %c0_35 = arith.constant 0 : index
    %47 = vector.load %arg10[%c0_33, %c0_34, %c0_35] : memref<8x1x16xf32, #tpu.memory_space<vmem>>, vector<1x1x16xf32>
    %48 = vector.shape_cast %47 : vector<1x1x16xf32> to vector<1x16xf32>
    %49 = vector.broadcast %48 : vector<1x16xf32> to vector<9x16xf32>
    %50 = arith.addf %46, %49 : vector<9x16xf32>
    %51 = arith.truncf %36 : vector<9x16xf32> to vector<9x16xbf16>
    %52 = arith.truncf %43 : vector<9x16xf32> to vector<9x16xbf16>
    %cst_36 = arith.constant dense<0.000000e+00> : vector<9x9xf32>
    %53 = tpu.matmul %51, %52, %cst_36 {dimension_numbers = #tpu.dot_dimension_numbers<[1], [1], [0], [0], [0, 0, 1, 0], [], []>} : vector<9x16xbf16>, vector<9x16xbf16>, vector<9x9xf32> -> vector<9x9xf32>
    %cst_37 = arith.constant dense<0xFF800000> : vector<9xf32>
    %54 = vector.multi_reduction <maximumf>, %53, %cst_37 [1] : vector<9x9xf32> to vector<9xf32>
    %55 = vector.shape_cast %54 : vector<9xf32> to vector<9x1xf32>
    %56 = vector.broadcast %55 : vector<9x1xf32> to vector<9x9xf32>
    %57 = arith.subf %53, %56 : vector<9x9xf32>
    %58 = math.exp %57 : vector<9x9xf32>
    %cst_38 = arith.constant dense<0.000000e+00> : vector<9xf32>
    %59 = vector.multi_reduction <add>, %58, %cst_38 [1] : vector<9x9xf32> to vector<9xf32>
    %60 = vector.shape_cast %59 : vector<9xf32> to vector<9x1xf32>
    %61 = tpu.reciprocal %60 {approx = true} : vector<9x1xf32> -> vector<9x1xf32>
    %62 = vector.broadcast %61 : vector<9x1xf32> to vector<9x9xf32>
    %63 = arith.mulf %58, %62 : vector<9x9xf32>
    %64 = arith.truncf %63 : vector<9x9xf32> to vector<9x9xbf16>
    %65 = arith.truncf %50 : vector<9x16xf32> to vector<9x16xbf16>
    %cst_39 = arith.constant dense<0.000000e+00> : vector<9x16xf32>
    %66 = tpu.matmul %64, %65, %cst_39 {dimension_numbers = #tpu.dot_dimension_numbers<[1], [0], [0], [1], [0, 0, 1, 1], [], []>} : vector<9x9xbf16>, vector<9x16xbf16>, vector<9x16xf32> -> vector<9x16xf32>
    %67 = arith.truncf %66 : vector<9x16xf32> to vector<9x16xbf16>
    %c0_40 = arith.constant 0 : index
    %c0_41 = arith.constant 0 : index
    %c0_42 = arith.constant 0 : index
    %68 = vector.load %arg11[%c0_40, %c0_41, %c0_42] : memref<8x16x64xbf16, #tpu.memory_space<vmem>>, vector<1x16x64xbf16>
    %69 = vector.shape_cast %68 : vector<1x16x64xbf16> to vector<16x64xbf16>
    %cst_43 = arith.constant dense<0.000000e+00> : vector<9x64xf32>
    %70 = tpu.matmul %67, %69, %cst_43 {dimension_numbers = #tpu.dot_dimension_numbers<[1], [0], [0], [1], [0, 0, 1, 1], [], []>} : vector<9x16xbf16>, vector<16x64xbf16>, vector<9x64xf32> -> vector<9x64xf32>
    %71 = arith.addf %29, %70 : vector<9x64xf32>
    %c1 = arith.constant 1 : index
    %c0_44 = arith.constant 0 : index
    %c0_45 = arith.constant 0 : index
    %72 = vector.load %arg5[%c1, %c0_44, %c0_45] : memref<8x64x16xbf16, #tpu.memory_space<vmem>>, vector<1x64x16xbf16>
    %73 = vector.shape_cast %72 : vector<1x64x16xbf16> to vector<64x16xbf16>
    %cst_46 = arith.constant dense<0.000000e+00> : vector<9x16xf32>
    %74 = tpu.matmul %28, %73, %cst_46 {dimension_numbers = #tpu.dot_dimension_numbers<[1], [0], [0], [1], [0, 0, 1, 1], [], []>} : vector<9x64xbf16>, vector<64x16xbf16>, vector<9x16xf32> -> vector<9x16xf32>
    %c1_47 = arith.constant 1 : index
    %c0_48 = arith.constant 0 : index
    %c0_49 = arith.constant 0 : index
    %75 = vector.load %arg6[%c1_47, %c0_48, %c0_49] : memref<8x1x16xf32, #tpu.memory_space<vmem>>, vector<1x1x16xf32>
    %76 = vector.shape_cast %75 : vector<1x1x16xf32> to vector<1x16xf32>
    %77 = vector.broadcast %76 : vector<1x16xf32> to vector<9x16xf32>
    %78 = arith.addf %74, %77 : vector<9x16xf32>
    %c1_50 = arith.constant 1 : index
    %c0_51 = arith.constant 0 : index
    %c0_52 = arith.constant 0 : index
    %79 = vector.load %arg7[%c1_50, %c0_51, %c0_52] : memref<8x64x16xbf16, #tpu.memory_space<vmem>>, vector<1x64x16xbf16>
    %80 = vector.shape_cast %79 : vector<1x64x16xbf16> to vector<64x16xbf16>
    %cst_53 = arith.constant dense<0.000000e+00> : vector<9x16xf32>
    %81 = tpu.matmul %28, %80, %cst_53 {dimension_numbers = #tpu.dot_dimension_numbers<[1], [0], [0], [1], [0, 0, 1, 1], [], []>} : vector<9x64xbf16>, vector<64x16xbf16>, vector<9x16xf32> -> vector<9x16xf32>
    %c1_54 = arith.constant 1 : index
    %c0_55 = arith.constant 0 : index
    %c0_56 = arith.constant 0 : index
    %82 = vector.load %arg8[%c1_54, %c0_55, %c0_56] : memref<8x1x16xf32, #tpu.memory_space<vmem>>, vector<1x1x16xf32>
    %83 = vector.shape_cast %82 : vector<1x1x16xf32> to vector<1x16xf32>
    %84 = vector.broadcast %83 : vector<1x16xf32> to vector<9x16xf32>
    %85 = arith.addf %81, %84 : vector<9x16xf32>
    %c1_57 = arith.constant 1 : index
    %c0_58 = arith.constant 0 : index
    %c0_59 = arith.constant 0 : index
    %86 = vector.load %arg9[%c1_57, %c0_58, %c0_59] : memref<8x64x16xbf16, #tpu.memory_space<vmem>>, vector<1x64x16xbf16>
    %87 = vector.shape_cast %86 : vector<1x64x16xbf16> to vector<64x16xbf16>
    %cst_60 = arith.constant dense<0.000000e+00> : vector<9x16xf32>
    %88 = tpu.matmul %28, %87, %cst_60 {dimension_numbers = #tpu.dot_dimension_numbers<[1], [0], [0], [1], [0, 0, 1, 1], [], []>} : vector<9x64xbf16>, vector<64x16xbf16>, vector<9x16xf32> -> vector<9x16xf32>
    %c1_61 = arith.constant 1 : index
    %c0_62 = arith.constant 0 : index
    %c0_63 = arith.constant 0 : index
    %89 = vector.load %arg10[%c1_61, %c0_62, %c0_63] : memref<8x1x16xf32, #tpu.memory_space<vmem>>, vector<1x1x16xf32>
    %90 = vector.shape_cast %89 : vector<1x1x16xf32> to vector<1x16xf32>
    %91 = vector.broadcast %90 : vector<1x16xf32> to vector<9x16xf32>
    %92 = arith.addf %88, %91 : vector<9x16xf32>
    %93 = arith.truncf %78 : vector<9x16xf32> to vector<9x16xbf16>
    %94 = arith.truncf %85 : vector<9x16xf32> to vector<9x16xbf16>
    %cst_64 = arith.constant dense<0.000000e+00> : vector<9x9xf32>
    %95 = tpu.matmul %93, %94, %cst_64 {dimension_numbers = #tpu.dot_dimension_numbers<[1], [1], [0], [0], [0, 0, 1, 0], [], []>} : vector<9x16xbf16>, vector<9x16xbf16>, vector<9x9xf32> -> vector<9x9xf32>
    %cst_65 = arith.constant dense<0xFF800000> : vector<9xf32>
    %96 = vector.multi_reduction <maximumf>, %95, %cst_65 [1] : vector<9x9xf32> to vector<9xf32>
    %97 = vector.shape_cast %96 : vector<9xf32> to vector<9x1xf32>
    %98 = vector.broadcast %97 : vector<9x1xf32> to vector<9x9xf32>
    %99 = arith.subf %95, %98 : vector<9x9xf32>
    %100 = math.exp %99 : vector<9x9xf32>
    %cst_66 = arith.constant dense<0.000000e+00> : vector<9xf32>
    %101 = vector.multi_reduction <add>, %100, %cst_66 [1] : vector<9x9xf32> to vector<9xf32>
    %102 = vector.shape_cast %101 : vector<9xf32> to vector<9x1xf32>
    %103 = tpu.reciprocal %102 {approx = true} : vector<9x1xf32> -> vector<9x1xf32>
    %104 = vector.broadcast %103 : vector<9x1xf32> to vector<9x9xf32>
    %105 = arith.mulf %100, %104 : vector<9x9xf32>
    %106 = arith.truncf %105 : vector<9x9xf32> to vector<9x9xbf16>
    %107 = arith.truncf %92 : vector<9x16xf32> to vector<9x16xbf16>
    %cst_67 = arith.constant dense<0.000000e+00> : vector<9x16xf32>
    %108 = tpu.matmul %106, %107, %cst_67 {dimension_numbers = #tpu.dot_dimension_numbers<[1], [0], [0], [1], [0, 0, 1, 1], [], []>} : vector<9x9xbf16>, vector<9x16xbf16>, vector<9x16xf32> -> vector<9x16xf32>
    %109 = arith.truncf %108 : vector<9x16xf32> to vector<9x16xbf16>
    %c1_68 = arith.constant 1 : index
    %c0_69 = arith.constant 0 : index
    %c0_70 = arith.constant 0 : index
    %110 = vector.load %arg11[%c1_68, %c0_69, %c0_70] : memref<8x16x64xbf16, #tpu.memory_space<vmem>>, vector<1x16x64xbf16>
    %111 = vector.shape_cast %110 : vector<1x16x64xbf16> to vector<16x64xbf16>
    %cst_71 = arith.constant dense<0.000000e+00> : vector<9x64xf32>
    %112 = tpu.matmul %109, %111, %cst_71 {dimension_numbers = #tpu.dot_dimension_numbers<[1], [0], [0], [1], [0, 0, 1, 1], [], []>} : vector<9x16xbf16>, vector<16x64xbf16>, vector<9x64xf32> -> vector<9x64xf32>
    %113 = arith.addf %71, %112 : vector<9x64xf32>
    %c2 = arith.constant 2 : index
    %c0_72 = arith.constant 0 : index
    %c0_73 = arith.constant 0 : index
    %114 = vector.load %arg5[%c2, %c0_72, %c0_73] : memref<8x64x16xbf16, #tpu.memory_space<vmem>>, vector<1x64x16xbf16>
    %115 = vector.shape_cast %114 : vector<1x64x16xbf16> to vector<64x16xbf16>
    %cst_74 = arith.constant dense<0.000000e+00> : vector<9x16xf32>
    %116 = tpu.matmul %28, %115, %cst_74 {dimension_numbers = #tpu.dot_dimension_numbers<[1], [0], [0], [1], [0, 0, 1, 1], [], []>} : vector<9x64xbf16>, vector<64x16xbf16>, vector<9x16xf32> -> vector<9x16xf32>
    %c2_75 = arith.constant 2 : index
    %c0_76 = arith.constant 0 : index
    %c0_77 = arith.constant 0 : index
    %117 = vector.load %arg6[%c2_75, %c0_76, %c0_77] : memref<8x1x16xf32, #tpu.memory_space<vmem>>, vector<1x1x16xf32>
    %118 = vector.shape_cast %117 : vector<1x1x16xf32> to vector<1x16xf32>
    %119 = vector.broadcast %118 : vector<1x16xf32> to vector<9x16xf32>
    %120 = arith.addf %116, %119 : vector<9x16xf32>
    %c2_78 = arith.constant 2 : index
    %c0_79 = arith.constant 0 : index
    %c0_80 = arith.constant 0 : index
    %121 = vector.load %arg7[%c2_78, %c0_79, %c0_80] : memref<8x64x16xbf16, #tpu.memory_space<vmem>>, vector<1x64x16xbf16>
    %122 = vector.shape_cast %121 : vector<1x64x16xbf16> to vector<64x16xbf16>
    %cst_81 = arith.constant dense<0.000000e+00> : vector<9x16xf32>
    %123 = tpu.matmul %28, %122, %cst_81 {dimension_numbers = #tpu.dot_dimension_numbers<[1], [0], [0], [1], [0, 0, 1, 1], [], []>} : vector<9x64xbf16>, vector<64x16xbf16>, vector<9x16xf32> -> vector<9x16xf32>
    %c2_82 = arith.constant 2 : index
    %c0_83 = arith.constant 0 : index
    %c0_84 = arith.constant 0 : index
    %124 = vector.load %arg8[%c2_82, %c0_83, %c0_84] : memref<8x1x16xf32, #tpu.memory_space<vmem>>, vector<1x1x16xf32>
    %125 = vector.shape_cast %124 : vector<1x1x16xf32> to vector<1x16xf32>
    %126 = vector.broadcast %125 : vector<1x16xf32> to vector<9x16xf32>
    %127 = arith.addf %123, %126 : vector<9x16xf32>
    %c2_85 = arith.constant 2 : index
    %c0_86 = arith.constant 0 : index
    %c0_87 = arith.constant 0 : index
    %128 = vector.load %arg9[%c2_85, %c0_86, %c0_87] : memref<8x64x16xbf16, #tpu.memory_space<vmem>>, vector<1x64x16xbf16>
    %129 = vector.shape_cast %128 : vector<1x64x16xbf16> to vector<64x16xbf16>
    %cst_88 = arith.constant dense<0.000000e+00> : vector<9x16xf32>
    %130 = tpu.matmul %28, %129, %cst_88 {dimension_numbers = #tpu.dot_dimension_numbers<[1], [0], [0], [1], [0, 0, 1, 1], [], []>} : vector<9x64xbf16>, vector<64x16xbf16>, vector<9x16xf32> -> vector<9x16xf32>
    %c2_89 = arith.constant 2 : index
    %c0_90 = arith.constant 0 : index
    %c0_91 = arith.constant 0 : index
    %131 = vector.load %arg10[%c2_89, %c0_90, %c0_91] : memref<8x1x16xf32, #tpu.memory_space<vmem>>, vector<1x1x16xf32>
    %132 = vector.shape_cast %131 : vector<1x1x16xf32> to vector<1x16xf32>
    %133 = vector.broadcast %132 : vector<1x16xf32> to vector<9x16xf32>
    %134 = arith.addf %130, %133 : vector<9x16xf32>
    %135 = arith.truncf %120 : vector<9x16xf32> to vector<9x16xbf16>
    %136 = arith.truncf %127 : vector<9x16xf32> to vector<9x16xbf16>
    %cst_92 = arith.constant dense<0.000000e+00> : vector<9x9xf32>
    %137 = tpu.matmul %135, %136, %cst_92 {dimension_numbers = #tpu.dot_dimension_numbers<[1], [1], [0], [0], [0, 0, 1, 0], [], []>} : vector<9x16xbf16>, vector<9x16xbf16>, vector<9x9xf32> -> vector<9x9xf32>
    %cst_93 = arith.constant dense<0xFF800000> : vector<9xf32>
    %138 = vector.multi_reduction <maximumf>, %137, %cst_93 [1] : vector<9x9xf32> to vector<9xf32>
    %139 = vector.shape_cast %138 : vector<9xf32> to vector<9x1xf32>
    %140 = vector.broadcast %139 : vector<9x1xf32> to vector<9x9xf32>
    %141 = arith.subf %137, %140 : vector<9x9xf32>
    %142 = math.exp %141 : vector<9x9xf32>
    %cst_94 = arith.constant dense<0.000000e+00> : vector<9xf32>
    %143 = vector.multi_reduction <add>, %142, %cst_94 [1] : vector<9x9xf32> to vector<9xf32>
    %144 = vector.shape_cast %143 : vector<9xf32> to vector<9x1xf32>
    %145 = tpu.reciprocal %144 {approx = true} : vector<9x1xf32> -> vector<9x1xf32>
    %146 = vector.broadcast %145 : vector<9x1xf32> to vector<9x9xf32>
    %147 = arith.mulf %142, %146 : vector<9x9xf32>
    %148 = arith.truncf %147 : vector<9x9xf32> to vector<9x9xbf16>
    %149 = arith.truncf %134 : vector<9x16xf32> to vector<9x16xbf16>
    %cst_95 = arith.constant dense<0.000000e+00> : vector<9x16xf32>
    %150 = tpu.matmul %148, %149, %cst_95 {dimension_numbers = #tpu.dot_dimension_numbers<[1], [0], [0], [1], [0, 0, 1, 1], [], []>} : vector<9x9xbf16>, vector<9x16xbf16>, vector<9x16xf32> -> vector<9x16xf32>
    %151 = arith.truncf %150 : vector<9x16xf32> to vector<9x16xbf16>
    %c2_96 = arith.constant 2 : index
    %c0_97 = arith.constant 0 : index
    %c0_98 = arith.constant 0 : index
    %152 = vector.load %arg11[%c2_96, %c0_97, %c0_98] : memref<8x16x64xbf16, #tpu.memory_space<vmem>>, vector<1x16x64xbf16>
    %153 = vector.shape_cast %152 : vector<1x16x64xbf16> to vector<16x64xbf16>
    %cst_99 = arith.constant dense<0.000000e+00> : vector<9x64xf32>
    %154 = tpu.matmul %151, %153, %cst_99 {dimension_numbers = #tpu.dot_dimension_numbers<[1], [0], [0], [1], [0, 0, 1, 1], [], []>} : vector<9x16xbf16>, vector<16x64xbf16>, vector<9x64xf32> -> vector<9x64xf32>
    %155 = arith.addf %113, %154 : vector<9x64xf32>
    %c3 = arith.constant 3 : index
    %c0_100 = arith.constant 0 : index
    %c0_101 = arith.constant 0 : index
    %156 = vector.load %arg5[%c3, %c0_100, %c0_101] : memref<8x64x16xbf16, #tpu.memory_space<vmem>>, vector<1x64x16xbf16>
    %157 = vector.shape_cast %156 : vector<1x64x16xbf16> to vector<64x16xbf16>
    %cst_102 = arith.constant dense<0.000000e+00> : vector<9x16xf32>
    %158 = tpu.matmul %28, %157, %cst_102 {dimension_numbers = #tpu.dot_dimension_numbers<[1], [0], [0], [1], [0, 0, 1, 1], [], []>} : vector<9x64xbf16>, vector<64x16xbf16>, vector<9x16xf32> -> vector<9x16xf32>
    %c3_103 = arith.constant 3 : index
    %c0_104 = arith.constant 0 : index
    %c0_105 = arith.constant 0 : index
    %159 = vector.load %arg6[%c3_103, %c0_104, %c0_105] : memref<8x1x16xf32, #tpu.memory_space<vmem>>, vector<1x1x16xf32>
    %160 = vector.shape_cast %159 : vector<1x1x16xf32> to vector<1x16xf32>
    %161 = vector.broadcast %160 : vector<1x16xf32> to vector<9x16xf32>
    %162 = arith.addf %158, %161 : vector<9x16xf32>
    %c3_106 = arith.constant 3 : index
    %c0_107 = arith.constant 0 : index
    %c0_108 = arith.constant 0 : index
    %163 = vector.load %arg7[%c3_106, %c0_107, %c0_108] : memref<8x64x16xbf16, #tpu.memory_space<vmem>>, vector<1x64x16xbf16>
    %164 = vector.shape_cast %163 : vector<1x64x16xbf16> to vector<64x16xbf16>
    %cst_109 = arith.constant dense<0.000000e+00> : vector<9x16xf32>
    %165 = tpu.matmul %28, %164, %cst_109 {dimension_numbers = #tpu.dot_dimension_numbers<[1], [0], [0], [1], [0, 0, 1, 1], [], []>} : vector<9x64xbf16>, vector<64x16xbf16>, vector<9x16xf32> -> vector<9x16xf32>
    %c3_110 = arith.constant 3 : index
    %c0_111 = arith.constant 0 : index
    %c0_112 = arith.constant 0 : index
    %166 = vector.load %arg8[%c3_110, %c0_111, %c0_112] : memref<8x1x16xf32, #tpu.memory_space<vmem>>, vector<1x1x16xf32>
    %167 = vector.shape_cast %166 : vector<1x1x16xf32> to vector<1x16xf32>
    %168 = vector.broadcast %167 : vector<1x16xf32> to vector<9x16xf32>
    %169 = arith.addf %165, %168 : vector<9x16xf32>
    %c3_113 = arith.constant 3 : index
    %c0_114 = arith.constant 0 : index
    %c0_115 = arith.constant 0 : index
    %170 = vector.load %arg9[%c3_113, %c0_114, %c0_115] : memref<8x64x16xbf16, #tpu.memory_space<vmem>>, vector<1x64x16xbf16>
    %171 = vector.shape_cast %170 : vector<1x64x16xbf16> to vector<64x16xbf16>
    %cst_116 = arith.constant dense<0.000000e+00> : vector<9x16xf32>
    %172 = tpu.matmul %28, %171, %cst_116 {dimension_numbers = #tpu.dot_dimension_numbers<[1], [0], [0], [1], [0, 0, 1, 1], [], []>} : vector<9x64xbf16>, vector<64x16xbf16>, vector<9x16xf32> -> vector<9x16xf32>
    %c3_117 = arith.constant 3 : index
    %c0_118 = arith.constant 0 : index
    %c0_119 = arith.constant 0 : index
    %173 = vector.load %arg10[%c3_117, %c0_118, %c0_119] : memref<8x1x16xf32, #tpu.memory_space<vmem>>, vector<1x1x16xf32>
    %174 = vector.shape_cast %173 : vector<1x1x16xf32> to vector<1x16xf32>
    %175 = vector.broadcast %174 : vector<1x16xf32> to vector<9x16xf32>
    %176 = arith.addf %172, %175 : vector<9x16xf32>
    %177 = arith.truncf %162 : vector<9x16xf32> to vector<9x16xbf16>
    %178 = arith.truncf %169 : vector<9x16xf32> to vector<9x16xbf16>
    %cst_120 = arith.constant dense<0.000000e+00> : vector<9x9xf32>
    %179 = tpu.matmul %177, %178, %cst_120 {dimension_numbers = #tpu.dot_dimension_numbers<[1], [1], [0], [0], [0, 0, 1, 0], [], []>} : vector<9x16xbf16>, vector<9x16xbf16>, vector<9x9xf32> -> vector<9x9xf32>
    %cst_121 = arith.constant dense<0xFF800000> : vector<9xf32>
    %180 = vector.multi_reduction <maximumf>, %179, %cst_121 [1] : vector<9x9xf32> to vector<9xf32>
    %181 = vector.shape_cast %180 : vector<9xf32> to vector<9x1xf32>
    %182 = vector.broadcast %181 : vector<9x1xf32> to vector<9x9xf32>
    %183 = arith.subf %179, %182 : vector<9x9xf32>
    %184 = math.exp %183 : vector<9x9xf32>
    %cst_122 = arith.constant dense<0.000000e+00> : vector<9xf32>
    %185 = vector.multi_reduction <add>, %184, %cst_122 [1] : vector<9x9xf32> to vector<9xf32>
    %186 = vector.shape_cast %185 : vector<9xf32> to vector<9x1xf32>
    %187 = tpu.reciprocal %186 {approx = true} : vector<9x1xf32> -> vector<9x1xf32>
    %188 = vector.broadcast %187 : vector<9x1xf32> to vector<9x9xf32>
    %189 = arith.mulf %184, %188 : vector<9x9xf32>
    %190 = arith.truncf %189 : vector<9x9xf32> to vector<9x9xbf16>
    %191 = arith.truncf %176 : vector<9x16xf32> to vector<9x16xbf16>
    %cst_123 = arith.constant dense<0.000000e+00> : vector<9x16xf32>
    %192 = tpu.matmul %190, %191, %cst_123 {dimension_numbers = #tpu.dot_dimension_numbers<[1], [0], [0], [1], [0, 0, 1, 1], [], []>} : vector<9x9xbf16>, vector<9x16xbf16>, vector<9x16xf32> -> vector<9x16xf32>
    %193 = arith.truncf %192 : vector<9x16xf32> to vector<9x16xbf16>
    %c3_124 = arith.constant 3 : index
    %c0_125 = arith.constant 0 : index
    %c0_126 = arith.constant 0 : index
    %194 = vector.load %arg11[%c3_124, %c0_125, %c0_126] : memref<8x16x64xbf16, #tpu.memory_space<vmem>>, vector<1x16x64xbf16>
    %195 = vector.shape_cast %194 : vector<1x16x64xbf16> to vector<16x64xbf16>
    %cst_127 = arith.constant dense<0.000000e+00> : vector<9x64xf32>
    %196 = tpu.matmul %193, %195, %cst_127 {dimension_numbers = #tpu.dot_dimension_numbers<[1], [0], [0], [1], [0, 0, 1, 1], [], []>} : vector<9x16xbf16>, vector<16x64xbf16>, vector<9x64xf32> -> vector<9x64xf32>
    %197 = arith.addf %155, %196 : vector<9x64xf32>
    %198 = arith.addf %3, %197 : vector<9x64xf32>
    %c0_128 = arith.constant 0 : index
    %c0_129 = arith.constant 0 : index
    %c0_130 = arith.constant 0 : index
    %199 = vector.load %arg12[%c0_128, %c0_129, %c0_130] : memref<2x1x64xf32, #tpu.memory_space<vmem>>, vector<1x1x64xf32>
    %200 = vector.shape_cast %199 : vector<1x1x64xf32> to vector<1x64xf32>
    %201 = vector.broadcast %200 : vector<1x64xf32> to vector<9x64xf32>
    %202 = arith.addf %198, %201 : vector<9x64xf32>
    %c0_131 = arith.constant 0 : index
    %c0_132 = arith.constant 0 : index
    %c0_133 = arith.constant 0 : index
    %203 = vector.load %arg13[%c0_131, %c0_132, %c0_133] : memref<2x1x64xf32, #tpu.memory_space<vmem>>, vector<1x1x64xf32>
    %204 = vector.shape_cast %203 : vector<1x1x64xf32> to vector<1x64xf32>
    %c0_134 = arith.constant 0 : index
    %c0_135 = arith.constant 0 : index
    %c0_136 = arith.constant 0 : index
    %205 = vector.load %arg14[%c0_134, %c0_135, %c0_136] : memref<2x1x64xf32, #tpu.memory_space<vmem>>, vector<1x1x64xf32>
    %206 = vector.shape_cast %205 : vector<1x1x64xf32> to vector<1x64xf32>
    %cst_137 = arith.constant dense<0.000000e+00> : vector<9xf32>
    %207 = vector.multi_reduction <add>, %202, %cst_137 [1] : vector<9x64xf32> to vector<9xf32>
    %208 = vector.shape_cast %207 : vector<9xf32> to vector<9x1xf32>
    %cst_138 = arith.constant 6.400000e+01 : f32
    %209 = vector.broadcast %cst_138 : f32 to vector<9x1xf32>
    %210 = arith.divf %208, %209 : vector<9x1xf32>
    %211 = vector.broadcast %210 : vector<9x1xf32> to vector<9x64xf32>
    %212 = arith.subf %202, %211 : vector<9x64xf32>
    %213 = arith.mulf %212, %212 : vector<9x64xf32>
    %cst_139 = arith.constant dense<0.000000e+00> : vector<9xf32>
    %214 = vector.multi_reduction <add>, %213, %cst_139 [1] : vector<9x64xf32> to vector<9xf32>
    %215 = vector.shape_cast %214 : vector<9xf32> to vector<9x1xf32>
    %cst_140 = arith.constant 6.400000e+01 : f32
    %216 = vector.broadcast %cst_140 : f32 to vector<9x1xf32>
    %217 = arith.divf %215, %216 : vector<9x1xf32>
    %cst_141 = arith.constant 9.99999974E-6 : f32
    %218 = vector.broadcast %cst_141 : f32 to vector<9x1xf32>
    %219 = arith.addf %217, %218 : vector<9x1xf32>
    %220 = math.rsqrt %219 : vector<9x1xf32>
    %221 = vector.broadcast %220 : vector<9x1xf32> to vector<9x64xf32>
    %222 = arith.mulf %212, %221 : vector<9x64xf32>
    %223 = vector.broadcast %204 : vector<1x64xf32> to vector<9x64xf32>
    %224 = arith.mulf %222, %223 : vector<9x64xf32>
    %225 = vector.broadcast %206 : vector<1x64xf32> to vector<9x64xf32>
    %226 = arith.addf %224, %225 : vector<9x64xf32>
    %227 = arith.truncf %226 : vector<9x64xf32> to vector<9x64xbf16>
    %c0_142 = arith.constant 0 : index
    %c0_143 = arith.constant 0 : index
    %c0_144 = arith.constant 0 : index
    %228 = vector.load %arg15[%c0_142, %c0_143, %c0_144] : memref<2x64x256xbf16, #tpu.memory_space<vmem>>, vector<1x64x256xbf16>
    %229 = vector.shape_cast %228 : vector<1x64x256xbf16> to vector<64x256xbf16>
    %cst_145 = arith.constant dense<0.000000e+00> : vector<9x256xf32>
    %230 = tpu.matmul %227, %229, %cst_145 {dimension_numbers = #tpu.dot_dimension_numbers<[1], [0], [0], [1], [0, 0, 1, 1], [], []>} : vector<9x64xbf16>, vector<64x256xbf16>, vector<9x256xf32> -> vector<9x256xf32>
    %c0_146 = arith.constant 0 : index
    %c0_147 = arith.constant 0 : index
    %c0_148 = arith.constant 0 : index
    %231 = vector.load %arg16[%c0_146, %c0_147, %c0_148] : memref<2x1x256xf32, #tpu.memory_space<vmem>>, vector<1x1x256xf32>
    %232 = vector.shape_cast %231 : vector<1x1x256xf32> to vector<1x256xf32>
    %233 = vector.broadcast %232 : vector<1x256xf32> to vector<9x256xf32>
    %234 = arith.addf %230, %233 : vector<9x256xf32>
    %cst_149 = arith.constant 5.000000e-01 : f32
    %235 = vector.broadcast %cst_149 : f32 to vector<9x256xf32>
    %236 = arith.mulf %235, %234 : vector<9x256xf32>
    %cst_150 = arith.constant 4.471500e-02 : f32
    %237 = vector.broadcast %cst_150 : f32 to vector<9x256xf32>
    %238 = arith.mulf %237, %234 : vector<9x256xf32>
    %239 = arith.mulf %238, %234 : vector<9x256xf32>
    %240 = arith.mulf %239, %234 : vector<9x256xf32>
    %241 = arith.addf %234, %240 : vector<9x256xf32>
    %cst_151 = arith.constant 0.797884583 : f32
    %242 = vector.broadcast %cst_151 : f32 to vector<9x256xf32>
    %243 = arith.mulf %242, %241 : vector<9x256xf32>
    %244 = math.tanh %243 : vector<9x256xf32>
    %cst_152 = arith.constant 1.000000e+00 : f32
    %245 = vector.broadcast %cst_152 : f32 to vector<9x256xf32>
    %246 = arith.addf %245, %244 : vector<9x256xf32>
    %247 = arith.mulf %236, %246 : vector<9x256xf32>
    %248 = arith.truncf %247 : vector<9x256xf32> to vector<9x256xbf16>
    %c0_153 = arith.constant 0 : index
    %c0_154 = arith.constant 0 : index
    %c0_155 = arith.constant 0 : index
    %249 = vector.load %arg17[%c0_153, %c0_154, %c0_155] : memref<2x256x64xbf16, #tpu.memory_space<vmem>>, vector<1x256x64xbf16>
    %250 = vector.shape_cast %249 : vector<1x256x64xbf16> to vector<256x64xbf16>
    %cst_156 = arith.constant dense<0.000000e+00> : vector<9x64xf32>
    %251 = tpu.matmul %248, %250, %cst_156 {dimension_numbers = #tpu.dot_dimension_numbers<[1], [0], [0], [1], [0, 0, 1, 1], [], []>} : vector<9x256xbf16>, vector<256x64xbf16>, vector<9x64xf32> -> vector<9x64xf32>
    %252 = arith.addf %202, %251 : vector<9x64xf32>
    %c0_157 = arith.constant 0 : index
    %c0_158 = arith.constant 0 : index
    %c0_159 = arith.constant 0 : index
    %253 = vector.load %arg18[%c0_157, %c0_158, %c0_159] : memref<2x1x64xf32, #tpu.memory_space<vmem>>, vector<1x1x64xf32>
    %254 = vector.shape_cast %253 : vector<1x1x64xf32> to vector<1x64xf32>
    %255 = vector.broadcast %254 : vector<1x64xf32> to vector<9x64xf32>
    %256 = arith.addf %252, %255 : vector<9x64xf32>
    %c1_160 = arith.constant 1 : index
    %c0_161 = arith.constant 0 : index
    %c0_162 = arith.constant 0 : index
    %257 = vector.load %arg3[%c1_160, %c0_161, %c0_162] : memref<2x1x64xf32, #tpu.memory_space<vmem>>, vector<1x1x64xf32>
    %258 = vector.shape_cast %257 : vector<1x1x64xf32> to vector<1x64xf32>
    %c1_163 = arith.constant 1 : index
    %c0_164 = arith.constant 0 : index
    %c0_165 = arith.constant 0 : index
    %259 = vector.load %arg4[%c1_163, %c0_164, %c0_165] : memref<2x1x64xf32, #tpu.memory_space<vmem>>, vector<1x1x64xf32>
    %260 = vector.shape_cast %259 : vector<1x1x64xf32> to vector<1x64xf32>
    %cst_166 = arith.constant dense<0.000000e+00> : vector<9xf32>
    %261 = vector.multi_reduction <add>, %256, %cst_166 [1] : vector<9x64xf32> to vector<9xf32>
    %262 = vector.shape_cast %261 : vector<9xf32> to vector<9x1xf32>
    %cst_167 = arith.constant 6.400000e+01 : f32
    %263 = vector.broadcast %cst_167 : f32 to vector<9x1xf32>
    %264 = arith.divf %262, %263 : vector<9x1xf32>
    %265 = vector.broadcast %264 : vector<9x1xf32> to vector<9x64xf32>
    %266 = arith.subf %256, %265 : vector<9x64xf32>
    %267 = arith.mulf %266, %266 : vector<9x64xf32>
    %cst_168 = arith.constant dense<0.000000e+00> : vector<9xf32>
    %268 = vector.multi_reduction <add>, %267, %cst_168 [1] : vector<9x64xf32> to vector<9xf32>
    %269 = vector.shape_cast %268 : vector<9xf32> to vector<9x1xf32>
    %cst_169 = arith.constant 6.400000e+01 : f32
    %270 = vector.broadcast %cst_169 : f32 to vector<9x1xf32>
    %271 = arith.divf %269, %270 : vector<9x1xf32>
    %cst_170 = arith.constant 9.99999974E-6 : f32
    %272 = vector.broadcast %cst_170 : f32 to vector<9x1xf32>
    %273 = arith.addf %271, %272 : vector<9x1xf32>
    %274 = math.rsqrt %273 : vector<9x1xf32>
    %275 = vector.broadcast %274 : vector<9x1xf32> to vector<9x64xf32>
    %276 = arith.mulf %266, %275 : vector<9x64xf32>
    %277 = vector.broadcast %258 : vector<1x64xf32> to vector<9x64xf32>
    %278 = arith.mulf %276, %277 : vector<9x64xf32>
    %279 = vector.broadcast %260 : vector<1x64xf32> to vector<9x64xf32>
    %280 = arith.addf %278, %279 : vector<9x64xf32>
    %281 = arith.truncf %280 : vector<9x64xf32> to vector<9x64xbf16>
    %cst_171 = arith.constant 0.000000e+00 : f32
    %282 = vector.broadcast %cst_171 : f32 to vector<9x64xf32>
    %c4 = arith.constant 4 : index
    %c0_172 = arith.constant 0 : index
    %c0_173 = arith.constant 0 : index
    %283 = vector.load %arg5[%c4, %c0_172, %c0_173] : memref<8x64x16xbf16, #tpu.memory_space<vmem>>, vector<1x64x16xbf16>
    %284 = vector.shape_cast %283 : vector<1x64x16xbf16> to vector<64x16xbf16>
    %cst_174 = arith.constant dense<0.000000e+00> : vector<9x16xf32>
    %285 = tpu.matmul %281, %284, %cst_174 {dimension_numbers = #tpu.dot_dimension_numbers<[1], [0], [0], [1], [0, 0, 1, 1], [], []>} : vector<9x64xbf16>, vector<64x16xbf16>, vector<9x16xf32> -> vector<9x16xf32>
    %c4_175 = arith.constant 4 : index
    %c0_176 = arith.constant 0 : index
    %c0_177 = arith.constant 0 : index
    %286 = vector.load %arg6[%c4_175, %c0_176, %c0_177] : memref<8x1x16xf32, #tpu.memory_space<vmem>>, vector<1x1x16xf32>
    %287 = vector.shape_cast %286 : vector<1x1x16xf32> to vector<1x16xf32>
    %288 = vector.broadcast %287 : vector<1x16xf32> to vector<9x16xf32>
    %289 = arith.addf %285, %288 : vector<9x16xf32>
    %c4_178 = arith.constant 4 : index
    %c0_179 = arith.constant 0 : index
    %c0_180 = arith.constant 0 : index
    %290 = vector.load %arg7[%c4_178, %c0_179, %c0_180] : memref<8x64x16xbf16, #tpu.memory_space<vmem>>, vector<1x64x16xbf16>
    %291 = vector.shape_cast %290 : vector<1x64x16xbf16> to vector<64x16xbf16>
    %cst_181 = arith.constant dense<0.000000e+00> : vector<9x16xf32>
    %292 = tpu.matmul %281, %291, %cst_181 {dimension_numbers = #tpu.dot_dimension_numbers<[1], [0], [0], [1], [0, 0, 1, 1], [], []>} : vector<9x64xbf16>, vector<64x16xbf16>, vector<9x16xf32> -> vector<9x16xf32>
    %c4_182 = arith.constant 4 : index
    %c0_183 = arith.constant 0 : index
    %c0_184 = arith.constant 0 : index
    %293 = vector.load %arg8[%c4_182, %c0_183, %c0_184] : memref<8x1x16xf32, #tpu.memory_space<vmem>>, vector<1x1x16xf32>
    %294 = vector.shape_cast %293 : vector<1x1x16xf32> to vector<1x16xf32>
    %295 = vector.broadcast %294 : vector<1x16xf32> to vector<9x16xf32>
    %296 = arith.addf %292, %295 : vector<9x16xf32>
    %c4_185 = arith.constant 4 : index
    %c0_186 = arith.constant 0 : index
    %c0_187 = arith.constant 0 : index
    %297 = vector.load %arg9[%c4_185, %c0_186, %c0_187] : memref<8x64x16xbf16, #tpu.memory_space<vmem>>, vector<1x64x16xbf16>
    %298 = vector.shape_cast %297 : vector<1x64x16xbf16> to vector<64x16xbf16>
    %cst_188 = arith.constant dense<0.000000e+00> : vector<9x16xf32>
    %299 = tpu.matmul %281, %298, %cst_188 {dimension_numbers = #tpu.dot_dimension_numbers<[1], [0], [0], [1], [0, 0, 1, 1], [], []>} : vector<9x64xbf16>, vector<64x16xbf16>, vector<9x16xf32> -> vector<9x16xf32>
    %c4_189 = arith.constant 4 : index
    %c0_190 = arith.constant 0 : index
    %c0_191 = arith.constant 0 : index
    %300 = vector.load %arg10[%c4_189, %c0_190, %c0_191] : memref<8x1x16xf32, #tpu.memory_space<vmem>>, vector<1x1x16xf32>
    %301 = vector.shape_cast %300 : vector<1x1x16xf32> to vector<1x16xf32>
    %302 = vector.broadcast %301 : vector<1x16xf32> to vector<9x16xf32>
    %303 = arith.addf %299, %302 : vector<9x16xf32>
    %304 = arith.truncf %289 : vector<9x16xf32> to vector<9x16xbf16>
    %305 = arith.truncf %296 : vector<9x16xf32> to vector<9x16xbf16>
    %cst_192 = arith.constant dense<0.000000e+00> : vector<9x9xf32>
    %306 = tpu.matmul %304, %305, %cst_192 {dimension_numbers = #tpu.dot_dimension_numbers<[1], [1], [0], [0], [0, 0, 1, 0], [], []>} : vector<9x16xbf16>, vector<9x16xbf16>, vector<9x9xf32> -> vector<9x9xf32>
    %cst_193 = arith.constant dense<0xFF800000> : vector<9xf32>
    %307 = vector.multi_reduction <maximumf>, %306, %cst_193 [1] : vector<9x9xf32> to vector<9xf32>
    %308 = vector.shape_cast %307 : vector<9xf32> to vector<9x1xf32>
    %309 = vector.broadcast %308 : vector<9x1xf32> to vector<9x9xf32>
    %310 = arith.subf %306, %309 : vector<9x9xf32>
    %311 = math.exp %310 : vector<9x9xf32>
    %cst_194 = arith.constant dense<0.000000e+00> : vector<9xf32>
    %312 = vector.multi_reduction <add>, %311, %cst_194 [1] : vector<9x9xf32> to vector<9xf32>
    %313 = vector.shape_cast %312 : vector<9xf32> to vector<9x1xf32>
    %314 = tpu.reciprocal %313 {approx = true} : vector<9x1xf32> -> vector<9x1xf32>
    %315 = vector.broadcast %314 : vector<9x1xf32> to vector<9x9xf32>
    %316 = arith.mulf %311, %315 : vector<9x9xf32>
    %317 = arith.truncf %316 : vector<9x9xf32> to vector<9x9xbf16>
    %318 = arith.truncf %303 : vector<9x16xf32> to vector<9x16xbf16>
    %cst_195 = arith.constant dense<0.000000e+00> : vector<9x16xf32>
    %319 = tpu.matmul %317, %318, %cst_195 {dimension_numbers = #tpu.dot_dimension_numbers<[1], [0], [0], [1], [0, 0, 1, 1], [], []>} : vector<9x9xbf16>, vector<9x16xbf16>, vector<9x16xf32> -> vector<9x16xf32>
    %320 = arith.truncf %319 : vector<9x16xf32> to vector<9x16xbf16>
    %c4_196 = arith.constant 4 : index
    %c0_197 = arith.constant 0 : index
    %c0_198 = arith.constant 0 : index
    %321 = vector.load %arg11[%c4_196, %c0_197, %c0_198] : memref<8x16x64xbf16, #tpu.memory_space<vmem>>, vector<1x16x64xbf16>
    %322 = vector.shape_cast %321 : vector<1x16x64xbf16> to vector<16x64xbf16>
    %cst_199 = arith.constant dense<0.000000e+00> : vector<9x64xf32>
    %323 = tpu.matmul %320, %322, %cst_199 {dimension_numbers = #tpu.dot_dimension_numbers<[1], [0], [0], [1], [0, 0, 1, 1], [], []>} : vector<9x16xbf16>, vector<16x64xbf16>, vector<9x64xf32> -> vector<9x64xf32>
    %324 = arith.addf %282, %323 : vector<9x64xf32>
    %c5 = arith.constant 5 : index
    %c0_200 = arith.constant 0 : index
    %c0_201 = arith.constant 0 : index
    %325 = vector.load %arg5[%c5, %c0_200, %c0_201] : memref<8x64x16xbf16, #tpu.memory_space<vmem>>, vector<1x64x16xbf16>
    %326 = vector.shape_cast %325 : vector<1x64x16xbf16> to vector<64x16xbf16>
    %cst_202 = arith.constant dense<0.000000e+00> : vector<9x16xf32>
    %327 = tpu.matmul %281, %326, %cst_202 {dimension_numbers = #tpu.dot_dimension_numbers<[1], [0], [0], [1], [0, 0, 1, 1], [], []>} : vector<9x64xbf16>, vector<64x16xbf16>, vector<9x16xf32> -> vector<9x16xf32>
    %c5_203 = arith.constant 5 : index
    %c0_204 = arith.constant 0 : index
    %c0_205 = arith.constant 0 : index
    %328 = vector.load %arg6[%c5_203, %c0_204, %c0_205] : memref<8x1x16xf32, #tpu.memory_space<vmem>>, vector<1x1x16xf32>
    %329 = vector.shape_cast %328 : vector<1x1x16xf32> to vector<1x16xf32>
    %330 = vector.broadcast %329 : vector<1x16xf32> to vector<9x16xf32>
    %331 = arith.addf %327, %330 : vector<9x16xf32>
    %c5_206 = arith.constant 5 : index
    %c0_207 = arith.constant 0 : index
    %c0_208 = arith.constant 0 : index
    %332 = vector.load %arg7[%c5_206, %c0_207, %c0_208] : memref<8x64x16xbf16, #tpu.memory_space<vmem>>, vector<1x64x16xbf16>
    %333 = vector.shape_cast %332 : vector<1x64x16xbf16> to vector<64x16xbf16>
    %cst_209 = arith.constant dense<0.000000e+00> : vector<9x16xf32>
    %334 = tpu.matmul %281, %333, %cst_209 {dimension_numbers = #tpu.dot_dimension_numbers<[1], [0], [0], [1], [0, 0, 1, 1], [], []>} : vector<9x64xbf16>, vector<64x16xbf16>, vector<9x16xf32> -> vector<9x16xf32>
    %c5_210 = arith.constant 5 : index
    %c0_211 = arith.constant 0 : index
    %c0_212 = arith.constant 0 : index
    %335 = vector.load %arg8[%c5_210, %c0_211, %c0_212] : memref<8x1x16xf32, #tpu.memory_space<vmem>>, vector<1x1x16xf32>
    %336 = vector.shape_cast %335 : vector<1x1x16xf32> to vector<1x16xf32>
    %337 = vector.broadcast %336 : vector<1x16xf32> to vector<9x16xf32>
    %338 = arith.addf %334, %337 : vector<9x16xf32>
    %c5_213 = arith.constant 5 : index
    %c0_214 = arith.constant 0 : index
    %c0_215 = arith.constant 0 : index
    %339 = vector.load %arg9[%c5_213, %c0_214, %c0_215] : memref<8x64x16xbf16, #tpu.memory_space<vmem>>, vector<1x64x16xbf16>
    %340 = vector.shape_cast %339 : vector<1x64x16xbf16> to vector<64x16xbf16>
    %cst_216 = arith.constant dense<0.000000e+00> : vector<9x16xf32>
    %341 = tpu.matmul %281, %340, %cst_216 {dimension_numbers = #tpu.dot_dimension_numbers<[1], [0], [0], [1], [0, 0, 1, 1], [], []>} : vector<9x64xbf16>, vector<64x16xbf16>, vector<9x16xf32> -> vector<9x16xf32>
    %c5_217 = arith.constant 5 : index
    %c0_218 = arith.constant 0 : index
    %c0_219 = arith.constant 0 : index
    %342 = vector.load %arg10[%c5_217, %c0_218, %c0_219] : memref<8x1x16xf32, #tpu.memory_space<vmem>>, vector<1x1x16xf32>
    %343 = vector.shape_cast %342 : vector<1x1x16xf32> to vector<1x16xf32>
    %344 = vector.broadcast %343 : vector<1x16xf32> to vector<9x16xf32>
    %345 = arith.addf %341, %344 : vector<9x16xf32>
    %346 = arith.truncf %331 : vector<9x16xf32> to vector<9x16xbf16>
    %347 = arith.truncf %338 : vector<9x16xf32> to vector<9x16xbf16>
    %cst_220 = arith.constant dense<0.000000e+00> : vector<9x9xf32>
    %348 = tpu.matmul %346, %347, %cst_220 {dimension_numbers = #tpu.dot_dimension_numbers<[1], [1], [0], [0], [0, 0, 1, 0], [], []>} : vector<9x16xbf16>, vector<9x16xbf16>, vector<9x9xf32> -> vector<9x9xf32>
    %cst_221 = arith.constant dense<0xFF800000> : vector<9xf32>
    %349 = vector.multi_reduction <maximumf>, %348, %cst_221 [1] : vector<9x9xf32> to vector<9xf32>
    %350 = vector.shape_cast %349 : vector<9xf32> to vector<9x1xf32>
    %351 = vector.broadcast %350 : vector<9x1xf32> to vector<9x9xf32>
    %352 = arith.subf %348, %351 : vector<9x9xf32>
    %353 = math.exp %352 : vector<9x9xf32>
    %cst_222 = arith.constant dense<0.000000e+00> : vector<9xf32>
    %354 = vector.multi_reduction <add>, %353, %cst_222 [1] : vector<9x9xf32> to vector<9xf32>
    %355 = vector.shape_cast %354 : vector<9xf32> to vector<9x1xf32>
    %356 = tpu.reciprocal %355 {approx = true} : vector<9x1xf32> -> vector<9x1xf32>
    %357 = vector.broadcast %356 : vector<9x1xf32> to vector<9x9xf32>
    %358 = arith.mulf %353, %357 : vector<9x9xf32>
    %359 = arith.truncf %358 : vector<9x9xf32> to vector<9x9xbf16>
    %360 = arith.truncf %345 : vector<9x16xf32> to vector<9x16xbf16>
    %cst_223 = arith.constant dense<0.000000e+00> : vector<9x16xf32>
    %361 = tpu.matmul %359, %360, %cst_223 {dimension_numbers = #tpu.dot_dimension_numbers<[1], [0], [0], [1], [0, 0, 1, 1], [], []>} : vector<9x9xbf16>, vector<9x16xbf16>, vector<9x16xf32> -> vector<9x16xf32>
    %362 = arith.truncf %361 : vector<9x16xf32> to vector<9x16xbf16>
    %c5_224 = arith.constant 5 : index
    %c0_225 = arith.constant 0 : index
    %c0_226 = arith.constant 0 : index
    %363 = vector.load %arg11[%c5_224, %c0_225, %c0_226] : memref<8x16x64xbf16, #tpu.memory_space<vmem>>, vector<1x16x64xbf16>
    %364 = vector.shape_cast %363 : vector<1x16x64xbf16> to vector<16x64xbf16>
    %cst_227 = arith.constant dense<0.000000e+00> : vector<9x64xf32>
    %365 = tpu.matmul %362, %364, %cst_227 {dimension_numbers = #tpu.dot_dimension_numbers<[1], [0], [0], [1], [0, 0, 1, 1], [], []>} : vector<9x16xbf16>, vector<16x64xbf16>, vector<9x64xf32> -> vector<9x64xf32>
    %366 = arith.addf %324, %365 : vector<9x64xf32>
    %c6 = arith.constant 6 : index
    %c0_228 = arith.constant 0 : index
    %c0_229 = arith.constant 0 : index
    %367 = vector.load %arg5[%c6, %c0_228, %c0_229] : memref<8x64x16xbf16, #tpu.memory_space<vmem>>, vector<1x64x16xbf16>
    %368 = vector.shape_cast %367 : vector<1x64x16xbf16> to vector<64x16xbf16>
    %cst_230 = arith.constant dense<0.000000e+00> : vector<9x16xf32>
    %369 = tpu.matmul %281, %368, %cst_230 {dimension_numbers = #tpu.dot_dimension_numbers<[1], [0], [0], [1], [0, 0, 1, 1], [], []>} : vector<9x64xbf16>, vector<64x16xbf16>, vector<9x16xf32> -> vector<9x16xf32>
    %c6_231 = arith.constant 6 : index
    %c0_232 = arith.constant 0 : index
    %c0_233 = arith.constant 0 : index
    %370 = vector.load %arg6[%c6_231, %c0_232, %c0_233] : memref<8x1x16xf32, #tpu.memory_space<vmem>>, vector<1x1x16xf32>
    %371 = vector.shape_cast %370 : vector<1x1x16xf32> to vector<1x16xf32>
    %372 = vector.broadcast %371 : vector<1x16xf32> to vector<9x16xf32>
    %373 = arith.addf %369, %372 : vector<9x16xf32>
    %c6_234 = arith.constant 6 : index
    %c0_235 = arith.constant 0 : index
    %c0_236 = arith.constant 0 : index
    %374 = vector.load %arg7[%c6_234, %c0_235, %c0_236] : memref<8x64x16xbf16, #tpu.memory_space<vmem>>, vector<1x64x16xbf16>
    %375 = vector.shape_cast %374 : vector<1x64x16xbf16> to vector<64x16xbf16>
    %cst_237 = arith.constant dense<0.000000e+00> : vector<9x16xf32>
    %376 = tpu.matmul %281, %375, %cst_237 {dimension_numbers = #tpu.dot_dimension_numbers<[1], [0], [0], [1], [0, 0, 1, 1], [], []>} : vector<9x64xbf16>, vector<64x16xbf16>, vector<9x16xf32> -> vector<9x16xf32>
    %c6_238 = arith.constant 6 : index
    %c0_239 = arith.constant 0 : index
    %c0_240 = arith.constant 0 : index
    %377 = vector.load %arg8[%c6_238, %c0_239, %c0_240] : memref<8x1x16xf32, #tpu.memory_space<vmem>>, vector<1x1x16xf32>
    %378 = vector.shape_cast %377 : vector<1x1x16xf32> to vector<1x16xf32>
    %379 = vector.broadcast %378 : vector<1x16xf32> to vector<9x16xf32>
    %380 = arith.addf %376, %379 : vector<9x16xf32>
    %c6_241 = arith.constant 6 : index
    %c0_242 = arith.constant 0 : index
    %c0_243 = arith.constant 0 : index
    %381 = vector.load %arg9[%c6_241, %c0_242, %c0_243] : memref<8x64x16xbf16, #tpu.memory_space<vmem>>, vector<1x64x16xbf16>
    %382 = vector.shape_cast %381 : vector<1x64x16xbf16> to vector<64x16xbf16>
    %cst_244 = arith.constant dense<0.000000e+00> : vector<9x16xf32>
    %383 = tpu.matmul %281, %382, %cst_244 {dimension_numbers = #tpu.dot_dimension_numbers<[1], [0], [0], [1], [0, 0, 1, 1], [], []>} : vector<9x64xbf16>, vector<64x16xbf16>, vector<9x16xf32> -> vector<9x16xf32>
    %c6_245 = arith.constant 6 : index
    %c0_246 = arith.constant 0 : index
    %c0_247 = arith.constant 0 : index
    %384 = vector.load %arg10[%c6_245, %c0_246, %c0_247] : memref<8x1x16xf32, #tpu.memory_space<vmem>>, vector<1x1x16xf32>
    %385 = vector.shape_cast %384 : vector<1x1x16xf32> to vector<1x16xf32>
    %386 = vector.broadcast %385 : vector<1x16xf32> to vector<9x16xf32>
    %387 = arith.addf %383, %386 : vector<9x16xf32>
    %388 = arith.truncf %373 : vector<9x16xf32> to vector<9x16xbf16>
    %389 = arith.truncf %380 : vector<9x16xf32> to vector<9x16xbf16>
    %cst_248 = arith.constant dense<0.000000e+00> : vector<9x9xf32>
    %390 = tpu.matmul %388, %389, %cst_248 {dimension_numbers = #tpu.dot_dimension_numbers<[1], [1], [0], [0], [0, 0, 1, 0], [], []>} : vector<9x16xbf16>, vector<9x16xbf16>, vector<9x9xf32> -> vector<9x9xf32>
    %cst_249 = arith.constant dense<0xFF800000> : vector<9xf32>
    %391 = vector.multi_reduction <maximumf>, %390, %cst_249 [1] : vector<9x9xf32> to vector<9xf32>
    %392 = vector.shape_cast %391 : vector<9xf32> to vector<9x1xf32>
    %393 = vector.broadcast %392 : vector<9x1xf32> to vector<9x9xf32>
    %394 = arith.subf %390, %393 : vector<9x9xf32>
    %395 = math.exp %394 : vector<9x9xf32>
    %cst_250 = arith.constant dense<0.000000e+00> : vector<9xf32>
    %396 = vector.multi_reduction <add>, %395, %cst_250 [1] : vector<9x9xf32> to vector<9xf32>
    %397 = vector.shape_cast %396 : vector<9xf32> to vector<9x1xf32>
    %398 = tpu.reciprocal %397 {approx = true} : vector<9x1xf32> -> vector<9x1xf32>
    %399 = vector.broadcast %398 : vector<9x1xf32> to vector<9x9xf32>
    %400 = arith.mulf %395, %399 : vector<9x9xf32>
    %401 = arith.truncf %400 : vector<9x9xf32> to vector<9x9xbf16>
    %402 = arith.truncf %387 : vector<9x16xf32> to vector<9x16xbf16>
    %cst_251 = arith.constant dense<0.000000e+00> : vector<9x16xf32>
    %403 = tpu.matmul %401, %402, %cst_251 {dimension_numbers = #tpu.dot_dimension_numbers<[1], [0], [0], [1], [0, 0, 1, 1], [], []>} : vector<9x9xbf16>, vector<9x16xbf16>, vector<9x16xf32> -> vector<9x16xf32>
    %404 = arith.truncf %403 : vector<9x16xf32> to vector<9x16xbf16>
    %c6_252 = arith.constant 6 : index
    %c0_253 = arith.constant 0 : index
    %c0_254 = arith.constant 0 : index
    %405 = vector.load %arg11[%c6_252, %c0_253, %c0_254] : memref<8x16x64xbf16, #tpu.memory_space<vmem>>, vector<1x16x64xbf16>
    %406 = vector.shape_cast %405 : vector<1x16x64xbf16> to vector<16x64xbf16>
    %cst_255 = arith.constant dense<0.000000e+00> : vector<9x64xf32>
    %407 = tpu.matmul %404, %406, %cst_255 {dimension_numbers = #tpu.dot_dimension_numbers<[1], [0], [0], [1], [0, 0, 1, 1], [], []>} : vector<9x16xbf16>, vector<16x64xbf16>, vector<9x64xf32> -> vector<9x64xf32>
    %408 = arith.addf %366, %407 : vector<9x64xf32>
    %c7 = arith.constant 7 : index
    %c0_256 = arith.constant 0 : index
    %c0_257 = arith.constant 0 : index
    %409 = vector.load %arg5[%c7, %c0_256, %c0_257] : memref<8x64x16xbf16, #tpu.memory_space<vmem>>, vector<1x64x16xbf16>
    %410 = vector.shape_cast %409 : vector<1x64x16xbf16> to vector<64x16xbf16>
    %cst_258 = arith.constant dense<0.000000e+00> : vector<9x16xf32>
    %411 = tpu.matmul %281, %410, %cst_258 {dimension_numbers = #tpu.dot_dimension_numbers<[1], [0], [0], [1], [0, 0, 1, 1], [], []>} : vector<9x64xbf16>, vector<64x16xbf16>, vector<9x16xf32> -> vector<9x16xf32>
    %c7_259 = arith.constant 7 : index
    %c0_260 = arith.constant 0 : index
    %c0_261 = arith.constant 0 : index
    %412 = vector.load %arg6[%c7_259, %c0_260, %c0_261] : memref<8x1x16xf32, #tpu.memory_space<vmem>>, vector<1x1x16xf32>
    %413 = vector.shape_cast %412 : vector<1x1x16xf32> to vector<1x16xf32>
    %414 = vector.broadcast %413 : vector<1x16xf32> to vector<9x16xf32>
    %415 = arith.addf %411, %414 : vector<9x16xf32>
    %c7_262 = arith.constant 7 : index
    %c0_263 = arith.constant 0 : index
    %c0_264 = arith.constant 0 : index
    %416 = vector.load %arg7[%c7_262, %c0_263, %c0_264] : memref<8x64x16xbf16, #tpu.memory_space<vmem>>, vector<1x64x16xbf16>
    %417 = vector.shape_cast %416 : vector<1x64x16xbf16> to vector<64x16xbf16>
    %cst_265 = arith.constant dense<0.000000e+00> : vector<9x16xf32>
    %418 = tpu.matmul %281, %417, %cst_265 {dimension_numbers = #tpu.dot_dimension_numbers<[1], [0], [0], [1], [0, 0, 1, 1], [], []>} : vector<9x64xbf16>, vector<64x16xbf16>, vector<9x16xf32> -> vector<9x16xf32>
    %c7_266 = arith.constant 7 : index
    %c0_267 = arith.constant 0 : index
    %c0_268 = arith.constant 0 : index
    %419 = vector.load %arg8[%c7_266, %c0_267, %c0_268] : memref<8x1x16xf32, #tpu.memory_space<vmem>>, vector<1x1x16xf32>
    %420 = vector.shape_cast %419 : vector<1x1x16xf32> to vector<1x16xf32>
    %421 = vector.broadcast %420 : vector<1x16xf32> to vector<9x16xf32>
    %422 = arith.addf %418, %421 : vector<9x16xf32>
    %c7_269 = arith.constant 7 : index
    %c0_270 = arith.constant 0 : index
    %c0_271 = arith.constant 0 : index
    %423 = vector.load %arg9[%c7_269, %c0_270, %c0_271] : memref<8x64x16xbf16, #tpu.memory_space<vmem>>, vector<1x64x16xbf16>
    %424 = vector.shape_cast %423 : vector<1x64x16xbf16> to vector<64x16xbf16>
    %cst_272 = arith.constant dense<0.000000e+00> : vector<9x16xf32>
    %425 = tpu.matmul %281, %424, %cst_272 {dimension_numbers = #tpu.dot_dimension_numbers<[1], [0], [0], [1], [0, 0, 1, 1], [], []>} : vector<9x64xbf16>, vector<64x16xbf16>, vector<9x16xf32> -> vector<9x16xf32>
    %c7_273 = arith.constant 7 : index
    %c0_274 = arith.constant 0 : index
    %c0_275 = arith.constant 0 : index
    %426 = vector.load %arg10[%c7_273, %c0_274, %c0_275] : memref<8x1x16xf32, #tpu.memory_space<vmem>>, vector<1x1x16xf32>
    %427 = vector.shape_cast %426 : vector<1x1x16xf32> to vector<1x16xf32>
    %428 = vector.broadcast %427 : vector<1x16xf32> to vector<9x16xf32>
    %429 = arith.addf %425, %428 : vector<9x16xf32>
    %430 = arith.truncf %415 : vector<9x16xf32> to vector<9x16xbf16>
    %431 = arith.truncf %422 : vector<9x16xf32> to vector<9x16xbf16>
    %cst_276 = arith.constant dense<0.000000e+00> : vector<9x9xf32>
    %432 = tpu.matmul %430, %431, %cst_276 {dimension_numbers = #tpu.dot_dimension_numbers<[1], [1], [0], [0], [0, 0, 1, 0], [], []>} : vector<9x16xbf16>, vector<9x16xbf16>, vector<9x9xf32> -> vector<9x9xf32>
    %cst_277 = arith.constant dense<0xFF800000> : vector<9xf32>
    %433 = vector.multi_reduction <maximumf>, %432, %cst_277 [1] : vector<9x9xf32> to vector<9xf32>
    %434 = vector.shape_cast %433 : vector<9xf32> to vector<9x1xf32>
    %435 = vector.broadcast %434 : vector<9x1xf32> to vector<9x9xf32>
    %436 = arith.subf %432, %435 : vector<9x9xf32>
    %437 = math.exp %436 : vector<9x9xf32>
    %cst_278 = arith.constant dense<0.000000e+00> : vector<9xf32>
    %438 = vector.multi_reduction <add>, %437, %cst_278 [1] : vector<9x9xf32> to vector<9xf32>
    %439 = vector.shape_cast %438 : vector<9xf32> to vector<9x1xf32>
    %440 = tpu.reciprocal %439 {approx = true} : vector<9x1xf32> -> vector<9x1xf32>
    %441 = vector.broadcast %440 : vector<9x1xf32> to vector<9x9xf32>
    %442 = arith.mulf %437, %441 : vector<9x9xf32>
    %443 = arith.truncf %442 : vector<9x9xf32> to vector<9x9xbf16>
    %444 = arith.truncf %429 : vector<9x16xf32> to vector<9x16xbf16>
    %cst_279 = arith.constant dense<0.000000e+00> : vector<9x16xf32>
    %445 = tpu.matmul %443, %444, %cst_279 {dimension_numbers = #tpu.dot_dimension_numbers<[1], [0], [0], [1], [0, 0, 1, 1], [], []>} : vector<9x9xbf16>, vector<9x16xbf16>, vector<9x16xf32> -> vector<9x16xf32>
    %446 = arith.truncf %445 : vector<9x16xf32> to vector<9x16xbf16>
    %c7_280 = arith.constant 7 : index
    %c0_281 = arith.constant 0 : index
    %c0_282 = arith.constant 0 : index
    %447 = vector.load %arg11[%c7_280, %c0_281, %c0_282] : memref<8x16x64xbf16, #tpu.memory_space<vmem>>, vector<1x16x64xbf16>
    %448 = vector.shape_cast %447 : vector<1x16x64xbf16> to vector<16x64xbf16>
    %cst_283 = arith.constant dense<0.000000e+00> : vector<9x64xf32>
    %449 = tpu.matmul %446, %448, %cst_283 {dimension_numbers = #tpu.dot_dimension_numbers<[1], [0], [0], [1], [0, 0, 1, 1], [], []>} : vector<9x16xbf16>, vector<16x64xbf16>, vector<9x64xf32> -> vector<9x64xf32>
    %450 = arith.addf %408, %449 : vector<9x64xf32>
    %451 = arith.addf %256, %450 : vector<9x64xf32>
    %c1_284 = arith.constant 1 : index
    %c0_285 = arith.constant 0 : index
    %c0_286 = arith.constant 0 : index
    %452 = vector.load %arg12[%c1_284, %c0_285, %c0_286] : memref<2x1x64xf32, #tpu.memory_space<vmem>>, vector<1x1x64xf32>
    %453 = vector.shape_cast %452 : vector<1x1x64xf32> to vector<1x64xf32>
    %454 = vector.broadcast %453 : vector<1x64xf32> to vector<9x64xf32>
    %455 = arith.addf %451, %454 : vector<9x64xf32>
    %c1_287 = arith.constant 1 : index
    %c0_288 = arith.constant 0 : index
    %c0_289 = arith.constant 0 : index
    %456 = vector.load %arg13[%c1_287, %c0_288, %c0_289] : memref<2x1x64xf32, #tpu.memory_space<vmem>>, vector<1x1x64xf32>
    %457 = vector.shape_cast %456 : vector<1x1x64xf32> to vector<1x64xf32>
    %c1_290 = arith.constant 1 : index
    %c0_291 = arith.constant 0 : index
    %c0_292 = arith.constant 0 : index
    %458 = vector.load %arg14[%c1_290, %c0_291, %c0_292] : memref<2x1x64xf32, #tpu.memory_space<vmem>>, vector<1x1x64xf32>
    %459 = vector.shape_cast %458 : vector<1x1x64xf32> to vector<1x64xf32>
    %cst_293 = arith.constant dense<0.000000e+00> : vector<9xf32>
    %460 = vector.multi_reduction <add>, %455, %cst_293 [1] : vector<9x64xf32> to vector<9xf32>
    %461 = vector.shape_cast %460 : vector<9xf32> to vector<9x1xf32>
    %cst_294 = arith.constant 6.400000e+01 : f32
    %462 = vector.broadcast %cst_294 : f32 to vector<9x1xf32>
    %463 = arith.divf %461, %462 : vector<9x1xf32>
    %464 = vector.broadcast %463 : vector<9x1xf32> to vector<9x64xf32>
    %465 = arith.subf %455, %464 : vector<9x64xf32>
    %466 = arith.mulf %465, %465 : vector<9x64xf32>
    %cst_295 = arith.constant dense<0.000000e+00> : vector<9xf32>
    %467 = vector.multi_reduction <add>, %466, %cst_295 [1] : vector<9x64xf32> to vector<9xf32>
    %468 = vector.shape_cast %467 : vector<9xf32> to vector<9x1xf32>
    %cst_296 = arith.constant 6.400000e+01 : f32
    %469 = vector.broadcast %cst_296 : f32 to vector<9x1xf32>
    %470 = arith.divf %468, %469 : vector<9x1xf32>
    %cst_297 = arith.constant 9.99999974E-6 : f32
    %471 = vector.broadcast %cst_297 : f32 to vector<9x1xf32>
    %472 = arith.addf %470, %471 : vector<9x1xf32>
    %473 = math.rsqrt %472 : vector<9x1xf32>
    %474 = vector.broadcast %473 : vector<9x1xf32> to vector<9x64xf32>
    %475 = arith.mulf %465, %474 : vector<9x64xf32>
    %476 = vector.broadcast %457 : vector<1x64xf32> to vector<9x64xf32>
    %477 = arith.mulf %475, %476 : vector<9x64xf32>
    %478 = vector.broadcast %459 : vector<1x64xf32> to vector<9x64xf32>
    %479 = arith.addf %477, %478 : vector<9x64xf32>
    %480 = arith.truncf %479 : vector<9x64xf32> to vector<9x64xbf16>
    %c1_298 = arith.constant 1 : index
    %c0_299 = arith.constant 0 : index
    %c0_300 = arith.constant 0 : index
    %481 = vector.load %arg15[%c1_298, %c0_299, %c0_300] : memref<2x64x256xbf16, #tpu.memory_space<vmem>>, vector<1x64x256xbf16>
    %482 = vector.shape_cast %481 : vector<1x64x256xbf16> to vector<64x256xbf16>
    %cst_301 = arith.constant dense<0.000000e+00> : vector<9x256xf32>
    %483 = tpu.matmul %480, %482, %cst_301 {dimension_numbers = #tpu.dot_dimension_numbers<[1], [0], [0], [1], [0, 0, 1, 1], [], []>} : vector<9x64xbf16>, vector<64x256xbf16>, vector<9x256xf32> -> vector<9x256xf32>
    %c1_302 = arith.constant 1 : index
    %c0_303 = arith.constant 0 : index
    %c0_304 = arith.constant 0 : index
    %484 = vector.load %arg16[%c1_302, %c0_303, %c0_304] : memref<2x1x256xf32, #tpu.memory_space<vmem>>, vector<1x1x256xf32>
    %485 = vector.shape_cast %484 : vector<1x1x256xf32> to vector<1x256xf32>
    %486 = vector.broadcast %485 : vector<1x256xf32> to vector<9x256xf32>
    %487 = arith.addf %483, %486 : vector<9x256xf32>
    %cst_305 = arith.constant 5.000000e-01 : f32
    %488 = vector.broadcast %cst_305 : f32 to vector<9x256xf32>
    %489 = arith.mulf %488, %487 : vector<9x256xf32>
    %cst_306 = arith.constant 4.471500e-02 : f32
    %490 = vector.broadcast %cst_306 : f32 to vector<9x256xf32>
    %491 = arith.mulf %490, %487 : vector<9x256xf32>
    %492 = arith.mulf %491, %487 : vector<9x256xf32>
    %493 = arith.mulf %492, %487 : vector<9x256xf32>
    %494 = arith.addf %487, %493 : vector<9x256xf32>
    %cst_307 = arith.constant 0.797884583 : f32
    %495 = vector.broadcast %cst_307 : f32 to vector<9x256xf32>
    %496 = arith.mulf %495, %494 : vector<9x256xf32>
    %497 = math.tanh %496 : vector<9x256xf32>
    %cst_308 = arith.constant 1.000000e+00 : f32
    %498 = vector.broadcast %cst_308 : f32 to vector<9x256xf32>
    %499 = arith.addf %498, %497 : vector<9x256xf32>
    %500 = arith.mulf %489, %499 : vector<9x256xf32>
    %501 = arith.truncf %500 : vector<9x256xf32> to vector<9x256xbf16>
    %c1_309 = arith.constant 1 : index
    %c0_310 = arith.constant 0 : index
    %c0_311 = arith.constant 0 : index
    %502 = vector.load %arg17[%c1_309, %c0_310, %c0_311] : memref<2x256x64xbf16, #tpu.memory_space<vmem>>, vector<1x256x64xbf16>
    %503 = vector.shape_cast %502 : vector<1x256x64xbf16> to vector<256x64xbf16>
    %cst_312 = arith.constant dense<0.000000e+00> : vector<9x64xf32>
    %504 = tpu.matmul %501, %503, %cst_312 {dimension_numbers = #tpu.dot_dimension_numbers<[1], [0], [0], [1], [0, 0, 1, 1], [], []>} : vector<9x256xbf16>, vector<256x64xbf16>, vector<9x64xf32> -> vector<9x64xf32>
    %505 = arith.addf %455, %504 : vector<9x64xf32>
    %c1_313 = arith.constant 1 : index
    %c0_314 = arith.constant 0 : index
    %c0_315 = arith.constant 0 : index
    %506 = vector.load %arg18[%c1_313, %c0_314, %c0_315] : memref<2x1x64xf32, #tpu.memory_space<vmem>>, vector<1x1x64xf32>
    %507 = vector.shape_cast %506 : vector<1x1x64xf32> to vector<1x64xf32>
    %508 = vector.broadcast %507 : vector<1x64xf32> to vector<9x64xf32>
    %509 = arith.addf %505, %508 : vector<9x64xf32>
    %510 = vector.extract_strided_slice %509 {offsets = [1, 0], sizes = [8, 64], strides = [1, 1]} : vector<9x64xf32> to vector<8x64xf32>
    %511 = arith.truncf %510 : vector<8x64xf32> to vector<8x64xbf16>
    %c0_316 = arith.constant 0 : index
    %c0_317 = arith.constant 0 : index
    %512 = vector.load %arg19[%c0_316, %c0_317] : memref<64x20xbf16, #tpu.memory_space<vmem>>, vector<64x20xbf16>
    %cst_318 = arith.constant dense<0.000000e+00> : vector<8x20xf32>
    %513 = tpu.matmul %511, %512, %cst_318 {dimension_numbers = #tpu.dot_dimension_numbers<[1], [0], [0], [1], [0, 0, 1, 1], [], []>} : vector<8x64xbf16>, vector<64x20xbf16>, vector<8x20xf32> -> vector<8x20xf32>
    %c0_319 = arith.constant 0 : index
    %c0_320 = arith.constant 0 : index
    %514 = vector.load %arg20[%c0_319, %c0_320] : memref<1x20xf32, #tpu.memory_space<vmem>>, vector<1x20xf32>
    %515 = vector.broadcast %514 : vector<1x20xf32> to vector<8x20xf32>
    %516 = arith.addf %513, %515 : vector<8x20xf32>
    %c0_321 = arith.constant 0 : index
    %c0_322 = arith.constant 0 : index
    %c0_323 = arith.constant 0 : index
    %517 = vector.load %arg21[%c0_321, %c0_322, %c0_323] : memref<1x8x20xf32, #tpu.memory_space<vmem>>, vector<1x8x20xf32>
    %518 = vector.shape_cast %517 : vector<1x8x20xf32> to vector<8x20xf32>
    %519 = vector.shape_cast %516 : vector<8x20xf32> to vector<1x8x20xf32>
    tpu.vector_store %arg21[%c0_321, %c0_322, %c0_323], %519 {strides = array<i32>} : memref<1x8x20xf32, #tpu.memory_space<vmem>>, vector<1x8x20xf32>,
    return
  }
  func.func @transform_0(%arg0: i32) -> (i32, i32, i32) {
    %c0_i32 = arith.constant 0 : i32
    %c0_i32_0 = arith.constant 0 : i32
    %c0_i32_1 = arith.constant 0 : i32
    return %arg0, %c0_i32, %c0_i32_0 : i32, i32, i32
  }
  func.func @transform_1(%arg0: i32) -> (i32, i32) {
    %c0_i32 = arith.constant 0 : i32
    %c0_i32_0 = arith.constant 0 : i32
    %c0_i32_1 = arith.constant 0 : i32
    return %c0_i32, %c0_i32_0 : i32, i32
  }
  func.func @transform_2(%arg0: i32) -> (i32, i32, i32) {
    %c0_i32 = arith.constant 0 : i32
    %c0_i32_0 = arith.constant 0 : i32
    %c0_i32_1 = arith.constant 0 : i32
    %c0_i32_2 = arith.constant 0 : i32
    return %c0_i32, %c0_i32_0, %c0_i32_1 : i32, i32, i32
  }
  func.func @transform_3(%arg0: i32) -> (i32, i32, i32) {
    %c0_i32 = arith.constant 0 : i32
    %c0_i32_0 = arith.constant 0 : i32
    %c0_i32_1 = arith.constant 0 : i32
    %c0_i32_2 = arith.constant 0 : i32
    return %c0_i32, %c0_i32_0, %c0_i32_1 : i32, i32, i32
  }
  func.func @transform_4(%arg0: i32) -> (i32, i32, i32) {
    %c0_i32 = arith.constant 0 : i32
    %c0_i32_0 = arith.constant 0 : i32
    %c0_i32_1 = arith.constant 0 : i32
    %c0_i32_2 = arith.constant 0 : i32
    return %c0_i32, %c0_i32_0, %c0_i32_1 : i32, i32, i32
  }
  func.func @transform_5(%arg0: i32) -> (i32, i32, i32) {
    %c0_i32 = arith.constant 0 : i32
    %c0_i32_0 = arith.constant 0 : i32
    %c0_i32_1 = arith.constant 0 : i32
    %c0_i32_2 = arith.constant 0 : i32
    return %c0_i32, %c0_i32_0, %c0_i32_1 : i32, i32, i32
  }
  func.func @transform_6(%arg0: i32) -> (i32, i32, i32) {
    %c0_i32 = arith.constant 0 : i32
    %c0_i32_0 = arith.constant 0 : i32
    %c0_i32_1 = arith.constant 0 : i32
    %c0_i32_2 = arith.constant 0 : i32
    return %c0_i32, %c0_i32_0, %c0_i32_1 : i32, i32, i32
  }
  func.func @transform_7(%arg0: i32) -> (i32, i32, i32) {
    %c0_i32 = arith.constant 0 : i32
    %c0_i32_0 = arith.constant 0 : i32
    %c0_i32_1 = arith.constant 0 : i32
    %c0_i32_2 = arith.constant 0 : i32
    return %c0_i32, %c0_i32_0, %c0_i32_1 : i32, i32, i32
  }
  func.func @transform_8(%arg0: i32) -> (i32, i32, i32) {
    %c0_i32 = arith.constant 0 : i32
    %c0_i32_0 = arith.constant 0 : i32
    %c0_i32_1 = arith.constant 0 : i32
    %c0_i32_2 = arith.constant 0 : i32
    return %c0_i32, %c0_i32_0, %c0_i32_1 : i32, i32, i32
  }
  func.func @transform_9(%arg0: i32) -> (i32, i32, i32) {
    %c0_i32 = arith.constant 0 : i32
    %c0_i32_0 = arith.constant 0 : i32
    %c0_i32_1 = arith.constant 0 : i32
    %c0_i32_2 = arith.constant 0 : i32
    return %c0_i32, %c0_i32_0, %c0_i32_1 : i32, i32, i32
  }
  func.func @transform_10(%arg0: i32) -> (i32, i32, i32) {
    %c0_i32 = arith.constant 0 : i32
    %c0_i32_0 = arith.constant 0 : i32
    %c0_i32_1 = arith.constant 0 : i32
    %c0_i32_2 = arith.constant 0 : i32
    return %c0_i32, %c0_i32_0, %c0_i32_1 : i32, i32, i32
  }
  func.func @transform_11(%arg0: i32) -> (i32, i32, i32) {
    %c0_i32 = arith.constant 0 : i32
    %c0_i32_0 = arith.constant 0 : i32
    %c0_i32_1 = arith.constant 0 : i32
    %c0_i32_2 = arith.constant 0 : i32
    return %c0_i32, %c0_i32_0, %c0_i32_1 : i32, i32, i32
  }
  func.func @transform_12(%arg0: i32) -> (i32, i32, i32) {
    %c0_i32 = arith.constant 0 : i32
    %c0_i32_0 = arith.constant 0 : i32
    %c0_i32_1 = arith.constant 0 : i32
    %c0_i32_2 = arith.constant 0 : i32
    return %c0_i32, %c0_i32_0, %c0_i32_1 : i32, i32, i32
  }
  func.func @transform_13(%arg0: i32) -> (i32, i32, i32) {
    %c0_i32 = arith.constant 0 : i32
    %c0_i32_0 = arith.constant 0 : i32
    %c0_i32_1 = arith.constant 0 : i32
    %c0_i32_2 = arith.constant 0 : i32
    return %c0_i32, %c0_i32_0, %c0_i32_1 : i32, i32, i32
  }
  func.func @transform_14(%arg0: i32) -> (i32, i32, i32) {
    %c0_i32 = arith.constant 0 : i32
    %c0_i32_0 = arith.constant 0 : i32
    %c0_i32_1 = arith.constant 0 : i32
    %c0_i32_2 = arith.constant 0 : i32
    return %c0_i32, %c0_i32_0, %c0_i32_1 : i32, i32, i32
  }
  func.func @transform_15(%arg0: i32) -> (i32, i32, i32) {
    %c0_i32 = arith.constant 0 : i32
    %c0_i32_0 = arith.constant 0 : i32
    %c0_i32_1 = arith.constant 0 : i32
    %c0_i32_2 = arith.constant 0 : i32
    return %c0_i32, %c0_i32_0, %c0_i32_1 : i32, i32, i32
  }
  func.func @transform_16(%arg0: i32) -> (i32, i32, i32) {
    %c0_i32 = arith.constant 0 : i32
    %c0_i32_0 = arith.constant 0 : i32
    %c0_i32_1 = arith.constant 0 : i32
    %c0_i32_2 = arith.constant 0 : i32
    return %c0_i32, %c0_i32_0, %c0_i32_1 : i32, i32, i32
  }
  func.func @transform_17(%arg0: i32) -> (i32, i32, i32) {
    %c0_i32 = arith.constant 0 : i32
    %c0_i32_0 = arith.constant 0 : i32
    %c0_i32_1 = arith.constant 0 : i32
    %c0_i32_2 = arith.constant 0 : i32
    return %c0_i32, %c0_i32_0, %c0_i32_1 : i32, i32, i32
  }
  func.func @transform_18(%arg0: i32) -> (i32, i32) {
    %c0_i32 = arith.constant 0 : i32
    %c0_i32_0 = arith.constant 0 : i32
    %c0_i32_1 = arith.constant 0 : i32
    return %c0_i32, %c0_i32_0 : i32, i32
  }
  func.func @transform_19(%arg0: i32) -> (i32, i32) {
    %c0_i32 = arith.constant 0 : i32
    %c0_i32_0 = arith.constant 0 : i32
    %c0_i32_1 = arith.constant 0 : i32
    return %c0_i32, %c0_i32_0 : i32, i32
  }
  func.func @transform_20(%arg0: i32) -> (i32, i32, i32) {
    %c0_i32 = arith.constant 0 : i32
    %c0_i32_0 = arith.constant 0 : i32
    %c0_i32_1 = arith.constant 0 : i32
    return %arg0, %c0_i32, %c0_i32_0 : i32, i32, i32
  }
}

</mosaic_0001>

<bundles_post_ra>
// kernel: _lambda_.5
= control target key start
LH: loop header
LB: loop body
LE: loop exit
PB: predicated region body
PF: predicated region fallthrough
CT: control target
= control target key end

     0   :  { %s391_s15 = smov 0   ;;  %s420_s0 = inlined_call_operand.vmem [shape: f32[2,8,20], index: 0, kind: input, shape index: {}]   ;;  %s421_s1 = inlined_call_operand.vmem [shape: bf16[20,64], index: 1, kind: input, shape index: {}]   ;;  %s422_s2 = inlined_call_operand.vmem [shape: f32[1,64], index: 2, kind: input, shape index: {}]   ;;  %s423_s3 = inlined_call_operand.vmem [shape: f32[8,64], index: 3, kind: input, shape index: {}]   ;;  %s424_s4 = inlined_call_operand.vmem [shape: f32[2,8,64], index: 4, kind: output, shape index: {}]  }
   0x1 LB: > { %s320_s16 = sadd.s32 4294967295, %s362_s15   ;;  %p324_p0 = scmp.ge.s32.totalorder %s362_s15, 1  ;;  %s362_s15 = sphi %s391_s15, %s14_s15  }
   0x2   : > { %p161_p1 = scmp.lt.s32.totalorder %s362_s15, 3 }
   0x4   : > { %p162_p2 = pnand %p324_p0, %p161_p1 }
   0x5   : > { %p185_p3 = scmp.lt.s32.totalorder (!%p162_p2), %s320_s16, 1 }
   0x6   : > { %165 = sbr.rel (%p162_p2) target bundleno = 219 (0xdb), region = 36 }
   0xb   : > { %v354_v0 = vld [vmem:[%s421_s1 + $0x8] ss:$0 sps:$4 sm:$0x33]   ;;  %v364_v1 = vmov 0.0   ;;  %vm219_vm0 = vcmask 1041408   ;;  %v355_v3 = vld [vmem:[%s421_s1] sm:$0xff]  }
   0xc   : > { %336 = vmatprep.subr.bf16.mxu0 %v364_v1  ;;  %v221_v2 = vsel %vm219_vm0, %v354_v0, 0  ;;  %vm365_vm1 = vmmov 0   ;;  %s426_s16 = smov (!%p185_p3, %s320_s16), 1  ;;  %vm215_vm2 = vcmask 162816   ;;  %v327_v6 = vld [vmem:[%s422_s2] ss:$0 sm:$0xff] }
   0xd   : > { %337 = vmatpush3.bf16.msra.mxu0 %v221_v2  ;;  %340 = vmatprep.mubr.msk.bf16.mxu0 %vm365_vm1, %v364_v1  ;;  %s325_s21 = sshll.u32 %s426_s16, 3  ;;  %v263_v8 = vld [vmem:[%s423_s3] sm:$0xff]  ;;  %vm265_vm3 = vcmask 523264  }
   0xe   : > { %338 = vmatprep.subr.bf16.mxu0 %v364_v1  ;;  %s188_s24 = scalar_lea.vmem %s420_s0, %s325_s21  ;;  %s192_s5 = scalar_lea.vmem %s424_s4, %s325_s21 }
   0xf   : > { %v194_v4 = vld [vmem:[%s188_s24] sm:$0xff] }
  0x10   : > { %v195_v5 = vpack.c.bf16 %v194_v4, %v194_v4 }
  0x11   : > { %339 = vmatpush3.bf16.msra.mxu0 %v355_v3 }
  0x14   : > { %341 = vmatmul.mubr.msk.bf16.vlgmr.msra.gmra.mxu0 %vm215_vm2, %v195_v5 }
  0xd4   : > { %v257_v7 = vpop.f32.mrf.mxu0 }
  0xd5   : > { %v258_v9 = vadd.f32 %v327_v6, %v257_v7 }
  0xd6   : > { %v342_v10 = vpop.f32.mrf.mxu0 }
  0xd7   : > { %v264_v11 = vadd.f32 %v263_v8, %v258_v9 }
  0xd8   : > { %v260_v12 = vpop.f32.mrf.mxu0 }
  0xd9   : > { %266 = vst.msk [vmem:[%s192_s5] sm:$0xff] %vm265_vm3, %v264_v11 }
  0xda   : > { %v343_v13 = vpop.f32.mrf.mxu0 }
  0xdb PF: > { %s14_s15 = sadd.s32 1, %s362_s15  }
  0xdc   : > { %p11_p4 = scmp.ge.s32.totalorder %s14_s15, 4  }
  0xde   :  { %13 = sbr.rel (!%p11_p4) target bundleno = 1 (0x1), region = 66 }

// kernel: _lambda_.6
= control target key start
LH: loop header
LB: loop body
LE: loop exit
PB: predicated region body
PF: predicated region fallthrough
CT: control target
= control target key end

     0   :  { %s7131_s0 = inlined_call_operand.vmem [shape: f32[2,3,64], index: 0, kind: input, shape index: {}]   ;;  %s7132_s1 = inlined_call_operand.vmem [shape: f32[2,1,64], index: 1, kind: input, shape index: {}]   ;;  %s7133_s2 = inlined_call_operand.vmem [shape: f32[2,1,64], index: 2, kind: input, shape index: {}]   ;;  %s7134_s3 = inlined_call_operand.vmem [shape: bf16[8,64,16], index: 3, kind: input, shape index: {}]   ;;  %s7135_s4 = inlined_call_operand.vmem [shape: f32[8,1,16], index: 4, kind: input, shape index: {}]   ;;  %s7136_s5 = inlined_call_operand.vmem [shape: bf16[8,64,16], index: 5, kind: input, shape index: {}]   ;;  %s7137_s6 = inlined_call_operand.vmem [shape: f32[8,1,16], index: 6, kind: input, shape index: {}]   ;;  %s7138_s7 = inlined_call_operand.vmem [shape: bf16[8,64,16], index: 7, kind: input, shape index: {}]   ;;  %s7139_s8 = inlined_call_operand.vmem [shape: f32[8,1,16], index: 8, kind: input, shape index: {}]   ;;  %s7140_s9 = inlined_call_operand.vmem [shape: bf16[8,16,64], index: 9, kind: input, shape index: {}]   ;;  %s7141_s10 = inlined_call_operand.vmem [shape: f32[2,1,64], index: 10, kind: input, shape index: {}]   ;;  %s7142_s11 = inlined_call_operand.vmem [shape: f32[2,1,64], index: 11, kind: input, shape index: {}]   ;;  %s7143_s12 = inlined_call_operand.vmem [shape: f32[2,1,64], index: 12, kind: input, shape index: {}]   ;;  %s7144_s13 = inlined_call_operand.vmem [shape: bf16[2,64,256], index: 13, kind: input, shape index: {}]   ;;  %s7145_s14 = inlined_call_operand.vmem [shape: f32[2,1,256], index: 14, kind: input, shape index: {}]   ;;  %s7146_s15 = inlined_call_operand.vmem [shape: bf16[2,256,64], index: 15, kind: input, shape index: {}]   ;;  %s7147_s16 = inlined_call_operand.vmem [shape: f32[2,1,64], index: 16, kind: input, shape index: {}]   ;;  %s7148_s17 = inlined_call_operand.vmem [shape: f32[1,64], index: 17, kind: input, shape index: {}]   ;;  %s7149_s18 = inlined_call_operand.vmem [shape: f32[1,64], index: 18, kind: input, shape index: {}]   ;;  %s7150_s19 = inlined_call_operand.vmem [shape: f32[2,3,64], index: 19, kind: output, shape index: {}]  }
   0x1   :  { %7155 = sst [smem:[#allocation2_spill]] %s7131_s0  ;;  %s6147_s0 = smov 0  }
   0x2   :  { %7156 = sst [smem:[#allocation3_spill]] %s7132_s1 }
   0x3   :  { %7157 = sst [smem:[#allocation4_spill]] %s7133_s2 }
   0x4   :  { %7158 = sst [smem:[#allocation5_spill]] %s7134_s3 }
   0x5 LB: > { %s4669_s30 = sadd.s32 4294967295, %s6041_s0   ;;  %p4673_p0 = scmp.ge.s32.totalorder %s6041_s0, 1  ;;  %s6041_s0 = sphi %s6147_s0, %s29_s0  }
   0x6   : > { %p536_p1 = scmp.lt.s32.totalorder %s6041_s0, 3 }
   0x8   : > { %p537_p2 = pnand %p4673_p0, %p536_p1 }
   0x9   : > { %p590_p3 = scmp.lt.s32.totalorder (!%p537_p2), %s4669_s30, 1  ;;  %s7159_s22 = sld [smem:[#allocation2_spill]] (!%p537_p2) }
   0xa   : > { %540 = sbr.rel (%p537_p2) target bundleno = 9786 (0x263a), region = 96  ;;  %s7160_s25 = sld [smem:[#allocation5_spill]] (!%p537_p2) }
   0xb   : > { %s7161_s1 = sld [smem:[#allocation3_spill]] (!%p537_p2) }
   0xc   : > { %s7162_s24 = sld [smem:[#allocation4_spill]] (!%p537_p2) }
   0xf   : > { %vm602_vm0 = vcmask 518144   ;;  %s7165_s30 = smov (!%p590_p3, %s4669_s30), 1  ;;  %v6043_v8 = vmov 0.0   ;;  %v5825_v9 = vld [vmem:[%s7136_s5 + $0x18] sm:$0xff]   ;;  %v5827_v11 = vld [vmem:[%s7136_s5 + $0x10] sm:$0xff]   ;;  %v5829_v13 = vld [vmem:[%s7136_s5 + $0x8] sm:$0xff]  }
  0x10   : > { %s7154_s20 = sshll.u32 %s7165_s30, 2  ;;  %v5824_v7 = vld [vmem:[%s7160_s25 + $0x18] sm:$0xff]   ;;  %5380 = vmatprep.subr.bf16.mxu0 %v6043_v8  ;;  %5392 = vmatprep.subr.bf16.mxu1 %v6043_v8  ;;  %v5826_v10 = vld [vmem:[%s7160_s25 + $0x10] sm:$0xff]   ;;  %v5828_v12 = vld [vmem:[%s7160_s25 + $0x8] sm:$0xff]   ;;  %vm6044_vm1 = vmmov 0   ;;  %vm671_vm2 = vcmask 523264  }
  0x11   : > { %s6163_s2 = scalar_lea.vmem %s7159_s22, %s7154_s20  ;;  %5381 = vmatpush3.bf16.msra.mxu0 %v5824_v7  ;;  %5393 = vmatpush3.bf16.msra.mxu1 %v5825_v9  ;;  %v5830_v14 = vld [vmem:[%s7160_s25] sm:$0xff]   ;;  %v5832_v25 = vld [vmem:[%s7138_s7 + $0x18] sm:$0xff]   ;;  %v5833_v27 = vld [vmem:[%s7138_s7 + $0x10] sm:$0xff]   ;;  %vm875_vm3 = vcmask 130048   ;;  %vm940_vm4 = vcmask 1040384   ;;  %vm941_vm5 = vcmask 1041408  }
  0x12   : > { %v599_v0 = vld [vmem:[%s6163_s2] sm:$0x7]  ;;  %5382 = vmatprep.subr.bf16.mxu0 %v6043_v8  ;;  %5394 = vmatprep.subr.bf16.mxu1 %v6043_v8  ;;  %v5834_v28 = vld [vmem:[%s7138_s7 + $0x8] sm:$0xff]   ;;  %v5836_v44 = vld [vmem:[%s7160_s25 + $0x38] sm:$0xff]   ;;  %v6045_v48 = vmov 65535   ;;  %vm922_vm6 = vcmask 18432  }
  0x13   : > { %v603_v1 = vsel %vm602_vm0, %v599_v0, 0.0  ;;  %v5831_v15 = vld [vmem:[%s7136_s5] sm:$0xff]   ;;  %5388 = vmatprep.mubr.msk.bf16.mxu0 %vm6044_vm1, %v6043_v8  ;;  %5400 = vmatprep.mubr.msk.bf16.mxu1 %vm6044_vm1, %v6043_v8  ;;  %v5837_v47 = vld [vmem:[%s7160_s25 + $0x30] sm:$0xff]   ;;  %v942_v49 = vsel %vm940_vm4, 4294967295, %v6045_v48  ;;  %v5838_v54 = vld [vmem:[%s7160_s25 + $0x28] sm:$0xff]   ;;  %vm936_vm7 = vcmask 23552  }
  0x14   : > { %604 = vadd.xlane.f32.xlu0 %v603_v1  ;;  %v4676_v20 = vld [vmem:[%s7161_s1] ss:$0 sm:$0xff]  ;;  %v6263_v52 = vsel %vm941_vm5, %v942_v49, 0  ;;  %v5840_v60 = vld [vmem:[%s7138_s7 + $0x38] sm:$0xff]   ;;  %v5841_v61 = vld [vmem:[%s7138_s7 + $0x30] sm:$0xff]   ;;  %s7163_s27 = sshll.u32 %s7165_s30, 2 }
  0x15   : > { %5383 = vmatpush3.bf16.msra.mxu0 %v5826_v10  ;;  %5395 = vmatpush3.bf16.msra.mxu1 %v5827_v11  ;;  %v4677_v22 = vld [vmem:[%s7162_s24] ss:$0 sm:$0xff]  ;;  %v5842_v62 = vld [vmem:[%s7138_s7 + $0x28] sm:$0xff]   ;;  %s597_s29 = scalar_lea.vmem %s7150_s19, %s7163_s27 }
  0x16   : > { %5384 = vmatprep.subr.bf16.mxu0 %v6043_v8  ;;  %5396 = vmatprep.subr.bf16.mxu1 %v6043_v8  ;;  %v5835_v29 = vld [vmem:[%s7138_s7] sm:$0xff]  }
  0x17   : > { %v4684_v30 = vld [vmem:[%s7137_s6] ss:$0 sm:$0xff] }
  0x18   : > { %v4678_v37 = vld [vmem:[%s7135_s4] ss:$0 sm:$0xff] }
  0x19   : > { %5385 = vmatpush3.bf16.msra.mxu0 %v5828_v12  ;;  %5397 = vmatpush3.bf16.msra.mxu1 %v5829_v13  ;;  %v4690_v46 = vld [vmem:[%s7139_s8] ss:$0 sm:$0xff] }
  0x1a   : > { %5386 = vmatprep.subr.bf16.mxu0 %v6043_v8  ;;  %5398 = vmatprep.subr.bf16.mxu1 %v6043_v8  ;;  %v5839_v59 = vld [vmem:[%s7160_s25 + $0x20] sm:$0xff]  }
  0x1b   : > { %v5843_v63 = vld [vmem:[%s7138_s7 + $0x20] sm:$0xff]  }
  0x1d   : > { %5387 = vmatpush3.bf16.msra.mxu0 %v5830_v14  ;;  %5399 = vmatpush3.bf16.msra.mxu1 %v5831_v15 }
  0x1e   : > { %5404 = vmatprep.subr.bf16.mxu0 %v6043_v8  ;;  %5422 = vmatprep.subr.bf16.mxu1 %v6043_v8 }
  0x9d   : > { %v605_v2 = vpop.xlane.xlu0 %604 }
  0x9e   : > { %v607_v3 = vmul.f32 0.015625, %v605_v2 }
  0xa0   : > { %v608_v4 = vsub.f32 %v599_v0, %v607_v3 }
  0xa2   : > { %v609_v5 = vmul.f32 %v608_v4, %v608_v4 }
  0xa4   : > { %v610_v6 = vsel %vm602_vm0, %v609_v5, 0.0 }
  0xa5   : > { %611 = vadd.xlane.f32.xlu0 %v610_v6 }
 0x12e   : > { %v612_v16 = vpop.xlane.xlu0 %611 }
 0x12f   : > { %v613_v17 = vmul.f32 0.015625, %v612_v16 }
 0x131   : > { %v614_v18 = vadd.f32 1e-05, %v613_v17 }
 0x133   : > { %5984 = vrsqrt.f32 %v614_v18 }
 0x140   : > { %v5985_v19 = vpop.eup %5984 }
 0x141   : > { %v616_v21 = vmul.f32 %v5985_v19, %v608_v4 }
 0x143   : > { %v623_v23 = vmul.f32 %v4676_v20, %v616_v21 }
 0x145   : > { %v630_v24 = vadd.f32 %v4677_v22, %v623_v23  ;;  %v5844_v22 = vld [vmem:[%s7136_s5 + $0x38] sm:$0xff]  }
 0x147   : > { %v6215_v26 = vpack.c.bf16 %v630_v24, %v630_v24  ;;  %v5845_v24 = vld [vmem:[%s7136_s5 + $0x30] sm:$0xff]  }
 0x149   : > { %5389 = vmatmul.mubr.msk.bf16.vlgmr.msra.gmra.mxu0 %vm671_vm2, %v6215_v26  ;;  %5401 = vmatmul.mubr.msk.bf16.vlgmr.msra.gmra.mxu1 %vm671_vm2, %v6215_v26 }
 0x14a   : > { %5405 = vmatpush3.bf16.msra.mxu0 %v5832_v25  ;;  %5412 = vmatprep.mubr.msk.bf16.mxu0 %vm6044_vm1, %v6043_v8  ;;  %v5846_v25 = vld [vmem:[%s7136_s5 + $0x28] sm:$0xff]  }
 0x14b   : > { %5406 = vmatprep.subr.bf16.mxu0 %v6043_v8  ;;  %5424 = vmatprep.mubr.msk.bf16.mxu1 %vm6044_vm1, %v6043_v8 }
 0x14e   : > { %5407 = vmatpush3.bf16.msra.mxu0 %v5833_v27  ;;  %v5847_v27 = vld [vmem:[%s7136_s5 + $0x20] sm:$0xff]  }
 0x14f   : > { %5408 = vmatprep.subr.bf16.mxu0 %v6043_v8 }
 0x152   : > { %5409 = vmatpush3.bf16.msra.mxu0 %v5834_v28 }
 0x153   : > { %5410 = vmatprep.subr.bf16.mxu0 %v6043_v8 }
 0x156   : > { %5411 = vmatpush3.bf16.msra.mxu0 %v5835_v29 }
 0x157   : > { %5416 = vmatprep.subr.bf16.mxu0 %v6043_v8 }
 0x159   : > { %5413 = vmatmul.mubr.msk.bf16.vlgmr.msra.gmra.mxu0 %vm671_vm2, %v6215_v26 }
 0x15a   : > { %5418 = vmatprep.mubr.msk.bf16.mxu0 %vm6044_vm1, %v6043_v8 }
 0x209   : > { %v709_v31 = vpop.f32.mrf.mxu0  ;;  %v788_v32 = vpop.f32.mrf.mxu1 }
 0x20a   : > { %v789_v33 = vadd.f32 %v4684_v30, %v788_v32  ;;  %v710_v43 = vadd.f32 %v4678_v37, %v709_v31  ;;  %v4722_v32 = vld [vmem:[%s7137_s6 + $0x1] ss:$0 sm:$0xff] }
 0x20b   : > { %v5390_v34 = vpop.f32.mrf.mxu0  ;;  %v5402_v35 = vpop.f32.mrf.mxu1 }
 0x20c   : > { %v874_v36 = vpack.c.bf16 %v789_v33, %v789_v33  ;;  %v873_v45 = vpack.c.bf16 %v710_v43, %v710_v43  ;;  %v4737_v34 = vld [vmem:[%s7139_s8 + $0x1] ss:$0 sm:$0xff] }
 0x20d   : > { %v712_v38 = vpop.f32.mrf.mxu0  ;;  %v791_v39 = vpop.f32.mrf.mxu1 }
 0x20e   : > { %v880_v40 = vsel %vm875_vm3, %v874_v36, 0  ;;  %v4707_v38 = vld [vmem:[%s7135_s4 + $0x1] ss:$0 sm:$0xff] }
 0x20f   : > { %v5391_v41 = vpop.f32.mrf.mxu0  ;;  %v5403_v42 = vpop.f32.mrf.mxu1  ;;  %5417 = vmatpush3.bf16.xpose.msra.mxu0 %v880_v40 }
 0x210   : > { %5428 = vmatprep.subr.bf16.mxu0 %v6043_v8 }
 0x216   : > { %5419 = vmatmul.mubr.msk.bf16.vlgmr.msra.gmra.mxu0 %vm875_vm3, %v873_v45 }
 0x217   : > { %5429 = vmatpush3.bf16.msra.mxu0 %v5836_v44  ;;  %5436 = vmatprep.mubr.msk.bf16.mxu0 %vm6044_vm1, %v6043_v8 }
 0x218   : > { %5430 = vmatprep.subr.bf16.mxu0 %v6043_v8 }
 0x219   : > { %v867_v50 = vpop.f32.mrf.mxu0 }
 0x21a   : > { %v868_v51 = vadd.f32 %v4690_v46, %v867_v50 }
 0x21b   : > { %v5414_v53 = vpop.f32.mrf.mxu0  ;;  %5431 = vmatpush3.bf16.msra.mxu0 %v5837_v47 }
 0x21c   : > { %v935_v55 = vpack.c.bf16 %v868_v51, %v868_v51  ;;  %5432 = vmatprep.subr.bf16.mxu0 %v6043_v8 }
 0x21d   : > { %v870_v56 = vpop.f32.mrf.mxu0 }
 0x21e   : > { %v945_v57 = vand.u32 %v6263_v52, %v935_v55 }
 0x21f   : > { %v5415_v58 = vpop.f32.mrf.mxu0  ;;  %5433 = vmatpush3.bf16.msra.mxu0 %v5838_v54 }
 0x220   : > { %5423 = vmatpush3.bf16.msra.mxu1 %v945_v57  ;;  %5434 = vmatprep.subr.bf16.mxu0 %v6043_v8  ;;  %v5853_v58 = vld [vmem:[%s7140_s9 + $0x8] sm:$0xff]  }
 0x221   : > { %5440 = vmatprep.subr.bf16.mxu1 %v6043_v8 }
 0x223   : > { %5435 = vmatpush3.bf16.msra.mxu0 %v5839_v59 }
 0x224   : > { %5452 = vmatprep.subr.bf16.mxu0 %v6043_v8 }
 0x226   : > { %5437 = vmatmul.mubr.msk.bf16.vlgmr.msra.gmra.mxu0 %vm671_vm2, %v6215_v26 }
 0x227   : > { %5453 = vmatpush3.bf16.msra.mxu0 %v5840_v60  ;;  %5460 = vmatprep.mubr.msk.bf16.mxu0 %vm6044_vm1, %v6043_v8 }
 0x228   : > { %5454 = vmatprep.subr.bf16.mxu0 %v6043_v8 }
 0x22b   : > { %5455 = vmatpush3.bf16.msra.mxu0 %v5841_v61 }
 0x22c   : > { %5456 = vmatprep.subr.bf16.mxu0 %v6043_v8 }
 0x22f   : > { %5457 = vmatpush3.bf16.msra.mxu0 %v5842_v62  ;;  %v5848_v62 = vld [vmem:[%s7140_s9] sm:$0xff]  }
 0x230   : > { %5458 = vmatprep.subr.bf16.mxu0 %v6043_v8 }
 0x233   : > { %5459 = vmatpush3.bf16.msra.mxu0 %v5843_v63 }
 0x234   : > { %5476 = vmatprep.subr.bf16.mxu0 %v6043_v8 }
 0x236   : > { %5461 = vmatmul.mubr.msk.bf16.vlgmr.msra.gmra.mxu0 %vm671_vm2, %v6215_v26 }
 0x237   : > { %5478 = vmatprep.mubr.msk.bf16.mxu0 %vm6044_vm1, %v6043_v8  ;;  %5477 = vmatpush3.bf16.msra.mxu0 %v5853_v58 }
 0x238   : > { %5488 = vmatprep.subr.bf16.mxu0 %v6043_v8 }
 0x2d6   : > { %v916_v0 = vpop.f32.mrf.mxu0 }
 0x2d7   : > { %v923_v1 = vsel %vm922_vm6, %v916_v0, -inf }
 0x2d8   : > { %924 = vmax.xlane.f32.xlu1 %v923_v1  ;;  %v5420_v2 = vpop.f32.mrf.mxu0 }
 0x2d9   : > { %v5850_v2 = vld [vmem:[%s7136_s5 + $0x50] sm:$0xff]  }
 0x2da   : > { %v919_v3 = vpop.f32.mrf.mxu0 }
 0x2db   : > { %v5851_v3 = vld [vmem:[%s7136_s5 + $0x48] sm:$0xff]  }
 0x2dc   : > { %v5421_v4 = vpop.f32.mrf.mxu0 }
 0x2dd   : > { %v5852_v4 = vld [vmem:[%s7136_s5 + $0x40] sm:$0xff]  }
 0x2e6   : > { %v1065_v5 = vpop.f32.mrf.mxu0 }
 0x2e7   : > { %v1066_v43 = vadd.f32 %v4707_v38, %v1065_v5 }
 0x2e8   : > { %v5438_v6 = vpop.f32.mrf.mxu0 }
 0x2e9   : > { %v1233_v45 = vpack.c.bf16 %v1066_v43, %v1066_v43  ;;  %v5854_v6 = vld [vmem:[%s7160_s25 + $0x58] sm:$0xff]   ;;  %v4790_v43 = vld [vmem:[%s7139_s8 + $0x2] ss:$0 sm:$0xff] }
 0x2ea   : > { %v1068_v7 = vpop.f32.mrf.mxu0 }
 0x2ec   : > { %v5439_v9 = vpop.f32.mrf.mxu0 }
 0x2f6   : > { %v1227_v10 = vpop.f32.mrf.mxu0 }
 0x2f7   : > { %v1228_v39 = vadd.f32 %v4737_v34, %v1227_v10 }
 0x2f8   : > { %v5462_v11 = vpop.f32.mrf.mxu0 }
 0x2f9   : > { %v1293_v44 = vpack.c.bf16 %v1228_v39, %v1228_v39  ;;  %v5855_v11 = vld [vmem:[%s7160_s25 + $0x50] sm:$0xff]  }
 0x2fa   : > { %v1230_v12 = vpop.f32.mrf.mxu0 }
 0x2fb   : > { %v1298_v46 = vand.u32 %v1293_v44, %v6263_v52 }
 0x2fc   : > { %v5463_v13 = vpop.f32.mrf.mxu0 }
 0x361   : > { %v925_v14 = vpop.xlane.xlu1 %924 }
 0x362   : > { %v926_v15 = vsub.f32 %v916_v0, %v925_v14  ;;  %v5849_v0 = vld [vmem:[%s7136_s5 + $0x58] sm:$0xff]   ;;  %v5856_v14 = vld [vmem:[%s7160_s25 + $0x48] sm:$0xff]  }
 0x364   : > { %v927_v16 = vmul.f32 1.442695, %v926_v15 }
 0x366   : > { %5986 = vpow2.f32 %v927_v16 }
 0x373   : > { %v5987_v17 = vpop.eup %5986 }
 0x374   : > { %v929_v18 = vsel %vm922_vm6, %v5987_v17, 0.0 }
 0x375   : > { %930 = vadd.xlane.f32.xlu1 %v929_v18 }
 0x3fe   : > { %v931_v19 = vpop.xlane.xlu1 %930 }
 0x3ff   : > { %5988 = vrcp.f32 %v931_v19  ;;  %v5858_v19 = vld [vmem:[%s7138_s7 + $0x58] sm:$0xff]  }
 0x40c   : > { %v5989_v20 = vpop.eup %5988 }
 0x40d   : > { %v933_v21 = vmul.f32 %v5989_v20, %v5987_v17  ;;  %v5857_v17 = vld [vmem:[%s7160_s25 + $0x40] sm:$0xff]   ;;  %v5859_v20 = vld [vmem:[%s7138_s7 + $0x50] sm:$0xff]  }
 0x40f   : > { %v934_v23 = vpack.c.bf16 %v933_v21, %v933_v21  ;;  %v4775_v21 = vld [vmem:[%s7137_s6 + $0x2] ss:$0 sm:$0xff] }
 0x411   : > { %5425 = vmatmul.mubr.msk.bf16.vlgmr.msra.gmra.mxu1 %vm936_vm7, %v934_v23  ;;  %v5860_v23 = vld [vmem:[%s7138_s7 + $0x48] sm:$0xff]  }
 0x412   : > { %5441 = vmatpush3.bf16.msra.mxu1 %v5844_v22  ;;  %5448 = vmatprep.mubr.msk.bf16.mxu1 %vm6044_vm1, %v6043_v8 }
 0x413   : > { %5442 = vmatprep.subr.bf16.mxu1 %v6043_v8 }
 0x416   : > { %5443 = vmatpush3.bf16.msra.mxu1 %v5845_v24 }
 0x417   : > { %5444 = vmatprep.subr.bf16.mxu1 %v6043_v8 }
 0x41a   : > { %5445 = vmatpush3.bf16.msra.mxu1 %v5846_v25 }
 0x41b   : > { %5446 = vmatprep.subr.bf16.mxu1 %v6043_v8 }
 0x41e   : > { %5447 = vmatpush3.bf16.msra.mxu1 %v5847_v27 }
 0x41f   : > { %5464 = vmatprep.subr.bf16.mxu1 %v6043_v8 }
 0x421   : > { %5449 = vmatmul.mubr.msk.bf16.vlgmr.msra.gmra.mxu1 %vm671_vm2, %v6215_v26 }
 0x422   : > { %5466 = vmatprep.mubr.msk.bf16.mxu1 %vm6044_vm1, %v6043_v8 }
 0x4d1   : > { %v981_v28 = vpop.f32.mrf.mxu1 }
 0x4d2   : > { %v987_v1 = vpack.c.bf16 %v981_v28, %v981_v28 }
 0x4d3   : > { %v5426_v29 = vpop.f32.mrf.mxu1 }
 0x4d4   : > { %v5861_v29 = vld [vmem:[%s7138_s7 + $0x40] sm:$0xff]  }
 0x4d5   : > { %v984_v30 = vpop.f32.mrf.mxu1 }
 0x4d7   : > { %v5427_v31 = vpop.f32.mrf.mxu1 }
 0x4e1   : > { %v1146_v33 = vpop.f32.mrf.mxu1 }
 0x4e2   : > { %v1147_v35 = vadd.f32 %v4722_v32, %v1146_v33 }
 0x4e3   : > { %v5450_v36 = vpop.f32.mrf.mxu1 }
 0x4e4   : > { %v1234_v37 = vpack.c.bf16 %v1147_v35, %v1147_v35  ;;  %v4760_v36 = vld [vmem:[%s7135_s4 + $0x2] ss:$0 sm:$0xff] }
 0x4e5   : > { %v1149_v40 = vpop.f32.mrf.mxu1 }
 0x4e6   : > { %v1239_v41 = vsel %vm875_vm3, %v1234_v37, 0 }
 0x4e7   : > { %v5451_v42 = vpop.f32.mrf.mxu1  ;;  %5465 = vmatpush3.bf16.xpose.msra.mxu1 %v1239_v41 }
 0x4e8   : > { %5470 = vmatprep.subr.bf16.mxu1 %v6043_v8 }
 0x4ee   : > { %5467 = vmatmul.mubr.msk.bf16.vlgmr.msra.gmra.mxu1 %vm875_vm3, %v1233_v45 }
 0x4ef   : > { %5471 = vmatpush3.bf16.msra.mxu1 %v1298_v46  ;;  %5472 = vmatprep.mubr.msk.bf16.mxu1 %vm6044_vm1, %v6043_v8 }
 0x4f0   : > { %5482 = vmatprep.subr.bf16.mxu1 %v6043_v8 }
 0x5ae   : > { %v1275_v47 = vpop.f32.mrf.mxu1 }
 0x5af   : > { %v1281_v48 = vsel %vm922_vm6, %v1275_v47, -inf }
 0x5b0   : > { %1282 = vmax.xlane.f32.xlu0 %v1281_v48  ;;  %v5468_v49 = vpop.f32.mrf.mxu1 }
 0x5b2   : > { %v1278_v50 = vpop.f32.mrf.mxu1 }
 0x5b4   : > { %v5469_v51 = vpop.f32.mrf.mxu1 }
 0x639   : > { %v1283_v53 = vpop.xlane.xlu0 %1282 }
 0x63a   : > { %v1284_v54 = vsub.f32 %v1275_v47, %v1283_v53 }
 0x63c   : > { %v1285_v55 = vmul.f32 1.442695, %v1284_v54 }
 0x63e   : > { %5990 = vpow2.f32 %v1285_v55 }
 0x64b   : > { %v5991_v56 = vpop.eup %5990 }
 0x64c   : > { %v1287_v57 = vsel %vm922_vm6, %v5991_v56, 0.0 }
 0x64d   : > { %1288 = vadd.xlane.f32.xlu1 %v1287_v57 }
 0x6d6   : > { %v1289_v59 = vpop.xlane.xlu1 %1288 }
 0x6d7   : > { %5992 = vrcp.f32 %v1289_v59 }
 0x6e4   : > { %v5993_v60 = vpop.eup %5992 }
 0x6e5   : > { %v1291_v61 = vmul.f32 %v5993_v60, %v5991_v56 }
 0x6e7   : > { %v1292_v63 = vpack.c.bf16 %v1291_v61, %v1291_v61 }
 0x6e9   : > { %5473 = vmatmul.mubr.msk.bf16.vlgmr.msra.gmra.mxu1 %vm936_vm7, %v1292_v63 }
 0x6ea   : > { %5483 = vmatpush3.bf16.msra.mxu1 %v5848_v62  ;;  %5484 = vmatprep.mubr.msk.bf16.mxu1 %vm6044_vm1, %v6043_v8  ;;  %v5870_v62 = vld [vmem:[%s7140_s9 + $0x10] sm:$0xff]  }
 0x6eb   : > { %5500 = vmatprep.subr.bf16.mxu1 %v6043_v8 }
 0x6f1   : > { %5485 = vmatmul.mubr.msk.bf16.vlgmr.msra.gmra.mxu1 %vm875_vm3, %v987_v1 }
 0x6f2   : > { %5501 = vmatpush3.bf16.msra.mxu1 %v5849_v0  ;;  %5508 = vmatprep.mubr.msk.bf16.mxu1 %vm6044_vm1, %v6043_v8 }
 0x6f3   : > { %5502 = vmatprep.subr.bf16.mxu1 %v6043_v8 }
 0x6f6   : > { %5503 = vmatpush3.bf16.msra.mxu1 %v5850_v2  ;;  %v5862_v2 = vld [vmem:[%s7160_s25 + $0x78] sm:$0xff]  }
 0x6f7   : > { %5504 = vmatprep.subr.bf16.mxu1 %v6043_v8 }
 0x6fa   : > { %5505 = vmatpush3.bf16.msra.mxu1 %v5851_v3 }
 0x6fb   : > { %5506 = vmatprep.subr.bf16.mxu1 %v6043_v8 }
 0x6fe   : > { %5507 = vmatpush3.bf16.msra.mxu1 %v5852_v4  ;;  %v5863_v4 = vld [vmem:[%s7160_s25 + $0x70] sm:$0xff]  }
 0x6ff   : > { %5524 = vmatprep.subr.bf16.mxu1 %v6043_v8 }
 0x701   : > { %5509 = vmatmul.mubr.msk.bf16.vlgmr.msra.gmra.mxu1 %vm671_vm2, %v6215_v26 }
 0x702   : > { %5526 = vmatprep.mubr.msk.bf16.mxu1 %vm6044_vm1, %v6043_v8 }
 0x7a9   : > { %v1334_v5 = vpop.f32.mrf.mxu1 }
 0x7aa   : > { %v1340_v7 = vpack.c.bf16 %v1334_v5, %v1334_v5  ;;  %v5864_v5 = vld [vmem:[%s7160_s25 + $0x68] sm:$0xff]  }
 0x7ab   : > { %v5474_v9 = vpop.f32.mrf.mxu1 }
 0x7ac   : > { %5479 = vmatmul.mubr.msk.bf16.vlgmr.msra.gmra.mxu0 %vm875_vm3, %v1340_v7  ;;  %v5866_v7 = vld [vmem:[%s7138_s7 + $0x78] sm:$0xff]   ;;  %v5867_v9 = vld [vmem:[%s7138_s7 + $0x70] sm:$0xff]  }
 0x7ad   : > { %5489 = vmatpush3.bf16.msra.mxu0 %v5854_v6  ;;  %v1337_v10 = vpop.f32.mrf.mxu1  ;;  %5496 = vmatprep.mubr.msk.bf16.mxu0 %vm6044_vm1, %v6043_v8  ;;  %v5865_v6 = vld [vmem:[%s7160_s25 + $0x60] sm:$0xff]  }
 0x7ae   : > { %5490 = vmatprep.subr.bf16.mxu0 %v6043_v8  ;;  %v5868_v10 = vld [vmem:[%s7138_s7 + $0x68] sm:$0xff]  }
 0x7af   : > { %v5475_v12 = vpop.f32.mrf.mxu1 }
 0x7b1   : > { %5491 = vmatpush3.bf16.msra.mxu0 %v5855_v11  ;;  %v6387_v13 = vpop.f32.mrf.mxu1  ;;  %v5869_v11 = vld [vmem:[%s7138_s7 + $0x60] sm:$0xff]  }
 0x7b2   : > { %5492 = vmatprep.subr.bf16.mxu0 %v6043_v8 }
 0x7b3   : > { %v5486_v15 = vpop.f32.mrf.mxu1 }
 0x7b5   : > { %5493 = vmatpush3.bf16.msra.mxu0 %v5856_v14  ;;  %v1439_v16 = vpop.f32.mrf.mxu1  ;;  %v5871_v14 = vld [vmem:[%s7136_s5 + $0x78] sm:$0xff]  }
 0x7b6   : > { %5494 = vmatprep.subr.bf16.mxu0 %v6043_v8 }
 0x7b7   : > { %v5487_v18 = vpop.f32.mrf.mxu1 }
 0x7b8   : > { %v5872_v18 = vld [vmem:[%s7136_s5 + $0x70] sm:$0xff]  }
 0x7b9   : > { %5495 = vmatpush3.bf16.msra.mxu0 %v5857_v17 }
 0x7ba   : > { %5512 = vmatprep.subr.bf16.mxu0 %v6043_v8 }
 0x7bc   : > { %5497 = vmatmul.mubr.msk.bf16.vlgmr.msra.gmra.mxu0 %vm671_vm2, %v6215_v26 }
 0x7bd   : > { %5513 = vmatpush3.bf16.msra.mxu0 %v5858_v19  ;;  %5520 = vmatprep.mubr.msk.bf16.mxu0 %vm6044_vm1, %v6043_v8 }
 0x7be   : > { %5514 = vmatprep.subr.bf16.mxu0 %v6043_v8 }
 0x7c1   : > { %v1598_v22 = vpop.f32.mrf.mxu1  ;;  %5515 = vmatpush3.bf16.msra.mxu0 %v5859_v20  ;;  %v5873_v20 = vld [vmem:[%s7136_s5 + $0x68] sm:$0xff]  }
 0x7c2   : > { %v1599_v24 = vadd.f32 %v4775_v21, %v1598_v22  ;;  %5516 = vmatprep.subr.bf16.mxu0 %v6043_v8  ;;  %v5874_v21 = vld [vmem:[%s7136_s5 + $0x60] sm:$0xff]  }
 0x7c3   : > { %v5510_v25 = vpop.f32.mrf.mxu1 }
 0x7c4   : > { %v1686_v27 = vpack.c.bf16 %v1599_v24, %v1599_v24 }
 0x7c5   : > { %v1601_v28 = vpop.f32.mrf.mxu1  ;;  %5517 = vmatpush3.bf16.msra.mxu0 %v5860_v23 }
 0x7c6   : > { %v1691_v30 = vsel %vm875_vm3, %v1686_v27, 0  ;;  %5518 = vmatprep.subr.bf16.mxu0 %v6043_v8 }
 0x7c7   : > { %v5511_v31 = vpop.f32.mrf.mxu1  ;;  %5525 = vmatpush3.bf16.xpose.msra.mxu1 %v1691_v30 }
 0x7c8   : > { %5530 = vmatprep.subr.bf16.mxu1 %v6043_v8 }
 0x7c9   : > { %5519 = vmatpush3.bf16.msra.mxu0 %v5861_v29 }
 0x7ca   : > { %5536 = vmatprep.subr.bf16.mxu0 %v6043_v8 }
 0x7cc   : > { %5521 = vmatmul.mubr.msk.bf16.vlgmr.msra.gmra.mxu0 %vm671_vm2, %v6215_v26 }
 0x7cd   : > { %5538 = vmatprep.mubr.msk.bf16.mxu0 %vm6044_vm1, %v6043_v8  ;;  %5537 = vmatpush3.bf16.msra.mxu0 %v5870_v62 }
 0x7ce   : > { %5554 = vmatprep.subr.bf16.mxu0 %v6043_v8 }
 0x86c   : > { %v6427_v32 = vpop.f32.mrf.mxu0 }
 0x86d   : > { %v1437_v31 = vadd.f32 %v6387_v13, %v6427_v32  ;;  %v4811_v13 = vld [vmem:[%s7135_s4 + $0x3] ss:$0 sm:$0xff] }
 0x86e   : > { %v5480_v33 = vpop.f32.mrf.mxu0 }
 0x870   : > { %v1390_v34 = vpop.f32.mrf.mxu0 }
 0x872   : > { %v5481_v35 = vpop.f32.mrf.mxu0 }
 0x87c   : > { %v1517_v37 = vpop.f32.mrf.mxu0 }
 0x87d   : > { %v1518_v38 = vadd.f32 %v4760_v36, %v1517_v37 }
 0x87e   : > { %v5498_v39 = vpop.f32.mrf.mxu0 }
 0x87f   : > { %v1685_v40 = vpack.c.bf16 %v1518_v38, %v1518_v38  ;;  %v4841_v39 = vld [vmem:[%s7139_s8 + $0x3] ss:$0 sm:$0xff] }
 0x880   : > { %v1520_v41 = vpop.f32.mrf.mxu0 }
 0x881   : > { %5527 = vmatmul.mubr.msk.bf16.vlgmr.msra.gmra.mxu1 %vm875_vm3, %v1685_v40 }
 0x882   : > { %v5499_v42 = vpop.f32.mrf.mxu0  ;;  %5532 = vmatprep.mubr.msk.bf16.mxu1 %vm6044_vm1, %v6043_v8 }
 0x88c   : > { %v1679_v44 = vpop.f32.mrf.mxu0 }
 0x88d   : > { %v1680_v45 = vadd.f32 %v4790_v43, %v1679_v44 }
 0x88e   : > { %v5522_v46 = vpop.f32.mrf.mxu0 }
 0x88f   : > { %v1745_v47 = vpack.c.bf16 %v1680_v45, %v1680_v45 }
 0x890   : > { %v1682_v48 = vpop.f32.mrf.mxu0 }
 0x891   : > { %v1750_v49 = vand.u32 %v1745_v47, %v6263_v52 }
 0x892   : > { %v5523_v50 = vpop.f32.mrf.mxu0 }
 0x893   : > { %5531 = vmatpush3.bf16.msra.mxu1 %v1750_v49 }
 0x894   : > { %5542 = vmatprep.subr.bf16.mxu1 %v6043_v8 }
 0x941   : > { %v1727_v51 = vpop.f32.mrf.mxu1 }
 0x942   : > { %v1733_v53 = vsel %vm922_vm6, %v1727_v51, -inf }
 0x943   : > { %1734 = vmax.xlane.f32.xlu0 %v1733_v53  ;;  %v5528_v54 = vpop.f32.mrf.mxu1 }
 0x945   : > { %v1730_v55 = vpop.f32.mrf.mxu1 }
 0x947   : > { %v5529_v56 = vpop.f32.mrf.mxu1 }
 0x9cc   : > { %v1735_v57 = vpop.xlane.xlu0 %1734 }
 0x9cd   : > { %v1736_v58 = vsub.f32 %v1727_v51, %v1735_v57 }
 0x9cf   : > { %v1737_v59 = vmul.f32 1.442695, %v1736_v58 }
 0x9d1   : > { %5994 = vpow2.f32 %v1737_v59 }
 0x9de   : > { %v5995_v60 = vpop.eup %5994 }
 0x9df   : > { %v1739_v61 = vsel %vm922_vm6, %v5995_v60, 0.0 }
 0x9e0   : > { %1740 = vadd.xlane.f32.xlu1 %v1739_v61  ;;  %v5875_v61 = vld [vmem:[%s7140_s9 + $0x18] sm:$0xff]  }
 0xa69   : > { %v1741_v63 = vpop.xlane.xlu1 %1740 }
 0xa6a   : > { %5996 = vrcp.f32 %v1741_v63 }
 0xa77   : > { %v5997_v0 = vpop.eup %5996 }
 0xa78   : > { %v1743_v1 = vmul.f32 %v5997_v0, %v5995_v60 }
 0xa7a   : > { %v1744_v3 = vpack.c.bf16 %v1743_v1, %v1743_v1 }
 0xa7c   : > { %5533 = vmatmul.mubr.msk.bf16.vlgmr.msra.gmra.mxu1 %vm936_vm7, %v1744_v3 }
 0xa7d   : > { %5543 = vmatpush3.bf16.msra.mxu1 %v5862_v2  ;;  %5550 = vmatprep.mubr.msk.bf16.mxu1 %vm6044_vm1, %v6043_v8 }
 0xa7e   : > { %5544 = vmatprep.subr.bf16.mxu1 %v6043_v8 }
 0xa81   : > { %5545 = vmatpush3.bf16.msra.mxu1 %v5863_v4 }
 0xa82   : > { %5546 = vmatprep.subr.bf16.mxu1 %v6043_v8 }
 0xa85   : > { %5547 = vmatpush3.bf16.msra.mxu1 %v5864_v5 }
 0xa86   : > { %5548 = vmatprep.subr.bf16.mxu1 %v6043_v8 }
 0xa89   : > { %5549 = vmatpush3.bf16.msra.mxu1 %v5865_v6 }
 0xa8a   : > { %5566 = vmatprep.subr.bf16.mxu1 %v6043_v8 }
 0xa8c   : > { %5551 = vmatmul.mubr.msk.bf16.vlgmr.msra.gmra.mxu1 %vm671_vm2, %v6215_v26 }
 0xa8d   : > { %5567 = vmatpush3.bf16.msra.mxu1 %v5866_v7  ;;  %5574 = vmatprep.mubr.msk.bf16.mxu1 %vm6044_vm1, %v6043_v8 }
 0xa8e   : > { %5568 = vmatprep.subr.bf16.mxu1 %v6043_v8 }
 0xa91   : > { %5569 = vmatpush3.bf16.msra.mxu1 %v5867_v9 }
 0xa92   : > { %5570 = vmatprep.subr.bf16.mxu1 %v6043_v8 }
 0xa95   : > { %5571 = vmatpush3.bf16.msra.mxu1 %v5868_v10  ;;  %v4853_v10 = vld [vmem:[%s7141_s10] ss:$0 sm:$0xff] }
 0xa96   : > { %5572 = vmatprep.subr.bf16.mxu1 %v6043_v8 }
 0xa99   : > { %5573 = vmatpush3.bf16.msra.mxu1 %v5869_v11 }
 0xa9a   : > { %5590 = vmatprep.subr.bf16.mxu1 %v6043_v8 }
 0xa9c   : > { %5575 = vmatmul.mubr.msk.bf16.vlgmr.msra.gmra.mxu1 %vm671_vm2, %v6215_v26 }
 0xa9d   : > { %5592 = vmatprep.mubr.msk.bf16.mxu1 %vm6044_vm1, %v6043_v8  ;;  %5591 = vmatpush3.bf16.msra.mxu1 %v5875_v61 }
 0xb3c   : > { %v1786_v12 = vpop.f32.mrf.mxu1 }
 0xb3d   : > { %v1792_v15 = vpack.c.bf16 %v1786_v12, %v1786_v12  ;;  %v6034_v12 = vld [vmem:[%s6163_s2] sm:$0x7] }
 0xb3e   : > { %v5534_v16 = vpop.f32.mrf.mxu1 }
 0xb3f   : > { %5539 = vmatmul.mubr.msk.bf16.vlgmr.msra.gmra.mxu0 %vm875_vm3, %v1792_v15 }
 0xb40   : > { %5555 = vmatpush3.bf16.msra.mxu0 %v5871_v14  ;;  %v1789_v17 = vpop.f32.mrf.mxu1  ;;  %5562 = vmatprep.mubr.msk.bf16.mxu0 %vm6044_vm1, %v6043_v8 }
 0xb41   : > { %5556 = vmatprep.subr.bf16.mxu0 %v6043_v8 }
 0xb42   : > { %v5535_v19 = vpop.f32.mrf.mxu1 }
 0xb44   : > { %5557 = vmatpush3.bf16.msra.mxu0 %v5872_v18 }
 0xb45   : > { %5558 = vmatprep.subr.bf16.mxu0 %v6043_v8 }
 0xb48   : > { %5559 = vmatpush3.bf16.msra.mxu0 %v5873_v20 }
 0xb49   : > { %5560 = vmatprep.subr.bf16.mxu0 %v6043_v8 }
 0xb4c   : > { %v1921_v22 = vpop.f32.mrf.mxu1  ;;  %5561 = vmatpush3.bf16.msra.mxu0 %v5874_v21 }
 0xb4d   : > { %5578 = vmatprep.subr.bf16.mxu0 %v6043_v8  ;;  %v1922_v46 = vadd.f32 %v4811_v13, %v1921_v22 }
 0xb4e   : > { %v5552_v23 = vpop.f32.mrf.mxu1 }
 0xb4f   : > { %5563 = vmatmul.mubr.msk.bf16.vlgmr.msra.gmra.mxu0 %vm671_vm2, %v6215_v26  ;;  %v4826_v26 = vld [vmem:[%s7137_s6 + $0x3] ss:$0 sm:$0xff]  ;;  %v2089_v48 = vpack.c.bf16 %v1922_v46, %v1922_v46  ;;  %v5892_v46 = vld [vmem:[%s7146_s15 + $0x68] sm:$0xff]  }
 0xb50   : > { %v1924_v24 = vpop.f32.mrf.mxu1  ;;  %5580 = vmatprep.mubr.msk.bf16.mxu0 %vm6044_vm1, %v6043_v8 }
 0xb51   : > { %v5878_v24 = vld [vmem:[%s7144_s13 + $0x34] ss:$8 sps:$4 sm:$0xff]  }
 0xb52   : > { %v5553_v25 = vpop.f32.mrf.mxu1 }
 0xb53   : > { %v5876_v25 = vld [vmem:[%s7144_s13 + $0x30] ss:$8 sps:$4 sm:$0xff]  }
 0xb5c   : > { %v2083_v27 = vpop.f32.mrf.mxu1 }
 0xb5d   : > { %v2084_v32 = vadd.f32 %v4841_v39, %v2083_v27  ;;  %v5881_v27 = vld [vmem:[%s7144_s13 + $0x24] ss:$8 sps:$4 sm:$0xff]  }
 0xb5e   : > { %v5576_v28 = vpop.f32.mrf.mxu1 }
 0xb5f   : > { %v2149_v47 = vpack.c.bf16 %v2084_v32, %v2084_v32  ;;  %v5879_v28 = vld [vmem:[%s7144_s13 + $0x20] ss:$8 sps:$4 sm:$0xff]   ;;  %v5888_v32 = vld [vmem:[%s7146_s15 + $0x78] sm:$0xff]  }
 0xb60   : > { %v2086_v29 = vpop.f32.mrf.mxu1  ;;  %5252 = vmatprep.subr.bf16.mxu1 %v5888_v32 }
 0xb61   : > { %v2154_v49 = vand.u32 %v2149_v47, %v6263_v52  ;;  %v5884_v29 = vld [vmem:[%s7144_s13 + $0x14] ss:$8 sps:$4 sm:$0xff]   ;;  %v5893_v47 = vld [vmem:[%s7146_s15 + $0x28] sm:$0xff]  }
 0xb62   : > { %v5577_v30 = vpop.f32.mrf.mxu1 }
 0xb63   : > { %v5882_v30 = vld [vmem:[%s7144_s13 + $0x10] ss:$8 sps:$4 sm:$0xff]  }
 0xbff   : > { %v1839_v33 = vpop.f32.mrf.mxu0 }
 0xc00   : > { %v1845_v34 = vadd.f32 %v1839_v33, %v1437_v31  ;;  %v5887_v31 = vld [vmem:[%s7144_s13 + $0x4] ss:$8 sps:$4 sm:$0xff]   ;;  %v5885_v33 = vld [vmem:[%s7144_s13] ss:$8 sps:$4 sm:$0xff]  }
 0xc01   : > { %v5540_v35 = vpop.f32.mrf.mxu0 }
 0xc03   : > { %v1842_v36 = vpop.f32.mrf.mxu0 }
 0xc05   : > { %v5541_v37 = vpop.f32.mrf.mxu0 }
 0xc0f   : > { %v2002_v38 = vpop.f32.mrf.mxu0 }
 0xc10   : > { %v2003_v40 = vadd.f32 %v4826_v26, %v2002_v38  ;;  %v4854_v38 = vld [vmem:[%s7142_s11] ss:$0 sm:$0xff] }
 0xc11   : > { %v5564_v41 = vpop.f32.mrf.mxu0 }
 0xc12   : > { %v2090_v42 = vpack.c.bf16 %v2003_v40, %v2003_v40  ;;  %v4855_v40 = vld [vmem:[%s7143_s12] ss:$0 sm:$0xff] }
 0xc13   : > { %v2005_v43 = vpop.f32.mrf.mxu0 }
 0xc14   : > { %v2095_v44 = vsel %vm875_vm3, %v2090_v42, 0  ;;  %v5889_v43 = vld [vmem:[%s7146_s15 + $0x38] sm:$0xff]  }
 0xc15   : > { %v5565_v45 = vpop.f32.mrf.mxu0  ;;  %5579 = vmatpush3.bf16.xpose.msra.mxu0 %v2095_v44  ;;  %v5890_v44 = vld [vmem:[%s7146_s15 + $0x70] sm:$0xff]  }
 0xc16   : > { %5584 = vmatprep.subr.bf16.mxu0 %v6043_v8  ;;  %v5891_v45 = vld [vmem:[%s7146_s15 + $0x30] sm:$0xff]  }
 0xc1c   : > { %5581 = vmatmul.mubr.msk.bf16.vlgmr.msra.gmra.mxu0 %vm875_vm3, %v2089_v48  ;;  %v5894_v48 = vld [vmem:[%s7146_s15 + $0x60] sm:$0xff]  }
 0xc1d   : > { %5585 = vmatpush3.bf16.msra.mxu0 %v2154_v49  ;;  %5586 = vmatprep.mubr.msk.bf16.mxu0 %vm6044_vm1, %v6043_v8  ;;  %v5895_v49 = vld [vmem:[%s7146_s15 + $0x20] sm:$0xff]  }
 0xc1e   : > { %2360 = vmatprep.subr.bf16.mxu0 %v5878_v24 }
 0xcdc   : > { %v2131_v50 = vpop.f32.mrf.mxu0 }
 0xcdd   : > { %v2137_v51 = vsel %vm922_vm6, %v2131_v50, -inf }
 0xcde   : > { %2138 = vmax.xlane.f32.xlu0 %v2137_v51  ;;  %v5582_v53 = vpop.f32.mrf.mxu0  ;;  %v5897_v51 = vld [vmem:[%s7146_s15 + $0x18] sm:$0xff]  }
 0xcdf   : > { %v5898_v53 = vld [vmem:[%s7146_s15 + $0x50] sm:$0xff]  }
 0xce0   : > { %v2134_v54 = vpop.f32.mrf.mxu0 }
 0xce1   : > { %v5899_v54 = vld [vmem:[%s7146_s15 + $0x10] sm:$0xff]  }
 0xce2   : > { %v5583_v55 = vpop.f32.mrf.mxu0 }
 0xce3   : > { %v5900_v55 = vld [vmem:[%s7146_s15 + $0x48] sm:$0xff]  }
 0xd67   : > { %v2139_v56 = vpop.xlane.xlu0 %2138 }
 0xd68   : > { %v2140_v57 = vsub.f32 %v2131_v50, %v2139_v56  ;;  %v5896_v50 = vld [vmem:[%s7146_s15 + $0x58] sm:$0xff]   ;;  %v5901_v56 = vld [vmem:[%s7146_s15 + $0x8] sm:$0xff]  }
 0xd6a   : > { %v2141_v58 = vmul.f32 1.442695, %v2140_v57  ;;  %v5902_v57 = vld [vmem:[%s7146_s15 + $0x40] sm:$0xff]  }
 0xd6c   : > { %5998 = vpow2.f32 %v2141_v58  ;;  %v5903_v58 = vld [vmem:[%s7146_s15] sm:$0xff]  }
 0xd79   : > { %v5999_v59 = vpop.eup %5998 }
 0xd7a   : > { %v2143_v60 = vsel %vm922_vm6, %v5999_v59, 0.0 }
 0xd7b   : > { %2144 = vadd.xlane.f32.xlu1 %v2143_v60 }
 0xe04   : > { %v2145_v62 = vpop.xlane.xlu1 %2144 }
 0xe05   : > { %6000 = vrcp.f32 %v2145_v62  ;;  %v2297_v62 = vld [vmem:[%s7145_s14] sm:$0x3] }
 0xe12   : > { %v6001_v63 = vpop.eup %6000 }
 0xe13   : > { %v2147_v0 = vmul.f32 %v6001_v63, %v5999_v59  ;;  %v2299_v59 = vlaneseq }
 0xe15   : > { %v2148_v1 = vpack.c.bf16 %v2147_v0, %v2147_v0  ;;  %v6630_v60 = vshrl.u32 %v2299_v59, 7  ;;  %v4885_v59 = vld [vmem:[%s7162_s24 + $0x1] ss:$0 sm:$0xff] }
 0xe17   : > { %5587 = vmatmul.mubr.msk.bf16.vlgmr.msra.gmra.mxu0 %vm936_vm7, %v2148_v1  ;;  %v2301_v61 = vsub.s32 0, %v6630_v60  ;;  %v2305_v63 = vsub.s32 1, %v6630_v60 }
 0xe18   : > { %2361 = vmatpush1.bf16.msra.mxu0 %v5876_v25 }
 0xe19   : > { %2362 = vmatprep.subr.bf16.mxu0 %v5881_v27  ;;  %v2302_v0 = vrot.slane %v2297_v62, %v2301_v61  ;;  %v2306_v1 = vrot.slane %v2297_v62, %v2305_v63 }
 0xe1c   : > { %2363 = vmatpush1.bf16.msra.mxu0 %v5879_v28 }
 0xe1d   : > { %2364 = vmatprep.subr.bf16.mxu0 %v5884_v29 }
 0xe20   : > { %2365 = vmatpush1.bf16.msra.mxu0 %v5882_v30 }
 0xe21   : > { %2366 = vmatprep.subr.bf16.mxu0 %v5887_v31 }
 0xe24   : > { %2367 = vmatpush1.bf16.msra.mxu0 %v5885_v33 }
 0xe25   : > { %5596 = vmatprep.subr.bf16.mxu0 %v6043_v8 }
 0xed7   : > { %v2190_v2 = vpop.f32.mrf.mxu0 }
 0xed8   : > { %v2196_v3 = vpack.c.bf16 %v2190_v2, %v2190_v2 }
 0xed9   : > { %v5588_v4 = vpop.f32.mrf.mxu0 }
 0xeda   : > { %5593 = vmatmul.mubr.msk.bf16.vlgmr.msra.gmra.mxu1 %vm875_vm3, %v2196_v3 }
 0xedb   : > { %v2193_v5 = vpop.f32.mrf.mxu0  ;;  %5253 = vmatpush3.bf16.msra.mxu1 %v5889_v43 }
 0xedc   : > { %5254 = vmatprep.subr.bf16.mxu1 %v5890_v44 }
 0xedd   : > { %v5589_v6 = vpop.f32.mrf.mxu0 }
 0xedf   : > { %5255 = vmatpush3.bf16.msra.mxu1 %v5891_v45  ;;  %v5904_v45 = vld [vmem:[%s7160_s25 + $0x98] sm:$0xff]  }
 0xee0   : > { %5256 = vmatprep.subr.bf16.mxu1 %v5892_v46  ;;  %v5906_v46 = vld [vmem:[%s7160_s25 + $0x90] sm:$0xff]  }
 0xee3   : > { %5257 = vmatpush3.bf16.msra.mxu1 %v5893_v47  ;;  %v5907_v47 = vld [vmem:[%s7138_s7 + $0x90] sm:$0xff]  }
 0xee4   : > { %5258 = vmatprep.subr.bf16.mxu1 %v5894_v48  ;;  %v5908_v48 = vld [vmem:[%s7160_s25 + $0x88] sm:$0xff]  }
 0xee7   : > { %5259 = vmatpush3.bf16.msra.mxu1 %v5895_v49  ;;  %v5909_v49 = vld [vmem:[%s7138_s7 + $0x88] sm:$0xff]  }
 0xee8   : > { %5260 = vmatprep.subr.bf16.mxu1 %v5896_v50  ;;  %v5910_v50 = vld [vmem:[%s7160_s25 + $0x80] sm:$0xff]  }
 0xeeb   : > { %5261 = vmatpush3.bf16.msra.mxu1 %v5897_v51  ;;  %v5911_v51 = vld [vmem:[%s7138_s7 + $0x80] sm:$0xff]  }
 0xeec   : > { %5262 = vmatprep.subr.bf16.mxu1 %v5898_v53 }
 0xeef   : > { %5263 = vmatpush3.bf16.msra.mxu1 %v5899_v54 }
 0xef0   : > { %5264 = vmatprep.subr.bf16.mxu1 %v5900_v55 }
 0xef3   : > { %5265 = vmatpush3.bf16.msra.mxu1 %v5901_v56 }
 0xef4   : > { %5266 = vmatprep.subr.bf16.mxu1 %v5902_v57  ;;  %v4884_v57 = vld [vmem:[%s7161_s1 + $0x1] ss:$0 sm:$0xff] }
 0xef7   : > { %5267 = vmatpush3.bf16.msra.mxu1 %v5903_v58 }
 0xef8   : > { %5620 = vmatprep.subr.bf16.mxu1 %v6043_v8 }
 0xf9a   : > { %v2243_v7 = vpop.f32.mrf.mxu1 }
 0xf9b   : > { %v2249_v9 = vadd.f32 %v2243_v7, %v1845_v34  ;;  %v6046_v34 = vmov 0  }
 0xf9c   : > { %v5594_v11 = vpop.f32.mrf.mxu1  ;;  %2384 = vmatprep.mubr.bf16.mxu0 %v6046_v34 }
 0xf9d   : > { %v2250_v14 = vadd.f32 %v6034_v12, %v2249_v9 }
 0xf9e   : > { %v2246_v15 = vpop.f32.mrf.mxu1 }
 0xf9f   : > { %v6540_v16 = vadd.f32 %v4853_v10, %v2250_v14 }
 0xfa0   : > { %v5595_v17 = vpop.f32.mrf.mxu1 }
 0xfa1   : > { %v2261_v18 = vsel %vm602_vm0, %v6540_v16, 0.0 }
 0xfa2   : > { %2262 = vadd.xlane.f32.xlu0 %v2261_v18 }
0x102b   : > { %v2263_v19 = vpop.xlane.xlu0 %2262 }
0x102c   : > { %v2264_v20 = vmul.f32 0.015625, %v2263_v19 }
0x102e   : > { %v2265_v21 = vsub.f32 %v6540_v16, %v2264_v20 }
0x1030   : > { %v2266_v22 = vmul.f32 %v2265_v21, %v2265_v21 }
0x1032   : > { %v2267_v23 = vsel %vm602_vm0, %v2266_v22, 0.0 }
0x1033   : > { %2268 = vadd.xlane.f32.xlu1 %v2267_v23 }
0x10bc   : > { %v2269_v35 = vpop.xlane.xlu1 %2268 }
0x10bd   : > { %v2270_v36 = vmul.f32 0.015625, %v2269_v35 }
0x10bf   : > { %v2271_v37 = vadd.f32 1e-05, %v2270_v36 }
0x10c1   : > { %6002 = vrsqrt.f32 %v2271_v37  ;;  %v4881_v37 = vld [vmem:[%s7147_s16] ss:$0 sm:$0xff] }
0x10ce   : > { %v6003_v26 = vpop.eup %6002 }
0x10cf   : > { %v2273_v39 = vmul.f32 %v6003_v26, %v2265_v21 }
0x10d1   : > { %v2280_v41 = vmul.f32 %v4854_v38, %v2273_v39 }
0x10d3   : > { %v2287_v42 = vadd.f32 %v4855_v40, %v2280_v41 }
0x10d5   : > { %v2288_v13 = vpack.c.bf16 %v2287_v42, %v2287_v42 }
0x10d7   : > { %4864 = vmatmul.mubr.msk.bf16.vlgmr.msra.gmra.mxu0 %vm671_vm2, %v2288_v13 }
0x10d8   : > { %5604 = vmatprep.mubr.msk.bf16.mxu0 %vm6044_vm1, %v6043_v8  ;;  %5597 = vmatpush3.bf16.msra.mxu0 %v5904_v45 }
0x10d9   : > { %5598 = vmatprep.subr.bf16.mxu0 %v6043_v8 }
0x10dc   : > { %5599 = vmatpush3.bf16.msra.mxu0 %v5906_v46 }
0x10dd   : > { %5600 = vmatprep.subr.bf16.mxu0 %v6043_v8 }
0x10e0   : > { %5601 = vmatpush3.bf16.msra.mxu0 %v5908_v48 }
0x10e1   : > { %5602 = vmatprep.subr.bf16.mxu0 %v6043_v8 }
0x10e4   : > { %5603 = vmatpush3.bf16.msra.mxu0 %v5910_v50 }
0x10e5   : > { %5608 = vmatprep.subr.bf16.mxu0 %v6043_v8 }
0x1197   : > { %v2386_v2 = vpop.f32.mrf.mxu0 }
0x1198   : > { %v2387_v3 = vadd.f32 %v2386_v2, %v2302_v0 }
0x1199   : > { %v2388_v4 = vpop.f32.mrf.mxu0 }
0x119a   : > { %v2395_v5 = vmul.f32 0.044715, %v2387_v3  ;;  %v2389_v6 = vadd.f32 %v2388_v4, %v2306_v1  ;;  %v2393_v24 = vmul.f32 0.5, %v2387_v3  ;;  %v5912_v1 = vld [vmem:[%s7136_s5 + $0x98] sm:$0xff]   ;;  %v5914_v4 = vld [vmem:[%s7136_s5 + $0x88] sm:$0xff]  }
0x119b   : > { %v2390_v7 = vpop.f32.mrf.mxu0 }
0x119c   : > { %v2397_v9 = vmul.f32 %v2395_v5, %v2387_v3  ;;  %v2396_v10 = vmul.f32 0.044715, %v2389_v6  ;;  %v2394_v25 = vmul.f32 0.5, %v2389_v6  ;;  %v5915_v5 = vld [vmem:[%s7136_s5 + $0x80] sm:$0xff]  }
0x119d   : > { %v2391_v11 = vpop.f32.mrf.mxu0 }
0x119e   : > { %v2399_v12 = vmul.f32 %v2397_v9, %v2387_v3  ;;  %v2398_v14 = vmul.f32 %v2396_v10, %v2389_v6 }
0x11a0   : > { %v2401_v15 = vadd.f32 %v2399_v12, %v2387_v3  ;;  %v2400_v17 = vmul.f32 %v2398_v14, %v2389_v6  ;;  %v5913_v3 = vld [vmem:[%s7136_s5 + $0x90] sm:$0xff]  }
0x11a2   : > { %v2403_v18 = vmul.f32 0.7978846, %v2401_v15  ;;  %v2402_v19 = vadd.f32 %v2400_v17, %v2389_v6  ;;  %v4925_v6 = vld [vmem:[%s7139_s8 + $0x4] ss:$0 sm:$0xff] }
0x11a4   : > { %v2404_v20 = vmul.f32 0.7978846, %v2402_v19  ;;  %6004 = vtanh.f32 %v2403_v18 }
0x11a6   : > { %6006 = vtanh.f32 %v2404_v20 }
0x11b1   : > { %v6005_v21 = vpop.eup %6004 }
0x11b2   : > { %v2407_v22 = vadd.f32 1.0, %v6005_v21  ;;  %v4910_v21 = vld [vmem:[%s7137_s6 + $0x4] ss:$0 sm:$0xff] }
0x11b3   : > { %v6007_v23 = vpop.eup %6006 }
0x11b4   : > { %v2408_v27 = vadd.f32 1.0, %v6007_v23  ;;  %v2409_v28 = vmul.f32 %v2407_v22, %v2393_v24 }
0x11b6   : > { %v2410_v29 = vmul.f32 %v2408_v27, %v2394_v25  ;;  %v2411_v31 = vpack.c.bf16 %v2409_v28, %v2409_v28  ;;  %v4895_v27 = vld [vmem:[%s7135_s4 + $0x4] ss:$0 sm:$0xff] }
0x11b8   : > { %v2412_v30 = vpack.c.bf16 %v2410_v29, %v2410_v29 }
0x11ba   : > { %2573 = vmatprep.mubr.bf16.mxu1 %v2412_v30 }
0x11bb   : > { %2574 = vmatmul.mubr.bf16.vlgmr.msra.gmra.mxu1 %v2411_v31 }
0x11bc   : > { %5628 = vmatprep.mubr.msk.bf16.mxu1 %vm6044_vm1, %v6043_v8 }
0x127b   : > { %v5268_v33 = vpop.f32.mrf.mxu1 }
0x127d   : > { %v5269_v35 = vpop.f32.mrf.mxu1 }
0x127e   : > { %v5270_v36 = vadd.f32 %v5269_v35, %v5268_v33  ;;  %v5916_v33 = vld [vmem:[%s7160_s25 + $0xb8] sm:$0xff]  }
0x127f   : > { %v5271_v26 = vpop.f32.mrf.mxu1 }
0x1280   : > { %v2581_v38 = vadd.f32 %v5270_v36, %v6540_v16  ;;  %v5905_v16 = vld [vmem:[%s7138_s7 + $0x98] sm:$0xff]   ;;  %v5917_v36 = vld [vmem:[%s7160_s25 + $0xb0] sm:$0xff]   ;;  %v5919_v26 = vld [vmem:[%s7160_s25 + $0xa0] sm:$0xff]  }
0x1281   : > { %v5272_v39 = vpop.f32.mrf.mxu1  ;;  %5621 = vmatpush3.bf16.msra.mxu1 %v5905_v16 }
0x1282   : > { %v6647_v40 = vadd.f32 %v4881_v37, %v2581_v38  ;;  %5622 = vmatprep.subr.bf16.mxu1 %v6043_v8  ;;  %v5918_v37 = vld [vmem:[%s7160_s25 + $0xa8] sm:$0xff]   ;;  %v5920_v38 = vld [vmem:[%s7138_s7 + $0xb8] sm:$0xff]   ;;  %v5921_v39 = vld [vmem:[%s7138_s7 + $0xb0] sm:$0xff]  }
0x1284   : > { %v2594_v41 = vsel %vm602_vm0, %v6647_v40, 0.0 }
0x1285   : > { %2595 = vadd.xlane.f32.xlu0 %v2594_v41  ;;  %5623 = vmatpush3.bf16.msra.mxu1 %v5907_v47  ;;  %v5922_v41 = vld [vmem:[%s7138_s7 + $0xa8] sm:$0xff]  }
0x1286   : > { %5624 = vmatprep.subr.bf16.mxu1 %v6043_v8 }
0x1289   : > { %5625 = vmatpush3.bf16.msra.mxu1 %v5909_v49 }
0x128a   : > { %5626 = vmatprep.subr.bf16.mxu1 %v6043_v8 }
0x128d   : > { %5627 = vmatpush3.bf16.msra.mxu1 %v5911_v51 }
0x128e   : > { %5638 = vmatprep.subr.bf16.mxu1 %v6043_v8 }
0x130e   : > { %v2596_v42 = vpop.xlane.xlu0 %2595 }
0x130f   : > { %v2597_v13 = vmul.f32 0.015625, %v2596_v42  ;;  %v5923_v42 = vld [vmem:[%s7138_s7 + $0xa0] sm:$0xff]  }
0x1311   : > { %v2598_v32 = vsub.f32 %v6647_v40, %v2597_v13 }
0x1313   : > { %v2599_v43 = vmul.f32 %v2598_v32, %v2598_v32 }
0x1315   : > { %v2600_v44 = vsel %vm602_vm0, %v2599_v43, 0.0 }
0x1316   : > { %2601 = vadd.xlane.f32.xlu1 %v2600_v44 }
0x139f   : > { %v2602_v53 = vpop.xlane.xlu1 %2601 }
0x13a0   : > { %v2603_v54 = vmul.f32 0.015625, %v2602_v53 }
0x13a2   : > { %v2604_v55 = vadd.f32 1e-05, %v2603_v54 }
0x13a4   : > { %6008 = vrsqrt.f32 %v2604_v55 }
0x13b1   : > { %v6009_v56 = vpop.eup %6008 }
0x13b2   : > { %v2606_v58 = vmul.f32 %v6009_v56, %v2598_v32 }
0x13b4   : > { %v2613_v62 = vmul.f32 %v4884_v57, %v2606_v58 }
0x13b6   : > { %v2620_v0 = vadd.f32 %v4885_v59, %v2613_v62 }
0x13b8   : > { %v6694_v2 = vpack.c.bf16 %v2620_v0, %v2620_v0 }
0x13ba   : > { %5605 = vmatmul.mubr.msk.bf16.vlgmr.msra.gmra.mxu0 %vm671_vm2, %v6694_v2  ;;  %5629 = vmatmul.mubr.msk.bf16.vlgmr.msra.gmra.mxu1 %vm671_vm2, %v6694_v2 }
0x13bb   : > { %5609 = vmatpush3.bf16.msra.mxu0 %v5912_v1  ;;  %5616 = vmatprep.mubr.msk.bf16.mxu0 %vm6044_vm1, %v6043_v8  ;;  %v5924_v1 = vld [vmem:[%s7136_s5 + $0xb8] sm:$0xff]  }
0x13bc   : > { %5610 = vmatprep.subr.bf16.mxu0 %v6043_v8  ;;  %5640 = vmatprep.mubr.msk.bf16.mxu1 %vm6044_vm1, %v6043_v8 }
0x13bf   : > { %5611 = vmatpush3.bf16.msra.mxu0 %v5913_v3 }
0x13c0   : > { %5612 = vmatprep.subr.bf16.mxu0 %v6043_v8 }
0x13c3   : > { %5613 = vmatpush3.bf16.msra.mxu0 %v5914_v4  ;;  %v5925_v4 = vld [vmem:[%s7136_s5 + $0xb0] sm:$0xff]  }
0x13c4   : > { %5614 = vmatprep.subr.bf16.mxu0 %v6043_v8 }
0x13c7   : > { %5615 = vmatpush3.bf16.msra.mxu0 %v5915_v5  ;;  %v5926_v5 = vld [vmem:[%s7136_s5 + $0xa8] sm:$0xff]  }
0x13c8   : > { %5632 = vmatprep.subr.bf16.mxu0 %v6043_v8 }
0x13ca   : > { %5617 = vmatmul.mubr.msk.bf16.vlgmr.msra.gmra.mxu0 %vm671_vm2, %v6694_v2 }
0x13cb   : > { %5634 = vmatprep.mubr.msk.bf16.mxu0 %vm6044_vm1, %v6043_v8 }
0x147a   : > { %v2700_v7 = vpop.f32.mrf.mxu0  ;;  %v2862_v9 = vpop.f32.mrf.mxu1 }
0x147b   : > { %v2863_v10 = vadd.f32 %v4925_v6, %v2862_v9  ;;  %v2701_v31 = vadd.f32 %v4895_v27, %v2700_v7  ;;  %v5927_v6 = vld [vmem:[%s7136_s5 + $0xa0] sm:$0xff]  }
0x147c   : > { %v5606_v11 = vpop.f32.mrf.mxu0  ;;  %v5630_v12 = vpop.f32.mrf.mxu1 }
0x147d   : > { %v2928_v14 = vpack.c.bf16 %v2863_v10, %v2863_v10  ;;  %v2868_v35 = vpack.c.bf16 %v2701_v31, %v2701_v31  ;;  %v4959_v12 = vld [vmem:[%s7137_s6 + $0x5] ss:$0 sm:$0xff] }
0x147e   : > { %v2703_v15 = vpop.f32.mrf.mxu0  ;;  %v2865_v17 = vpop.f32.mrf.mxu1 }
0x147f   : > { %v2933_v18 = vand.u32 %v2928_v14, %v6263_v52  ;;  %v4974_v15 = vld [vmem:[%s7139_s8 + $0x5] ss:$0 sm:$0xff] }
0x1480   : > { %v5607_v19 = vpop.f32.mrf.mxu0  ;;  %v5631_v20 = vpop.f32.mrf.mxu1 }
0x1481   : > { %5639 = vmatpush3.bf16.msra.mxu1 %v2933_v18  ;;  %v4944_v20 = vld [vmem:[%s7135_s4 + $0x5] ss:$0 sm:$0xff] }
0x1482   : > { %5656 = vmatprep.subr.bf16.mxu1 %v6043_v8 }
0x148a   : > { %v2781_v22 = vpop.f32.mrf.mxu0 }
0x148b   : > { %v2782_v23 = vadd.f32 %v4910_v21, %v2781_v22 }
0x148c   : > { %v5618_v24 = vpop.f32.mrf.mxu0 }
0x148d   : > { %v2869_v25 = vpack.c.bf16 %v2782_v23, %v2782_v23 }
0x148e   : > { %v2784_v28 = vpop.f32.mrf.mxu0 }
0x148f   : > { %v2874_v29 = vsel %vm875_vm3, %v2869_v25, 0 }
0x1490   : > { %v5619_v30 = vpop.f32.mrf.mxu0  ;;  %5633 = vmatpush3.bf16.xpose.msra.mxu0 %v2874_v29 }
0x1491   : > { %5644 = vmatprep.subr.bf16.mxu0 %v6043_v8 }
0x1497   : > { %5635 = vmatmul.mubr.msk.bf16.vlgmr.msra.gmra.mxu0 %vm875_vm3, %v2868_v35 }
0x1498   : > { %5645 = vmatpush3.bf16.msra.mxu0 %v5916_v33  ;;  %5652 = vmatprep.mubr.msk.bf16.mxu0 %vm6044_vm1, %v6043_v8 }
0x1499   : > { %5646 = vmatprep.subr.bf16.mxu0 %v6043_v8 }
0x149c   : > { %5647 = vmatpush3.bf16.msra.mxu0 %v5917_v36 }
0x149d   : > { %5648 = vmatprep.subr.bf16.mxu0 %v6043_v8 }
0x14a0   : > { %5649 = vmatpush3.bf16.msra.mxu0 %v5918_v37 }
0x14a1   : > { %5650 = vmatprep.subr.bf16.mxu0 %v6043_v8 }
0x14a4   : > { %5651 = vmatpush3.bf16.msra.mxu0 %v5919_v26 }
0x14a5   : > { %5668 = vmatprep.subr.bf16.mxu0 %v6043_v8 }
0x14a7   : > { %5653 = vmatmul.mubr.msk.bf16.vlgmr.msra.gmra.mxu0 %vm671_vm2, %v6694_v2 }
0x14a8   : > { %5669 = vmatpush3.bf16.msra.mxu0 %v5920_v38  ;;  %5676 = vmatprep.mubr.msk.bf16.mxu0 %vm6044_vm1, %v6043_v8 }
0x14a9   : > { %5670 = vmatprep.subr.bf16.mxu0 %v6043_v8 }
0x14ac   : > { %5671 = vmatpush3.bf16.msra.mxu0 %v5921_v39 }
0x14ad   : > { %5672 = vmatprep.subr.bf16.mxu0 %v6043_v8 }
0x14b0   : > { %5673 = vmatpush3.bf16.msra.mxu0 %v5922_v41 }
0x14b1   : > { %5674 = vmatprep.subr.bf16.mxu0 %v6043_v8 }
0x14b4   : > { %5675 = vmatpush3.bf16.msra.mxu0 %v5923_v42  ;;  %v5933_v42 = vld [vmem:[%s7140_s9 + $0x28] sm:$0xff]  }
0x14b5   : > { %5692 = vmatprep.subr.bf16.mxu0 %v6043_v8 }
0x14b7   : > { %5677 = vmatmul.mubr.msk.bf16.vlgmr.msra.gmra.mxu0 %vm671_vm2, %v6694_v2 }
0x14b8   : > { %5694 = vmatprep.mubr.msk.bf16.mxu0 %vm6044_vm1, %v6043_v8  ;;  %5693 = vmatpush3.bf16.msra.mxu0 %v5933_v42 }
0x14b9   : > { %5704 = vmatprep.subr.bf16.mxu0 %v6043_v8 }
0x1557   : > { %v2910_v13 = vpop.f32.mrf.mxu0 }
0x1558   : > { %v2916_v32 = vsel %vm922_vm6, %v2910_v13, -inf }
0x1559   : > { %2917 = vmax.xlane.f32.xlu0 %v2916_v32  ;;  %v5636_v43 = vpop.f32.mrf.mxu0 }
0x155b   : > { %v2913_v44 = vpop.f32.mrf.mxu0 }
0x155c   : > { %v5928_v44 = vld [vmem:[%s7140_s9 + $0x20] sm:$0xff]  }
0x155d   : > { %v5637_v45 = vpop.f32.mrf.mxu0 }
0x1567   : > { %v3054_v16 = vpop.f32.mrf.mxu0 }
0x1568   : > { %v3055_v25 = vadd.f32 %v4944_v20, %v3054_v16  ;;  %v5929_v16 = vld [vmem:[%s7136_s5 + $0xd8] sm:$0xff]  }
0x1569   : > { %v5654_v46 = vpop.f32.mrf.mxu0 }
0x156a   : > { %v3222_v28 = vpack.c.bf16 %v3055_v25, %v3055_v25 }
0x156b   : > { %v3057_v47 = vpop.f32.mrf.mxu0 }
0x156c   : > { %v5930_v47 = vld [vmem:[%s7136_s5 + $0xd0] sm:$0xff]  }
0x156d   : > { %v5655_v48 = vpop.f32.mrf.mxu0 }
0x156e   : > { %v5931_v48 = vld [vmem:[%s7136_s5 + $0xc8] sm:$0xff]  }
0x1577   : > { %v3216_v49 = vpop.f32.mrf.mxu0 }
0x1578   : > { %v3217_v21 = vadd.f32 %v4974_v15, %v3216_v49  ;;  %v5932_v49 = vld [vmem:[%s7136_s5 + $0xc0] sm:$0xff]  }
0x1579   : > { %v5678_v50 = vpop.f32.mrf.mxu0  ;;  %v5941_v15 = vld [vmem:[%s7138_s7 + $0xc0] sm:$0xff]  }
0x157a   : > { %v3282_v27 = vpack.c.bf16 %v3217_v21, %v3217_v21 }
0x157b   : > { %v3219_v51 = vpop.f32.mrf.mxu0 }
0x157c   : > { %v3287_v29 = vand.u32 %v3282_v27, %v6263_v52  ;;  %v5934_v51 = vld [vmem:[%s7160_s25 + $0xd8] sm:$0xff]  }
0x157d   : > { %v5679_v53 = vpop.f32.mrf.mxu0 }
0x15e2   : > { %v2918_v54 = vpop.xlane.xlu0 %2917 }
0x15e3   : > { %v2919_v55 = vsub.f32 %v2910_v13, %v2918_v54 }
0x15e5   : > { %v2920_v56 = vmul.f32 1.442695, %v2919_v55 }
0x15e7   : > { %6010 = vpow2.f32 %v2920_v56  ;;  %v5935_v56 = vld [vmem:[%s7160_s25 + $0xd0] sm:$0xff]  }
0x15f4   : > { %v6011_v57 = vpop.eup %6010 }
0x15f5   : > { %v2922_v58 = vsel %vm922_vm6, %v6011_v57, 0.0 }
0x15f6   : > { %2923 = vadd.xlane.f32.xlu1 %v2922_v58 }
0x167f   : > { %v2924_v59 = vpop.xlane.xlu1 %2923 }
0x1680   : > { %6012 = vrcp.f32 %v2924_v59  ;;  %v5936_v59 = vld [vmem:[%s7160_s25 + $0xc8] sm:$0xff]  }
0x168d   : > { %v6013_v62 = vpop.eup %6012 }
0x168e   : > { %v2926_v0 = vmul.f32 %v6013_v62, %v6011_v57 }
0x1690   : > { %v2927_v3 = vpack.c.bf16 %v2926_v0, %v2926_v0 }
0x1692   : > { %5641 = vmatmul.mubr.msk.bf16.vlgmr.msra.gmra.mxu1 %vm936_vm7, %v2927_v3 }
0x1693   : > { %5657 = vmatpush3.bf16.msra.mxu1 %v5924_v1  ;;  %5664 = vmatprep.mubr.msk.bf16.mxu1 %vm6044_vm1, %v6043_v8  ;;  %v5937_v1 = vld [vmem:[%s7160_s25 + $0xc0] sm:$0xff]  }
0x1694   : > { %5658 = vmatprep.subr.bf16.mxu1 %v6043_v8 }
0x1697   : > { %5659 = vmatpush3.bf16.msra.mxu1 %v5925_v4  ;;  %v5938_v4 = vld [vmem:[%s7138_s7 + $0xd8] sm:$0xff]  }
0x1698   : > { %5660 = vmatprep.subr.bf16.mxu1 %v6043_v8 }
0x169b   : > { %5661 = vmatpush3.bf16.msra.mxu1 %v5926_v5  ;;  %v5939_v5 = vld [vmem:[%s7138_s7 + $0xd0] sm:$0xff]  }
0x169c   : > { %5662 = vmatprep.subr.bf16.mxu1 %v6043_v8 }
0x169f   : > { %5663 = vmatpush3.bf16.msra.mxu1 %v5927_v6  ;;  %v5012_v6 = vld [vmem:[%s7137_s6 + $0x6] ss:$0 sm:$0xff] }
0x16a0   : > { %5680 = vmatprep.subr.bf16.mxu1 %v6043_v8 }
0x16a2   : > { %5665 = vmatmul.mubr.msk.bf16.vlgmr.msra.gmra.mxu1 %vm671_vm2, %v6694_v2 }
0x16a3   : > { %5682 = vmatprep.mubr.msk.bf16.mxu1 %vm6044_vm1, %v6043_v8 }
0x1752   : > { %v2969_v7 = vpop.f32.mrf.mxu1 }
0x1753   : > { %v2975_v46 = vpack.c.bf16 %v2969_v7, %v2969_v7 }
0x1754   : > { %v5642_v9 = vpop.f32.mrf.mxu1 }
0x1755   : > { %v5940_v9 = vld [vmem:[%s7138_s7 + $0xc8] sm:$0xff]  }
0x1756   : > { %v2972_v10 = vpop.f32.mrf.mxu1 }
0x1758   : > { %v5643_v11 = vpop.f32.mrf.mxu1 }
0x1762   : > { %v3135_v14 = vpop.f32.mrf.mxu1 }
0x1763   : > { %v3136_v17 = vadd.f32 %v4959_v12, %v3135_v14 }
0x1764   : > { %v5666_v18 = vpop.f32.mrf.mxu1 }
0x1765   : > { %v3223_v19 = vpack.c.bf16 %v3136_v17, %v3136_v17 }
0x1766   : > { %v3138_v22 = vpop.f32.mrf.mxu1 }
0x1767   : > { %v3228_v23 = vsel %vm875_vm3, %v3223_v19, 0 }
0x1768   : > { %v5667_v24 = vpop.f32.mrf.mxu1  ;;  %5681 = vmatpush3.bf16.xpose.msra.mxu1 %v3228_v23  ;;  %v4997_v23 = vld [vmem:[%s7135_s4 + $0x6] ss:$0 sm:$0xff] }
0x1769   : > { %5686 = vmatprep.subr.bf16.mxu1 %v6043_v8 }
0x176f   : > { %5683 = vmatmul.mubr.msk.bf16.vlgmr.msra.gmra.mxu1 %vm875_vm3, %v3222_v28 }
0x1770   : > { %5687 = vmatpush3.bf16.msra.mxu1 %v3287_v29  ;;  %5688 = vmatprep.mubr.msk.bf16.mxu1 %vm6044_vm1, %v6043_v8 }
0x1771   : > { %5698 = vmatprep.subr.bf16.mxu1 %v6043_v8 }
0x182f   : > { %v3264_v30 = vpop.f32.mrf.mxu1 }
0x1830   : > { %v3270_v31 = vsel %vm922_vm6, %v3264_v30, -inf }
0x1831   : > { %3271 = vmax.xlane.f32.xlu0 %v3270_v31  ;;  %v5684_v33 = vpop.f32.mrf.mxu1  ;;  %v5027_v31 = vld [vmem:[%s7139_s8 + $0x6] ss:$0 sm:$0xff] }
0x1833   : > { %v3267_v35 = vpop.f32.mrf.mxu1 }
0x1835   : > { %v5685_v36 = vpop.f32.mrf.mxu1 }
0x18ba   : > { %v3272_v37 = vpop.xlane.xlu0 %3271 }
0x18bb   : > { %v3273_v26 = vsub.f32 %v3264_v30, %v3272_v37 }
0x18bd   : > { %v3274_v38 = vmul.f32 1.442695, %v3273_v26 }
0x18bf   : > { %6014 = vpow2.f32 %v3274_v38 }
0x18cc   : > { %v6015_v39 = vpop.eup %6014 }
0x18cd   : > { %v3276_v41 = vsel %vm922_vm6, %v6015_v39, 0.0 }
0x18ce   : > { %3277 = vadd.xlane.f32.xlu1 %v3276_v41 }
0x1957   : > { %v3278_v13 = vpop.xlane.xlu1 %3277 }
0x1958   : > { %6016 = vrcp.f32 %v3278_v13 }
0x1965   : > { %v6017_v32 = vpop.eup %6016 }
0x1966   : > { %v3280_v43 = vmul.f32 %v6017_v32, %v6015_v39 }
0x1968   : > { %v3281_v45 = vpack.c.bf16 %v3280_v43, %v3280_v43 }
0x196a   : > { %5689 = vmatmul.mubr.msk.bf16.vlgmr.msra.gmra.mxu1 %vm936_vm7, %v3281_v45 }
0x196b   : > { %5699 = vmatpush3.bf16.msra.mxu1 %v5928_v44  ;;  %5700 = vmatprep.mubr.msk.bf16.mxu1 %vm6044_vm1, %v6043_v8 }
0x196c   : > { %5716 = vmatprep.subr.bf16.mxu1 %v6043_v8 }
0x1972   : > { %5701 = vmatmul.mubr.msk.bf16.vlgmr.msra.gmra.mxu1 %vm875_vm3, %v2975_v46 }
0x1973   : > { %5717 = vmatpush3.bf16.msra.mxu1 %v5929_v16  ;;  %5724 = vmatprep.mubr.msk.bf16.mxu1 %vm6044_vm1, %v6043_v8 }
0x1974   : > { %5718 = vmatprep.subr.bf16.mxu1 %v6043_v8 }
0x1977   : > { %5719 = vmatpush3.bf16.msra.mxu1 %v5930_v47 }
0x1978   : > { %5720 = vmatprep.subr.bf16.mxu1 %v6043_v8 }
0x197b   : > { %5721 = vmatpush3.bf16.msra.mxu1 %v5931_v48  ;;  %v5950_v48 = vld [vmem:[%s7140_s9 + $0x30] sm:$0xff]  }
0x197c   : > { %5722 = vmatprep.subr.bf16.mxu1 %v6043_v8 }
0x197f   : > { %5723 = vmatpush3.bf16.msra.mxu1 %v5932_v49 }
0x1980   : > { %5740 = vmatprep.subr.bf16.mxu1 %v6043_v8 }
0x1982   : > { %5725 = vmatmul.mubr.msk.bf16.vlgmr.msra.gmra.mxu1 %vm671_vm2, %v6694_v2 }
0x1983   : > { %5742 = vmatprep.mubr.msk.bf16.mxu1 %vm6044_vm1, %v6043_v8 }
0x1a2a   : > { %v3323_v50 = vpop.f32.mrf.mxu1 }
0x1a2b   : > { %v3329_v53 = vpack.c.bf16 %v3323_v50, %v3323_v50 }
0x1a2c   : > { %v5690_v54 = vpop.f32.mrf.mxu1 }
0x1a2d   : > { %5695 = vmatmul.mubr.msk.bf16.vlgmr.msra.gmra.mxu0 %vm875_vm3, %v3329_v53  ;;  %v5942_v53 = vld [vmem:[%s7160_s25 + $0xf8] sm:$0xff]  }
0x1a2e   : > { %5705 = vmatpush3.bf16.msra.mxu0 %v5934_v51  ;;  %v3326_v55 = vpop.f32.mrf.mxu1  ;;  %5712 = vmatprep.mubr.msk.bf16.mxu0 %vm6044_vm1, %v6043_v8 }
0x1a2f   : > { %5706 = vmatprep.subr.bf16.mxu0 %v6043_v8  ;;  %v5943_v55 = vld [vmem:[%s7160_s25 + $0xf0] sm:$0xff]  }
0x1a30   : > { %v5691_v57 = vpop.f32.mrf.mxu1 }
0x1a31   : > { %v5945_v57 = vld [vmem:[%s7160_s25 + $0xe0] sm:$0xff]  }
0x1a32   : > { %5707 = vmatpush3.bf16.msra.mxu0 %v5935_v56  ;;  %v6864_v58 = vpop.f32.mrf.mxu1  ;;  %v5944_v56 = vld [vmem:[%s7160_s25 + $0xe8] sm:$0xff]  }
0x1a33   : > { %5708 = vmatprep.subr.bf16.mxu0 %v6043_v8 }
0x1a34   : > { %v5702_v62 = vpop.f32.mrf.mxu1 }
0x1a35   : > { %v5947_v62 = vld [vmem:[%s7138_s7 + $0xf0] sm:$0xff]  }
0x1a36   : > { %5709 = vmatpush3.bf16.msra.mxu0 %v5936_v59  ;;  %v3428_v0 = vpop.f32.mrf.mxu1  ;;  %v5946_v59 = vld [vmem:[%s7138_s7 + $0xf8] sm:$0xff]  }
0x1a37   : > { %5710 = vmatprep.subr.bf16.mxu0 %v6043_v8  ;;  %v5948_v0 = vld [vmem:[%s7138_s7 + $0xe8] sm:$0xff]  }
0x1a38   : > { %v5703_v3 = vpop.f32.mrf.mxu1 }
0x1a3a   : > { %5711 = vmatpush3.bf16.msra.mxu0 %v5937_v1  ;;  %v5949_v1 = vld [vmem:[%s7138_s7 + $0xe0] sm:$0xff]  }
0x1a3b   : > { %5728 = vmatprep.subr.bf16.mxu0 %v6043_v8 }
0x1a3d   : > { %5713 = vmatmul.mubr.msk.bf16.vlgmr.msra.gmra.mxu0 %vm671_vm2, %v6694_v2 }
0x1a3e   : > { %5729 = vmatpush3.bf16.msra.mxu0 %v5938_v4  ;;  %5736 = vmatprep.mubr.msk.bf16.mxu0 %vm6044_vm1, %v6043_v8  ;;  %v5951_v4 = vld [vmem:[%s7136_s5 + $0xf8] sm:$0xff]  }
0x1a3f   : > { %5730 = vmatprep.subr.bf16.mxu0 %v6043_v8 }
0x1a42   : > { %v3587_v7 = vpop.f32.mrf.mxu1  ;;  %5731 = vmatpush3.bf16.msra.mxu0 %v5939_v5 }
0x1a43   : > { %v3588_v10 = vadd.f32 %v5012_v6, %v3587_v7  ;;  %5732 = vmatprep.subr.bf16.mxu0 %v6043_v8 }
0x1a44   : > { %v5726_v11 = vpop.f32.mrf.mxu1 }
0x1a45   : > { %v3675_v12 = vpack.c.bf16 %v3588_v10, %v3588_v10  ;;  %v5953_v11 = vld [vmem:[%s7136_s5 + $0xe8] sm:$0xff]  }
0x1a46   : > { %v3590_v14 = vpop.f32.mrf.mxu1  ;;  %5733 = vmatpush3.bf16.msra.mxu0 %v5940_v9  ;;  %v5952_v9 = vld [vmem:[%s7136_s5 + $0xf0] sm:$0xff]  }
0x1a47   : > { %v3680_v17 = vsel %vm875_vm3, %v3675_v12, 0  ;;  %5734 = vmatprep.subr.bf16.mxu0 %v6043_v8  ;;  %v5954_v12 = vld [vmem:[%s7136_s5 + $0xe0] sm:$0xff]  }
0x1a48   : > { %v5727_v18 = vpop.f32.mrf.mxu1  ;;  %5741 = vmatpush3.bf16.xpose.msra.mxu1 %v3680_v17 }
0x1a49   : > { %5746 = vmatprep.subr.bf16.mxu1 %v6043_v8 }
0x1a4a   : > { %5735 = vmatpush3.bf16.msra.mxu0 %v5941_v15 }
0x1a4b   : > { %5752 = vmatprep.subr.bf16.mxu0 %v6043_v8 }
0x1a4d   : > { %5737 = vmatmul.mubr.msk.bf16.vlgmr.msra.gmra.mxu0 %vm671_vm2, %v6694_v2 }
0x1a4e   : > { %5754 = vmatprep.mubr.msk.bf16.mxu0 %vm6044_vm1, %v6043_v8  ;;  %5753 = vmatpush3.bf16.msra.mxu0 %v5950_v48 }
0x1a4f   : > { %5770 = vmatprep.subr.bf16.mxu0 %v6043_v8 }
0x1aed   : > { %v6904_v19 = vpop.f32.mrf.mxu0 }
0x1aef   : > { %v5696_v20 = vpop.f32.mrf.mxu0 }
0x1af1   : > { %v3379_v21 = vpop.f32.mrf.mxu0 }
0x1af3   : > { %v5697_v22 = vpop.f32.mrf.mxu0 }
0x1afd   : > { %v3506_v24 = vpop.f32.mrf.mxu0 }
0x1afe   : > { %v3507_v25 = vadd.f32 %v4997_v23, %v3506_v24  ;;  %v3426_v24 = vadd.f32 %v6864_v58, %v6904_v19  ;;  %v5048_v58 = vld [vmem:[%s7135_s4 + $0x7] ss:$0 sm:$0xff] }
0x1aff   : > { %v5714_v27 = vpop.f32.mrf.mxu0 }
0x1b00   : > { %v3674_v28 = vpack.c.bf16 %v3507_v25, %v3507_v25 }
0x1b01   : > { %v3509_v29 = vpop.f32.mrf.mxu0 }
0x1b02   : > { %5743 = vmatmul.mubr.msk.bf16.vlgmr.msra.gmra.mxu1 %vm875_vm3, %v3674_v28 }
0x1b03   : > { %v5715_v30 = vpop.f32.mrf.mxu0  ;;  %5748 = vmatprep.mubr.msk.bf16.mxu1 %vm6044_vm1, %v6043_v8 }
0x1b0d   : > { %v3668_v33 = vpop.f32.mrf.mxu0 }
0x1b0e   : > { %v3669_v35 = vadd.f32 %v5027_v31, %v3668_v33  ;;  %v5078_v33 = vld [vmem:[%s7139_s8 + $0x7] ss:$0 sm:$0xff] }
0x1b0f   : > { %v5738_v36 = vpop.f32.mrf.mxu0 }
0x1b10   : > { %v3734_v37 = vpack.c.bf16 %v3669_v35, %v3669_v35 }
0x1b11   : > { %v3671_v26 = vpop.f32.mrf.mxu0 }
0x1b12   : > { %v3739_v38 = vand.u32 %v3734_v37, %v6263_v52 }
0x1b13   : > { %v5739_v39 = vpop.f32.mrf.mxu0 }
0x1b14   : > { %5747 = vmatpush3.bf16.msra.mxu1 %v3739_v38 }
0x1b15   : > { %5758 = vmatprep.subr.bf16.mxu1 %v6043_v8 }
0x1bc2   : > { %v3716_v41 = vpop.f32.mrf.mxu1 }
0x1bc3   : > { %v3722_v42 = vsel %vm922_vm6, %v3716_v41, -inf }
0x1bc4   : > { %3723 = vmax.xlane.f32.xlu0 %v3722_v42  ;;  %v5744_v13 = vpop.f32.mrf.mxu1 }
0x1bc6   : > { %v3719_v32 = vpop.f32.mrf.mxu1 }
0x1bc8   : > { %v5745_v43 = vpop.f32.mrf.mxu1 }
0x1c4d   : > { %v3724_v44 = vpop.xlane.xlu0 %3723 }
0x1c4e   : > { %v3725_v45 = vsub.f32 %v3716_v41, %v3724_v44 }
0x1c50   : > { %v3726_v16 = vmul.f32 1.442695, %v3725_v45 }
0x1c52   : > { %6018 = vpow2.f32 %v3726_v16 }
0x1c5f   : > { %v6019_v46 = vpop.eup %6018 }
0x1c60   : > { %v3728_v47 = vsel %vm922_vm6, %v6019_v46, 0.0 }
0x1c61   : > { %3729 = vadd.xlane.f32.xlu1 %v3728_v47 }
0x1cea   : > { %v3730_v49 = vpop.xlane.xlu1 %3729 }
0x1ceb   : > { %6020 = vrcp.f32 %v3730_v49 }
0x1cf8   : > { %v6021_v50 = vpop.eup %6020 }
0x1cf9   : > { %v3732_v51 = vmul.f32 %v6021_v50, %v6019_v46 }
0x1cfb   : > { %v3733_v54 = vpack.c.bf16 %v3732_v51, %v3732_v51  ;;  %v5955_v51 = vld [vmem:[%s7140_s9 + $0x38] sm:$0xff]  }
0x1cfd   : > { %5749 = vmatmul.mubr.msk.bf16.vlgmr.msra.gmra.mxu1 %vm936_vm7, %v3733_v54 }
0x1cfe   : > { %5759 = vmatpush3.bf16.msra.mxu1 %v5942_v53  ;;  %5766 = vmatprep.mubr.msk.bf16.mxu1 %vm6044_vm1, %v6043_v8 }
0x1cff   : > { %5760 = vmatprep.subr.bf16.mxu1 %v6043_v8 }
0x1d02   : > { %5761 = vmatpush3.bf16.msra.mxu1 %v5943_v55 }
0x1d03   : > { %5762 = vmatprep.subr.bf16.mxu1 %v6043_v8 }
0x1d06   : > { %5763 = vmatpush3.bf16.msra.mxu1 %v5944_v56 }
0x1d07   : > { %5764 = vmatprep.subr.bf16.mxu1 %v6043_v8 }
0x1d0a   : > { %5765 = vmatpush3.bf16.msra.mxu1 %v5945_v57 }
0x1d0b   : > { %5782 = vmatprep.subr.bf16.mxu1 %v6043_v8 }
0x1d0d   : > { %5767 = vmatmul.mubr.msk.bf16.vlgmr.msra.gmra.mxu1 %vm671_vm2, %v6694_v2 }
0x1d0e   : > { %5783 = vmatpush3.bf16.msra.mxu1 %v5946_v59  ;;  %5790 = vmatprep.mubr.msk.bf16.mxu1 %vm6044_vm1, %v6043_v8 }
0x1d0f   : > { %5784 = vmatprep.subr.bf16.mxu1 %v6043_v8 }
0x1d12   : > { %5785 = vmatpush3.bf16.msra.mxu1 %v5947_v62 }
0x1d13   : > { %5786 = vmatprep.subr.bf16.mxu1 %v6043_v8 }
0x1d16   : > { %5787 = vmatpush3.bf16.msra.mxu1 %v5948_v0 }
0x1d17   : > { %5788 = vmatprep.subr.bf16.mxu1 %v6043_v8 }
0x1d1a   : > { %5789 = vmatpush3.bf16.msra.mxu1 %v5949_v1 }
0x1d1b   : > { %5806 = vmatprep.subr.bf16.mxu1 %v6043_v8 }
0x1d1d   : > { %5791 = vmatmul.mubr.msk.bf16.vlgmr.msra.gmra.mxu1 %vm671_vm2, %v6694_v2 }
0x1d1e   : > { %5808 = vmatprep.mubr.msk.bf16.mxu1 %vm6044_vm1, %v6043_v8  ;;  %5807 = vmatpush3.bf16.msra.mxu1 %v5955_v51 }
0x1dbd   : > { %v3775_v3 = vpop.f32.mrf.mxu1 }
0x1dbe   : > { %v3781_v5 = vpack.c.bf16 %v3775_v3, %v3775_v3 }
0x1dbf   : > { %v5750_v6 = vpop.f32.mrf.mxu1 }
0x1dc0   : > { %5755 = vmatmul.mubr.msk.bf16.vlgmr.msra.gmra.mxu0 %vm875_vm3, %v3781_v5 }
0x1dc1   : > { %5771 = vmatpush3.bf16.msra.mxu0 %v5951_v4  ;;  %v3778_v7 = vpop.f32.mrf.mxu1  ;;  %5778 = vmatprep.mubr.msk.bf16.mxu0 %vm6044_vm1, %v6043_v8  ;;  %v5091_v4 = vld [vmem:[%s7141_s10 + $0x1] ss:$0 sm:$0xff] }
0x1dc2   : > { %5772 = vmatprep.subr.bf16.mxu0 %v6043_v8 }
0x1dc3   : > { %v5751_v10 = vpop.f32.mrf.mxu1 }
0x1dc5   : > { %5773 = vmatpush3.bf16.msra.mxu0 %v5952_v9 }
0x1dc6   : > { %5774 = vmatprep.subr.bf16.mxu0 %v6043_v8 }
0x1dc9   : > { %5775 = vmatpush3.bf16.msra.mxu0 %v5953_v11 }
0x1dca   : > { %5776 = vmatprep.subr.bf16.mxu0 %v6043_v8 }
0x1dcd   : > { %v3910_v14 = vpop.f32.mrf.mxu1  ;;  %5777 = vmatpush3.bf16.msra.mxu0 %v5954_v12 }
0x1dce   : > { %5794 = vmatprep.subr.bf16.mxu0 %v6043_v8  ;;  %v3911_v41 = vadd.f32 %v5048_v58, %v3910_v14  ;;  %v5968_v58 = vld [vmem:[%s7146_s15 + $0xf8] sm:$0xff]  }
0x1dcf   : > { %v5768_v15 = vpop.f32.mrf.mxu1  ;;  %5358 = vmatprep.subr.bf16.mxu1 %v5968_v58 }
0x1dd0   : > { %5779 = vmatmul.mubr.msk.bf16.vlgmr.msra.gmra.mxu0 %vm671_vm2, %v6694_v2  ;;  %v5063_v2 = vld [vmem:[%s7137_s6 + $0x7] ss:$0 sm:$0xff]  ;;  %v4078_v13 = vpack.c.bf16 %v3911_v41, %v3911_v41  ;;  %v5973_v41 = vld [vmem:[%s7146_s15 + $0xa8] sm:$0xff]  }
0x1dd1   : > { %v3913_v17 = vpop.f32.mrf.mxu1  ;;  %5796 = vmatprep.mubr.msk.bf16.mxu0 %vm6044_vm1, %v6043_v8 }
0x1dd3   : > { %v5769_v18 = vpop.f32.mrf.mxu1 }
0x1dd4   : > { %v5956_v18 = vld [vmem:[%s7144_s13 + $0x70] ss:$8 sps:$4 sm:$0xff]  }
0x1ddd   : > { %v4072_v20 = vpop.f32.mrf.mxu1 }
0x1dde   : > { %v4073_v19 = vadd.f32 %v5078_v33, %v4072_v20  ;;  %v5961_v20 = vld [vmem:[%s7144_s13 + $0x64] ss:$8 sps:$4 sm:$0xff]   ;;  %v5095_v33 = vld [vmem:[%s7143_s12 + $0x1] ss:$0 sm:$0xff] }
0x1ddf   : > { %v5792_v21 = vpop.f32.mrf.mxu1 }
0x1de0   : > { %v4138_v42 = vpack.c.bf16 %v4073_v19, %v4073_v19  ;;  %v5959_v21 = vld [vmem:[%s7144_s13 + $0x60] ss:$8 sps:$4 sm:$0xff]   ;;  %v5969_v19 = vld [vmem:[%s7146_s15 + $0xb8] sm:$0xff]  }
0x1de1   : > { %v4075_v22 = vpop.f32.mrf.mxu1 }
0x1de2   : > { %v4143_v32 = vand.u32 %v4138_v42, %v6263_v52  ;;  %v5964_v22 = vld [vmem:[%s7144_s13 + $0x54] ss:$8 sps:$4 sm:$0xff]   ;;  %v5974_v42 = vld [vmem:[%s7146_s15 + $0xe0] sm:$0xff]  }
0x1de3   : > { %v5793_v23 = vpop.f32.mrf.mxu1 }
0x1de4   : > { %v5962_v23 = vld [vmem:[%s7144_s13 + $0x50] ss:$8 sps:$4 sm:$0xff]  }
0x1e80   : > { %v3828_v25 = vpop.f32.mrf.mxu0 }
0x1e81   : > { %v3834_v27 = vadd.f32 %v3828_v25, %v3426_v24  ;;  %v5967_v24 = vld [vmem:[%s7144_s13 + $0x44] ss:$8 sps:$4 sm:$0xff]   ;;  %v5965_v25 = vld [vmem:[%s7144_s13 + $0x40] ss:$8 sps:$4 sm:$0xff]  }
0x1e82   : > { %v5756_v28 = vpop.f32.mrf.mxu0 }
0x1e84   : > { %v3831_v29 = vpop.f32.mrf.mxu0 }
0x1e86   : > { %v5757_v30 = vpop.f32.mrf.mxu0 }
0x1e90   : > { %v3991_v31 = vpop.f32.mrf.mxu0 }
0x1e91   : > { %v3992_v35 = vadd.f32 %v5063_v2, %v3991_v31  ;;  %v5094_v2 = vld [vmem:[%s7142_s11 + $0x1] ss:$0 sm:$0xff] }
0x1e92   : > { %v5780_v36 = vpop.f32.mrf.mxu0 }
0x1e93   : > { %v4079_v37 = vpack.c.bf16 %v3992_v35, %v3992_v35 }
0x1e94   : > { %v3994_v26 = vpop.f32.mrf.mxu0 }
0x1e95   : > { %v4084_v38 = vsel %vm875_vm3, %v4079_v37, 0  ;;  %v5970_v26 = vld [vmem:[%s7146_s15 + $0xf0] sm:$0xff]  }
0x1e96   : > { %v5781_v39 = vpop.f32.mrf.mxu0  ;;  %5795 = vmatpush3.bf16.xpose.msra.mxu0 %v4084_v38  ;;  %v5971_v38 = vld [vmem:[%s7146_s15 + $0xb0] sm:$0xff]  }
0x1e97   : > { %5800 = vmatprep.subr.bf16.mxu0 %v6043_v8  ;;  %v5972_v39 = vld [vmem:[%s7146_s15 + $0xe8] sm:$0xff]  }
0x1e9d   : > { %5797 = vmatmul.mubr.msk.bf16.vlgmr.msra.gmra.mxu0 %vm875_vm3, %v4078_v13  ;;  %v5975_v13 = vld [vmem:[%s7146_s15 + $0xa0] sm:$0xff]  }
0x1e9e   : > { %5801 = vmatpush3.bf16.msra.mxu0 %v4143_v32  ;;  %5802 = vmatprep.mubr.msk.bf16.mxu0 %vm6044_vm1, %v6043_v8  ;;  %v5976_v32 = vld [vmem:[%s7146_s15 + $0xd8] sm:$0xff]  }
0x1f5d   : > { %v4120_v43 = vpop.f32.mrf.mxu0 }
0x1f5e   : > { %v4126_v44 = vsel %vm922_vm6, %v4120_v43, -inf }
0x1f5f   : > { %4127 = vmax.xlane.f32.xlu0 %v4126_v44  ;;  %v5798_v45 = vpop.f32.mrf.mxu0  ;;  %v5978_v44 = vld [vmem:[%s7146_s15 + $0xd0] sm:$0xff]  }
0x1f60   : > { %v5979_v45 = vld [vmem:[%s7146_s15 + $0x90] sm:$0xff]  }
0x1f61   : > { %v4123_v16 = vpop.f32.mrf.mxu0 }
0x1f62   : > { %v5980_v16 = vld [vmem:[%s7146_s15 + $0xc8] sm:$0xff]  }
0x1f63   : > { %v5799_v46 = vpop.f32.mrf.mxu0 }
0x1f64   : > { %v5981_v46 = vld [vmem:[%s7146_s15 + $0x88] sm:$0xff]  }
0x1fe8   : > { %v4128_v47 = vpop.xlane.xlu0 %4127 }
0x1fe9   : > { %v4129_v48 = vsub.f32 %v4120_v43, %v4128_v47  ;;  %v5977_v43 = vld [vmem:[%s7146_s15 + $0x98] sm:$0xff]   ;;  %v5982_v47 = vld [vmem:[%s7146_s15 + $0xc0] sm:$0xff]  }
0x1feb   : > { %v4130_v49 = vmul.f32 1.442695, %v4129_v48  ;;  %v5983_v48 = vld [vmem:[%s7146_s15 + $0x80] sm:$0xff]  }
0x1fed   : > { %6022 = vpow2.f32 %v4130_v49  ;;  %v5104_v49 = vld [vmem:[%s7145_s14 + $0x2] sm:$0x3] }
0x1ffa   : > { %v6023_v50 = vpop.eup %6022 }
0x1ffb   : > { %v4132_v52 = vsel %vm922_vm6, %v6023_v50, 0.0 }
0x1ffc   : > { %4133 = vadd.xlane.f32.xlu1 %v4132_v52  ;;  %v4300_v52 = vrot.slane %v5104_v49, %v2305_v63 }
0x2085   : > { %v4134_v8 = vpop.xlane.xlu1 %4133 }
0x2086   : > { %6024 = vrcp.f32 %v4134_v8 }
0x2093   : > { %v6025_v53 = vpop.eup %6024 }
0x2094   : > { %v4136_v54 = vmul.f32 %v6025_v53, %v6023_v50  ;;  %v4296_v50 = vrot.slane %v5104_v49, %v2301_v61 }
0x2096   : > { %v4137_v55 = vpack.c.bf16 %v4136_v54, %v4136_v54 }
0x2098   : > { %5803 = vmatmul.mubr.msk.bf16.vlgmr.msra.gmra.mxu0 %vm936_vm7, %v4137_v55 }
0x2099   : > { %4378 = vmatprep.mubr.bf16.mxu0 %v6046_v34 }
0x2158   : > { %v4179_v56 = vpop.f32.mrf.mxu0 }
0x2159   : > { %v4185_v57 = vpack.c.bf16 %v4179_v56, %v4179_v56 }
0x215a   : > { %v5804_v59 = vpop.f32.mrf.mxu0 }
0x215b   : > { %5809 = vmatmul.mubr.msk.bf16.vlgmr.msra.gmra.mxu1 %vm875_vm3, %v4185_v57 }
0x215c   : > { %v4182_v62 = vpop.f32.mrf.mxu0  ;;  %5359 = vmatpush3.bf16.msra.mxu1 %v5969_v19  ;;  %v5165_v19 = vld [vmem:[%s7149_s18] ss:$0 sm:$0xff] }
0x215d   : > { %5360 = vmatprep.subr.bf16.mxu1 %v5970_v26 }
0x215e   : > { %v5805_v0 = vpop.f32.mrf.mxu0 }
0x2160   : > { %5361 = vmatpush3.bf16.msra.mxu1 %v5971_v38 }
0x2161   : > { %5362 = vmatprep.subr.bf16.mxu1 %v5972_v39 }
0x2164   : > { %5363 = vmatpush3.bf16.msra.mxu1 %v5973_v41 }
0x2165   : > { %5364 = vmatprep.subr.bf16.mxu1 %v5974_v42 }
0x2168   : > { %5365 = vmatpush3.bf16.msra.mxu1 %v5975_v13 }
0x2169   : > { %5366 = vmatprep.subr.bf16.mxu1 %v5976_v32 }
0x216c   : > { %5367 = vmatpush3.bf16.msra.mxu1 %v5977_v43 }
0x216d   : > { %5368 = vmatprep.subr.bf16.mxu1 %v5978_v44 }
0x2170   : > { %5369 = vmatpush3.bf16.msra.mxu1 %v5979_v45 }
0x2171   : > { %5370 = vmatprep.subr.bf16.mxu1 %v5980_v16 }
0x2174   : > { %5371 = vmatpush3.bf16.msra.mxu1 %v5981_v46 }
0x2175   : > { %5372 = vmatprep.subr.bf16.mxu1 %v5982_v47 }
0x2178   : > { %5373 = vmatpush3.bf16.msra.mxu1 %v5983_v48 }
0x221b   : > { %v4232_v1 = vpop.f32.mrf.mxu1 }
0x221c   : > { %v4238_v3 = vadd.f32 %v4232_v1, %v3834_v27 }
0x221d   : > { %v5810_v5 = vpop.f32.mrf.mxu1 }
0x221e   : > { %v4239_v6 = vadd.f32 %v4238_v3, %v6647_v40  ;;  %v5958_v40 = vld [vmem:[%s7144_s13 + $0x74] ss:$8 sps:$4 sm:$0xff]  }
0x221f   : > { %v4235_v7 = vpop.f32.mrf.mxu1  ;;  %4354 = vmatprep.subr.bf16.mxu0 %v5958_v40 }
0x2220   : > { %v7018_v9 = vadd.f32 %v5091_v4, %v4239_v6  ;;  %4355 = vmatpush1.bf16.msra.mxu0 %v5956_v18 }
0x2221   : > { %v5811_v34 = vpop.f32.mrf.mxu1  ;;  %4356 = vmatprep.subr.bf16.mxu0 %v5961_v20 }
0x2222   : > { %v4253_v10 = vsel %vm602_vm0, %v7018_v9, 0.0 }
0x2223   : > { %4254 = vadd.xlane.f32.xlu0 %v4253_v10 }
0x2224   : > { %4357 = vmatpush1.bf16.msra.mxu0 %v5959_v21 }
0x2225   : > { %4358 = vmatprep.subr.bf16.mxu0 %v5964_v22  ;;  %v5163_v22 = vld [vmem:[%s7147_s16 + $0x1] ss:$0 sm:$0xff] }
0x2228   : > { %4359 = vmatpush1.bf16.msra.mxu0 %v5962_v23 }
0x2229   : > { %4360 = vmatprep.subr.bf16.mxu0 %v5967_v24 }
0x222c   : > { %4361 = vmatpush1.bf16.msra.mxu0 %v5965_v25 }
0x22ac   : > { %v4255_v11 = vpop.xlane.xlu0 %4254 }
0x22ad   : > { %v4256_v12 = vmul.f32 0.015625, %v4255_v11 }
0x22af   : > { %v4257_v14 = vsub.f32 %v7018_v9, %v4256_v12 }
0x22b1   : > { %v4258_v15 = vmul.f32 %v4257_v14, %v4257_v14 }
0x22b3   : > { %v4259_v17 = vsel %vm602_vm0, %v4258_v15, 0.0 }
0x22b4   : > { %4260 = vadd.xlane.f32.xlu1 %v4259_v17 }
0x233d   : > { %v4261_v27 = vpop.xlane.xlu1 %4260 }
0x233e   : > { %v4262_v28 = vmul.f32 0.015625, %v4261_v27 }
0x2340   : > { %v4263_v29 = vadd.f32 1e-05, %v4262_v28 }
0x2342   : > { %6026 = vrsqrt.f32 %v4263_v29 }
0x234f   : > { %v6027_v30 = vpop.eup %6026 }
0x2350   : > { %v4265_v31 = vmul.f32 %v6027_v30, %v4257_v14 }
0x2352   : > { %v4272_v35 = vmul.f32 %v5094_v2, %v4265_v31 }
0x2354   : > { %v4279_v36 = vadd.f32 %v5095_v33, %v4272_v35 }
0x2356   : > { %v4280_v37 = vpack.c.bf16 %v4279_v36, %v4279_v36 }
0x2358   : > { %5113 = vmatmul.mubr.msk.bf16.vlgmr.msra.gmra.mxu0 %vm671_vm2, %v4280_v37 }
0x2418   : > { %v4380_v51 = vpop.f32.mrf.mxu0 }
0x2419   : > { %v4381_v8 = vadd.f32 %v4380_v51, %v4296_v50 }
0x241a   : > { %v4382_v53 = vpop.f32.mrf.mxu0 }
0x241b   : > { %v4389_v54 = vmul.f32 0.044715, %v4381_v8  ;;  %v4383_v55 = vadd.f32 %v4382_v53, %v4300_v52  ;;  %v4387_v34 = vmul.f32 0.5, %v4381_v8 }
0x241c   : > { %v4384_v56 = vpop.f32.mrf.mxu0 }
0x241d   : > { %v4391_v57 = vmul.f32 %v4389_v54, %v4381_v8  ;;  %v4390_v59 = vmul.f32 0.044715, %v4383_v55  ;;  %v4388_v10 = vmul.f32 0.5, %v4383_v55 }
0x241e   : > { %v4385_v62 = vpop.f32.mrf.mxu0 }
0x241f   : > { %v4393_v0 = vmul.f32 %v4391_v57, %v4381_v8  ;;  %v4392_v1 = vmul.f32 %v4390_v59, %v4383_v55 }
0x2421   : > { %v4395_v3 = vadd.f32 %v4393_v0, %v4381_v8  ;;  %v4394_v4 = vmul.f32 %v4392_v1, %v4383_v55 }
0x2423   : > { %v4397_v5 = vmul.f32 0.7978846, %v4395_v3  ;;  %v4396_v6 = vadd.f32 %v4394_v4, %v4383_v55 }
0x2425   : > { %v4398_v7 = vmul.f32 0.7978846, %v4396_v6  ;;  %6028 = vtanh.f32 %v4397_v5 }
0x2427   : > { %6030 = vtanh.f32 %v4398_v7 }
0x2432   : > { %v6029_v60 = vpop.eup %6028 }
0x2433   : > { %v4401_v61 = vadd.f32 1.0, %v6029_v60 }
0x2434   : > { %v6031_v63 = vpop.eup %6030 }
0x2435   : > { %v4402_v11 = vadd.f32 1.0, %v6031_v63  ;;  %v4403_v12 = vmul.f32 %v4401_v61, %v4387_v34 }
0x2437   : > { %v4404_v14 = vmul.f32 %v4402_v11, %v4388_v10  ;;  %v4405_v17 = vpack.c.bf16 %v4403_v12, %v4403_v12 }
0x2439   : > { %v4406_v15 = vpack.c.bf16 %v4404_v14, %v4404_v14 }
0x243b   : > { %4568 = vmatprep.mubr.bf16.mxu1 %v4406_v15 }
0x243c   : > { %4569 = vmatmul.mubr.bf16.vlgmr.msra.gmra.mxu1 %v4405_v17 }
0x24fc   : > { %v5374_v40 = vpop.f32.mrf.mxu1 }
0x24fe   : > { %v5375_v18 = vpop.f32.mrf.mxu1 }
0x24ff   : > { %v5376_v20 = vadd.f32 %v5375_v18, %v5374_v40 }
0x2500   : > { %v5377_v21 = vpop.f32.mrf.mxu1 }
0x2501   : > { %v4576_v23 = vadd.f32 %v5376_v20, %v7018_v9  ;;  %v5164_v9 = vld [vmem:[%s7148_s17] ss:$0 sm:$0xff] }
0x2502   : > { %v5378_v24 = vpop.f32.mrf.mxu1 }
0x2503   : > { %v4585_v25 = vadd.f32 %v5163_v22, %v4576_v23 }
0x2505   : > { %v4588_v27 = vsel %vm602_vm0, %v4585_v25, 0.0 }
0x2506   : > { %4589 = vadd.xlane.f32.xlu0 %v4588_v27 }
0x258f   : > { %v4590_v28 = vpop.xlane.xlu0 %4589 }
0x2590   : > { %v4591_v29 = vmul.f32 0.015625, %v4590_v28 }
0x2592   : > { %v4592_v30 = vsub.f32 %v4585_v25, %v4591_v29 }
0x2594   : > { %v4593_v2 = vmul.f32 %v4592_v30, %v4592_v30 }
0x2596   : > { %v4594_v31 = vsel %vm602_vm0, %v4593_v2, 0.0 }
0x2597   : > { %4595 = vadd.xlane.f32.xlu1 %v4594_v31 }
0x2620   : > { %v4596_v33 = vpop.xlane.xlu1 %4595 }
0x2621   : > { %v4597_v35 = vmul.f32 0.015625, %v4596_v33 }
0x2623   : > { %v4598_v36 = vadd.f32 1e-05, %v4597_v35 }
0x2625   : > { %6032 = vrsqrt.f32 %v4598_v36 }
0x2632   : > { %v6033_v37 = vpop.eup %6032 }
0x2633   : > { %v4600_v58 = vmul.f32 %v6033_v37, %v4592_v30 }
0x2635   : > { %v4607_v26 = vmul.f32 %v5164_v9, %v4600_v58 }
0x2637   : > { %v4614_v38 = vadd.f32 %v5165_v19, %v4607_v26 }
0x2639   : > { %4615 = vst.msk [vmem:[%s597_s29] sm:$0x7] %vm602_vm0, %v4614_v38 }
0x263a PF: > { %s29_s0 = sadd.s32 1, %s6041_s0  }
0x263b   : > { %p26_p4 = scmp.ge.s32.totalorder %s29_s0, 4  }
0x263d   :  { %28 = sbr.rel (!%p26_p4) target bundleno = 5 (0x5), region = 184 }

// kernel: _lambda_.9
= control target key start
LH: loop header
LB: loop body
LE: loop exit
PB: predicated region body
PF: predicated region fallthrough
CT: control target
= control target key end

     0   :  { %s7664_s0 = inlined_call_operand.vmem [shape: f32[2,9,64], index: 0, kind: input, shape index: {}]   ;;  %s7665_s1 = inlined_call_operand.vmem [shape: f32[9,64], index: 1, kind: input, shape index: {}]   ;;  %s7666_s2 = inlined_call_operand.vmem [shape: f32[2,1,64], index: 2, kind: input, shape index: {}]   ;;  %s7667_s3 = inlined_call_operand.vmem [shape: f32[2,1,64], index: 3, kind: input, shape index: {}]   ;;  %s7668_s4 = inlined_call_operand.vmem [shape: bf16[8,64,16], index: 4, kind: input, shape index: {}]   ;;  %s7669_s5 = inlined_call_operand.vmem [shape: f32[8,1,16], index: 5, kind: input, shape index: {}]   ;;  %s7670_s6 = inlined_call_operand.vmem [shape: bf16[8,64,16], index: 6, kind: input, shape index: {}]   ;;  %s7671_s7 = inlined_call_operand.vmem [shape: f32[8,1,16], index: 7, kind: input, shape index: {}]   ;;  %s7672_s8 = inlined_call_operand.vmem [shape: bf16[8,64,16], index: 8, kind: input, shape index: {}]   ;;  %s7673_s9 = inlined_call_operand.vmem [shape: f32[8,1,16], index: 9, kind: input, shape index: {}]   ;;  %s7674_s10 = inlined_call_operand.vmem [shape: bf16[8,16,64], index: 10, kind: input, shape index: {}]   ;;  %s7675_s11 = inlined_call_operand.vmem [shape: f32[2,1,64], index: 11, kind: input, shape index: {}]   ;;  %s7676_s12 = inlined_call_operand.vmem [shape: f32[2,1,64], index: 12, kind: input, shape index: {}]   ;;  %s7677_s13 = inlined_call_operand.vmem [shape: f32[2,1,64], index: 13, kind: input, shape index: {}]   ;;  %s7678_s14 = inlined_call_operand.vmem [shape: bf16[2,64,256], index: 14, kind: input, shape index: {}]   ;;  %s7679_s15 = inlined_call_operand.vmem [shape: f32[2,1,256], index: 15, kind: input, shape index: {}]   ;;  %s7680_s16 = inlined_call_operand.vmem [shape: bf16[2,256,64], index: 16, kind: input, shape index: {}]   ;;  %s7681_s17 = inlined_call_operand.vmem [shape: f32[2,1,64], index: 17, kind: input, shape index: {}]   ;;  %s7682_s18 = inlined_call_operand.vmem [shape: bf16[64,20], index: 18, kind: input, shape index: {}]   ;;  %s7683_s19 = inlined_call_operand.vmem [shape: f32[1,20], index: 19, kind: input, shape index: {}]   ;;  %s7684_s20 = inlined_call_operand.vmem [shape: f32[2,8,20], index: 20, kind: output, shape index: {}]  }
   0x1   :  { %7690 = sst [smem:[#allocation2_spill]] %s7664_s0 }
   0x2   :  { %7691 = sst [smem:[#allocation3_spill]] %s7665_s1  ;;  %s6571_s1 = smov 0  }
   0x3   :  { %7692 = sst [smem:[#allocation4_spill]] %s7666_s2 }
   0x4   :  { %7693 = sst [smem:[#allocation5_spill]] %s7667_s3 }
   0x5   :  { %7694 = sst [smem:[#allocation6_spill]] %s7668_s4 }
   0x6 LB: > { %s5016_s22 = sadd.s32 4294967295, %s6460_s1   ;;  %p5020_p0 = scmp.ge.s32.totalorder %s6460_s1, 1  ;;  %s6460_s1 = sphi %s6571_s1, %s30_s1  }
   0x7   : > { %p562_p1 = scmp.lt.s32.totalorder %s6460_s1, 3 }
   0x9   : > { %p563_p2 = pnand %p5020_p0, %p562_p1 }
   0xa   : > { %p619_p3 = scmp.lt.s32.totalorder (!%p563_p2), %s5016_s22, 1  ;;  %s7695_s2 = sld [smem:[#allocation3_spill]] (!%p563_p2) }
   0xb   : > { %566 = sbr.rel (%p563_p2) target bundleno = 9803 (0x264b), region = 100  ;;  %s7696_s4 = sld [smem:[#allocation2_spill]] (!%p563_p2) }
   0xc   : > { %s7697_s21 = sld [smem:[#allocation6_spill]] (!%p563_p2) }
   0xd   : > { %s7698_s27 = sld [smem:[#allocation4_spill]] (!%p563_p2) }
  0x10   : > { %vm637_vm0 = vcmask 523264   ;;  %s7701_s22 = smov (!%p619_p3, %s5016_s22), 1  ;;  %v631_v0 = vld [vmem:[%s7695_s2] sm:$0xff]  ;;  %v632_v1 = vld [vmem:[%s7695_s2 + $0x8] sm:$0x1]  ;;  %vm641_vm1 = vcmask 516096  }
  0x11   : > { %s5520_s26 = sshll.u32 %s7701_s22, 4  ;;  %v6462_v19 = vmov 0.0   ;;  %v6195_v20 = vld [vmem:[%s7670_s6 + $0x18] sm:$0xff]   ;;  %v6197_v22 = vld [vmem:[%s7670_s6 + $0x10] sm:$0xff]   ;;  %v6199_v24 = vld [vmem:[%s7670_s6 + $0x8] sm:$0xff]   ;;  %vm6463_vm2 = vmmov 0  }
  0x12   : > { %s623_s29 = scalar_lea.vmem %s7696_s4, %s5520_s26  ;;  %v6194_v18 = vld [vmem:[%s7697_s21 + $0x18] sm:$0xff]   ;;  %5738 = vmatprep.subr.bf16.mxu0 %v6462_v19  ;;  %5750 = vmatprep.subr.bf16.mxu1 %v6462_v19  ;;  %v6196_v21 = vld [vmem:[%s7697_s21 + $0x10] sm:$0xff]   ;;  %v6198_v23 = vld [vmem:[%s7697_s21 + $0x8] sm:$0xff]   ;;  %vm928_vm3 = vcmask 130048   ;;  %vm1005_vm4 = vcmask 1043456   ;;  %vm1006_vm5 = vcmask 1044480  }
  0x13   : > { %v629_v2 = vld [vmem:[%s623_s29] sm:$0xff]  ;;  %v630_v3 = vld [vmem:[%s623_s29 + $0x8] sm:$0x1]  ;;  %5739 = vmatpush3.bf16.msra.mxu0 %v6194_v18  ;;  %5751 = vmatpush3.bf16.msra.mxu1 %v6195_v20  ;;  %s7699_s29 = sld [smem:[#allocation5_spill]]  ;;  %v6202_v43 = vld [vmem:[%s7672_s8 + $0x18] sm:$0xff]   ;;  %vm976_vm6 = vcmask 72704  }
  0x14   : > { %v6591_v4 = vadd.f32 %v631_v0, %v629_v2  ;;  %v6593_v5 = vadd.f32 %v632_v1, %v630_v3  ;;  %5740 = vmatprep.subr.bf16.mxu0 %v6462_v19  ;;  %5752 = vmatprep.subr.bf16.mxu1 %v6462_v19  ;;  %v6200_v25 = vld [vmem:[%s7697_s21] sm:$0xff]   ;;  %v6203_v45 = vld [vmem:[%s7672_s8 + $0x10] sm:$0xff]   ;;  %v6204_v46 = vld [vmem:[%s7672_s8 + $0x8] sm:$0xff]   ;;  %vm980_vm7 = vcmask 65536   ;;  %s5023_s0 = sshll.u32 %s7701_s22, 3  ;;  %vm4961_vm8 = vcmask 162816  }
  0x15   : > { %v6201_v26 = vld [vmem:[%s7670_s6] sm:$0xff]   ;;  %5746 = vmatprep.mubr.msk.bf16.mxu0 %vm6463_vm2, %v6462_v19  ;;  %5758 = vmatprep.mubr.msk.bf16.mxu1 %vm6463_vm2, %v6462_v19  ;;  %v6206_v48 = vld [vmem:[%s7697_s21 + $0x38] sm:$0xff]   ;;  %v6207_v49 = vld [vmem:[%s7697_s21 + $0x30] sm:$0xff]   ;;  %s627_s3 = scalar_lea.vmem %s7684_s20, %s5023_s0 }
  0x16   : > { %v638_v6 = vsel %vm637_vm0, %v6591_v4, 0.0  ;;  %v642_v7 = vsel %vm641_vm1, %v6593_v5, 0.0  ;;  %v5024_v35 = vld [vmem:[%s7698_s27] ss:$0 sm:$0xff]  ;;  %v6208_v50 = vld [vmem:[%s7697_s21 + $0x28] sm:$0xff]   ;;  %v6210_v52 = vld [vmem:[%s7672_s8 + $0x38] sm:$0xff]  }
  0x17   : > { %639 = vadd.xlane.f32.xlu0 %v638_v6  ;;  %5741 = vmatpush3.bf16.msra.mxu0 %v6196_v21  ;;  %v6205_v47 = vld [vmem:[%s7672_s8] sm:$0xff]   ;;  %v6211_v53 = vld [vmem:[%s7672_s8 + $0x30] sm:$0xff]   ;;  %v6212_v54 = vld [vmem:[%s7672_s8 + $0x28] sm:$0xff]  }
  0x18   : > { %5753 = vmatpush3.bf16.msra.mxu1 %v6197_v22  ;;  %5742 = vmatprep.subr.bf16.mxu0 %v6462_v19  ;;  %v6209_v51 = vld [vmem:[%s7697_s21 + $0x20] sm:$0xff]  }
  0x19   : > { %5754 = vmatprep.subr.bf16.mxu1 %v6462_v19  ;;  %v5025_v39 = vld [vmem:[%s7699_s29] ss:$0 sm:$0xff] }
  0x1a   : > { %v6213_v55 = vld [vmem:[%s7672_s8 + $0x20] sm:$0xff]  }
  0x1b   : > { %643 = vadd.xlane.f32.xlu0 %v642_v7  ;;  %5743 = vmatpush3.bf16.msra.mxu0 %v6198_v23  ;;  %v5032_v58 = vld [vmem:[%s7671_s7] ss:$0 sm:$0xff] }
  0x1c   : > { %5755 = vmatpush3.bf16.msra.mxu1 %v6199_v24  ;;  %5744 = vmatprep.subr.bf16.mxu0 %v6462_v19  ;;  %v5026_v7 = vld [vmem:[%s7669_s5] ss:$0 sm:$0xff] }
  0x1d   : > { %5756 = vmatprep.subr.bf16.mxu1 %v6462_v19 }
  0x1f   : > { %5745 = vmatpush3.bf16.msra.mxu0 %v6200_v25  ;;  %v5055_v25 = vld [vmem:[%s7669_s5 + $0x1] ss:$0 sm:$0xff] }
  0x20   : > { %5757 = vmatpush3.bf16.msra.mxu1 %v6201_v26  ;;  %5762 = vmatprep.subr.bf16.mxu0 %v6462_v19 }
  0x21   : > { %5774 = vmatprep.subr.bf16.mxu1 %v6462_v19 }
  0xa0   : > { %v640_v8 = vpop.xlane.xlu0 %639 }
  0xa1   : > { %v646_v9 = vmul.f32 0.015625, %v640_v8 }
  0xa3   : > { %v648_v10 = vsub.f32 %v6591_v4, %v646_v9 }
  0xa4   : > { %v644_v11 = vpop.xlane.xlu0 %643 }
  0xa5   : > { %v647_v12 = vmul.f32 0.015625, %v644_v11  ;;  %v650_v13 = vmul.f32 %v648_v10, %v648_v10 }
  0xa7   : > { %v649_v14 = vsub.f32 %v6593_v5, %v647_v12  ;;  %v652_v15 = vsel %vm637_vm0, %v650_v13, 0.0  ;;  %v5038_v12 = vld [vmem:[%s7673_s9] ss:$0 sm:$0xff] }
  0xa8   : > { %653 = vadd.xlane.f32.xlu1 %v652_v15 }
  0xa9   : > { %v651_v16 = vmul.f32 %v649_v14, %v649_v14 }
  0xab   : > { %v655_v17 = vsel %vm641_vm1, %v651_v16, 0.0 }
  0xac   : > { %656 = vadd.xlane.f32.xlu1 %v655_v17 }
 0x131   : > { %v654_v27 = vpop.xlane.xlu1 %653 }
 0x132   : > { %v658_v28 = vmul.f32 0.015625, %v654_v27 }
 0x134   : > { %v660_v29 = vadd.f32 1e-05, %v658_v28 }
 0x135   : > { %v657_v30 = vpop.xlane.xlu1 %656 }
 0x136   : > { %6358 = vrsqrt.f32 %v660_v29  ;;  %v659_v31 = vmul.f32 0.015625, %v657_v30 }
 0x138   : > { %v661_v32 = vadd.f32 1e-05, %v659_v31 }
 0x13a   : > { %6360 = vrsqrt.f32 %v661_v32 }
 0x143   : > { %v6359_v33 = vpop.eup %6358 }
 0x144   : > { %v664_v34 = vmul.f32 %v6359_v33, %v648_v10  ;;  %v5085_v33 = vld [vmem:[%s7673_s9 + $0x1] ss:$0 sm:$0xff] }
 0x146   : > { %v672_v37 = vmul.f32 %v5024_v35, %v664_v34 }
 0x147   : > { %v6361_v36 = vpop.eup %6360 }
 0x148   : > { %v665_v38 = vmul.f32 %v6361_v36, %v649_v14  ;;  %v680_v41 = vadd.f32 %v5025_v39, %v672_v37  ;;  %v6464_v14 = vmov 65535  }
 0x149   : > { %v1007_v15 = vsel %vm1005_vm4, 4294967295, %v6464_v14 }
 0x14a   : > { %v673_v40 = vmul.f32 %v5024_v35, %v665_v38  ;;  %v6731_v20 = vsel %vm1006_vm5, %v1007_v15, 0 }
 0x14c   : > { %v681_v42 = vadd.f32 %v5025_v39, %v673_v40 }
 0x14e   : > { %v6650_v44 = vpack.c.bf16 %v681_v42, %v680_v41 }
 0x150   : > { %5747 = vmatmul.mubr.msk.bf16.vlgmr.msra.gmra.mxu0 %vm637_vm0, %v6650_v44  ;;  %5759 = vmatmul.mubr.msk.bf16.vlgmr.msra.gmra.mxu1 %vm637_vm0, %v6650_v44 }
 0x151   : > { %5763 = vmatpush3.bf16.msra.mxu0 %v6202_v43  ;;  %5770 = vmatprep.mubr.msk.bf16.mxu0 %vm6463_vm2, %v6462_v19 }
 0x152   : > { %5764 = vmatprep.subr.bf16.mxu0 %v6462_v19  ;;  %5776 = vmatprep.mubr.msk.bf16.mxu1 %vm6463_vm2, %v6462_v19 }
 0x155   : > { %5765 = vmatpush3.bf16.msra.mxu0 %v6203_v45 }
 0x156   : > { %5766 = vmatprep.subr.bf16.mxu0 %v6462_v19 }
 0x159   : > { %5767 = vmatpush3.bf16.msra.mxu0 %v6204_v46 }
 0x15a   : > { %5768 = vmatprep.subr.bf16.mxu0 %v6462_v19 }
 0x15d   : > { %5769 = vmatpush3.bf16.msra.mxu0 %v6205_v47 }
 0x15e   : > { %5786 = vmatprep.subr.bf16.mxu0 %v6462_v19 }
 0x160   : > { %5771 = vmatmul.mubr.msk.bf16.vlgmr.msra.gmra.mxu0 %vm637_vm0, %v6650_v44 }
 0x161   : > { %5787 = vmatpush3.bf16.msra.mxu0 %v6206_v48  ;;  %5794 = vmatprep.mubr.msk.bf16.mxu0 %vm6463_vm2, %v6462_v19 }
 0x162   : > { %5788 = vmatprep.subr.bf16.mxu0 %v6462_v19 }
 0x165   : > { %5789 = vmatpush3.bf16.msra.mxu0 %v6207_v49 }
 0x166   : > { %5790 = vmatprep.subr.bf16.mxu0 %v6462_v19 }
 0x169   : > { %5791 = vmatpush3.bf16.msra.mxu0 %v6208_v50 }
 0x16a   : > { %5792 = vmatprep.subr.bf16.mxu0 %v6462_v19 }
 0x16d   : > { %5793 = vmatpush3.bf16.msra.mxu0 %v6209_v51 }
 0x16e   : > { %5810 = vmatprep.subr.bf16.mxu0 %v6462_v19 }
 0x170   : > { %5795 = vmatmul.mubr.msk.bf16.vlgmr.msra.gmra.mxu0 %vm637_vm0, %v6650_v44 }
 0x171   : > { %5811 = vmatpush3.bf16.msra.mxu0 %v6210_v52  ;;  %5818 = vmatprep.mubr.msk.bf16.mxu0 %vm6463_vm2, %v6462_v19 }
 0x172   : > { %5812 = vmatprep.subr.bf16.mxu0 %v6462_v19 }
 0x175   : > { %5813 = vmatpush3.bf16.msra.mxu0 %v6211_v53 }
 0x176   : > { %5814 = vmatprep.subr.bf16.mxu0 %v6462_v19 }
 0x179   : > { %5815 = vmatpush3.bf16.msra.mxu0 %v6212_v54 }
 0x17a   : > { %5816 = vmatprep.subr.bf16.mxu0 %v6462_v19 }
 0x17d   : > { %5817 = vmatpush3.bf16.msra.mxu0 %v6213_v55 }
 0x17e   : > { %5834 = vmatprep.subr.bf16.mxu0 %v6462_v19 }
 0x180   : > { %5819 = vmatmul.mubr.msk.bf16.vlgmr.msra.gmra.mxu0 %vm637_vm0, %v6650_v44 }
 0x181   : > { %5836 = vmatprep.mubr.msk.bf16.mxu0 %vm6463_vm2, %v6462_v19 }
 0x210   : > { %v759_v56 = vpop.f32.mrf.mxu0  ;;  %v839_v57 = vpop.f32.mrf.mxu1 }
 0x211   : > { %v840_v63 = vadd.f32 %v5032_v58, %v839_v57  ;;  %v760_v9 = vadd.f32 %v5026_v7, %v759_v56 }
 0x212   : > { %v5748_v59 = vpop.f32.mrf.mxu0  ;;  %v5760_v60 = vpop.f32.mrf.mxu1 }
 0x214   : > { %v762_v61 = vpop.f32.mrf.mxu0  ;;  %v842_v62 = vpop.f32.mrf.mxu1 }
 0x215   : > { %v843_v0 = vadd.f32 %v5032_v58, %v842_v62  ;;  %v763_v8 = vadd.f32 %v5026_v7, %v762_v61 }
 0x216   : > { %v5749_v1 = vpop.f32.mrf.mxu0  ;;  %v5761_v2 = vpop.f32.mrf.mxu1 }
 0x217   : > { %v927_v3 = vpack.c.bf16 %v843_v0, %v840_v63  ;;  %v926_v10 = vpack.c.bf16 %v763_v8, %v760_v9  ;;  %v6214_v63 = vld [vmem:[%s7670_s6 + $0x38] sm:$0xff]   ;;  %v6215_v1 = vld [vmem:[%s7670_s6 + $0x30] sm:$0xff]   ;;  %v6216_v2 = vld [vmem:[%s7670_s6 + $0x28] sm:$0xff]  }
 0x219   : > { %v933_v6 = vsel %vm928_vm3, %v927_v3, 0  ;;  %v6217_v3 = vld [vmem:[%s7670_s6 + $0x20] sm:$0xff]  }
 0x21a   : > { %5775 = vmatpush3.bf16.xpose.msra.mxu1 %v933_v6 }
 0x21b   : > { %5780 = vmatprep.subr.bf16.mxu1 %v6462_v19 }
 0x220   : > { %v919_v11 = vpop.f32.mrf.mxu0 }
 0x221   : > { %5777 = vmatmul.mubr.msk.bf16.vlgmr.msra.gmra.mxu1 %vm928_vm3, %v926_v10  ;;  %v920_v17 = vadd.f32 %v5038_v12, %v919_v11 }
 0x222   : > { %v5772_v13 = vpop.f32.mrf.mxu0  ;;  %5782 = vmatprep.mubr.msk.bf16.mxu1 %vm6463_vm2, %v6462_v19 }
 0x224   : > { %v922_v16 = vpop.f32.mrf.mxu0 }
 0x225   : > { %v923_v18 = vadd.f32 %v5038_v12, %v922_v16  ;;  %v5070_v12 = vld [vmem:[%s7671_s7 + $0x1] ss:$0 sm:$0xff] }
 0x226   : > { %v5773_v21 = vpop.f32.mrf.mxu0 }
 0x227   : > { %v1001_v22 = vpack.c.bf16 %v923_v18, %v920_v17 }
 0x229   : > { %v1010_v23 = vand.u32 %v6731_v20, %v1001_v22 }
 0x22b   : > { %5781 = vmatpush3.bf16.msra.mxu1 %v1010_v23 }
 0x22c   : > { %5798 = vmatprep.subr.bf16.mxu1 %v6462_v19 }
 0x230   : > { %v1131_v24 = vpop.f32.mrf.mxu0 }
 0x231   : > { %v6738_v28 = vadd.f32 %v5055_v25, %v1131_v24 }
 0x232   : > { %v5796_v26 = vpop.f32.mrf.mxu0 }
 0x234   : > { %v1134_v27 = vpop.f32.mrf.mxu0 }
 0x235   : > { %v6740_v29 = vadd.f32 %v5055_v25, %v1134_v27 }
 0x236   : > { %v5797_v30 = vpop.f32.mrf.mxu0 }
 0x237   : > { %v1302_v31 = vpack.c.bf16 %v6740_v29, %v6738_v28 }
 0x240   : > { %v1295_v32 = vpop.f32.mrf.mxu0 }
 0x241   : > { %v6747_v36 = vadd.f32 %v5085_v33, %v1295_v32 }
 0x242   : > { %v5820_v34 = vpop.f32.mrf.mxu0 }
 0x244   : > { %v1298_v35 = vpop.f32.mrf.mxu0 }
 0x245   : > { %v6749_v37 = vadd.f32 %v5085_v33, %v1298_v35 }
 0x246   : > { %v5821_v38 = vpop.f32.mrf.mxu0 }
 0x247   : > { %v1374_v39 = vpack.c.bf16 %v6749_v37, %v6747_v36 }
 0x249   : > { %v1379_v22 = vand.u32 %v1374_v39, %v6731_v20 }
 0x2e1   : > { %v969_v40 = vpop.f32.mrf.mxu1 }
 0x2e2   : > { %v977_v41 = vsel %vm976_vm6, %v969_v40, -inf }
 0x2e3   : > { %978 = vmax.xlane.f32.xlu0 %v977_v41  ;;  %v5778_v42 = vpop.f32.mrf.mxu1 }
 0x2e5   : > { %v972_v43 = vpop.f32.mrf.mxu1 }
 0x2e6   : > { %v981_v45 = vsel %vm980_vm7, %v972_v43, -inf }
 0x2e7   : > { %982 = vmax.xlane.f32.xlu1 %v981_v45  ;;  %v5779_v46 = vpop.f32.mrf.mxu1 }
 0x2e8   : > { %v6218_v46 = vld [vmem:[%s7674_s10] sm:$0xff]  }
 0x36c   : > { %v979_v47 = vpop.xlane.xlu0 %978 }
 0x36d   : > { %v984_v48 = vsub.f32 %v969_v40, %v979_v47 }
 0x36f   : > { %v986_v49 = vmul.f32 1.442695, %v984_v48  ;;  %v6219_v48 = vld [vmem:[%s7670_s6 + $0x58] sm:$0xff]  }
 0x370   : > { %v983_v50 = vpop.xlane.xlu1 %982 }
 0x371   : > { %6362 = vpow2.f32 %v986_v49  ;;  %v985_v51 = vsub.f32 %v972_v43, %v983_v50  ;;  %v6220_v49 = vld [vmem:[%s7670_s6 + $0x50] sm:$0xff]   ;;  %v6221_v50 = vld [vmem:[%s7670_s6 + $0x48] sm:$0xff]  }
 0x373   : > { %v988_v52 = vmul.f32 1.442695, %v985_v51  ;;  %v6222_v51 = vld [vmem:[%s7670_s6 + $0x40] sm:$0xff]  }
 0x375   : > { %6364 = vpow2.f32 %v988_v52  ;;  %v6223_v52 = vld [vmem:[%s7674_s10 + $0x8] sm:$0xff]  }
 0x376   : > { %5835 = vmatpush3.bf16.msra.mxu0 %v6223_v52 }
 0x377   : > { %5846 = vmatprep.subr.bf16.mxu0 %v6462_v19 }
 0x37e   : > { %v6363_v53 = vpop.eup %6362 }
 0x37f   : > { %v990_v54 = vsel %vm976_vm6, %v6363_v53, 0.0 }
 0x380   : > { %991 = vadd.xlane.f32.xlu0 %v990_v54 }
 0x382   : > { %v6365_v55 = vpop.eup %6364 }
 0x383   : > { %v993_v56 = vsel %vm980_vm7, %v6365_v55, 0.0 }
 0x384   : > { %994 = vadd.xlane.f32.xlu1 %v993_v56  ;;  %v6224_v56 = vld [vmem:[%s7697_s21 + $0x58] sm:$0xff]  }
 0x409   : > { %v992_v57 = vpop.xlane.xlu0 %991 }
 0x40a   : > { %6366 = vrcp.f32 %v992_v57 }
 0x40d   : > { %v995_v58 = vpop.xlane.xlu1 %994 }
 0x40e   : > { %6368 = vrcp.f32 %v995_v58 }
 0x417   : > { %v6367_v59 = vpop.eup %6366 }
 0x418   : > { %v998_v61 = vmul.f32 %v6367_v59, %v6363_v53 }
 0x41b   : > { %v6369_v60 = vpop.eup %6368 }
 0x41c   : > { %v999_v62 = vmul.f32 %v6369_v60, %v6365_v55  ;;  %v6225_v60 = vld [vmem:[%s7697_s21 + $0x50] sm:$0xff]  }
 0x41e   : > { %v1000_v0 = vpack.c.bf16 %v999_v62, %v998_v61 }
 0x420   : > { %5783 = vmatmul.mubr.msk.bf16.vlgmr.msra.gmra.mxu1 %vm976_vm6, %v1000_v0 }
 0x421   : > { %5799 = vmatpush3.bf16.msra.mxu1 %v6214_v63  ;;  %5806 = vmatprep.mubr.msk.bf16.mxu1 %vm6463_vm2, %v6462_v19  ;;  %v6226_v63 = vld [vmem:[%s7697_s21 + $0x48] sm:$0xff]  }
 0x422   : > { %5800 = vmatprep.subr.bf16.mxu1 %v6462_v19 }
 0x425   : > { %5801 = vmatpush3.bf16.msra.mxu1 %v6215_v1  ;;  %v6227_v1 = vld [vmem:[%s7697_s21 + $0x40] sm:$0xff]  }
 0x426   : > { %5802 = vmatprep.subr.bf16.mxu1 %v6462_v19 }
 0x429   : > { %5803 = vmatpush3.bf16.msra.mxu1 %v6216_v2  ;;  %v6228_v2 = vld [vmem:[%s7672_s8 + $0x58] sm:$0xff]  }
 0x42a   : > { %5804 = vmatprep.subr.bf16.mxu1 %v6462_v19 }
 0x42d   : > { %5805 = vmatpush3.bf16.msra.mxu1 %v6217_v3 }
 0x42e   : > { %5822 = vmatprep.subr.bf16.mxu1 %v6462_v19 }
 0x430   : > { %5807 = vmatmul.mubr.msk.bf16.vlgmr.msra.gmra.mxu1 %vm637_vm0, %v6650_v44 }
 0x431   : > { %5824 = vmatprep.mubr.msk.bf16.mxu1 %vm6463_vm2, %v6462_v19 }
 0x4e0   : > { %v1046_v6 = vpop.f32.mrf.mxu1 }
 0x4e2   : > { %v5784_v7 = vpop.f32.mrf.mxu1 }
 0x4e3   : > { %v5123_v7 = vld [vmem:[%s7671_s7 + $0x2] ss:$0 sm:$0xff] }
 0x4e4   : > { %v1049_v8 = vpop.f32.mrf.mxu1 }
 0x4e5   : > { %v1053_v9 = vpack.c.bf16 %v1049_v8, %v1046_v6  ;;  %v6229_v6 = vld [vmem:[%s7672_s8 + $0x50] sm:$0xff]  }
 0x4e6   : > { %v5785_v10 = vpop.f32.mrf.mxu1 }
 0x4e7   : > { %v6230_v10 = vld [vmem:[%s7672_s8 + $0x48] sm:$0xff]  }
 0x4f0   : > { %v1213_v11 = vpop.f32.mrf.mxu1 }
 0x4f1   : > { %v1214_v15 = vadd.f32 %v5070_v12, %v1213_v11 }
 0x4f2   : > { %v5808_v13 = vpop.f32.mrf.mxu1 }
 0x4f4   : > { %v1216_v14 = vpop.f32.mrf.mxu1 }
 0x4f5   : > { %v1217_v16 = vadd.f32 %v5070_v12, %v1216_v14 }
 0x4f6   : > { %v5809_v17 = vpop.f32.mrf.mxu1 }
 0x4f7   : > { %v1303_v18 = vpack.c.bf16 %v1217_v16, %v1214_v15  ;;  %v6231_v15 = vld [vmem:[%s7672_s8 + $0x40] sm:$0xff]  }
 0x4f9   : > { %v1308_v21 = vsel %vm928_vm3, %v1303_v18, 0 }
 0x4fa   : > { %5823 = vmatpush3.bf16.xpose.msra.mxu1 %v1308_v21 }
 0x4fb   : > { %5828 = vmatprep.subr.bf16.mxu1 %v6462_v19 }
 0x501   : > { %5825 = vmatmul.mubr.msk.bf16.vlgmr.msra.gmra.mxu1 %vm928_vm3, %v1302_v31 }
 0x502   : > { %5829 = vmatpush3.bf16.msra.mxu1 %v1379_v22  ;;  %5830 = vmatprep.mubr.msk.bf16.mxu1 %vm6463_vm2, %v6462_v19 }
 0x503   : > { %5840 = vmatprep.subr.bf16.mxu1 %v6462_v19 }
 0x5c1   : > { %v1344_v23 = vpop.f32.mrf.mxu1 }
 0x5c2   : > { %v1351_v24 = vsel %vm976_vm6, %v1344_v23, -inf }
 0x5c3   : > { %1352 = vmax.xlane.f32.xlu0 %v1351_v24  ;;  %v5826_v25 = vpop.f32.mrf.mxu1  ;;  %v5108_v24 = vld [vmem:[%s7669_s5 + $0x2] ss:$0 sm:$0xff] }
 0x5c5   : > { %v1347_v26 = vpop.f32.mrf.mxu1 }
 0x5c6   : > { %v1354_v27 = vsel %vm980_vm7, %v1347_v26, -inf }
 0x5c7   : > { %1355 = vmax.xlane.f32.xlu1 %v1354_v27  ;;  %v5827_v30 = vpop.f32.mrf.mxu1 }
 0x64c   : > { %v1353_v32 = vpop.xlane.xlu0 %1352 }
 0x64d   : > { %v1357_v28 = vsub.f32 %v1344_v23, %v1353_v32 }
 0x64f   : > { %v1359_v29 = vmul.f32 1.442695, %v1357_v28 }
 0x650   : > { %v1356_v31 = vpop.xlane.xlu1 %1355 }
 0x651   : > { %6370 = vpow2.f32 %v1359_v29  ;;  %v1358_v33 = vsub.f32 %v1347_v26, %v1356_v31  ;;  %v5138_v31 = vld [vmem:[%s7673_s9 + $0x2] ss:$0 sm:$0xff] }
 0x653   : > { %v1361_v34 = vmul.f32 1.442695, %v1358_v33 }
 0x655   : > { %6372 = vpow2.f32 %v1361_v34 }
 0x65e   : > { %v6371_v35 = vpop.eup %6370 }
 0x65f   : > { %v1363_v36 = vsel %vm976_vm6, %v6371_v35, 0.0 }
 0x660   : > { %1364 = vadd.xlane.f32.xlu0 %v1363_v36 }
 0x662   : > { %v6373_v37 = vpop.eup %6372 }
 0x663   : > { %v1366_v38 = vsel %vm980_vm7, %v6373_v37, 0.0 }
 0x664   : > { %1367 = vadd.xlane.f32.xlu1 %v1366_v38 }
 0x6e9   : > { %v1365_v39 = vpop.xlane.xlu0 %1364 }
 0x6ea   : > { %6374 = vrcp.f32 %v1365_v39 }
 0x6ed   : > { %v1368_v40 = vpop.xlane.xlu1 %1367 }
 0x6ee   : > { %6376 = vrcp.f32 %v1368_v40 }
 0x6f7   : > { %v6375_v41 = vpop.eup %6374 }
 0x6f8   : > { %v1371_v43 = vmul.f32 %v6375_v41, %v6371_v35 }
 0x6fb   : > { %v6377_v42 = vpop.eup %6376 }
 0x6fc   : > { %v1372_v45 = vmul.f32 %v6377_v42, %v6373_v37 }
 0x6fe   : > { %v1373_v47 = vpack.c.bf16 %v1372_v45, %v1371_v43 }
 0x700   : > { %5831 = vmatmul.mubr.msk.bf16.vlgmr.msra.gmra.mxu1 %vm976_vm6, %v1373_v47 }
 0x701   : > { %5841 = vmatpush3.bf16.msra.mxu1 %v6218_v46  ;;  %5842 = vmatprep.mubr.msk.bf16.mxu1 %vm6463_vm2, %v6462_v19 }
 0x702   : > { %5858 = vmatprep.subr.bf16.mxu1 %v6462_v19 }
 0x708   : > { %5843 = vmatmul.mubr.msk.bf16.vlgmr.msra.gmra.mxu1 %vm928_vm3, %v1053_v9 }
 0x709   : > { %5859 = vmatpush3.bf16.msra.mxu1 %v6219_v48  ;;  %5866 = vmatprep.mubr.msk.bf16.mxu1 %vm6463_vm2, %v6462_v19 }
 0x70a   : > { %5860 = vmatprep.subr.bf16.mxu1 %v6462_v19 }
 0x70d   : > { %5861 = vmatpush3.bf16.msra.mxu1 %v6220_v49 }
 0x70e   : > { %5862 = vmatprep.subr.bf16.mxu1 %v6462_v19 }
 0x711   : > { %5863 = vmatpush3.bf16.msra.mxu1 %v6221_v50 }
 0x712   : > { %5864 = vmatprep.subr.bf16.mxu1 %v6462_v19 }
 0x715   : > { %5865 = vmatpush3.bf16.msra.mxu1 %v6222_v51 }
 0x716   : > { %5882 = vmatprep.subr.bf16.mxu1 %v6462_v19 }
 0x718   : > { %5867 = vmatmul.mubr.msk.bf16.vlgmr.msra.gmra.mxu1 %vm637_vm0, %v6650_v44 }
 0x719   : > { %5884 = vmatprep.mubr.msk.bf16.mxu1 %vm6463_vm2, %v6462_v19 }
 0x7c0   : > { %v1415_v53 = vpop.f32.mrf.mxu1 }
 0x7c2   : > { %v5832_v54 = vpop.f32.mrf.mxu1 }
 0x7c4   : > { %v1418_v55 = vpop.f32.mrf.mxu1 }
 0x7c5   : > { %v1422_v57 = vpack.c.bf16 %v1418_v55, %v1415_v53 }
 0x7c6   : > { %v5833_v58 = vpop.f32.mrf.mxu1 }
 0x7c7   : > { %5837 = vmatmul.mubr.msk.bf16.vlgmr.msra.gmra.mxu0 %vm928_vm3, %v1422_v57 }
 0x7c8   : > { %5847 = vmatpush3.bf16.msra.mxu0 %v6224_v56  ;;  %v6838_v59 = vpop.f32.mrf.mxu1  ;;  %5854 = vmatprep.mubr.msk.bf16.mxu0 %vm6463_vm2, %v6462_v19 }
 0x7c9   : > { %5848 = vmatprep.subr.bf16.mxu0 %v6462_v19 }
 0x7ca   : > { %v5844_v61 = vpop.f32.mrf.mxu1 }
 0x7cc   : > { %5849 = vmatpush3.bf16.msra.mxu0 %v6225_v60  ;;  %v6846_v62 = vpop.f32.mrf.mxu1 }
 0x7cd   : > { %5850 = vmatprep.subr.bf16.mxu0 %v6462_v19 }
 0x7ce   : > { %v5845_v0 = vpop.f32.mrf.mxu1 }
 0x7d0   : > { %5851 = vmatpush3.bf16.msra.mxu0 %v6226_v63 }
 0x7d1   : > { %5852 = vmatprep.subr.bf16.mxu0 %v6462_v19 }
 0x7d4   : > { %5853 = vmatpush3.bf16.msra.mxu0 %v6227_v1  ;;  %v6232_v1 = vld [vmem:[%s7697_s21 + $0x78] sm:$0xff]  }
 0x7d5   : > { %5870 = vmatprep.subr.bf16.mxu0 %v6462_v19 }
 0x7d7   : > { %5855 = vmatmul.mubr.msk.bf16.vlgmr.msra.gmra.mxu0 %vm637_vm0, %v6650_v44 }
 0x7d8   : > { %v1683_v3 = vpop.f32.mrf.mxu1  ;;  %5871 = vmatpush3.bf16.msra.mxu0 %v6228_v2  ;;  %5878 = vmatprep.mubr.msk.bf16.mxu0 %vm6463_vm2, %v6462_v19 }
 0x7d9   : > { %5872 = vmatprep.subr.bf16.mxu0 %v6462_v19  ;;  %v1684_v11 = vadd.f32 %v5123_v7, %v1683_v3  ;;  %v6233_v3 = vld [vmem:[%s7697_s21 + $0x70] sm:$0xff]  }
 0x7da   : > { %v5868_v8 = vpop.f32.mrf.mxu1 }
 0x7db   : > { %v6236_v8 = vld [vmem:[%s7672_s8 + $0x78] sm:$0xff]  }
 0x7dc   : > { %v1686_v9 = vpop.f32.mrf.mxu1  ;;  %5873 = vmatpush3.bf16.msra.mxu0 %v6229_v6  ;;  %v6234_v6 = vld [vmem:[%s7697_s21 + $0x68] sm:$0xff]  }
 0x7dd   : > { %v1687_v12 = vadd.f32 %v5123_v7, %v1686_v9  ;;  %5874 = vmatprep.subr.bf16.mxu0 %v6462_v19  ;;  %v6235_v7 = vld [vmem:[%s7697_s21 + $0x60] sm:$0xff]   ;;  %v6237_v9 = vld [vmem:[%s7672_s8 + $0x70] sm:$0xff]  }
 0x7de   : > { %v5869_v13 = vpop.f32.mrf.mxu1 }
 0x7df   : > { %v1773_v14 = vpack.c.bf16 %v1687_v12, %v1684_v11  ;;  %v6239_v11 = vld [vmem:[%s7672_s8 + $0x60] sm:$0xff]   ;;  %v6240_v12 = vld [vmem:[%s7674_s10 + $0x10] sm:$0xff]  }
 0x7e0   : > { %5875 = vmatpush3.bf16.msra.mxu0 %v6230_v10  ;;  %v6238_v10 = vld [vmem:[%s7672_s8 + $0x68] sm:$0xff]  }
 0x7e1   : > { %v1778_v16 = vsel %vm928_vm3, %v1773_v14, 0  ;;  %5876 = vmatprep.subr.bf16.mxu0 %v6462_v19 }
 0x7e2   : > { %5883 = vmatpush3.bf16.xpose.msra.mxu1 %v1778_v16  ;;  %v6241_v16 = vld [vmem:[%s7670_s6 + $0x78] sm:$0xff]  }
 0x7e3   : > { %5888 = vmatprep.subr.bf16.mxu1 %v6462_v19 }
 0x7e4   : > { %5877 = vmatpush3.bf16.msra.mxu0 %v6231_v15 }
 0x7e5   : > { %5894 = vmatprep.subr.bf16.mxu0 %v6462_v19 }
 0x7e7   : > { %5879 = vmatmul.mubr.msk.bf16.vlgmr.msra.gmra.mxu0 %vm637_vm0, %v6650_v44 }
 0x7e8   : > { %5896 = vmatprep.mubr.msk.bf16.mxu0 %vm6463_vm2, %v6462_v19  ;;  %5895 = vmatpush3.bf16.msra.mxu0 %v6240_v12 }
 0x7e9   : > { %5912 = vmatprep.subr.bf16.mxu0 %v6462_v19 }
 0x887   : > { %v6886_v17 = vpop.f32.mrf.mxu0 }
 0x889   : > { %v5838_v18 = vpop.f32.mrf.mxu0 }
 0x88b   : > { %v6888_v21 = vpop.f32.mrf.mxu0 }
 0x88d   : > { %v5839_v22 = vpop.f32.mrf.mxu0 }
 0x897   : > { %v1601_v23 = vpop.f32.mrf.mxu0 }
 0x898   : > { %v1602_v27 = vadd.f32 %v5108_v24, %v1601_v23  ;;  %v6242_v23 = vld [vmem:[%s7670_s6 + $0x70] sm:$0xff]  }
 0x899   : > { %v5856_v25 = vpop.f32.mrf.mxu0 }
 0x89b   : > { %v1604_v26 = vpop.f32.mrf.mxu0 }
 0x89c   : > { %v1605_v30 = vadd.f32 %v5108_v24, %v1604_v26  ;;  %v6243_v24 = vld [vmem:[%s7670_s6 + $0x68] sm:$0xff]   ;;  %v6244_v26 = vld [vmem:[%s7670_s6 + $0x60] sm:$0xff]  }
 0x89d   : > { %v5857_v32 = vpop.f32.mrf.mxu0 }
 0x89e   : > { %v1772_v28 = vpack.c.bf16 %v1605_v30, %v1602_v27  ;;  %v5159_v27 = vld [vmem:[%s7669_s5 + $0x3] ss:$0 sm:$0xff] }
 0x8a0   : > { %5885 = vmatmul.mubr.msk.bf16.vlgmr.msra.gmra.mxu1 %vm928_vm3, %v1772_v28 }
 0x8a1   : > { %5890 = vmatprep.mubr.msk.bf16.mxu1 %vm6463_vm2, %v6462_v19 }
 0x8a7   : > { %v1765_v29 = vpop.f32.mrf.mxu0 }
 0x8a8   : > { %v1766_v35 = vadd.f32 %v5138_v31, %v1765_v29 }
 0x8a9   : > { %v5880_v33 = vpop.f32.mrf.mxu0 }
 0x8ab   : > { %v1768_v34 = vpop.f32.mrf.mxu0 }
 0x8ac   : > { %v1769_v36 = vadd.f32 %v5138_v31, %v1768_v34 }
 0x8ad   : > { %v5881_v37 = vpop.f32.mrf.mxu0 }
 0x8ae   : > { %v1844_v38 = vpack.c.bf16 %v1769_v36, %v1766_v35  ;;  %v5189_v35 = vld [vmem:[%s7673_s9 + $0x3] ss:$0 sm:$0xff] }
 0x8b0   : > { %v1849_v39 = vand.u32 %v1844_v38, %v6731_v20 }
 0x8b2   : > { %5889 = vmatpush3.bf16.msra.mxu1 %v1849_v39 }
 0x8b3   : > { %5900 = vmatprep.subr.bf16.mxu1 %v6462_v19 }
 0x960   : > { %v1814_v40 = vpop.f32.mrf.mxu1 }
 0x961   : > { %v1821_v41 = vsel %vm976_vm6, %v1814_v40, -inf }
 0x962   : > { %1822 = vmax.xlane.f32.xlu0 %v1821_v41  ;;  %v5886_v42 = vpop.f32.mrf.mxu1 }
 0x963   : > { %v1520_v42 = vadd.f32 %v6838_v59, %v6886_v17 }
 0x964   : > { %v1817_v43 = vpop.f32.mrf.mxu1 }
 0x965   : > { %v1824_v45 = vsel %vm980_vm7, %v1817_v43, -inf }
 0x966   : > { %1825 = vmax.xlane.f32.xlu1 %v1824_v45  ;;  %v5887_v46 = vpop.f32.mrf.mxu1 }
 0x967   : > { %v1523_v46 = vadd.f32 %v6846_v62, %v6888_v21 }
 0x9eb   : > { %v1823_v47 = vpop.xlane.xlu0 %1822 }
 0x9ec   : > { %v1827_v48 = vsub.f32 %v1814_v40, %v1823_v47 }
 0x9ee   : > { %v1829_v49 = vmul.f32 1.442695, %v1827_v48 }
 0x9ef   : > { %v1826_v50 = vpop.xlane.xlu1 %1825 }
 0x9f0   : > { %6378 = vpow2.f32 %v1829_v49  ;;  %v1828_v51 = vsub.f32 %v1817_v43, %v1826_v50 }
 0x9f2   : > { %v1831_v52 = vmul.f32 1.442695, %v1828_v51  ;;  %v5174_v51 = vld [vmem:[%s7671_s7 + $0x3] ss:$0 sm:$0xff] }
 0x9f4   : > { %6380 = vpow2.f32 %v1831_v52 }
 0x9fd   : > { %v6379_v53 = vpop.eup %6378 }
 0x9fe   : > { %v1833_v54 = vsel %vm976_vm6, %v6379_v53, 0.0 }
 0x9ff   : > { %1834 = vadd.xlane.f32.xlu0 %v1833_v54 }
 0xa01   : > { %v6381_v55 = vpop.eup %6380 }
 0xa02   : > { %v1836_v56 = vsel %vm980_vm7, %v6381_v55, 0.0 }
 0xa03   : > { %1837 = vadd.xlane.f32.xlu1 %v1836_v56 }
 0xa88   : > { %v1835_v57 = vpop.xlane.xlu0 %1834 }
 0xa89   : > { %6382 = vrcp.f32 %v1835_v57 }
 0xa8c   : > { %v1838_v58 = vpop.xlane.xlu1 %1837 }
 0xa8d   : > { %6384 = vrcp.f32 %v1838_v58 }
 0xa96   : > { %v6383_v60 = vpop.eup %6382 }
 0xa97   : > { %v1841_v63 = vmul.f32 %v6383_v60, %v6379_v53 }
 0xa9a   : > { %v6385_v61 = vpop.eup %6384 }
 0xa9b   : > { %v1842_v0 = vmul.f32 %v6385_v61, %v6381_v55 }
 0xa9d   : > { %v1843_v2 = vpack.c.bf16 %v1842_v0, %v1841_v63 }
 0xa9f   : > { %5891 = vmatmul.mubr.msk.bf16.vlgmr.msra.gmra.mxu1 %vm976_vm6, %v1843_v2 }
 0xaa0   : > { %5901 = vmatpush3.bf16.msra.mxu1 %v6232_v1  ;;  %5908 = vmatprep.mubr.msk.bf16.mxu1 %vm6463_vm2, %v6462_v19 }
 0xaa1   : > { %5902 = vmatprep.subr.bf16.mxu1 %v6462_v19 }
 0xaa4   : > { %5903 = vmatpush3.bf16.msra.mxu1 %v6233_v3 }
 0xaa5   : > { %5904 = vmatprep.subr.bf16.mxu1 %v6462_v19 }
 0xaa8   : > { %5905 = vmatpush3.bf16.msra.mxu1 %v6234_v6 }
 0xaa9   : > { %5906 = vmatprep.subr.bf16.mxu1 %v6462_v19 }
 0xaac   : > { %5907 = vmatpush3.bf16.msra.mxu1 %v6235_v7 }
 0xaad   : > { %5924 = vmatprep.subr.bf16.mxu1 %v6462_v19 }
 0xaaf   : > { %5909 = vmatmul.mubr.msk.bf16.vlgmr.msra.gmra.mxu1 %vm637_vm0, %v6650_v44 }
 0xab0   : > { %5925 = vmatpush3.bf16.msra.mxu1 %v6236_v8  ;;  %5932 = vmatprep.mubr.msk.bf16.mxu1 %vm6463_vm2, %v6462_v19 }
 0xab1   : > { %5926 = vmatprep.subr.bf16.mxu1 %v6462_v19 }
 0xab4   : > { %5927 = vmatpush3.bf16.msra.mxu1 %v6237_v9 }
 0xab5   : > { %5928 = vmatprep.subr.bf16.mxu1 %v6462_v19 }
 0xab8   : > { %5929 = vmatpush3.bf16.msra.mxu1 %v6238_v10 }
 0xab9   : > { %5930 = vmatprep.subr.bf16.mxu1 %v6462_v19 }
 0xabc   : > { %5931 = vmatpush3.bf16.msra.mxu1 %v6239_v11 }
 0xabd   : > { %5948 = vmatprep.subr.bf16.mxu1 %v6462_v19 }
 0xabf   : > { %5933 = vmatmul.mubr.msk.bf16.vlgmr.msra.gmra.mxu1 %vm637_vm0, %v6650_v44 }
 0xac0   : > { %5950 = vmatprep.mubr.msk.bf16.mxu1 %vm6463_vm2, %v6462_v19 }
 0xb5f   : > { %v1885_v13 = vpop.f32.mrf.mxu1 }
 0xb61   : > { %v5892_v14 = vpop.f32.mrf.mxu1 }
 0xb63   : > { %v1888_v15 = vpop.f32.mrf.mxu1 }
 0xb64   : > { %v1892_v18 = vpack.c.bf16 %v1888_v15, %v1885_v13 }
 0xb65   : > { %v5893_v22 = vpop.f32.mrf.mxu1 }
 0xb66   : > { %5897 = vmatmul.mubr.msk.bf16.vlgmr.msra.gmra.mxu0 %vm928_vm3, %v1892_v18 }
 0xb67   : > { %5913 = vmatpush3.bf16.msra.mxu0 %v6241_v16  ;;  %5920 = vmatprep.mubr.msk.bf16.mxu0 %vm6463_vm2, %v6462_v19 }
 0xb68   : > { %5914 = vmatprep.subr.bf16.mxu0 %v6462_v19 }
 0xb6b   : > { %5915 = vmatpush3.bf16.msra.mxu0 %v6242_v23  ;;  %v6245_v23 = vld [vmem:[%s7674_s10 + $0x18] sm:$0xff]  }
 0xb6c   : > { %5916 = vmatprep.subr.bf16.mxu0 %v6462_v19  ;;  %5949 = vmatpush3.bf16.msra.mxu1 %v6245_v23  ;;  %v6265_v23 = vld [vmem:[%s7680_s16 + $0x20] sm:$0xff]  }
 0xb6f   : > { %v2023_v25 = vpop.f32.mrf.mxu1  ;;  %5917 = vmatpush3.bf16.msra.mxu0 %v6243_v24 }
 0xb70   : > { %5918 = vmatprep.subr.bf16.mxu0 %v6462_v19  ;;  %v2024_v28 = vadd.f32 %v5159_v27, %v2023_v25 }
 0xb71   : > { %v5910_v30 = vpop.f32.mrf.mxu1 }
 0xb73   : > { %v2026_v32 = vpop.f32.mrf.mxu1  ;;  %5919 = vmatpush3.bf16.msra.mxu0 %v6244_v26 }
 0xb74   : > { %v2027_v29 = vadd.f32 %v5159_v27, %v2026_v32  ;;  %5936 = vmatprep.subr.bf16.mxu0 %v6462_v19 }
 0xb75   : > { %v5911_v31 = vpop.f32.mrf.mxu1 }
 0xb76   : > { %v2194_v33 = vpack.c.bf16 %v2027_v29, %v2024_v28  ;;  %5921 = vmatmul.mubr.msk.bf16.vlgmr.msra.gmra.mxu0 %vm637_vm0, %v6650_v44  ;;  %v5201_v29 = vld [vmem:[%s7675_s11] ss:$0 sm:$0xff] }
 0xb77   : > { %5938 = vmatprep.mubr.msk.bf16.mxu0 %vm6463_vm2, %v6462_v19 }
 0xb7f   : > { %v2187_v34 = vpop.f32.mrf.mxu1 }
 0xb80   : > { %v2188_v38 = vadd.f32 %v5189_v35, %v2187_v34 }
 0xb81   : > { %v5934_v36 = vpop.f32.mrf.mxu1 }
 0xb83   : > { %v2190_v37 = vpop.f32.mrf.mxu1 }
 0xb84   : > { %v2191_v39 = vadd.f32 %v5189_v35, %v2190_v37 }
 0xb85   : > { %v5935_v40 = vpop.f32.mrf.mxu1 }
 0xb86   : > { %v2266_v41 = vpack.c.bf16 %v2191_v39, %v2188_v38 }
 0xb88   : > { %v2271_v62 = vand.u32 %v2266_v41, %v6731_v20 }
 0xc26   : > { %v1939_v43 = vpop.f32.mrf.mxu0 }
 0xc27   : > { %v1946_v45 = vadd.f32 %v1939_v43, %v1520_v42 }
 0xc28   : > { %v5898_v44 = vpop.f32.mrf.mxu0 }
 0xc2a   : > { %v1942_v47 = vpop.f32.mrf.mxu0 }
 0xc2b   : > { %v6985_v48 = vadd.f32 %v1942_v47, %v1523_v46 }
 0xc2c   : > { %v5899_v49 = vpop.f32.mrf.mxu0 }
 0xc36   : > { %v2105_v50 = vpop.f32.mrf.mxu0 }
 0xc37   : > { %v2106_v54 = vadd.f32 %v5174_v51, %v2105_v50  ;;  %v6248_v50 = vld [vmem:[%s7678_s14 + $0x34] ss:$8 sps:$4 sm:$0xff]  }
 0xc38   : > { %v5922_v52 = vpop.f32.mrf.mxu0 }
 0xc39   : > { %v6251_v52 = vld [vmem:[%s7678_s14 + $0x24] ss:$8 sps:$4 sm:$0xff]  }
 0xc3a   : > { %v2108_v53 = vpop.f32.mrf.mxu0 }
 0xc3b   : > { %v2109_v55 = vadd.f32 %v5174_v51, %v2108_v53  ;;  %v6246_v51 = vld [vmem:[%s7678_s14 + $0x30] ss:$8 sps:$4 sm:$0xff]   ;;  %v6249_v53 = vld [vmem:[%s7678_s14 + $0x20] ss:$8 sps:$4 sm:$0xff]  }
 0xc3c   : > { %v5923_v59 = vpop.f32.mrf.mxu0 }
 0xc3d   : > { %v2195_v17 = vpack.c.bf16 %v2109_v55, %v2106_v54  ;;  %v6254_v54 = vld [vmem:[%s7678_s14 + $0x14] ss:$8 sps:$4 sm:$0xff]   ;;  %v6252_v55 = vld [vmem:[%s7678_s14 + $0x10] ss:$8 sps:$4 sm:$0xff]   ;;  %v6257_v59 = vld [vmem:[%s7678_s14 + $0x4] ss:$8 sps:$4 sm:$0xff]  }
 0xc3f   : > { %v2200_v56 = vsel %vm928_vm3, %v2195_v17, 0  ;;  %v6255_v17 = vld [vmem:[%s7678_s14] ss:$8 sps:$4 sm:$0xff]  }
 0xc40   : > { %5937 = vmatpush3.bf16.xpose.msra.mxu0 %v2200_v56  ;;  %v6465_v56 = vmov 0  }
 0xc41   : > { %5942 = vmatprep.subr.bf16.mxu0 %v6462_v19 }
 0xc47   : > { %5939 = vmatmul.mubr.msk.bf16.vlgmr.msra.gmra.mxu0 %vm928_vm3, %v2194_v33 }
 0xc48   : > { %5943 = vmatpush3.bf16.msra.mxu0 %v2271_v62  ;;  %5944 = vmatprep.mubr.msk.bf16.mxu0 %vm6463_vm2, %v6462_v19 }
 0xc49   : > { %2497 = vmatprep.subr.bf16.mxu0 %v6248_v50 }
 0xd07   : > { %v2236_v21 = vpop.f32.mrf.mxu0 }
 0xd08   : > { %v2243_v57 = vsel %vm976_vm6, %v2236_v21, -inf }
 0xd09   : > { %2244 = vmax.xlane.f32.xlu0 %v2243_v57  ;;  %v5940_v58 = vpop.f32.mrf.mxu0 }
 0xd0b   : > { %v2239_v60 = vpop.f32.mrf.mxu0 }
 0xd0c   : > { %v2246_v61 = vsel %vm980_vm7, %v2239_v60, -inf }
 0xd0d   : > { %2247 = vmax.xlane.f32.xlu1 %v2246_v61  ;;  %v5941_v63 = vpop.f32.mrf.mxu0 }
 0xd92   : > { %v2245_v0 = vpop.xlane.xlu0 %2244 }
 0xd93   : > { %v2249_v1 = vsub.f32 %v2236_v21, %v2245_v0 }
 0xd95   : > { %v2251_v2 = vmul.f32 1.442695, %v2249_v1  ;;  %v5202_v1 = vld [vmem:[%s7676_s12] ss:$0 sm:$0xff] }
 0xd96   : > { %v2248_v3 = vpop.xlane.xlu1 %2247 }
 0xd97   : > { %6386 = vpow2.f32 %v2251_v2  ;;  %v2250_v6 = vsub.f32 %v2239_v60, %v2248_v3 }
 0xd99   : > { %v2253_v7 = vmul.f32 1.442695, %v2250_v6 }
 0xd9b   : > { %6388 = vpow2.f32 %v2253_v7  ;;  %v5203_v7 = vld [vmem:[%s7677_s13] ss:$0 sm:$0xff] }
 0xda4   : > { %v6387_v8 = vpop.eup %6386 }
 0xda5   : > { %v2255_v9 = vsel %vm976_vm6, %v6387_v8, 0.0 }
 0xda6   : > { %2256 = vadd.xlane.f32.xlu0 %v2255_v9 }
 0xda8   : > { %v6389_v10 = vpop.eup %6388 }
 0xda9   : > { %v2258_v11 = vsel %vm980_vm7, %v6389_v10, 0.0 }
 0xdaa   : > { %2259 = vadd.xlane.f32.xlu1 %v2258_v11 }
 0xe2f   : > { %v2257_v12 = vpop.xlane.xlu0 %2256 }
 0xe30   : > { %6390 = vrcp.f32 %v2257_v12  ;;  %v6258_v12 = vld [vmem:[%s7680_s16 + $0x78] sm:$0xff]  }
 0xe31   : > { %5605 = vmatprep.subr.bf16.mxu1 %v6258_v12 }
 0xe33   : > { %v2260_v13 = vpop.xlane.xlu1 %2259 }
 0xe34   : > { %6392 = vrcp.f32 %v2260_v13  ;;  %v6259_v13 = vld [vmem:[%s7680_s16 + $0x38] sm:$0xff]  }
 0xe3d   : > { %v6391_v14 = vpop.eup %6390 }
 0xe3e   : > { %v2263_v16 = vmul.f32 %v6391_v14, %v6387_v8  ;;  %v6260_v14 = vld [vmem:[%s7680_s16 + $0x70] sm:$0xff]  }
 0xe41   : > { %v6393_v15 = vpop.eup %6392 }
 0xe42   : > { %v2264_v18 = vmul.f32 %v6393_v15, %v6389_v10  ;;  %v6261_v15 = vld [vmem:[%s7680_s16 + $0x30] sm:$0xff]  }
 0xe44   : > { %v2265_v22 = vpack.c.bf16 %v2264_v18, %v2263_v16  ;;  %v6262_v16 = vld [vmem:[%s7680_s16 + $0x68] sm:$0xff]  }
 0xe45   : > { %v6263_v18 = vld [vmem:[%s7680_s16 + $0x28] sm:$0xff]  }
 0xe46   : > { %5945 = vmatmul.mubr.msk.bf16.vlgmr.msra.gmra.mxu0 %vm976_vm6, %v2265_v22  ;;  %v6264_v22 = vld [vmem:[%s7680_s16 + $0x60] sm:$0xff]  }
 0xe47   : > { %2498 = vmatpush1.bf16.msra.mxu0 %v6246_v51  ;;  %2521 = vmatprep.mubr.bf16.mxu0 %v6465_v56 }
 0xe48   : > { %2499 = vmatprep.subr.bf16.mxu0 %v6251_v52 }
 0xe4b   : > { %2500 = vmatpush1.bf16.msra.mxu0 %v6249_v53 }
 0xe4c   : > { %2501 = vmatprep.subr.bf16.mxu0 %v6254_v54 }
 0xe4f   : > { %2502 = vmatpush1.bf16.msra.mxu0 %v6252_v55 }
 0xe50   : > { %2503 = vmatprep.subr.bf16.mxu0 %v6257_v59 }
 0xe53   : > { %2504 = vmatpush1.bf16.msra.mxu0 %v6255_v17 }
 0xe54   : > { %5954 = vmatprep.subr.bf16.mxu0 %v6462_v19 }
 0xf06   : > { %v2307_v24 = vpop.f32.mrf.mxu0 }
 0xf08   : > { %v5946_v25 = vpop.f32.mrf.mxu0 }
 0xf09   : > { %v6267_v25 = vld [vmem:[%s7680_s16 + $0x18] sm:$0xff]  }
 0xf0a   : > { %v2310_v26 = vpop.f32.mrf.mxu0 }
 0xf0b   : > { %v2314_v27 = vpack.c.bf16 %v2310_v26, %v2307_v24  ;;  %v6266_v24 = vld [vmem:[%s7680_s16 + $0x58] sm:$0xff]   ;;  %v6268_v26 = vld [vmem:[%s7680_s16 + $0x50] sm:$0xff]  }
 0xf0c   : > { %v5947_v30 = vpop.f32.mrf.mxu0 }
 0xf0d   : > { %5951 = vmatmul.mubr.msk.bf16.vlgmr.msra.gmra.mxu1 %vm928_vm3, %v2314_v27  ;;  %v6269_v27 = vld [vmem:[%s7680_s16 + $0x10] sm:$0xff]   ;;  %v6270_v30 = vld [vmem:[%s7680_s16 + $0x48] sm:$0xff]  }
 0xf0e   : > { %5606 = vmatpush3.bf16.msra.mxu1 %v6259_v13 }
 0xf0f   : > { %5607 = vmatprep.subr.bf16.mxu1 %v6260_v14 }
 0xf12   : > { %5608 = vmatpush3.bf16.msra.mxu1 %v6261_v15 }
 0xf13   : > { %5609 = vmatprep.subr.bf16.mxu1 %v6262_v16 }
 0xf16   : > { %5610 = vmatpush3.bf16.msra.mxu1 %v6263_v18 }
 0xf17   : > { %5611 = vmatprep.subr.bf16.mxu1 %v6264_v22 }
 0xf1a   : > { %5612 = vmatpush3.bf16.msra.mxu1 %v6265_v23 }
 0xf1b   : > { %5613 = vmatprep.subr.bf16.mxu1 %v6266_v24 }
 0xf1e   : > { %5614 = vmatpush3.bf16.msra.mxu1 %v6267_v25 }
 0xf1f   : > { %5615 = vmatprep.subr.bf16.mxu1 %v6268_v26 }
 0xf22   : > { %5616 = vmatpush3.bf16.msra.mxu1 %v6269_v27 }
 0xf23   : > { %5617 = vmatprep.subr.bf16.mxu1 %v6270_v30 }
 0xfcd   : > { %v2361_v32 = vpop.f32.mrf.mxu1 }
 0xfce   : > { %v2368_v28 = vadd.f32 %v2361_v32, %v1946_v45  ;;  %v6271_v32 = vld [vmem:[%s7680_s16 + $0x8] sm:$0xff]  }
 0xfcf   : > { %v5952_v31 = vpop.f32.mrf.mxu1  ;;  %5618 = vmatpush3.bf16.msra.mxu1 %v6271_v32  ;;  %v5229_v32 = vld [vmem:[%s7681_s17] ss:$0 sm:$0xff] }
 0xfd0   : > { %v2370_v33 = vadd.f32 %v2368_v28, %v6591_v4  ;;  %v6272_v28 = vld [vmem:[%s7680_s16 + $0x40] sm:$0xff]   ;;  %v2436_v31 = vlaneseq }
 0xfd1   : > { %v2364_v34 = vpop.f32.mrf.mxu1  ;;  %5619 = vmatprep.subr.bf16.mxu1 %v6272_v28 }
 0xfd2   : > { %v7009_v35 = vadd.f32 %v5201_v29, %v2370_v33  ;;  %v2369_v36 = vadd.f32 %v2364_v34, %v6985_v48  ;;  %v7107_v33 = vshrl.u32 %v2436_v31, 7 }
 0xfd3   : > { %v5953_v37 = vpop.f32.mrf.mxu1 }
 0xfd4   : > { %v2371_v38 = vadd.f32 %v2369_v36, %v6593_v5  ;;  %v2383_v39 = vsel %vm637_vm0, %v7009_v35, 0.0  ;;  %v2438_v34 = vsub.s32 0, %v7107_v33  ;;  %v2434_v36 = vld [vmem:[%s7679_s15] sm:$0x3]  ;;  %v2442_v37 = vsub.s32 1, %v7107_v33 }
 0xfd5   : > { %2384 = vadd.xlane.f32.xlu0 %v2383_v39 }
 0xfd6   : > { %v7015_v40 = vadd.f32 %v5201_v29, %v2371_v38  ;;  %v6273_v29 = vld [vmem:[%s7680_s16] sm:$0xff]   ;;  %v2439_v38 = vrot.slane %v2434_v36, %v2438_v34  ;;  %v2443_v39 = vrot.slane %v2434_v36, %v2442_v37 }
 0xfd7   : > { %5620 = vmatpush3.bf16.msra.mxu1 %v6273_v29 }
 0xfd8   : > { %v2386_v41 = vsel %vm641_vm1, %v7015_v40, 0.0  ;;  %5978 = vmatprep.subr.bf16.mxu1 %v6462_v19 }
 0xfd9   : > { %2387 = vadd.xlane.f32.xlu1 %v2386_v41 }
0x105e   : > { %v2385_v42 = vpop.xlane.xlu0 %2384 }
0x105f   : > { %v2389_v4 = vmul.f32 0.015625, %v2385_v42 }
0x1061   : > { %v2391_v43 = vsub.f32 %v7009_v35, %v2389_v4 }
0x1062   : > { %v2388_v45 = vpop.xlane.xlu1 %2387 }
0x1063   : > { %v2390_v44 = vmul.f32 0.015625, %v2388_v45  ;;  %v2393_v46 = vmul.f32 %v2391_v43, %v2391_v43 }
0x1065   : > { %v2392_v47 = vsub.f32 %v7015_v40, %v2390_v44  ;;  %v2395_v5 = vsel %vm637_vm0, %v2393_v46, 0.0 }
0x1066   : > { %2396 = vadd.xlane.f32.xlu0 %v2395_v5 }
0x1067   : > { %v2394_v48 = vmul.f32 %v2392_v47, %v2392_v47 }
0x1069   : > { %v2398_v49 = vsel %vm641_vm1, %v2394_v48, 0.0 }
0x106a   : > { %2399 = vadd.xlane.f32.xlu1 %v2398_v49 }
0x10ef   : > { %v2397_v62 = vpop.xlane.xlu0 %2396 }
0x10f0   : > { %v2401_v21 = vmul.f32 0.015625, %v2397_v62 }
0x10f2   : > { %v2403_v57 = vadd.f32 1e-05, %v2401_v21 }
0x10f3   : > { %v2400_v58 = vpop.xlane.xlu1 %2399 }
0x10f4   : > { %6394 = vrsqrt.f32 %v2403_v57  ;;  %v2402_v60 = vmul.f32 0.015625, %v2400_v58 }
0x10f6   : > { %v2404_v61 = vadd.f32 1e-05, %v2402_v60 }
0x10f8   : > { %6396 = vrsqrt.f32 %v2404_v61 }
0x1101   : > { %v6395_v63 = vpop.eup %6394 }
0x1102   : > { %v2407_v0 = vmul.f32 %v6395_v63, %v2391_v43 }
0x1104   : > { %v2415_v6 = vmul.f32 %v5202_v1, %v2407_v0 }
0x1105   : > { %v6397_v2 = vpop.eup %6396 }
0x1106   : > { %v2408_v3 = vmul.f32 %v6397_v2, %v2392_v47  ;;  %v2423_v9 = vadd.f32 %v5203_v7, %v2415_v6 }
0x1108   : > { %v2416_v8 = vmul.f32 %v5202_v1, %v2408_v3 }
0x110a   : > { %v2424_v10 = vadd.f32 %v5203_v7, %v2416_v8 }
0x110c   : > { %v2425_v11 = vpack.c.bf16 %v2424_v10, %v2423_v9 }
0x110e   : > { %5212 = vmatmul.mubr.msk.bf16.vlgmr.msra.gmra.mxu0 %vm637_vm0, %v2425_v11 }
0x110f   : > { %5962 = vmatprep.mubr.msk.bf16.mxu0 %vm6463_vm2, %v6462_v19 }
0x11ce   : > { %v2523_v41 = vpop.f32.mrf.mxu0 }
0x11cf   : > { %v2524_v42 = vadd.f32 %v2523_v41, %v2439_v38 }
0x11d0   : > { %v2525_v4 = vpop.f32.mrf.mxu0 }
0x11d1   : > { %v2536_v43 = vmul.f32 0.044715, %v2524_v42  ;;  %v2526_v45 = vadd.f32 %v2525_v4, %v2443_v39  ;;  %v2532_v15 = vmul.f32 0.5, %v2524_v42 }
0x11d2   : > { %v2527_v44 = vpop.f32.mrf.mxu0 }
0x11d3   : > { %v2540_v46 = vmul.f32 %v2536_v43, %v2524_v42  ;;  %v2537_v47 = vmul.f32 0.044715, %v2526_v45  ;;  %v2528_v5 = vadd.f32 %v2527_v44, %v2439_v38  ;;  %v2533_v12 = vmul.f32 0.5, %v2526_v45 }
0x11d4   : > { %v2529_v48 = vpop.f32.mrf.mxu0 }
0x11d5   : > { %v2544_v49 = vmul.f32 %v2540_v46, %v2524_v42  ;;  %v2541_v50 = vmul.f32 %v2537_v47, %v2526_v45  ;;  %v2538_v51 = vmul.f32 0.044715, %v2528_v5  ;;  %v2530_v52 = vadd.f32 %v2529_v48, %v2443_v39 }
0x11d6   : > { %v2534_v10 = vmul.f32 0.5, %v2528_v5 }
0x11d7   : > { %v2548_v53 = vadd.f32 %v2544_v49, %v2524_v42  ;;  %v2545_v54 = vmul.f32 %v2541_v50, %v2526_v45  ;;  %v2542_v55 = vmul.f32 %v2538_v51, %v2528_v5  ;;  %v2539_v59 = vmul.f32 0.044715, %v2530_v52  ;;  %v6274_v50 = vld [vmem:[%s7697_s21 + $0x98] sm:$0xff]  }
0x11d8   : > { %v2535_v13 = vmul.f32 0.5, %v2530_v52  ;;  %v6275_v51 = vld [vmem:[%s7672_s8 + $0x98] sm:$0xff]   ;;  %5955 = vmatpush3.bf16.msra.mxu0 %v6274_v50  ;;  %v6287_v50 = vld [vmem:[%s7697_s21 + $0xb0] sm:$0xff]  }
0x11d9   : > { %v2546_v17 = vmul.f32 %v2542_v55, %v2528_v5  ;;  %v2543_v62 = vmul.f32 %v2539_v59, %v2530_v52  ;;  %v2549_v21 = vadd.f32 %v2545_v54, %v2526_v45  ;;  %v2552_v57 = vmul.f32 0.7978846, %v2548_v53  ;;  %5956 = vmatprep.subr.bf16.mxu0 %v6462_v19  ;;  %v6277_v53 = vld [vmem:[%s7672_s8 + $0x90] sm:$0xff]   ;;  %v6278_v54 = vld [vmem:[%s7697_s21 + $0x88] sm:$0xff]   ;;  %v6280_v59 = vld [vmem:[%s7697_s21 + $0x80] sm:$0xff]  }
0x11da   : > { %v6279_v55 = vld [vmem:[%s7672_s8 + $0x88] sm:$0xff]  }
0x11db   : > { %v2550_v58 = vadd.f32 %v2546_v17, %v2528_v5  ;;  %v2547_v60 = vmul.f32 %v2543_v62, %v2530_v52  ;;  %v2553_v61 = vmul.f32 0.7978846, %v2549_v21  ;;  %v6281_v17 = vld [vmem:[%s7672_s8 + $0x80] sm:$0xff]  }
0x11dd   : > { %v2554_v63 = vmul.f32 0.7978846, %v2550_v58  ;;  %v2551_v0 = vadd.f32 %v2547_v60, %v2530_v52  ;;  %6398 = vtanh.f32 %v2553_v61  ;;  %v6276_v52 = vld [vmem:[%s7697_s21 + $0x90] sm:$0xff]  }
0x11de   : > { %6400 = vtanh.f32 %v2552_v57  ;;  %5957 = vmatpush3.bf16.msra.mxu0 %v6276_v52  ;;  %v6289_v52 = vld [vmem:[%s7697_s21 + $0xa0] sm:$0xff]  }
0x11df   : > { %6402 = vtanh.f32 %v2554_v63  ;;  %v2555_v1 = vmul.f32 0.7978846, %v2551_v0  ;;  %5958 = vmatprep.subr.bf16.mxu0 %v6462_v19 }
0x11e1   : > { %6404 = vtanh.f32 %v2555_v1  ;;  %v5232_v1 = vld [vmem:[%s7698_s27 + $0x1] ss:$0 sm:$0xff] }
0x11e2   : > { %5959 = vmatpush3.bf16.msra.mxu0 %v6278_v54  ;;  %v6291_v54 = vld [vmem:[%s7672_s8 + $0xb0] sm:$0xff]  }
0x11e3   : > { %5960 = vmatprep.subr.bf16.mxu0 %v6462_v19 }
0x11e6   : > { %5961 = vmatpush3.bf16.msra.mxu0 %v6280_v59  ;;  %v6293_v59 = vld [vmem:[%s7672_s8 + $0xa0] sm:$0xff]  }
0x11e7   : > { %5966 = vmatprep.subr.bf16.mxu0 %v6462_v19 }
0x11ea   : > { %v6399_v2 = vpop.eup %6398 }
0x11eb   : > { %v6401_v3 = vpop.eup %6400  ;;  %v2561_v7 = vadd.f32 1.0, %v6399_v2 }
0x11ec   : > { %v6403_v6 = vpop.eup %6402  ;;  %v2560_v11 = vadd.f32 1.0, %v6401_v3 }
0x11ed   : > { %v2562_v8 = vadd.f32 1.0, %v6403_v6  ;;  %v2565_v18 = vmul.f32 %v2561_v7, %v2533_v12  ;;  %v5233_v7 = vld [vmem:[%s7699_s29 + $0x1] ss:$0 sm:$0xff] }
0x11ee   : > { %v6405_v9 = vpop.eup %6404  ;;  %v2564_v23 = vmul.f32 %v2560_v11, %v2532_v15  ;;  %v6282_v11 = vld [vmem:[%s7670_s6 + $0x98] sm:$0xff]   ;;  %v6285_v15 = vld [vmem:[%s7670_s6 + $0x80] sm:$0xff]  }
0x11ef   : > { %v2563_v14 = vadd.f32 1.0, %v6405_v9  ;;  %v2566_v16 = vmul.f32 %v2562_v8, %v2534_v10 }
0x11f1   : > { %v2567_v22 = vmul.f32 %v2563_v14, %v2535_v13  ;;  %v2568_v25 = vpack.c.bf16 %v2566_v16, %v2564_v23  ;;  %v6283_v13 = vld [vmem:[%s7670_s6 + $0x90] sm:$0xff]   ;;  %v6284_v14 = vld [vmem:[%s7670_s6 + $0x88] sm:$0xff]  }
0x11f3   : > { %v2569_v24 = vpack.c.bf16 %v2567_v22, %v2565_v18  ;;  %v5273_v22 = vld [vmem:[%s7673_s9 + $0x4] ss:$0 sm:$0xff] }
0x11f5   : > { %2730 = vmatprep.mubr.bf16.mxu1 %v2569_v24 }
0x11f6   : > { %2731 = vmatmul.mubr.bf16.vlgmr.msra.gmra.mxu1 %v2568_v25 }
0x11f7   : > { %5986 = vmatprep.mubr.msk.bf16.mxu1 %vm6463_vm2, %v6462_v19  ;;  %5979 = vmatpush3.bf16.msra.mxu1 %v6275_v51  ;;  %v6288_v51 = vld [vmem:[%s7697_s21 + $0xa8] sm:$0xff]  }
0x11f8   : > { %5980 = vmatprep.subr.bf16.mxu1 %v6462_v19 }
0x11fb   : > { %5981 = vmatpush3.bf16.msra.mxu1 %v6277_v53  ;;  %v6290_v53 = vld [vmem:[%s7672_s8 + $0xb8] sm:$0xff]  }
0x11fc   : > { %5982 = vmatprep.subr.bf16.mxu1 %v6462_v19 }
0x11ff   : > { %5983 = vmatpush3.bf16.msra.mxu1 %v6279_v55  ;;  %v6292_v55 = vld [vmem:[%s7672_s8 + $0xa8] sm:$0xff]  }
0x1200   : > { %5984 = vmatprep.subr.bf16.mxu1 %v6462_v19 }
0x1203   : > { %5985 = vmatpush3.bf16.msra.mxu1 %v6281_v17 }
0x1204   : > { %5996 = vmatprep.subr.bf16.mxu1 %v6462_v19 }
0x12b6   : > { %v5621_v26 = vpop.f32.mrf.mxu1 }
0x12b8   : > { %v5622_v27 = vpop.f32.mrf.mxu1 }
0x12b9   : > { %v5623_v30 = vadd.f32 %v5622_v27, %v5621_v26 }
0x12ba   : > { %v5624_v28 = vpop.f32.mrf.mxu1 }
0x12bb   : > { %v2739_v29 = vadd.f32 %v5623_v30, %v7009_v35 }
0x12bc   : > { %v5625_v31 = vpop.f32.mrf.mxu1 }
0x12bd   : > { %v7124_v36 = vadd.f32 %v5229_v32, %v2739_v29  ;;  %v5626_v38 = vadd.f32 %v5625_v31, %v5624_v28 }
0x12bf   : > { %v2740_v39 = vadd.f32 %v5626_v38, %v7015_v40  ;;  %v2754_v41 = vsel %vm637_vm0, %v7124_v36, 0.0 }
0x12c0   : > { %2755 = vadd.xlane.f32.xlu0 %v2754_v41 }
0x12c1   : > { %v7129_v42 = vadd.f32 %v5229_v32, %v2740_v39  ;;  %v5258_v39 = vld [vmem:[%s7671_s7 + $0x4] ss:$0 sm:$0xff] }
0x12c3   : > { %v2757_v4 = vsel %vm641_vm1, %v7129_v42, 0.0 }
0x12c4   : > { %2758 = vadd.xlane.f32.xlu1 %v2757_v4 }
0x1349   : > { %v2756_v43 = vpop.xlane.xlu0 %2755 }
0x134a   : > { %v2760_v45 = vmul.f32 0.015625, %v2756_v43 }
0x134c   : > { %v2762_v35 = vsub.f32 %v7124_v36, %v2760_v45 }
0x134d   : > { %v2759_v44 = vpop.xlane.xlu1 %2758 }
0x134e   : > { %v2761_v46 = vmul.f32 0.015625, %v2759_v44  ;;  %v2764_v47 = vmul.f32 %v2762_v35, %v2762_v35 }
0x1350   : > { %v2763_v5 = vsub.f32 %v7129_v42, %v2761_v46  ;;  %v2766_v40 = vsel %vm637_vm0, %v2764_v47, 0.0  ;;  %v5243_v47 = vld [vmem:[%s7669_s5 + $0x4] ss:$0 sm:$0xff] }
0x1351   : > { %2767 = vadd.xlane.f32.xlu0 %v2766_v40 }
0x1352   : > { %v2765_v48 = vmul.f32 %v2763_v5, %v2763_v5 }
0x1354   : > { %v2769_v49 = vsel %vm641_vm1, %v2765_v48, 0.0  ;;  %v6286_v48 = vld [vmem:[%s7697_s21 + $0xb8] sm:$0xff]  }
0x1355   : > { %2770 = vadd.xlane.f32.xlu1 %v2769_v49 }
0x13da   : > { %v2768_v62 = vpop.xlane.xlu0 %2767 }
0x13db   : > { %v2772_v21 = vmul.f32 0.015625, %v2768_v62 }
0x13dd   : > { %v2774_v57 = vadd.f32 1e-05, %v2772_v21 }
0x13de   : > { %v2771_v58 = vpop.xlane.xlu1 %2770 }
0x13df   : > { %6406 = vrsqrt.f32 %v2774_v57  ;;  %v2773_v60 = vmul.f32 0.015625, %v2771_v58 }
0x13e1   : > { %v2775_v61 = vadd.f32 1e-05, %v2773_v60 }
0x13e3   : > { %6408 = vrsqrt.f32 %v2775_v61 }
0x13ec   : > { %v6407_v63 = vpop.eup %6406 }
0x13ed   : > { %v2778_v0 = vmul.f32 %v6407_v63, %v2762_v35  ;;  %v5292_v63 = vld [vmem:[%s7669_s5 + $0x5] ss:$0 sm:$0xff] }
0x13ef   : > { %v2786_v3 = vmul.f32 %v5232_v1, %v2778_v0 }
0x13f0   : > { %v6409_v2 = vpop.eup %6408 }
0x13f1   : > { %v2779_v6 = vmul.f32 %v6409_v2, %v2763_v5  ;;  %v2794_v9 = vadd.f32 %v5233_v7, %v2786_v3 }
0x13f3   : > { %v2787_v8 = vmul.f32 %v5232_v1, %v2779_v6 }
0x13f5   : > { %v2795_v10 = vadd.f32 %v5233_v7, %v2787_v8 }
0x13f7   : > { %v7178_v12 = vpack.c.bf16 %v2795_v10, %v2794_v9  ;;  %v5322_v9 = vld [vmem:[%s7673_s9 + $0x5] ss:$0 sm:$0xff] }
0x13f9   : > { %5963 = vmatmul.mubr.msk.bf16.vlgmr.msra.gmra.mxu0 %vm637_vm0, %v7178_v12  ;;  %5987 = vmatmul.mubr.msk.bf16.vlgmr.msra.gmra.mxu1 %vm637_vm0, %v7178_v12 }
0x13fa   : > { %5967 = vmatpush3.bf16.msra.mxu0 %v6282_v11  ;;  %5974 = vmatprep.mubr.msk.bf16.mxu0 %vm6463_vm2, %v6462_v19 }
0x13fb   : > { %5968 = vmatprep.subr.bf16.mxu0 %v6462_v19  ;;  %5998 = vmatprep.mubr.msk.bf16.mxu1 %vm6463_vm2, %v6462_v19 }
0x13fe   : > { %5969 = vmatpush3.bf16.msra.mxu0 %v6283_v13 }
0x13ff   : > { %5970 = vmatprep.subr.bf16.mxu0 %v6462_v19 }
0x1402   : > { %5971 = vmatpush3.bf16.msra.mxu0 %v6284_v14 }
0x1403   : > { %5972 = vmatprep.subr.bf16.mxu0 %v6462_v19 }
0x1406   : > { %5973 = vmatpush3.bf16.msra.mxu0 %v6285_v15 }
0x1407   : > { %5990 = vmatprep.subr.bf16.mxu0 %v6462_v19 }
0x1409   : > { %5975 = vmatmul.mubr.msk.bf16.vlgmr.msra.gmra.mxu0 %vm637_vm0, %v7178_v12 }
0x140a   : > { %5992 = vmatprep.mubr.msk.bf16.mxu0 %vm6463_vm2, %v6462_v19 }
0x14b9   : > { %v2875_v16 = vpop.f32.mrf.mxu0  ;;  %v3039_v18 = vpop.f32.mrf.mxu1 }
0x14ba   : > { %v3040_v27 = vadd.f32 %v5273_v22, %v3039_v18  ;;  %v2876_v40 = vadd.f32 %v5243_v47, %v2875_v16 }
0x14bb   : > { %v5964_v23 = vpop.f32.mrf.mxu0  ;;  %v5988_v24 = vpop.f32.mrf.mxu1 }
0x14bd   : > { %v2878_v25 = vpop.f32.mrf.mxu0  ;;  %v3042_v26 = vpop.f32.mrf.mxu1 }
0x14be   : > { %v3043_v30 = vadd.f32 %v5273_v22, %v3042_v26  ;;  %v2879_v5 = vadd.f32 %v5243_v47, %v2878_v25 }
0x14bf   : > { %v5965_v32 = vpop.f32.mrf.mxu0  ;;  %v5989_v28 = vpop.f32.mrf.mxu1 }
0x14c0   : > { %v3118_v29 = vpack.c.bf16 %v3043_v30, %v3040_v27  ;;  %v3046_v49 = vpack.c.bf16 %v2879_v5, %v2876_v40 }
0x14c2   : > { %v3123_v31 = vand.u32 %v3118_v29, %v6731_v20 }
0x14c4   : > { %5997 = vmatpush3.bf16.msra.mxu1 %v3123_v31 }
0x14c5   : > { %6014 = vmatprep.subr.bf16.mxu1 %v6462_v19 }
0x14c9   : > { %v2957_v38 = vpop.f32.mrf.mxu0 }
0x14ca   : > { %v2958_v43 = vadd.f32 %v5258_v39, %v2957_v38 }
0x14cb   : > { %v5976_v41 = vpop.f32.mrf.mxu0 }
0x14cd   : > { %v2960_v4 = vpop.f32.mrf.mxu0 }
0x14ce   : > { %v2961_v45 = vadd.f32 %v5258_v39, %v2960_v4 }
0x14cf   : > { %v5977_v35 = vpop.f32.mrf.mxu0 }
0x14d0   : > { %v3047_v44 = vpack.c.bf16 %v2961_v45, %v2958_v43  ;;  %v6294_v43 = vld [vmem:[%s7670_s6 + $0xb8] sm:$0xff]   ;;  %v6295_v35 = vld [vmem:[%s7670_s6 + $0xb0] sm:$0xff]  }
0x14d2   : > { %v3052_v46 = vsel %vm928_vm3, %v3047_v44, 0  ;;  %v6296_v44 = vld [vmem:[%s7670_s6 + $0xa8] sm:$0xff]  }
0x14d3   : > { %5991 = vmatpush3.bf16.xpose.msra.mxu0 %v3052_v46  ;;  %v6297_v46 = vld [vmem:[%s7670_s6 + $0xa0] sm:$0xff]  }
0x14d4   : > { %6002 = vmatprep.subr.bf16.mxu0 %v6462_v19 }
0x14da   : > { %5993 = vmatmul.mubr.msk.bf16.vlgmr.msra.gmra.mxu0 %vm928_vm3, %v3046_v49 }
0x14db   : > { %6003 = vmatpush3.bf16.msra.mxu0 %v6286_v48  ;;  %6010 = vmatprep.mubr.msk.bf16.mxu0 %vm6463_vm2, %v6462_v19 }
0x14dc   : > { %6004 = vmatprep.subr.bf16.mxu0 %v6462_v19 }
0x14df   : > { %6005 = vmatpush3.bf16.msra.mxu0 %v6287_v50 }
0x14e0   : > { %6006 = vmatprep.subr.bf16.mxu0 %v6462_v19 }
0x14e3   : > { %6007 = vmatpush3.bf16.msra.mxu0 %v6288_v51  ;;  %v5307_v51 = vld [vmem:[%s7671_s7 + $0x5] ss:$0 sm:$0xff] }
0x14e4   : > { %6008 = vmatprep.subr.bf16.mxu0 %v6462_v19 }
0x14e7   : > { %6009 = vmatpush3.bf16.msra.mxu0 %v6289_v52 }
0x14e8   : > { %6026 = vmatprep.subr.bf16.mxu0 %v6462_v19 }
0x14ea   : > { %6011 = vmatmul.mubr.msk.bf16.vlgmr.msra.gmra.mxu0 %vm637_vm0, %v7178_v12 }
0x14eb   : > { %6027 = vmatpush3.bf16.msra.mxu0 %v6290_v53  ;;  %6034 = vmatprep.mubr.msk.bf16.mxu0 %vm6463_vm2, %v6462_v19 }
0x14ec   : > { %6028 = vmatprep.subr.bf16.mxu0 %v6462_v19 }
0x14ef   : > { %6029 = vmatpush3.bf16.msra.mxu0 %v6291_v54 }
0x14f0   : > { %6030 = vmatprep.subr.bf16.mxu0 %v6462_v19 }
0x14f3   : > { %6031 = vmatpush3.bf16.msra.mxu0 %v6292_v55 }
0x14f4   : > { %6032 = vmatprep.subr.bf16.mxu0 %v6462_v19 }
0x14f7   : > { %6033 = vmatpush3.bf16.msra.mxu0 %v6293_v59 }
0x14f8   : > { %6050 = vmatprep.subr.bf16.mxu0 %v6462_v19 }
0x14fa   : > { %6035 = vmatmul.mubr.msk.bf16.vlgmr.msra.gmra.mxu0 %vm637_vm0, %v7178_v12 }
0x14fb   : > { %6052 = vmatprep.mubr.msk.bf16.mxu0 %vm6463_vm2, %v6462_v19 }
0x159a   : > { %v3088_v17 = vpop.f32.mrf.mxu0 }
0x159b   : > { %v3095_v62 = vsel %vm976_vm6, %v3088_v17, -inf }
0x159c   : > { %3096 = vmax.xlane.f32.xlu0 %v3095_v62  ;;  %v5994_v21 = vpop.f32.mrf.mxu0 }
0x159e   : > { %v3091_v57 = vpop.f32.mrf.mxu0 }
0x159f   : > { %v3098_v58 = vsel %vm980_vm7, %v3091_v57, -inf }
0x15a0   : > { %3099 = vmax.xlane.f32.xlu1 %v3098_v58  ;;  %v5995_v60 = vpop.f32.mrf.mxu0 }
0x15aa   : > { %v3245_v61 = vpop.f32.mrf.mxu0 }
0x15ab   : > { %v7266_v2 = vadd.f32 %v5292_v63, %v3245_v61 }
0x15ac   : > { %v6012_v0 = vpop.f32.mrf.mxu0 }
0x15ae   : > { %v3248_v1 = vpop.f32.mrf.mxu0 }
0x15af   : > { %v7268_v3 = vadd.f32 %v5292_v63, %v3248_v1 }
0x15b0   : > { %v6013_v6 = vpop.f32.mrf.mxu0 }
0x15b1   : > { %v3416_v7 = vpack.c.bf16 %v7268_v3, %v7266_v2 }
0x15ba   : > { %v3409_v8 = vpop.f32.mrf.mxu0 }
0x15bb   : > { %v3410_v13 = vadd.f32 %v5322_v9, %v3409_v8 }
0x15bc   : > { %v6036_v10 = vpop.f32.mrf.mxu0 }
0x15be   : > { %v3412_v11 = vpop.f32.mrf.mxu0 }
0x15bf   : > { %v3413_v14 = vadd.f32 %v5322_v9, %v3412_v11 }
0x15c0   : > { %v6037_v15 = vpop.f32.mrf.mxu0 }
0x15c1   : > { %v3488_v16 = vpack.c.bf16 %v3413_v14, %v3410_v13 }
0x15c3   : > { %v3493_v21 = vand.u32 %v3488_v16, %v6731_v20 }
0x1625   : > { %v3097_v18 = vpop.xlane.xlu0 %3096 }
0x1626   : > { %v3101_v22 = vsub.f32 %v3088_v17, %v3097_v18 }
0x1628   : > { %v3103_v23 = vmul.f32 1.442695, %v3101_v22 }
0x1629   : > { %v3100_v24 = vpop.xlane.xlu1 %3099 }
0x162a   : > { %6410 = vpow2.f32 %v3103_v23  ;;  %v3102_v25 = vsub.f32 %v3091_v57, %v3100_v24  ;;  %v6298_v24 = vld [vmem:[%s7674_s10 + $0x20] sm:$0xff]  }
0x162c   : > { %v3105_v26 = vmul.f32 1.442695, %v3102_v25 }
0x162e   : > { %6412 = vpow2.f32 %v3105_v26  ;;  %v6299_v26 = vld [vmem:[%s7670_s6 + $0xd8] sm:$0xff]  }
0x1637   : > { %v6411_v27 = vpop.eup %6410 }
0x1638   : > { %v3107_v30 = vsel %vm976_vm6, %v6411_v27, 0.0 }
0x1639   : > { %3108 = vadd.xlane.f32.xlu0 %v3107_v30  ;;  %v6301_v30 = vld [vmem:[%s7670_s6 + $0xc8] sm:$0xff]  }
0x163b   : > { %v6413_v32 = vpop.eup %6412 }
0x163c   : > { %v3110_v28 = vsel %vm980_vm7, %v6413_v32, 0.0 }
0x163d   : > { %3111 = vadd.xlane.f32.xlu1 %v3110_v28  ;;  %v6303_v28 = vld [vmem:[%s7674_s10 + $0x28] sm:$0xff]  }
0x163e   : > { %6051 = vmatpush3.bf16.msra.mxu0 %v6303_v28 }
0x163f   : > { %6062 = vmatprep.subr.bf16.mxu0 %v6462_v19 }
0x16c2   : > { %v3109_v29 = vpop.xlane.xlu0 %3108 }
0x16c3   : > { %6414 = vrcp.f32 %v3109_v29 }
0x16c6   : > { %v3112_v31 = vpop.xlane.xlu1 %3111 }
0x16c7   : > { %6416 = vrcp.f32 %v3112_v31 }
0x16d0   : > { %v6415_v38 = vpop.eup %6414 }
0x16d1   : > { %v3115_v41 = vmul.f32 %v6415_v38, %v6411_v27  ;;  %v6300_v27 = vld [vmem:[%s7670_s6 + $0xd0] sm:$0xff]  }
0x16d4   : > { %v6417_v39 = vpop.eup %6416 }
0x16d5   : > { %v3116_v4 = vmul.f32 %v6417_v39, %v6413_v32  ;;  %v6302_v32 = vld [vmem:[%s7670_s6 + $0xc0] sm:$0xff]   ;;  %v6304_v39 = vld [vmem:[%s7697_s21 + $0xd8] sm:$0xff]  }
0x16d7   : > { %v3117_v45 = vpack.c.bf16 %v3116_v4, %v3115_v41 }
0x16d9   : > { %5999 = vmatmul.mubr.msk.bf16.vlgmr.msra.gmra.mxu1 %vm976_vm6, %v3117_v45  ;;  %v6305_v45 = vld [vmem:[%s7697_s21 + $0xd0] sm:$0xff]  }
0x16da   : > { %6015 = vmatpush3.bf16.msra.mxu1 %v6294_v43  ;;  %6022 = vmatprep.mubr.msk.bf16.mxu1 %vm6463_vm2, %v6462_v19 }
0x16db   : > { %6016 = vmatprep.subr.bf16.mxu1 %v6462_v19 }
0x16de   : > { %6017 = vmatpush3.bf16.msra.mxu1 %v6295_v35 }
0x16df   : > { %6018 = vmatprep.subr.bf16.mxu1 %v6462_v19 }
0x16e2   : > { %6019 = vmatpush3.bf16.msra.mxu1 %v6296_v44 }
0x16e3   : > { %6020 = vmatprep.subr.bf16.mxu1 %v6462_v19 }
0x16e6   : > { %6021 = vmatpush3.bf16.msra.mxu1 %v6297_v46  ;;  %v6306_v46 = vld [vmem:[%s7697_s21 + $0xc8] sm:$0xff]  }
0x16e7   : > { %6038 = vmatprep.subr.bf16.mxu1 %v6462_v19 }
0x16e9   : > { %6023 = vmatmul.mubr.msk.bf16.vlgmr.msra.gmra.mxu1 %vm637_vm0, %v7178_v12 }
0x16ea   : > { %6040 = vmatprep.mubr.msk.bf16.mxu1 %vm6463_vm2, %v6462_v19 }
0x1799   : > { %v3159_v47 = vpop.f32.mrf.mxu1 }
0x179b   : > { %v6000_v5 = vpop.f32.mrf.mxu1 }
0x179c   : > { %v6307_v5 = vld [vmem:[%s7697_s21 + $0xc0] sm:$0xff]  }
0x179d   : > { %v3162_v40 = vpop.f32.mrf.mxu1 }
0x179e   : > { %v3166_v48 = vpack.c.bf16 %v3162_v40, %v3159_v47  ;;  %v6308_v40 = vld [vmem:[%s7672_s8 + $0xd8] sm:$0xff]  }
0x179f   : > { %v6001_v49 = vpop.f32.mrf.mxu1 }
0x17a0   : > { %v6309_v49 = vld [vmem:[%s7672_s8 + $0xd0] sm:$0xff]  }
0x17a9   : > { %v3327_v50 = vpop.f32.mrf.mxu1 }
0x17aa   : > { %v3328_v54 = vadd.f32 %v5307_v51, %v3327_v50  ;;  %v5360_v50 = vld [vmem:[%s7671_s7 + $0x6] ss:$0 sm:$0xff] }
0x17ab   : > { %v6024_v52 = vpop.f32.mrf.mxu1 }
0x17ad   : > { %v3330_v53 = vpop.f32.mrf.mxu1 }
0x17ae   : > { %v3331_v55 = vadd.f32 %v5307_v51, %v3330_v53  ;;  %v6310_v53 = vld [vmem:[%s7672_s8 + $0xc8] sm:$0xff]  }
0x17af   : > { %v6025_v59 = vpop.f32.mrf.mxu1 }
0x17b0   : > { %v3417_v17 = vpack.c.bf16 %v3331_v55, %v3328_v54 }
0x17b2   : > { %v3422_v62 = vsel %vm928_vm3, %v3417_v17, 0 }
0x17b3   : > { %6039 = vmatpush3.bf16.xpose.msra.mxu1 %v3422_v62  ;;  %v6311_v62 = vld [vmem:[%s7672_s8 + $0xc0] sm:$0xff]  }
0x17b4   : > { %6044 = vmatprep.subr.bf16.mxu1 %v6462_v19 }
0x17ba   : > { %6041 = vmatmul.mubr.msk.bf16.vlgmr.msra.gmra.mxu1 %vm928_vm3, %v3416_v7 }
0x17bb   : > { %6045 = vmatpush3.bf16.msra.mxu1 %v3493_v21  ;;  %6046 = vmatprep.mubr.msk.bf16.mxu1 %vm6463_vm2, %v6462_v19 }
0x17bc   : > { %6056 = vmatprep.subr.bf16.mxu1 %v6462_v19 }
0x187a   : > { %v3458_v57 = vpop.f32.mrf.mxu1 }
0x187b   : > { %v3465_v58 = vsel %vm976_vm6, %v3458_v57, -inf }
0x187c   : > { %3466 = vmax.xlane.f32.xlu0 %v3465_v58  ;;  %v6042_v60 = vpop.f32.mrf.mxu1 }
0x187e   : > { %v3461_v61 = vpop.f32.mrf.mxu1 }
0x187f   : > { %v3468_v63 = vsel %vm980_vm7, %v3461_v61, -inf }
0x1880   : > { %3469 = vmax.xlane.f32.xlu1 %v3468_v63  ;;  %v6043_v0 = vpop.f32.mrf.mxu1 }
0x1881   : > { %v5345_v0 = vld [vmem:[%s7669_s5 + $0x6] ss:$0 sm:$0xff] }
0x1905   : > { %v3467_v1 = vpop.xlane.xlu0 %3466 }
0x1906   : > { %v3471_v2 = vsub.f32 %v3458_v57, %v3467_v1 }
0x1908   : > { %v3473_v3 = vmul.f32 1.442695, %v3471_v2 }
0x1909   : > { %v3470_v6 = vpop.xlane.xlu1 %3469 }
0x190a   : > { %6418 = vpow2.f32 %v3473_v3  ;;  %v3472_v7 = vsub.f32 %v3461_v61, %v3470_v6 }
0x190c   : > { %v3475_v8 = vmul.f32 1.442695, %v3472_v7 }
0x190e   : > { %6420 = vpow2.f32 %v3475_v8 }
0x1917   : > { %v6419_v9 = vpop.eup %6418 }
0x1918   : > { %v3477_v10 = vsel %vm976_vm6, %v6419_v9, 0.0 }
0x1919   : > { %3478 = vadd.xlane.f32.xlu0 %v3477_v10  ;;  %v5375_v10 = vld [vmem:[%s7673_s9 + $0x6] ss:$0 sm:$0xff] }
0x191b   : > { %v6421_v11 = vpop.eup %6420 }
0x191c   : > { %v3480_v13 = vsel %vm980_vm7, %v6421_v11, 0.0 }
0x191d   : > { %3481 = vadd.xlane.f32.xlu1 %v3480_v13 }
0x19a2   : > { %v3479_v14 = vpop.xlane.xlu0 %3478 }
0x19a3   : > { %6422 = vrcp.f32 %v3479_v14 }
0x19a6   : > { %v3482_v15 = vpop.xlane.xlu1 %3481 }
0x19a7   : > { %6424 = vrcp.f32 %v3482_v15 }
0x19b0   : > { %v6423_v16 = vpop.eup %6422 }
0x19b1   : > { %v3485_v22 = vmul.f32 %v6423_v16, %v6419_v9 }
0x19b4   : > { %v6425_v18 = vpop.eup %6424 }
0x19b5   : > { %v3486_v23 = vmul.f32 %v6425_v18, %v6421_v11 }
0x19b7   : > { %v3487_v25 = vpack.c.bf16 %v3486_v23, %v3485_v22 }
0x19b9   : > { %6047 = vmatmul.mubr.msk.bf16.vlgmr.msra.gmra.mxu1 %vm976_vm6, %v3487_v25 }
0x19ba   : > { %6057 = vmatpush3.bf16.msra.mxu1 %v6298_v24  ;;  %6058 = vmatprep.mubr.msk.bf16.mxu1 %vm6463_vm2, %v6462_v19 }
0x19bb   : > { %6074 = vmatprep.subr.bf16.mxu1 %v6462_v19 }
0x19c1   : > { %6059 = vmatmul.mubr.msk.bf16.vlgmr.msra.gmra.mxu1 %vm928_vm3, %v3166_v48 }
0x19c2   : > { %6075 = vmatpush3.bf16.msra.mxu1 %v6299_v26  ;;  %6082 = vmatprep.mubr.msk.bf16.mxu1 %vm6463_vm2, %v6462_v19 }
0x19c3   : > { %6076 = vmatprep.subr.bf16.mxu1 %v6462_v19 }
0x19c6   : > { %6077 = vmatpush3.bf16.msra.mxu1 %v6300_v27 }
0x19c7   : > { %6078 = vmatprep.subr.bf16.mxu1 %v6462_v19 }
0x19ca   : > { %6079 = vmatpush3.bf16.msra.mxu1 %v6301_v30 }
0x19cb   : > { %6080 = vmatprep.subr.bf16.mxu1 %v6462_v19 }
0x19ce   : > { %6081 = vmatpush3.bf16.msra.mxu1 %v6302_v32 }
0x19cf   : > { %6098 = vmatprep.subr.bf16.mxu1 %v6462_v19 }
0x19d1   : > { %6083 = vmatmul.mubr.msk.bf16.vlgmr.msra.gmra.mxu1 %vm637_vm0, %v7178_v12 }
0x19d2   : > { %6100 = vmatprep.mubr.msk.bf16.mxu1 %vm6463_vm2, %v6462_v19 }
0x1a79   : > { %v3529_v29 = vpop.f32.mrf.mxu1 }
0x1a7b   : > { %v6048_v31 = vpop.f32.mrf.mxu1 }
0x1a7d   : > { %v3532_v38 = vpop.f32.mrf.mxu1 }
0x1a7e   : > { %v3536_v41 = vpack.c.bf16 %v3532_v38, %v3529_v29 }
0x1a7f   : > { %v6049_v4 = vpop.f32.mrf.mxu1 }
0x1a80   : > { %6053 = vmatmul.mubr.msk.bf16.vlgmr.msra.gmra.mxu0 %vm928_vm3, %v3536_v41 }
0x1a81   : > { %6063 = vmatpush3.bf16.msra.mxu0 %v6304_v39  ;;  %v7355_v43 = vpop.f32.mrf.mxu1  ;;  %6070 = vmatprep.mubr.msk.bf16.mxu0 %vm6463_vm2, %v6462_v19 }
0x1a82   : > { %6064 = vmatprep.subr.bf16.mxu0 %v6462_v19 }
0x1a83   : > { %v6060_v35 = vpop.f32.mrf.mxu1 }
0x1a85   : > { %6065 = vmatpush3.bf16.msra.mxu0 %v6305_v45  ;;  %v7363_v44 = vpop.f32.mrf.mxu1 }
0x1a86   : > { %6066 = vmatprep.subr.bf16.mxu0 %v6462_v19 }
0x1a87   : > { %v6061_v47 = vpop.f32.mrf.mxu1 }
0x1a89   : > { %6067 = vmatpush3.bf16.msra.mxu0 %v6306_v46 }
0x1a8a   : > { %6068 = vmatprep.subr.bf16.mxu0 %v6462_v19 }
0x1a8d   : > { %6069 = vmatpush3.bf16.msra.mxu0 %v6307_v5 }
0x1a8e   : > { %6086 = vmatprep.subr.bf16.mxu0 %v6462_v19 }
0x1a90   : > { %6071 = vmatmul.mubr.msk.bf16.vlgmr.msra.gmra.mxu0 %vm637_vm0, %v7178_v12 }
0x1a91   : > { %v3797_v48 = vpop.f32.mrf.mxu1  ;;  %6087 = vmatpush3.bf16.msra.mxu0 %v6308_v40  ;;  %6094 = vmatprep.mubr.msk.bf16.mxu0 %vm6463_vm2, %v6462_v19 }
0x1a92   : > { %6088 = vmatprep.subr.bf16.mxu0 %v6462_v19  ;;  %v3798_v54 = vadd.f32 %v5360_v50, %v3797_v48 }
0x1a93   : > { %v6084_v51 = vpop.f32.mrf.mxu1 }
0x1a95   : > { %v3800_v52 = vpop.f32.mrf.mxu1  ;;  %6089 = vmatpush3.bf16.msra.mxu0 %v6309_v49 }
0x1a96   : > { %v3801_v55 = vadd.f32 %v5360_v50, %v3800_v52  ;;  %6090 = vmatprep.subr.bf16.mxu0 %v6462_v19  ;;  %v6312_v50 = vld [vmem:[%s7697_s21 + $0xf8] sm:$0xff]   ;;  %v6313_v52 = vld [vmem:[%s7697_s21 + $0xf0] sm:$0xff]  }
0x1a97   : > { %v6085_v59 = vpop.f32.mrf.mxu1 }
0x1a98   : > { %v3887_v17 = vpack.c.bf16 %v3801_v55, %v3798_v54  ;;  %v6315_v54 = vld [vmem:[%s7697_s21 + $0xe0] sm:$0xff]   ;;  %v6316_v55 = vld [vmem:[%s7672_s8 + $0xf8] sm:$0xff]   ;;  %v6317_v59 = vld [vmem:[%s7672_s8 + $0xf0] sm:$0xff]  }
0x1a99   : > { %6091 = vmatpush3.bf16.msra.mxu0 %v6310_v53  ;;  %v6314_v53 = vld [vmem:[%s7697_s21 + $0xe8] sm:$0xff]  }
0x1a9a   : > { %v3892_v21 = vsel %vm928_vm3, %v3887_v17, 0  ;;  %6092 = vmatprep.subr.bf16.mxu0 %v6462_v19  ;;  %v6318_v17 = vld [vmem:[%s7672_s8 + $0xe8] sm:$0xff]  }
0x1a9b   : > { %6099 = vmatpush3.bf16.xpose.msra.mxu1 %v3892_v21  ;;  %v6320_v21 = vld [vmem:[%s7674_s10 + $0x30] sm:$0xff]  }
0x1a9c   : > { %6104 = vmatprep.subr.bf16.mxu1 %v6462_v19 }
0x1a9d   : > { %6093 = vmatpush3.bf16.msra.mxu0 %v6311_v62  ;;  %v6319_v62 = vld [vmem:[%s7672_s8 + $0xe0] sm:$0xff]  }
0x1a9e   : > { %6110 = vmatprep.subr.bf16.mxu0 %v6462_v19 }
0x1aa0   : > { %6095 = vmatmul.mubr.msk.bf16.vlgmr.msra.gmra.mxu0 %vm637_vm0, %v7178_v12 }
0x1aa1   : > { %6112 = vmatprep.mubr.msk.bf16.mxu0 %vm6463_vm2, %v6462_v19  ;;  %6111 = vmatpush3.bf16.msra.mxu0 %v6320_v21 }
0x1aa2   : > { %6128 = vmatprep.subr.bf16.mxu0 %v6462_v19 }
0x1b40   : > { %v7403_v57 = vpop.f32.mrf.mxu0 }
0x1b42   : > { %v6054_v58 = vpop.f32.mrf.mxu0 }
0x1b44   : > { %v7405_v60 = vpop.f32.mrf.mxu0 }
0x1b46   : > { %v6055_v61 = vpop.f32.mrf.mxu0 }
0x1b50   : > { %v3715_v63 = vpop.f32.mrf.mxu0 }
0x1b51   : > { %v3716_v3 = vadd.f32 %v5345_v0, %v3715_v63 }
0x1b52   : > { %v6072_v1 = vpop.f32.mrf.mxu0 }
0x1b54   : > { %v3718_v2 = vpop.f32.mrf.mxu0 }
0x1b55   : > { %v3719_v6 = vadd.f32 %v5345_v0, %v3718_v2  ;;  %v6321_v0 = vld [vmem:[%s7670_s6 + $0xf8] sm:$0xff]  }
0x1b56   : > { %v6073_v7 = vpop.f32.mrf.mxu0 }
0x1b57   : > { %v3886_v8 = vpack.c.bf16 %v3719_v6, %v3716_v3  ;;  %v6322_v3 = vld [vmem:[%s7670_s6 + $0xf0] sm:$0xff]   ;;  %v6323_v6 = vld [vmem:[%s7670_s6 + $0xe8] sm:$0xff]  }
0x1b59   : > { %6101 = vmatmul.mubr.msk.bf16.vlgmr.msra.gmra.mxu1 %vm928_vm3, %v3886_v8  ;;  %v6324_v8 = vld [vmem:[%s7670_s6 + $0xe0] sm:$0xff]  }
0x1b5a   : > { %6106 = vmatprep.mubr.msk.bf16.mxu1 %vm6463_vm2, %v6462_v19 }
0x1b60   : > { %v3879_v9 = vpop.f32.mrf.mxu0 }
0x1b61   : > { %v3880_v14 = vadd.f32 %v5375_v10, %v3879_v9  ;;  %v5396_v9 = vld [vmem:[%s7669_s5 + $0x7] ss:$0 sm:$0xff] }
0x1b62   : > { %v6096_v11 = vpop.f32.mrf.mxu0 }
0x1b64   : > { %v3882_v13 = vpop.f32.mrf.mxu0 }
0x1b65   : > { %v3883_v15 = vadd.f32 %v5375_v10, %v3882_v13 }
0x1b66   : > { %v6097_v16 = vpop.f32.mrf.mxu0 }
0x1b67   : > { %v3958_v18 = vpack.c.bf16 %v3883_v15, %v3880_v14 }
0x1b69   : > { %v3963_v22 = vand.u32 %v3958_v18, %v6731_v20 }
0x1b6b   : > { %6105 = vmatpush3.bf16.msra.mxu1 %v3963_v22  ;;  %v5426_v22 = vld [vmem:[%s7673_s9 + $0x7] ss:$0 sm:$0xff] }
0x1b6c   : > { %6116 = vmatprep.subr.bf16.mxu1 %v6462_v19 }
0x1c19   : > { %v3928_v23 = vpop.f32.mrf.mxu1 }
0x1c1a   : > { %v3935_v24 = vsel %vm976_vm6, %v3928_v23, -inf }
0x1c1b   : > { %3936 = vmax.xlane.f32.xlu0 %v3935_v24  ;;  %v6102_v25 = vpop.f32.mrf.mxu1 }
0x1c1d   : > { %v3931_v26 = vpop.f32.mrf.mxu1 }
0x1c1e   : > { %v3938_v27 = vsel %vm980_vm7, %v3931_v26, -inf }
0x1c1f   : > { %3939 = vmax.xlane.f32.xlu1 %v3938_v27  ;;  %v6103_v30 = vpop.f32.mrf.mxu1 }
0x1ca4   : > { %v3937_v32 = vpop.xlane.xlu0 %3936 }
0x1ca5   : > { %v3941_v28 = vsub.f32 %v3928_v23, %v3937_v32  ;;  %v3634_v32 = vadd.f32 %v7355_v43, %v7403_v57 }
0x1ca7   : > { %v3943_v29 = vmul.f32 1.442695, %v3941_v28 }
0x1ca8   : > { %v3940_v31 = vpop.xlane.xlu1 %3939 }
0x1ca9   : > { %6426 = vpow2.f32 %v3943_v29  ;;  %v3942_v38 = vsub.f32 %v3931_v26, %v3940_v31  ;;  %v3637_v31 = vadd.f32 %v7363_v44, %v7405_v60 }
0x1cab   : > { %v3945_v39 = vmul.f32 1.442695, %v3942_v38 }
0x1cad   : > { %6428 = vpow2.f32 %v3945_v39 }
0x1cb6   : > { %v6427_v41 = vpop.eup %6426 }
0x1cb7   : > { %v3947_v4 = vsel %vm976_vm6, %v6427_v41, 0.0 }
0x1cb8   : > { %3948 = vadd.xlane.f32.xlu0 %v3947_v4 }
0x1cba   : > { %v6429_v45 = vpop.eup %6428 }
0x1cbb   : > { %v3950_v35 = vsel %vm980_vm7, %v6429_v45, 0.0 }
0x1cbc   : > { %3951 = vadd.xlane.f32.xlu1 %v3950_v35 }
0x1d41   : > { %v3949_v46 = vpop.xlane.xlu0 %3948 }
0x1d42   : > { %6430 = vrcp.f32 %v3949_v46 }
0x1d45   : > { %v3952_v47 = vpop.xlane.xlu1 %3951 }
0x1d46   : > { %6432 = vrcp.f32 %v3952_v47 }
0x1d4f   : > { %v6431_v5 = vpop.eup %6430 }
0x1d50   : > { %v3955_v48 = vmul.f32 %v6431_v5, %v6427_v41 }
0x1d53   : > { %v6433_v40 = vpop.eup %6432 }
0x1d54   : > { %v3956_v49 = vmul.f32 %v6433_v40, %v6429_v45  ;;  %v5411_v45 = vld [vmem:[%s7671_s7 + $0x7] ss:$0 sm:$0xff] }
0x1d56   : > { %v3957_v51 = vpack.c.bf16 %v3956_v49, %v3955_v48 }
0x1d58   : > { %6107 = vmatmul.mubr.msk.bf16.vlgmr.msra.gmra.mxu1 %vm976_vm6, %v3957_v51 }
0x1d59   : > { %6117 = vmatpush3.bf16.msra.mxu1 %v6312_v50  ;;  %6124 = vmatprep.mubr.msk.bf16.mxu1 %vm6463_vm2, %v6462_v19 }
0x1d5a   : > { %6118 = vmatprep.subr.bf16.mxu1 %v6462_v19 }
0x1d5d   : > { %6119 = vmatpush3.bf16.msra.mxu1 %v6313_v52 }
0x1d5e   : > { %6120 = vmatprep.subr.bf16.mxu1 %v6462_v19 }
0x1d61   : > { %6121 = vmatpush3.bf16.msra.mxu1 %v6314_v53 }
0x1d62   : > { %6122 = vmatprep.subr.bf16.mxu1 %v6462_v19 }
0x1d65   : > { %6123 = vmatpush3.bf16.msra.mxu1 %v6315_v54 }
0x1d66   : > { %6140 = vmatprep.subr.bf16.mxu1 %v6462_v19 }
0x1d68   : > { %6125 = vmatmul.mubr.msk.bf16.vlgmr.msra.gmra.mxu1 %vm637_vm0, %v7178_v12 }
0x1d69   : > { %6141 = vmatpush3.bf16.msra.mxu1 %v6316_v55  ;;  %6148 = vmatprep.mubr.msk.bf16.mxu1 %vm6463_vm2, %v6462_v19 }
0x1d6a   : > { %6142 = vmatprep.subr.bf16.mxu1 %v6462_v19 }
0x1d6d   : > { %6143 = vmatpush3.bf16.msra.mxu1 %v6317_v59 }
0x1d6e   : > { %6144 = vmatprep.subr.bf16.mxu1 %v6462_v19 }
0x1d71   : > { %6145 = vmatpush3.bf16.msra.mxu1 %v6318_v17 }
0x1d72   : > { %6146 = vmatprep.subr.bf16.mxu1 %v6462_v19 }
0x1d75   : > { %6147 = vmatpush3.bf16.msra.mxu1 %v6319_v62 }
0x1d76   : > { %6164 = vmatprep.subr.bf16.mxu1 %v6462_v19 }
0x1d78   : > { %6149 = vmatmul.mubr.msk.bf16.vlgmr.msra.gmra.mxu1 %vm637_vm0, %v7178_v12 }
0x1d79   : > { %6166 = vmatprep.mubr.msk.bf16.mxu1 %vm6463_vm2, %v6462_v19 }
0x1e18   : > { %v3999_v58 = vpop.f32.mrf.mxu1 }
0x1e1a   : > { %v6108_v61 = vpop.f32.mrf.mxu1 }
0x1e1c   : > { %v4002_v63 = vpop.f32.mrf.mxu1 }
0x1e1d   : > { %v4006_v1 = vpack.c.bf16 %v4002_v63, %v3999_v58 }
0x1e1e   : > { %v6109_v2 = vpop.f32.mrf.mxu1 }
0x1e1f   : > { %6113 = vmatmul.mubr.msk.bf16.vlgmr.msra.gmra.mxu0 %vm928_vm3, %v4006_v1 }
0x1e20   : > { %6129 = vmatpush3.bf16.msra.mxu0 %v6321_v0  ;;  %6136 = vmatprep.mubr.msk.bf16.mxu0 %vm6463_vm2, %v6462_v19 }
0x1e21   : > { %6130 = vmatprep.subr.bf16.mxu0 %v6462_v19 }
0x1e24   : > { %6131 = vmatpush3.bf16.msra.mxu0 %v6322_v3 }
0x1e25   : > { %6132 = vmatprep.subr.bf16.mxu0 %v6462_v19 }
0x1e28   : > { %v4137_v7 = vpop.f32.mrf.mxu1  ;;  %6133 = vmatpush3.bf16.msra.mxu0 %v6323_v6 }
0x1e29   : > { %6134 = vmatprep.subr.bf16.mxu0 %v6462_v19  ;;  %v4138_v13 = vadd.f32 %v5396_v9, %v4137_v7 }
0x1e2a   : > { %v6126_v10 = vpop.f32.mrf.mxu1 }
0x1e2c   : > { %v4140_v11 = vpop.f32.mrf.mxu1  ;;  %6135 = vmatpush3.bf16.msra.mxu0 %v6324_v8  ;;  %v6325_v8 = vld [vmem:[%s7674_s10 + $0x38] sm:$0xff]  }
0x1e2d   : > { %v4141_v14 = vadd.f32 %v5396_v9, %v4140_v11  ;;  %6152 = vmatprep.subr.bf16.mxu0 %v6462_v19  ;;  %6165 = vmatpush3.bf16.msra.mxu1 %v6325_v8  ;;  %v6344_v8 = vld [vmem:[%s7680_s16 + $0xe0] sm:$0xff]  }
0x1e2e   : > { %v6127_v15 = vpop.f32.mrf.mxu1 }
0x1e2f   : > { %v4308_v16 = vpack.c.bf16 %v4141_v14, %v4138_v13  ;;  %6137 = vmatmul.mubr.msk.bf16.vlgmr.msra.gmra.mxu0 %vm637_vm0, %v7178_v12 }
0x1e30   : > { %6154 = vmatprep.mubr.msk.bf16.mxu0 %vm6463_vm2, %v6462_v19 }
0x1e38   : > { %v4301_v18 = vpop.f32.mrf.mxu1 }
0x1e39   : > { %v4302_v25 = vadd.f32 %v5426_v22, %v4301_v18  ;;  %v5439_v18 = vld [vmem:[%s7675_s11 + $0x1] ss:$0 sm:$0xff] }
0x1e3a   : > { %v6150_v23 = vpop.f32.mrf.mxu1 }
0x1e3c   : > { %v4304_v24 = vpop.f32.mrf.mxu1 }
0x1e3d   : > { %v4305_v26 = vadd.f32 %v5426_v22, %v4304_v24 }
0x1e3e   : > { %v6151_v27 = vpop.f32.mrf.mxu1 }
0x1e3f   : > { %v4380_v30 = vpack.c.bf16 %v4305_v26, %v4302_v25 }
0x1e41   : > { %v4385_v44 = vand.u32 %v4380_v30, %v6731_v20 }
0x1edf   : > { %v4053_v28 = vpop.f32.mrf.mxu0 }
0x1ee0   : > { %v7500_v29 = vadd.f32 %v4053_v28, %v3634_v32 }
0x1ee1   : > { %v6114_v12 = vpop.f32.mrf.mxu0 }
0x1ee3   : > { %v4056_v38 = vpop.f32.mrf.mxu0 }
0x1ee4   : > { %v7504_v39 = vadd.f32 %v4056_v38, %v3637_v31 }
0x1ee5   : > { %v6115_v41 = vpop.f32.mrf.mxu0 }
0x1eef   : > { %v4219_v4 = vpop.f32.mrf.mxu0 }
0x1ef0   : > { %v4220_v47 = vadd.f32 %v5411_v45, %v4219_v4 }
0x1ef1   : > { %v6138_v35 = vpop.f32.mrf.mxu0 }
0x1ef2   : > { %v6328_v35 = vld [vmem:[%s7678_s14 + $0x74] ss:$8 sps:$4 sm:$0xff]  }
0x1ef3   : > { %v4222_v46 = vpop.f32.mrf.mxu0 }
0x1ef4   : > { %v4223_v43 = vadd.f32 %v5411_v45, %v4222_v46  ;;  %v6326_v46 = vld [vmem:[%s7678_s14 + $0x70] ss:$8 sps:$4 sm:$0xff]  }
0x1ef5   : > { %v6139_v57 = vpop.f32.mrf.mxu0 }
0x1ef6   : > { %v4309_v5 = vpack.c.bf16 %v4223_v43, %v4220_v47  ;;  %v6331_v47 = vld [vmem:[%s7678_s14 + $0x64] ss:$8 sps:$4 sm:$0xff]   ;;  %v6329_v43 = vld [vmem:[%s7678_s14 + $0x60] ss:$8 sps:$4 sm:$0xff]   ;;  %v6334_v57 = vld [vmem:[%s7678_s14 + $0x54] ss:$8 sps:$4 sm:$0xff]  }
0x1ef8   : > { %v4314_v40 = vsel %vm928_vm3, %v4309_v5, 0  ;;  %v6332_v5 = vld [vmem:[%s7678_s14 + $0x50] ss:$8 sps:$4 sm:$0xff]  }
0x1ef9   : > { %6153 = vmatpush3.bf16.xpose.msra.mxu0 %v4314_v40  ;;  %v6337_v40 = vld [vmem:[%s7678_s14 + $0x44] ss:$8 sps:$4 sm:$0xff]  }
0x1efa   : > { %6158 = vmatprep.subr.bf16.mxu0 %v6462_v19 }
0x1f00   : > { %6155 = vmatmul.mubr.msk.bf16.vlgmr.msra.gmra.mxu0 %vm928_vm3, %v4308_v16 }
0x1f01   : > { %6159 = vmatpush3.bf16.msra.mxu0 %v4385_v44  ;;  %6160 = vmatprep.mubr.msk.bf16.mxu0 %vm6463_vm2, %v6462_v19  ;;  %v6335_v44 = vld [vmem:[%s7678_s14 + $0x40] ss:$8 sps:$4 sm:$0xff]  }
0x1f02   : > { %4616 = vmatprep.subr.bf16.mxu0 %v6328_v35 }
0x1fc0   : > { %v4350_v60 = vpop.f32.mrf.mxu0 }
0x1fc1   : > { %v4357_v48 = vsel %vm976_vm6, %v4350_v60, -inf }
0x1fc2   : > { %4358 = vmax.xlane.f32.xlu0 %v4357_v48  ;;  %v6156_v49 = vpop.f32.mrf.mxu0 }
0x1fc4   : > { %v4353_v50 = vpop.f32.mrf.mxu0 }
0x1fc5   : > { %v4360_v51 = vsel %vm980_vm7, %v4353_v50, -inf }
0x1fc6   : > { %4361 = vmax.xlane.f32.xlu1 %v4360_v51  ;;  %v6157_v52 = vpop.f32.mrf.mxu0 }
0x204b   : > { %v4359_v53 = vpop.xlane.xlu0 %4358 }
0x204c   : > { %v4363_v54 = vsub.f32 %v4350_v60, %v4359_v53 }
0x204e   : > { %v4365_v55 = vmul.f32 1.442695, %v4363_v54 }
0x204f   : > { %v4362_v20 = vpop.xlane.xlu1 %4361 }
0x2050   : > { %6434 = vpow2.f32 %v4365_v55  ;;  %v4364_v59 = vsub.f32 %v4353_v50, %v4362_v20  ;;  %v5442_v55 = vld [vmem:[%s7676_s12 + $0x1] ss:$0 sm:$0xff] }
0x2052   : > { %v4367_v17 = vmul.f32 1.442695, %v4364_v59 }
0x2054   : > { %6436 = vpow2.f32 %v4367_v17 }
0x205d   : > { %v6435_v62 = vpop.eup %6434 }
0x205e   : > { %v4369_v21 = vsel %vm976_vm6, %v6435_v62, 0.0 }
0x205f   : > { %4370 = vadd.xlane.f32.xlu0 %v4369_v21 }
0x2061   : > { %v6437_v58 = vpop.eup %6436 }
0x2062   : > { %v4372_v61 = vsel %vm980_vm7, %v6437_v58, 0.0 }
0x2063   : > { %4373 = vadd.xlane.f32.xlu1 %v4372_v61 }
0x20e8   : > { %v4371_v63 = vpop.xlane.xlu0 %4370 }
0x20e9   : > { %6438 = vrcp.f32 %v4371_v63 }
0x20ec   : > { %v4374_v0 = vpop.xlane.xlu1 %4373 }
0x20ed   : > { %6440 = vrcp.f32 %v4374_v0  ;;  %v6338_v0 = vld [vmem:[%s7680_s16 + $0xf8] sm:$0xff]  }
0x20ee   : > { %5711 = vmatprep.subr.bf16.mxu1 %v6338_v0 }
0x20f6   : > { %v6439_v1 = vpop.eup %6438 }
0x20f7   : > { %v4377_v3 = vmul.f32 %v6439_v1, %v6435_v62  ;;  %v5443_v62 = vld [vmem:[%s7677_s13 + $0x1] ss:$0 sm:$0xff]  ;;  %v6339_v1 = vld [vmem:[%s7680_s16 + $0xb8] sm:$0xff]  }
0x20fa   : > { %v6441_v2 = vpop.eup %6440 }
0x20fb   : > { %v4378_v6 = vmul.f32 %v6441_v2, %v6437_v58  ;;  %v6340_v2 = vld [vmem:[%s7680_s16 + $0xf0] sm:$0xff]  }
0x20fd   : > { %v4379_v7 = vpack.c.bf16 %v4378_v6, %v4377_v3  ;;  %v6341_v3 = vld [vmem:[%s7680_s16 + $0xb0] sm:$0xff]   ;;  %v6342_v6 = vld [vmem:[%s7680_s16 + $0xe8] sm:$0xff]  }
0x20ff   : > { %6161 = vmatmul.mubr.msk.bf16.vlgmr.msra.gmra.mxu0 %vm976_vm6, %v4379_v7  ;;  %v6343_v7 = vld [vmem:[%s7680_s16 + $0xa8] sm:$0xff]  }
0x2100   : > { %4640 = vmatprep.mubr.bf16.mxu0 %v6465_v56  ;;  %4617 = vmatpush1.bf16.msra.mxu0 %v6326_v46 }
0x2101   : > { %4618 = vmatprep.subr.bf16.mxu0 %v6331_v47 }
0x2104   : > { %4619 = vmatpush1.bf16.msra.mxu0 %v6329_v43 }
0x2105   : > { %4620 = vmatprep.subr.bf16.mxu0 %v6334_v57 }
0x2108   : > { %4621 = vmatpush1.bf16.msra.mxu0 %v6332_v5 }
0x2109   : > { %4622 = vmatprep.subr.bf16.mxu0 %v6337_v40 }
0x210c   : > { %4623 = vmatpush1.bf16.msra.mxu0 %v6335_v44 }
0x210d   : > { %6170 = vmatprep.subr.bf16.mxu0 %v6462_v19 }
0x21bf   : > { %v4421_v9 = vpop.f32.mrf.mxu0 }
0x21c1   : > { %v6162_v10 = vpop.f32.mrf.mxu0 }
0x21c2   : > { %v6346_v10 = vld [vmem:[%s7680_s16 + $0xd8] sm:$0xff]  }
0x21c3   : > { %v4424_v11 = vpop.f32.mrf.mxu0 }
0x21c4   : > { %v4428_v13 = vpack.c.bf16 %v4424_v11, %v4421_v9  ;;  %v6345_v9 = vld [vmem:[%s7680_s16 + $0xa0] sm:$0xff]   ;;  %v6347_v11 = vld [vmem:[%s7680_s16 + $0x98] sm:$0xff]  }
0x21c5   : > { %v6163_v14 = vpop.f32.mrf.mxu0 }
0x21c6   : > { %6167 = vmatmul.mubr.msk.bf16.vlgmr.msra.gmra.mxu1 %vm928_vm3, %v4428_v13  ;;  %v6348_v13 = vld [vmem:[%s7680_s16 + $0xd0] sm:$0xff]  }
0x21c7   : > { %5712 = vmatpush3.bf16.msra.mxu1 %v6339_v1  ;;  %v6349_v14 = vld [vmem:[%s7680_s16 + $0x90] sm:$0xff]  }
0x21c8   : > { %5713 = vmatprep.subr.bf16.mxu1 %v6340_v2 }
0x21cb   : > { %5714 = vmatpush3.bf16.msra.mxu1 %v6341_v3 }
0x21cc   : > { %5715 = vmatprep.subr.bf16.mxu1 %v6342_v6  ;;  %v6354_v6 = vld [vmem:[%s7682_s18 + $0x18] sm:$0xff]  }
0x21cf   : > { %5716 = vmatpush3.bf16.msra.mxu1 %v6343_v7  ;;  %v6355_v7 = vld [vmem:[%s7682_s18 + $0x10] sm:$0xff]  }
0x21d0   : > { %5717 = vmatprep.subr.bf16.mxu1 %v6344_v8  ;;  %v6356_v8 = vld [vmem:[%s7682_s18 + $0x8] sm:$0xff]  }
0x21d3   : > { %5718 = vmatpush3.bf16.msra.mxu1 %v6345_v9  ;;  %v6357_v9 = vld [vmem:[%s7682_s18] sm:$0xff]  }
0x21d4   : > { %5719 = vmatprep.subr.bf16.mxu1 %v6346_v10 }
0x21d7   : > { %5720 = vmatpush3.bf16.msra.mxu1 %v6347_v11 }
0x21d8   : > { %5721 = vmatprep.subr.bf16.mxu1 %v6348_v13 }
0x21db   : > { %5722 = vmatpush3.bf16.msra.mxu1 %v6349_v14 }
0x2286   : > { %v4475_v15 = vpop.f32.mrf.mxu1 }
0x2287   : > { %v4482_v16 = vadd.f32 %v4475_v15, %v7500_v29  ;;  %v6350_v15 = vld [vmem:[%s7680_s16 + $0xc8] sm:$0xff]  }
0x2288   : > { %v6168_v56 = vpop.f32.mrf.mxu1  ;;  %5723 = vmatprep.subr.bf16.mxu1 %v6350_v15 }
0x2289   : > { %v4484_v22 = vadd.f32 %v4482_v16, %v7124_v36  ;;  %v6351_v16 = vld [vmem:[%s7680_s16 + $0x88] sm:$0xff]   ;;  %v6353_v56 = vld [vmem:[%s7680_s16 + $0x80] sm:$0xff]  }
0x228a   : > { %v4478_v23 = vpop.f32.mrf.mxu1  ;;  %5724 = vmatpush3.bf16.msra.mxu1 %v6351_v16 }
0x228b   : > { %v7530_v24 = vadd.f32 %v5439_v18, %v4484_v22  ;;  %v4483_v25 = vadd.f32 %v4478_v23, %v7504_v39  ;;  %v5452_v22 = vld [vmem:[%s7679_s15 + $0x2] sm:$0x3] }
0x228c   : > { %v6169_v26 = vpop.f32.mrf.mxu1  ;;  %v4558_v23 = vrot.slane %v5452_v22, %v2438_v34 }
0x228d   : > { %v4485_v27 = vadd.f32 %v4483_v25, %v7129_v42  ;;  %v4500_v30 = vsel %vm637_vm0, %v7530_v24, 0.0  ;;  %v4562_v25 = vrot.slane %v5452_v22, %v2442_v37 }
0x228e   : > { %4501 = vadd.xlane.f32.xlu0 %v4500_v30 }
0x228f   : > { %v7536_v32 = vadd.f32 %v5439_v18, %v4485_v27  ;;  %v6352_v18 = vld [vmem:[%s7680_s16 + $0xc0] sm:$0xff]  }
0x2290   : > { %5725 = vmatprep.subr.bf16.mxu1 %v6352_v18 }
0x2291   : > { %v4503_v28 = vsel %vm641_vm1, %v7536_v32, 0.0  ;;  %5726 = vmatpush3.bf16.msra.mxu1 %v6353_v56  ;;  %v5511_v56 = vld [vmem:[%s7681_s17 + $0x1] ss:$0 sm:$0xff] }
0x2292   : > { %4504 = vadd.xlane.f32.xlu1 %v4503_v28 }
0x2317   : > { %v4502_v29 = vpop.xlane.xlu0 %4501 }
0x2318   : > { %v4506_v36 = vmul.f32 0.015625, %v4502_v29 }
0x231a   : > { %v4508_v12 = vsub.f32 %v7530_v24, %v4506_v36 }
0x231b   : > { %v4505_v31 = vpop.xlane.xlu1 %4504 }
0x231c   : > { %v4507_v38 = vmul.f32 0.015625, %v4505_v31  ;;  %v4510_v39 = vmul.f32 %v4508_v12, %v4508_v12 }
0x231e   : > { %v4509_v41 = vsub.f32 %v7536_v32, %v4507_v38  ;;  %v4512_v42 = vsel %vm637_vm0, %v4510_v39, 0.0 }
0x231f   : > { %4513 = vadd.xlane.f32.xlu0 %v4512_v42 }
0x2320   : > { %v4511_v4 = vmul.f32 %v4509_v41, %v4509_v41 }
0x2322   : > { %v4515_v45 = vsel %vm641_vm1, %v4511_v4, 0.0 }
0x2323   : > { %4516 = vadd.xlane.f32.xlu1 %v4515_v45 }
0x23a8   : > { %v4514_v60 = vpop.xlane.xlu0 %4513 }
0x23a9   : > { %v4518_v48 = vmul.f32 0.015625, %v4514_v60 }
0x23ab   : > { %v4520_v49 = vadd.f32 1e-05, %v4518_v48 }
0x23ac   : > { %v4517_v50 = vpop.xlane.xlu1 %4516 }
0x23ad   : > { %6442 = vrsqrt.f32 %v4520_v49  ;;  %v4519_v51 = vmul.f32 0.015625, %v4517_v50 }
0x23af   : > { %v4521_v52 = vadd.f32 1e-05, %v4519_v51 }
0x23b1   : > { %6444 = vrsqrt.f32 %v4521_v52 }
0x23ba   : > { %v6443_v53 = vpop.eup %6442 }
0x23bb   : > { %v4524_v54 = vmul.f32 %v6443_v53, %v4508_v12 }
0x23bd   : > { %v4532_v17 = vmul.f32 %v5442_v55, %v4524_v54 }
0x23be   : > { %v6445_v20 = vpop.eup %6444 }
0x23bf   : > { %v4525_v59 = vmul.f32 %v6445_v20, %v4509_v41  ;;  %v4540_v58 = vadd.f32 %v5443_v62, %v4532_v17 }
0x23c1   : > { %v4533_v21 = vmul.f32 %v5442_v55, %v4525_v59 }
0x23c3   : > { %v4541_v61 = vadd.f32 %v5443_v62, %v4533_v21 }
0x23c5   : > { %v4542_v63 = vpack.c.bf16 %v4541_v61, %v4540_v58 }
0x23c7   : > { %5461 = vmatmul.mubr.msk.bf16.vlgmr.msra.gmra.mxu0 %vm637_vm0, %v4542_v63 }
0x23c8   : > { %6178 = vmatprep.mubr.msk.bf16.mxu0 %vm6463_vm2, %v6462_v19  ;;  %6171 = vmatpush3.bf16.msra.mxu0 %v6354_v6 }
0x23c9   : > { %6172 = vmatprep.subr.bf16.mxu0 %v6462_v19 }
0x23cc   : > { %6173 = vmatpush3.bf16.msra.mxu0 %v6355_v7 }
0x23cd   : > { %6174 = vmatprep.subr.bf16.mxu0 %v6462_v19 }
0x23d0   : > { %6175 = vmatpush3.bf16.msra.mxu0 %v6356_v8 }
0x23d1   : > { %6176 = vmatprep.subr.bf16.mxu0 %v6462_v19 }
0x23d4   : > { %6177 = vmatpush3.bf16.msra.mxu0 %v6357_v9 }
0x2487   : > { %v4642_v26 = vpop.f32.mrf.mxu0 }
0x2488   : > { %v4643_v27 = vadd.f32 %v4642_v26, %v4558_v23 }
0x2489   : > { %v4644_v30 = vpop.f32.mrf.mxu0 }
0x248a   : > { %v4655_v28 = vmul.f32 0.044715, %v4643_v27  ;;  %v4645_v29 = vadd.f32 %v4644_v30, %v4562_v25  ;;  %v4651_v58 = vmul.f32 0.5, %v4643_v27 }
0x248b   : > { %v4646_v36 = vpop.f32.mrf.mxu0 }
0x248c   : > { %v4659_v12 = vmul.f32 %v4655_v28, %v4643_v27  ;;  %v4656_v31 = vmul.f32 0.044715, %v4645_v29  ;;  %v4647_v38 = vadd.f32 %v4646_v36, %v4558_v23  ;;  %v4652_v17 = vmul.f32 0.5, %v4645_v29 }
0x248d   : > { %v4648_v39 = vpop.f32.mrf.mxu0 }
0x248e   : > { %v4663_v41 = vmul.f32 %v4659_v12, %v4643_v27  ;;  %v4660_v42 = vmul.f32 %v4656_v31, %v4645_v29  ;;  %v4657_v4 = vmul.f32 0.044715, %v4647_v38  ;;  %v4649_v45 = vadd.f32 %v4648_v39, %v4562_v25 }
0x248f   : > { %v4653_v20 = vmul.f32 0.5, %v4647_v38 }
0x2490   : > { %v4667_v35 = vadd.f32 %v4663_v41, %v4643_v27  ;;  %v4664_v46 = vmul.f32 %v4660_v42, %v4645_v29  ;;  %v4661_v34 = vmul.f32 %v4657_v4, %v4647_v38  ;;  %v4658_v47 = vmul.f32 0.044715, %v4649_v45 }
0x2491   : > { %v4654_v62 = vmul.f32 0.5, %v4649_v45 }
0x2492   : > { %v4665_v33 = vmul.f32 %v4661_v34, %v4647_v38  ;;  %v4662_v37 = vmul.f32 %v4658_v47, %v4649_v45  ;;  %v4668_v43 = vadd.f32 %v4664_v46, %v4645_v29  ;;  %v4671_v57 = vmul.f32 0.7978846, %v4667_v35 }
0x2494   : > { %v4669_v5 = vadd.f32 %v4665_v33, %v4647_v38  ;;  %v4666_v40 = vmul.f32 %v4662_v37, %v4649_v45  ;;  %v4672_v44 = vmul.f32 0.7978846, %v4668_v43 }
0x2496   : > { %v4673_v60 = vmul.f32 0.7978846, %v4669_v5  ;;  %v4670_v48 = vadd.f32 %v4666_v40, %v4649_v45  ;;  %6446 = vtanh.f32 %v4672_v44 }
0x2497   : > { %6448 = vtanh.f32 %v4671_v57 }
0x2498   : > { %6450 = vtanh.f32 %v4673_v60  ;;  %v4674_v49 = vmul.f32 0.7978846, %v4670_v48 }
0x249a   : > { %6452 = vtanh.f32 %v4674_v49 }
0x24a3   : > { %v6447_v50 = vpop.eup %6446 }
0x24a4   : > { %v6449_v51 = vpop.eup %6448  ;;  %v4680_v53 = vadd.f32 1.0, %v6447_v50 }
0x24a5   : > { %v6451_v52 = vpop.eup %6450  ;;  %v4679_v59 = vadd.f32 1.0, %v6449_v51 }
0x24a6   : > { %v4681_v54 = vadd.f32 1.0, %v6451_v52  ;;  %v4684_v63 = vmul.f32 %v4680_v53, %v4652_v17 }
0x24a7   : > { %v6453_v55 = vpop.eup %6452  ;;  %v4683_v1 = vmul.f32 %v4679_v59, %v4651_v58 }
0x24a8   : > { %v4682_v21 = vadd.f32 1.0, %v6453_v55  ;;  %v4685_v61 = vmul.f32 %v4681_v54, %v4653_v20 }
0x24aa   : > { %v4686_v0 = vmul.f32 %v4682_v21, %v4654_v62  ;;  %v4687_v3 = vpack.c.bf16 %v4685_v61, %v4683_v1 }
0x24ac   : > { %v4688_v2 = vpack.c.bf16 %v4686_v0, %v4684_v63 }
0x24ae   : > { %4850 = vmatprep.mubr.bf16.mxu1 %v4688_v2 }
0x24af   : > { %4851 = vmatmul.mubr.bf16.vlgmr.msra.gmra.mxu1 %v4687_v3 }
0x256f   : > { %v5727_v10 = vpop.f32.mrf.mxu1 }
0x2571   : > { %v5728_v11 = vpop.f32.mrf.mxu1 }
0x2572   : > { %v5729_v13 = vadd.f32 %v5728_v11, %v5727_v10 }
0x2573   : > { %v5730_v14 = vpop.f32.mrf.mxu1 }
0x2574   : > { %v4859_v16 = vadd.f32 %v5729_v13, %v7530_v24  ;;  %v5512_v24 = vld [vmem:[%s7683_s19] ss:$0 sm:$0xff] }
0x2575   : > { %v5731_v15 = vpop.f32.mrf.mxu1 }
0x2576   : > { %v5732_v18 = vadd.f32 %v5731_v15, %v5730_v14  ;;  %v4869_v22 = vadd.f32 %v5511_v56, %v4859_v16 }
0x2578   : > { %v4860_v19 = vadd.f32 %v5732_v18, %v7536_v32 }
0x257a   : > { %v4870_v23 = vadd.f32 %v5511_v56, %v4860_v19 }
0x257c   : > { %v4871_v25 = vpack.c.bf16 %v4870_v23, %v4869_v22 }
0x257e   : > { %v4890_v26 = vshll.u32 %v4871_v25, 16  ;;  %v4888_v27 = vshrl.u32 %v4871_v25, 16 }
0x2580   : > { %v4892_v30 = vrot.slane %v4890_v26, 1 }
0x2582   : > { %v4893_v28 = vor.u32 %v4892_v30, %v4888_v27 }
0x2584   : > { %6179 = vmatmul.mubr.msk.bf16.vlgmr.msra.gmra.mxu0 %vm637_vm0, %v4893_v28 }
0x2644   : > { %v4955_v29 = vpop.f32.mrf.mxu0 }
0x2645   : > { %v4956_v32 = vadd.f32 %v5512_v24, %v4955_v29 }
0x2646   : > { %v6180_v36 = vpop.f32.mrf.mxu0 }
0x2647   : > { %4962 = vst.msk [vmem:[%s627_s3] sm:$0xff] %vm4961_vm8, %v4956_v32 }
0x2648   : > { %v4958_v12 = vpop.f32.mrf.mxu0 }
0x264a   : > { %v6181_v31 = vpop.f32.mrf.mxu0 }
0x264b PF: > { %s30_s1 = sadd.s32 1, %s6460_s1  }
0x264c   : > { %p27_p4 = scmp.ge.s32.totalorder %s30_s1, 4  }
0x264e   :  { %29 = sbr.rel (!%p27_p4) target bundleno = 6 (0x6), region = 188 }

</bundles_post_ra>
